<compile_context>
chip_gen: v6e
topology: v6e:2x2x1
jax: 0.10.0
libtpu: 0.0.40
codegen_flags: <defaults>
</compile_context>

<pallas_src>
import functools

import jax
import jax.numpy as jnp
from jax.experimental import pallas as pl
from jax.experimental.pallas import tpu as pltpu

LANE = 128
_BN_EPS = 1e-5
_FUSED_VMEM_BUDGET = 6 * 1024 * 1024   # bytes allowed for the single-block fused conv path


def _round_up(x, m):
    return ((x + m - 1) // m) * m


def _cp(c):
    return _round_up(c, LANE)


def _pick_tm(m, cap=512):
    """Row tile: equal to (8-rounded) M for small M so no host-side padding is
    needed; otherwise a divisor of M where possible."""
    if m <= cap:
        return _round_up(m, 8)
    for t in (cap, 256, 128):
        if m % t == 0:
            return t
    return cap


def _pick_tn(n):
    return 256 if n % 256 == 0 else 128


# ----------------------------------------------------------------------------
# Pallas kernels
# ----------------------------------------------------------------------------
def _fused_conv_bn_relu_kernel(a_ref, b_ref, g_ref, bt_ref, o_ref, *,
                               inv_m, eps, normalize):
    """One-shot conv block: Y = A @ B (bf16 operands, f32 accumulation),
    batch-stat BatchNorm, ReLU and optional per-position L2 normalize, all
    resident in VMEM (no intermediate HBM round trip)."""
    y = jnp.dot(a_ref[...], b_ref[...], preferred_element_type=jnp.float32)
    # Padded rows of A are zero, so sums over the full block are exact; the
    # divisor inv_m uses the real row count.
    mean = jnp.sum(y, axis=0, keepdims=True) * inv_m
    # NOTE: single-pass E[x^2]-E[x]^2 in f32; adequate at these sizes.
    var = jnp.maximum(jnp.sum(y * y, axis=0, keepdims=True) * inv_m
                      - mean * mean, 0.0)
    scale = g_ref[...] * jax.lax.rsqrt(var + eps)
    shift = bt_ref[...] - mean * scale
    o = jnp.maximum(y * scale + shift, 0.0)
    if normalize:
        # F.normalize(p=2, dim=channel); padded channels are exactly zero.
        nrm = jnp.sqrt(jnp.sum(o * o, axis=1, keepdims=True))
        o = o / jnp.maximum(nrm, 1e-12)
    o_ref[...] = o.astype(o_ref.dtype)


def _mm_stats_kernel(a_ref, b_ref, y_ref, stats_ref):
    """Fallback (large layers): Y = A @ B plus per-column sum / sum-of-squares
    accumulated over the innermost ('arbitrary') M grid axis.
    stats row 0 = sum, row 1 = sum of squares, rows 2..7 unused padding."""
    y = jnp.dot(a_ref[...], b_ref[...], preferred_element_type=jnp.float32)
    y_ref[...] = y.astype(y_ref.dtype)

    @pl.when(pl.program_id(1) == 0)
    def _():
        stats_ref[...] = jnp.zeros_like(stats_ref)

    rows = jax.lax.broadcasted_iota(jnp.int32, stats_ref.shape, 0)
    upd = jnp.where(rows == 0, jnp.sum(y, axis=0, keepdims=True),
                    jnp.where(rows == 1, jnp.sum(y * y, axis=0, keepdims=True),
                              0.0))
    stats_ref[...] += upd


def _bn_affine_relu_kernel(y_ref, stats_ref, g_ref, bt_ref, o_ref, *, inv_m, eps):
    """Fallback BN apply: scale/shift derived in-kernel from the stats (no XLA
    glue), bf16 in / bf16 out, large row tiles."""
    mean = stats_ref[0:1, :] * inv_m
    var = jnp.maximum(stats_ref[1:2, :] * inv_m - mean * mean, 0.0)
    scale = g_ref[...] * jax.lax.rsqrt(var + eps)
    shift = bt_ref[...] - mean * scale
    o_ref[...] = jnp.maximum(y_ref[...].astype(jnp.float32) * scale + shift,
                             0.0).astype(o_ref.dtype)


def _mm_bias_kernel(a_ref, b_ref, bias_ref, o_ref):
    """O = A @ B + bias (bias fused into the matmul epilogue)."""
    y = jnp.dot(a_ref[...], b_ref[...], preferred_element_type=jnp.float32)
    o_ref[...] = (y + bias_ref[...]).astype(o_ref.dtype)


# ----------------------------------------------------------------------------
# Pallas wrappers
# ----------------------------------------------------------------------------
def conv_bn_relu(a, b, gamma, beta, normalize=False):
    """a: (M, K) bf16 patches, b: (K, Np) bf16 weights, gamma/beta: (1, Np) f32.
    Returns (M, Np) bf16 = relu(BatchNorm(a @ b)) [optionally L2-normalized]."""
    M, K = a.shape
    Np = b.shape[1]
    Mp = _round_up(M, 8)
    a_p = a if Mp == M else jnp.pad(a, ((0, Mp - M), (0, 0)))

    est = Mp * K * 2 + K * Np * 2 + 6 * Mp * Np * 4
    if est <= _FUSED_VMEM_BUDGET:
        kern = functools.partial(_fused_conv_bn_relu_kernel,
                                 inv_m=1.0 / M, eps=_BN_EPS, normalize=normalize)
        out = pl.pallas_call(
            kern,
            out_shape=jax.ShapeDtypeStruct((Mp, Np), jnp.bfloat16),
        )(a_p, b, gamma, beta)
        return out[:M] if Mp != M else out

    # Large-layer fallback: tiled matmul + stats, then BN apply.
    y, stats = matmul_stats(a_p, b)
    out = bn_affine_relu(y, stats, gamma, beta, float(M))
    out = out[:M] if Mp != M else out
    if normalize:
        of = out.astype(jnp.float32)
        nrm = jnp.sqrt(jnp.sum(of * of, axis=-1, keepdims=True))
        out = (of / jnp.maximum(nrm, 1e-12)).astype(jnp.bfloat16)
    return out


def matmul_stats(a, b):
    """(M, K) bf16 @ (K, Np) bf16 -> (Y (M, Np) bf16, stats (8, Np) f32).
    TODO(synk): on v7x emit per-M-tile partial stats with a 'parallel' M axis
    (reduced in XLA) so the two TensorCores share the matmul."""
    M, K = a.shape
    Np = b.shape[1]
    tm = _pick_tm(M)
    Mp = _round_up(M, tm)
    tn = _pick_tn(Np)
    a_p = a if Mp == M else jnp.pad(a, ((0, Mp - M), (0, 0)))

    y, stats = pl.pallas_call(
        _mm_stats_kernel,
        out_shape=(jax.ShapeDtypeStruct((Mp, Np), jnp.bfloat16),
                   jax.ShapeDtypeStruct((8, Np), jnp.float32)),
        grid_spec=pltpu.PrefetchScalarGridSpec(
            num_scalar_prefetch=0,
            grid=(Np // tn, Mp // tm),           # stats accumulate over M (last axis)
            in_specs=[
                pl.BlockSpec((tm, K), lambda j, i: (i, 0)),
                pl.BlockSpec((K, tn), lambda j, i: (0, j)),
            ],
            out_specs=[
                pl.BlockSpec((tm, tn), lambda j, i: (i, j)),
                pl.BlockSpec((8, tn), lambda j, i: (0, j)),
            ],
        ),
        compiler_params=pltpu.CompilerParams(
            dimension_semantics=("parallel", "arbitrary")),
    )(a_p, b)
    return (y[:M] if Mp != M else y), stats


def bn_affine_relu(y, stats, gamma, beta, m_total):
    """Fallback BN-apply pass; large row tiles (pure elementwise, memory-bound)."""
    M, Np = y.shape
    tm = _pick_tm(M, cap=1024)
    Mp = _round_up(M, tm)
    y_p = y if Mp == M else jnp.pad(y, ((0, Mp - M), (0, 0)))
    kern = functools.partial(_bn_affine_relu_kernel,
                             inv_m=1.0 / m_total, eps=_BN_EPS)
    out = pl.pallas_call(
        kern,
        out_shape=jax.ShapeDtypeStruct((Mp, Np), jnp.bfloat16),
        grid=(Mp // tm,),
        in_specs=[
            pl.BlockSpec((tm, Np), lambda i: (i, 0)),
            pl.BlockSpec((8, Np), lambda i: (0, 0)),
            pl.BlockSpec((1, Np), lambda i: (0, 0)),
            pl.BlockSpec((1, Np), lambda i: (0, 0)),
        ],
        out_specs=pl.BlockSpec((tm, Np), lambda i: (i, 0)),
        compiler_params=pltpu.CompilerParams(dimension_semantics=("parallel",)),
    )(y_p, stats, gamma, beta)
    return out[:M] if Mp != M else out


def matmul_bias(a, b, bias, out_dtype=jnp.bfloat16):
    """(M, K) bf16 @ (K, Np) bf16 + bias (1, Np) f32, bias fused in the epilogue."""
    M, K = a.shape
    Np = b.shape[1]
    tm = _pick_tm(M)
    Mp = _round_up(M, tm)
    tn = _pick_tn(Np)
    a_p = a if Mp == M else jnp.pad(a, ((0, Mp - M), (0, 0)))

    out = pl.pallas_call(
        _mm_bias_kernel,
        out_shape=jax.ShapeDtypeStruct((Mp, Np), out_dtype),
        grid=(Mp // tm, Np // tn),
        in_specs=[
            pl.BlockSpec((tm, K), lambda i, j: (i, 0)),
            pl.BlockSpec((K, tn), lambda i, j: (0, j)),
            pl.BlockSpec((1, tn), lambda i, j: (0, j)),
        ],
        out_specs=pl.BlockSpec((tm, tn), lambda i, j: (i, j)),
        compiler_params=pltpu.CompilerParams(
            dimension_semantics=("parallel", "parallel")),
    )(a_p, b, bias)
    return out[:M] if Mp != M else out


# ----------------------------------------------------------------------------
# Conv / upconv building blocks (NHWC, outputs padded to 128 lanes)
# ----------------------------------------------------------------------------
def _im2col3x3(sources, stride):
    """sources: list of (NHWC array, real_channels).  Channel-compact 3x3
    im2col (padding=1): output (N*Ho*Wo, 9 * sum(real_channels)) bf16.
    TODO(synk): fold the 9-tap extraction into the matmul kernel as a reduction
    grid axis reading shifted windows of the activations directly, removing
    this patch materialization (and the skip-concat) from HBM entirely."""
    N, H, W, _ = sources[0][0].shape
    Ho = (H + 2 - 3) // stride + 1
    Wo = (W + 2 - 3) // stride + 1
    padded = []
    for src, c in sources:
        s = src[..., :c] if src.shape[-1] != c else src
        padded.append(jnp.pad(s, ((0, 0), (1, 1), (1, 1), (0, 0))))
    cols = []
    for dy in range(3):
        for dx in range(3):
            for sp in padded:
                cols.append(sp[:, dy:dy + (Ho - 1) * stride + 1:stride,
                               dx:dx + (Wo - 1) * stride + 1:stride, :])
    k_total = 9 * sum(c for _, c in sources)
    patches = jnp.concatenate(cols, axis=-1).reshape(N * Ho * Wo, k_total)
    return patches, (N, Ho, Wo)


def conv_block(sources, p, stride=1, normalize=False):
    """Conv3x3(pad=1, no bias) -> BatchNorm2d (batch statistics) -> ReLU
    [-> optional L2 channel normalize].  The conv bias is omitted: it is an
    exact no-op in front of training-mode BatchNorm."""
    patches, (N, Ho, Wo) = _im2col3x3(sources, stride)
    y = conv_bn_relu(patches, p["wm"], p["gamma"], p["beta"],
                     normalize=normalize)
    return y.reshape(N, Ho, Wo, p["wm"].shape[1])


def upconv(x, p):
    """ConvTranspose2d(k=2, s=2) with bias fused in the matmul epilogue; bf16 out."""
    N, H, W, Cp = x.shape
    coutp = p["wm"].shape[1] // 4
    y = matmul_bias(x.reshape(N * H * W, Cp), p["wm"], p["shift"])
    y = y.reshape(N, H, W, 2, 2, coutp)
    y = jnp.transpose(y, (0, 1, 3, 2, 4, 5)).reshape(N, 2 * H, 2 * W, coutp)
    # TODO(synk): scatter the 2x2 sub-pixel interleave straight from the kernel
    # (grid axis over the 4 taps + strided output index_map) instead of this
    # XLA 6-D transpose (now at least bf16, half the bytes of v2).
    return y


def conv1x1(x, p):
    N, H, W, Cp = x.shape
    coutp = p["wm"].shape[1]
    y = matmul_bias(x.reshape(N * H * W, Cp), p["wm"], p["shift"],
                    out_dtype=jnp.float32)
    return y.reshape(N, H, W, coutp)


# ----------------------------------------------------------------------------
# Parameter construction: pre-reshaped, channel-compact-K, pre-cast (bf16)
# ----------------------------------------------------------------------------
def _pack_conv3x3(w, gamma, beta, coutp):
    """w: (Cout, Cin, 3, 3) -> channel-compact matmul weight (9*Cin, coutp) bf16.
    Row order (tap-major, channel-minor) matches _im2col3x3's column order."""
    cout, cin = w.shape[0], w.shape[1]
    wt = jnp.transpose(w, (2, 3, 1, 0)).reshape(9 * cin, cout)
    return {
        "wm": jnp.pad(wt, ((0, 0), (0, coutp - cout))).astype(jnp.bfloat16),
        "gamma": jnp.pad(gamma, (0, coutp - cout)).reshape(1, coutp).astype(jnp.float32),
        "beta": jnp.pad(beta, (0, coutp - cout)).reshape(1, coutp).astype(jnp.float32),
    }


def _pack_upconv(w, b, cinp, coutp):
    """w: (Cin, Cout, 2, 2) -> (cinp, 4*coutp) bf16; bias tiled over the 4 taps."""
    cin, cout = w.shape[0], w.shape[1]
    wt = jnp.transpose(w, (0, 2, 3, 1))              # (Cin, 2, 2, Cout)
    wt = jnp.pad(wt, ((0, cinp - cin), (0, 0), (0, 0), (0, coutp - cout)))
    wm = wt.reshape(cinp, 4 * coutp).astype(jnp.bfloat16)
    shift = jnp.tile(jnp.pad(b, (0, coutp - cout)), 4).reshape(1, 4 * coutp)
    return {"wm": wm, "shift": shift.astype(jnp.float32)}


def _pack_conv1x1(w, b, cinp, coutp):
    cout, cin = w.shape[0], w.shape[1]
    wm = jnp.pad(w.reshape(cout, cin).T, ((0, cinp - cin), (0, coutp - cout)))
    return {"wm": wm.astype(jnp.bfloat16),
            "shift": jnp.pad(b, (0, coutp - cout)).reshape(1, coutp).astype(jnp.float32)}


def init_params(key, in_channels, mid_channels, out_channels):
    """Deterministic synthetic parameters in pre-packed matmul layout."""
    midp, outp = _cp(mid_channels), _cp(out_channels)
    keys = iter(jax.random.split(key, 64))

    def cb(cin, cout, coutp):
        w = 0.05 * jax.random.normal(next(keys), (cout, cin, 3, 3), jnp.float32)
        # NOTE: conv bias omitted; exact no-op under batch-stat BatchNorm.
        return _pack_conv3x3(w, jnp.ones((cout,), jnp.float32),
                             jnp.zeros((cout,), jnp.float32), coutp)

    def up(cin, cinp, cout, coutp):
        w = 0.05 * jax.random.normal(next(keys), (cin, cout, 2, 2), jnp.float32)
        b = 0.01 * jax.random.normal(next(keys), (cout,), jnp.float32)
        return _pack_upconv(w, b, cinp, coutp)

    ic, mc, oc = in_channels, mid_channels, out_channels
    p = {}
    p["enc1"] = cb(ic, mc, midp)
    p["enc2"] = cb(mc, mc, midp)
    p["enc3"] = cb(mc, mc, midp)
    p["enc4"] = cb(mc, mc, midp)
    p["bottleneck"] = cb(2 * mc, mc, midp)
    p["upconv4"] = up(mc, midp, mc, midp)
    p["upconv4x"] = up(mc, midp, mc, midp)
    p["dec4"] = cb(3 * mc, mc, midp)
    p["upconv3"] = up(mc, midp, mc, midp)
    p["upconv3x"] = up(mc, midp, mc, midp)
    p["dec3"] = cb(3 * mc, mc, midp)
    p["upconv2"] = up(mc, midp, mc, midp)
    p["upconv2x"] = up(mc, midp, mc, midp)
    p["dec2"] = cb(3 * mc, mc, midp)
    p["upconv1"] = up(mc, midp, mc, midp)
    p["upconv1x"] = up(mc, midp, mc, midp)
    p["dec1"] = cb(2 * mc + ic, oc, outp)
    wf = 0.05 * jax.random.normal(next(keys), (oc, oc, 1, 1), jnp.float32)
    bf = 0.01 * jax.random.normal(next(keys), (oc,), jnp.float32)
    p["final_conv"] = _pack_conv1x1(wf, bf, outp, outp)
    return p


# ----------------------------------------------------------------------------
# Forward pass (mirrors LightweightUNetX.forward)
# ----------------------------------------------------------------------------
def lightweight_unetx_forward(params, search_nchw, template_nchw,
                              out_channels, normalize=True):
    in_c = search_nchw.shape[1]
    mid_c = template_nchw.shape[1]

    # Search input stays channel-compact (only read through the compact im2col);
    # template is zero-padded to 128 lanes for the upconv matmuls.
    x = jnp.transpose(search_nchw, (0, 2, 3, 1)).astype(jnp.bfloat16)
    t = jnp.transpose(template_nchw, (0, 2, 3, 1)).astype(jnp.bfloat16)
    t = jnp.pad(t, ((0, 0), (0, 0), (0, 0), (0, _cp(mid_c) - mid_c)))

    enc1 = conv_block([(x, in_c)], params["enc1"], stride=2)
    enc2 = conv_block([(enc1, mid_c)], params["enc2"], stride=2)
    enc3 = conv_block([(enc2, mid_c)], params["enc3"], stride=2)
    # F.normalize(enc4, p=2, dim=1) is fused into the enc4 Pallas kernel.
    enc4 = conv_block([(enc3, mid_c)], params["enc4"], stride=2,
                      normalize=normalize)

    bottleneck = conv_block([(enc4, mid_c), (t, mid_c)], params["bottleneck"])

    dec4u = upconv(bottleneck, params["upconv4"])
    dec4x = upconv(t, params["upconv4x"])
    dec4 = conv_block([(dec4u, mid_c), (enc3, mid_c), (dec4x, mid_c)],
                      params["dec4"])

    dec3u = upconv(dec4, params["upconv3"])
    dec3x = upconv(dec4x, params["upconv3x"])
    dec3 = conv_block([(dec3u, mid_c), (enc2, mid_c), (dec3x, mid_c)],
                      params["dec3"])

    dec2u = upconv(dec3, params["upconv2"])
    dec2x = upconv(dec3x, params["upconv2x"])
    dec2 = conv_block([(dec2u, mid_c), (enc1, mid_c), (dec2x, mid_c)],
                      params["dec2"])

    dec1u = upconv(dec2, params["upconv1"])
    dec1x = upconv(dec2x, params["upconv1x"])
    dec1 = conv_block([(dec1u, mid_c), (x, in_c), (dec1x, mid_c)],
                      params["dec1"])

    out = conv1x1(dec1, params["final_conv"])
    out = out[..., :out_channels]                    # strip channel padding
    return jnp.transpose(out, (0, 3, 1, 2))          # back to NCHW (f32)


# ----------------------------------------------------------------------------
if __name__ == "__main__":
    # Small, shape-consistent test config (spatial must be divisible by 16).
    B, IN_C, MID_C, OUT_C, H, W = 2, 32, 16, 8, 16, 16

    key = jax.random.PRNGKey(0)
    k_params, k_search, k_template = jax.random.split(key, 3)

    params = init_params(k_params, IN_C, MID_C, OUT_C)
    search = jax.random.normal(k_search, (B, IN_C, H, W), jnp.float32)
    template = jax.random.normal(k_template, (B, MID_C, H // 16, W // 16),
                                 jnp.float32)

    fwd = jax.jit(functools.partial(lightweight_unetx_forward,
                                    out_channels=OUT_C, normalize=True))
    out = fwd(params, search, template)
    jax.block_until_ready(out)

    assert out.shape == (B, OUT_C, H, W), out.shape
    assert bool(jnp.all(jnp.isfinite(out))), "non-finite values in output"
    print("KERNEL_OK")
</pallas_src>

<mosaic_0001>
module attributes {stable_mosaic.version = 11 : i64} {
  func.func @_mm_bias_kernel(%arg0: i32, %arg1: i32, %arg2: memref<8x128xbf16, #tpu.memory_space<vmem>>, %arg3: memref<128x256xbf16, #tpu.memory_space<vmem>>, %arg4: memref<1x256xf32, #tpu.memory_space<vmem>>, %arg5: memref<8x256xbf16, #tpu.memory_space<vmem>>) attributes {dimension_semantics = [#tpu.dimension_semantics<parallel>, #tpu.dimension_semantics<parallel>], iteration_bounds = array<i64: 1, 2>, scalar_prefetch = 0 : i64, scratch_operands = 0 : i64, tpu.core_type = #tpu.core_type<tc>, window_params = [{transform_indices = @transform_0, window_bounds = array<i64: 8, 128>}, {transform_indices = @transform_1, window_bounds = array<i64: 128, 256>}, {transform_indices = @transform_2, window_bounds = array<i64: 1, 256>}, {transform_indices = @transform_3, window_bounds = array<i64: 8, 256>}]} {
    %c0 = arith.constant 0 : index
    %c0_0 = arith.constant 0 : index
    %0 = vector.load %arg2[%c0, %c0_0] : memref<8x128xbf16, #tpu.memory_space<vmem>>, vector<8x128xbf16>
    %c0_1 = arith.constant 0 : index
    %c0_2 = arith.constant 0 : index
    %1 = vector.load %arg3[%c0_1, %c0_2] : memref<128x256xbf16, #tpu.memory_space<vmem>>, vector<128x256xbf16>
    %cst = arith.constant dense<0.000000e+00> : vector<8x256xf32>
    %2 = tpu.matmul %0, %1, %cst {dimension_numbers = #tpu.dot_dimension_numbers<[1], [0], [0], [1], [0, 0, 1, 1], [], []>} : vector<8x128xbf16>, vector<128x256xbf16>, vector<8x256xf32> -> vector<8x256xf32>
    %c0_3 = arith.constant 0 : index
    %c0_4 = arith.constant 0 : index
    %3 = vector.load %arg4[%c0_3, %c0_4] : memref<1x256xf32, #tpu.memory_space<vmem>>, vector<1x256xf32>
    %4 = vector.broadcast %3 : vector<1x256xf32> to vector<8x256xf32>
    %5 = arith.addf %2, %4 : vector<8x256xf32>
    %6 = arith.truncf %5 : vector<8x256xf32> to vector<8x256xbf16>
    %c0_5 = arith.constant 0 : index
    %c0_6 = arith.constant 0 : index
    %7 = vector.load %arg5[%c0_5, %c0_6] : memref<8x256xbf16, #tpu.memory_space<vmem>>, vector<8x256xbf16>
    tpu.vector_store %arg5[%c0_5, %c0_6], %6 {strides = array<i32>} : memref<8x256xbf16, #tpu.memory_space<vmem>>, vector<8x256xbf16>,
    return
  }
  func.func @transform_0(%arg0: i32, %arg1: i32) -> (i32, i32) {
    %c0_i32 = arith.constant 0 : i32
    %c0_i32_0 = arith.constant 0 : i32
    return %arg0, %c0_i32 : i32, i32
  }
  func.func @transform_1(%arg0: i32, %arg1: i32) -> (i32, i32) {
    %c0_i32 = arith.constant 0 : i32
    %c0_i32_0 = arith.constant 0 : i32
    return %c0_i32, %arg1 : i32, i32
  }
  func.func @transform_2(%arg0: i32, %arg1: i32) -> (i32, i32) {
    %c0_i32 = arith.constant 0 : i32
    %c0_i32_0 = arith.constant 0 : i32
    return %c0_i32, %arg1 : i32, i32
  }
  func.func @transform_3(%arg0: i32, %arg1: i32) -> (i32, i32) {
    %c0_i32 = arith.constant 0 : i32
    return %arg0, %arg1 : i32, i32
  }
}

module attributes {stable_mosaic.version = 11 : i64} {
  func.func @_mm_bias_kernel(%arg0: i32, %arg1: i32, %arg2: memref<8x128xbf16, #tpu.memory_space<vmem>>, %arg3: memref<128x256xbf16, #tpu.memory_space<vmem>>, %arg4: memref<1x256xf32, #tpu.memory_space<vmem>>, %arg5: memref<8x256xbf16, #tpu.memory_space<vmem>>) attributes {dimension_semantics = [#tpu.dimension_semantics<parallel>, #tpu.dimension_semantics<parallel>], iteration_bounds = array<i64: 1, 2>, scalar_prefetch = 0 : i64, scratch_operands = 0 : i64, tpu.core_type = #tpu.core_type<tc>, window_params = [{transform_indices = @transform_0, window_bounds = array<i64: 8, 128>}, {transform_indices = @transform_1, window_bounds = array<i64: 128, 256>}, {transform_indices = @transform_2, window_bounds = array<i64: 1, 256>}, {transform_indices = @transform_3, window_bounds = array<i64: 8, 256>}]} {
    %c0 = arith.constant 0 : index
    %c0_0 = arith.constant 0 : index
    %0 = vector.load %arg2[%c0, %c0_0] : memref<8x128xbf16, #tpu.memory_space<vmem>>, vector<8x128xbf16>
    %c0_1 = arith.constant 0 : index
    %c0_2 = arith.constant 0 : index
    %1 = vector.load %arg3[%c0_1, %c0_2] : memref<128x256xbf16, #tpu.memory_space<vmem>>, vector<128x256xbf16>
    %cst = arith.constant dense<0.000000e+00> : vector<8x256xf32>
    %2 = tpu.matmul %0, %1, %cst {dimension_numbers = #tpu.dot_dimension_numbers<[1], [0], [0], [1], [0, 0, 1, 1], [], []>} : vector<8x128xbf16>, vector<128x256xbf16>, vector<8x256xf32> -> vector<8x256xf32>
    %c0_3 = arith.constant 0 : index
    %c0_4 = arith.constant 0 : index
    %3 = vector.load %arg4[%c0_3, %c0_4] : memref<1x256xf32, #tpu.memory_space<vmem>>, vector<1x256xf32>
    %4 = vector.broadcast %3 : vector<1x256xf32> to vector<8x256xf32>
    %5 = arith.addf %2, %4 : vector<8x256xf32>
    %6 = arith.truncf %5 : vector<8x256xf32> to vector<8x256xbf16>
    %c0_5 = arith.constant 0 : index
    %c0_6 = arith.constant 0 : index
    %7 = vector.load %arg5[%c0_5, %c0_6] : memref<8x256xbf16, #tpu.memory_space<vmem>>, vector<8x256xbf16>
    tpu.vector_store %arg5[%c0_5, %c0_6], %6 {strides = array<i32>} : memref<8x256xbf16, #tpu.memory_space<vmem>>, vector<8x256xbf16>,
    return
  }
  func.func @transform_0(%arg0: i32, %arg1: i32) -> (i32, i32) {
    %c0_i32 = arith.constant 0 : i32
    %c0_i32_0 = arith.constant 0 : i32
    return %arg0, %c0_i32 : i32, i32
  }
  func.func @transform_1(%arg0: i32, %arg1: i32) -> (i32, i32) {
    %c0_i32 = arith.constant 0 : i32
    %c0_i32_0 = arith.constant 0 : i32
    return %c0_i32, %arg1 : i32, i32
  }
  func.func @transform_2(%arg0: i32, %arg1: i32) -> (i32, i32) {
    %c0_i32 = arith.constant 0 : i32
    %c0_i32_0 = arith.constant 0 : i32
    return %c0_i32, %arg1 : i32, i32
  }
  func.func @transform_3(%arg0: i32, %arg1: i32) -> (i32, i32) {
    %c0_i32 = arith.constant 0 : i32
    return %arg0, %arg1 : i32, i32
  }
}

module attributes {stable_mosaic.version = 11 : i64} {
  func.func @_mm_bias_kernel(%arg0: i32, %arg1: i32, %arg2: memref<32x128xbf16, #tpu.memory_space<vmem>>, %arg3: memref<128x256xbf16, #tpu.memory_space<vmem>>, %arg4: memref<1x256xf32, #tpu.memory_space<vmem>>, %arg5: memref<32x256xbf16, #tpu.memory_space<vmem>>) attributes {dimension_semantics = [#tpu.dimension_semantics<parallel>, #tpu.dimension_semantics<parallel>], iteration_bounds = array<i64: 1, 2>, scalar_prefetch = 0 : i64, scratch_operands = 0 : i64, tpu.core_type = #tpu.core_type<tc>, window_params = [{transform_indices = @transform_0, window_bounds = array<i64: 32, 128>}, {transform_indices = @transform_1, window_bounds = array<i64: 128, 256>}, {transform_indices = @transform_2, window_bounds = array<i64: 1, 256>}, {transform_indices = @transform_3, window_bounds = array<i64: 32, 256>}]} {
    %c0 = arith.constant 0 : index
    %c0_0 = arith.constant 0 : index
    %0 = vector.load %arg2[%c0, %c0_0] : memref<32x128xbf16, #tpu.memory_space<vmem>>, vector<32x128xbf16>
    %c0_1 = arith.constant 0 : index
    %c0_2 = arith.constant 0 : index
    %1 = vector.load %arg3[%c0_1, %c0_2] : memref<128x256xbf16, #tpu.memory_space<vmem>>, vector<128x256xbf16>
    %cst = arith.constant dense<0.000000e+00> : vector<32x256xf32>
    %2 = tpu.matmul %0, %1, %cst {dimension_numbers = #tpu.dot_dimension_numbers<[1], [0], [0], [1], [0, 0, 1, 1], [], []>} : vector<32x128xbf16>, vector<128x256xbf16>, vector<32x256xf32> -> vector<32x256xf32>
    %c0_3 = arith.constant 0 : index
    %c0_4 = arith.constant 0 : index
    %3 = vector.load %arg4[%c0_3, %c0_4] : memref<1x256xf32, #tpu.memory_space<vmem>>, vector<1x256xf32>
    %4 = vector.broadcast %3 : vector<1x256xf32> to vector<32x256xf32>
    %5 = arith.addf %2, %4 : vector<32x256xf32>
    %6 = arith.truncf %5 : vector<32x256xf32> to vector<32x256xbf16>
    %c0_5 = arith.constant 0 : index
    %c0_6 = arith.constant 0 : index
    %7 = vector.load %arg5[%c0_5, %c0_6] : memref<32x256xbf16, #tpu.memory_space<vmem>>, vector<32x256xbf16>
    tpu.vector_store %arg5[%c0_5, %c0_6], %6 {strides = array<i32>} : memref<32x256xbf16, #tpu.memory_space<vmem>>, vector<32x256xbf16>,
    return
  }
  func.func @transform_0(%arg0: i32, %arg1: i32) -> (i32, i32) {
    %c0_i32 = arith.constant 0 : i32
    %c0_i32_0 = arith.constant 0 : i32
    return %arg0, %c0_i32 : i32, i32
  }
  func.func @transform_1(%arg0: i32, %arg1: i32) -> (i32, i32) {
    %c0_i32 = arith.constant 0 : i32
    %c0_i32_0 = arith.constant 0 : i32
    return %c0_i32, %arg1 : i32, i32
  }
  func.func @transform_2(%arg0: i32, %arg1: i32) -> (i32, i32) {
    %c0_i32 = arith.constant 0 : i32
    %c0_i32_0 = arith.constant 0 : i32
    return %c0_i32, %arg1 : i32, i32
  }
  func.func @transform_3(%arg0: i32, %arg1: i32) -> (i32, i32) {
    %c0_i32 = arith.constant 0 : i32
    return %arg0, %arg1 : i32, i32
  }
}

module attributes {stable_mosaic.version = 11 : i64} {
  func.func @_mm_bias_kernel(%arg0: i32, %arg1: i32, %arg2: memref<128x128xbf16, #tpu.memory_space<vmem>>, %arg3: memref<128x256xbf16, #tpu.memory_space<vmem>>, %arg4: memref<1x256xf32, #tpu.memory_space<vmem>>, %arg5: memref<128x256xbf16, #tpu.memory_space<vmem>>) attributes {dimension_semantics = [#tpu.dimension_semantics<parallel>, #tpu.dimension_semantics<parallel>], iteration_bounds = array<i64: 1, 2>, scalar_prefetch = 0 : i64, scratch_operands = 0 : i64, tpu.core_type = #tpu.core_type<tc>, window_params = [{transform_indices = @transform_0, window_bounds = array<i64: 128, 128>}, {transform_indices = @transform_1, window_bounds = array<i64: 128, 256>}, {transform_indices = @transform_2, window_bounds = array<i64: 1, 256>}, {transform_indices = @transform_3, window_bounds = array<i64: 128, 256>}]} {
    %c0 = arith.constant 0 : index
    %c0_0 = arith.constant 0 : index
    %0 = vector.load %arg2[%c0, %c0_0] : memref<128x128xbf16, #tpu.memory_space<vmem>>, vector<128x128xbf16>
    %c0_1 = arith.constant 0 : index
    %c0_2 = arith.constant 0 : index
    %1 = vector.load %arg3[%c0_1, %c0_2] : memref<128x256xbf16, #tpu.memory_space<vmem>>, vector<128x256xbf16>
    %cst = arith.constant dense<0.000000e+00> : vector<128x256xf32>
    %2 = tpu.matmul %0, %1, %cst {dimension_numbers = #tpu.dot_dimension_numbers<[1], [0], [0], [1], [0, 0, 1, 1], [], []>} : vector<128x128xbf16>, vector<128x256xbf16>, vector<128x256xf32> -> vector<128x256xf32>
    %c0_3 = arith.constant 0 : index
    %c0_4 = arith.constant 0 : index
    %3 = vector.load %arg4[%c0_3, %c0_4] : memref<1x256xf32, #tpu.memory_space<vmem>>, vector<1x256xf32>
    %4 = vector.broadcast %3 : vector<1x256xf32> to vector<128x256xf32>
    %5 = arith.addf %2, %4 : vector<128x256xf32>
    %6 = arith.truncf %5 : vector<128x256xf32> to vector<128x256xbf16>
    %c0_5 = arith.constant 0 : index
    %c0_6 = arith.constant 0 : index
    %7 = vector.load %arg5[%c0_5, %c0_6] : memref<128x256xbf16, #tpu.memory_space<vmem>>, vector<128x256xbf16>
    tpu.vector_store %arg5[%c0_5, %c0_6], %6 {strides = array<i32>} : memref<128x256xbf16, #tpu.memory_space<vmem>>, vector<128x256xbf16>,
    return
  }
  func.func @transform_0(%arg0: i32, %arg1: i32) -> (i32, i32) {
    %c0_i32 = arith.constant 0 : i32
    %c0_i32_0 = arith.constant 0 : i32
    return %arg0, %c0_i32 : i32, i32
  }
  func.func @transform_1(%arg0: i32, %arg1: i32) -> (i32, i32) {
    %c0_i32 = arith.constant 0 : i32
    %c0_i32_0 = arith.constant 0 : i32
    return %c0_i32, %arg1 : i32, i32
  }
  func.func @transform_2(%arg0: i32, %arg1: i32) -> (i32, i32) {
    %c0_i32 = arith.constant 0 : i32
    %c0_i32_0 = arith.constant 0 : i32
    return %c0_i32, %arg1 : i32, i32
  }
  func.func @transform_3(%arg0: i32, %arg1: i32) -> (i32, i32) {
    %c0_i32 = arith.constant 0 : i32
    return %arg0, %arg1 : i32, i32
  }
}

module attributes {stable_mosaic.version = 11 : i64} {
  func.func @_fused_conv_bn_relu_kernel(%arg0: memref<128x288xbf16, #tpu.memory_space<vmem>>, %arg1: memref<288x128xbf16, #tpu.memory_space<vmem>>, %arg2: memref<1x128xf32, #tpu.memory_space<vmem>>, %arg3: memref<1x128xf32, #tpu.memory_space<vmem>>, %arg4: memref<128x128xbf16, #tpu.memory_space<vmem>>) attributes {dimension_semantics = [], scalar_prefetch = 0 : i64, scratch_operands = 0 : i64, tpu.core_type = #tpu.core_type<tc>} {
    %c0 = arith.constant 0 : index
    %c0_0 = arith.constant 0 : index
    %0 = vector.load %arg0[%c0, %c0_0] : memref<128x288xbf16, #tpu.memory_space<vmem>>, vector<128x288xbf16>
    %c0_1 = arith.constant 0 : index
    %c0_2 = arith.constant 0 : index
    %1 = vector.load %arg1[%c0_1, %c0_2] : memref<288x128xbf16, #tpu.memory_space<vmem>>, vector<288x128xbf16>
    %cst = arith.constant dense<0.000000e+00> : vector<128x128xf32>
    %2 = tpu.matmul %0, %1, %cst {dimension_numbers = #tpu.dot_dimension_numbers<[1], [0], [0], [1], [0, 0, 1, 1], [], []>} : vector<128x288xbf16>, vector<288x128xbf16>, vector<128x128xf32> -> vector<128x128xf32>
    %cst_3 = arith.constant dense<0.000000e+00> : vector<128xf32>
    %3 = vector.multi_reduction <add>, %2, %cst_3 [0] : vector<128x128xf32> to vector<128xf32>
    %4 = vector.shape_cast %3 : vector<128xf32> to vector<1x128xf32>
    %cst_4 = arith.constant 7.812500e-03 : f32
    %5 = vector.broadcast %cst_4 : f32 to vector<1x128xf32>
    %6 = arith.mulf %4, %5 : vector<1x128xf32>
    %7 = arith.mulf %2, %2 : vector<128x128xf32>
    %cst_5 = arith.constant dense<0.000000e+00> : vector<128xf32>
    %8 = vector.multi_reduction <add>, %7, %cst_5 [0] : vector<128x128xf32> to vector<128xf32>
    %9 = vector.shape_cast %8 : vector<128xf32> to vector<1x128xf32>
    %cst_6 = arith.constant 7.812500e-03 : f32
    %10 = vector.broadcast %cst_6 : f32 to vector<1x128xf32>
    %11 = arith.mulf %9, %10 : vector<1x128xf32>
    %12 = arith.mulf %6, %6 : vector<1x128xf32>
    %13 = arith.subf %11, %12 : vector<1x128xf32>
    %cst_7 = arith.constant 0.000000e+00 : f32
    %14 = vector.broadcast %cst_7 : f32 to vector<1x128xf32>
    %15 = arith.maximumf %13, %14 : vector<1x128xf32>
    %c0_8 = arith.constant 0 : index
    %c0_9 = arith.constant 0 : index
    %16 = vector.load %arg2[%c0_8, %c0_9] : memref<1x128xf32, #tpu.memory_space<vmem>>, vector<1x128xf32>
    %cst_10 = arith.constant 9.99999974E-6 : f32
    %17 = vector.broadcast %cst_10 : f32 to vector<1x128xf32>
    %18 = arith.addf %15, %17 : vector<1x128xf32>
    %19 = math.rsqrt %18 : vector<1x128xf32>
    %20 = arith.mulf %16, %19 : vector<1x128xf32>
    %c0_11 = arith.constant 0 : index
    %c0_12 = arith.constant 0 : index
    %21 = vector.load %arg3[%c0_11, %c0_12] : memref<1x128xf32, #tpu.memory_space<vmem>>, vector<1x128xf32>
    %22 = arith.mulf %6, %20 : vector<1x128xf32>
    %23 = arith.subf %21, %22 : vector<1x128xf32>
    %24 = vector.broadcast %20 : vector<1x128xf32> to vector<128x128xf32>
    %25 = arith.mulf %2, %24 : vector<128x128xf32>
    %26 = vector.broadcast %23 : vector<1x128xf32> to vector<128x128xf32>
    %27 = arith.addf %25, %26 : vector<128x128xf32>
    %cst_13 = arith.constant 0.000000e+00 : f32
    %28 = vector.broadcast %cst_13 : f32 to vector<128x128xf32>
    %29 = arith.maximumf %27, %28 : vector<128x128xf32>
    %30 = arith.truncf %29 : vector<128x128xf32> to vector<128x128xbf16>
    %c0_14 = arith.constant 0 : index
    %c0_15 = arith.constant 0 : index
    %31 = vector.load %arg4[%c0_14, %c0_15] : memref<128x128xbf16, #tpu.memory_space<vmem>>, vector<128x128xbf16>
    tpu.vector_store %arg4[%c0_14, %c0_15], %30 {strides = array<i32>} : memref<128x128xbf16, #tpu.memory_space<vmem>>, vector<128x128xbf16>,
    return
  }
}

module attributes {stable_mosaic.version = 11 : i64} {
  func.func @_fused_conv_bn_relu_kernel(%arg0: memref<32x144xbf16, #tpu.memory_space<vmem>>, %arg1: memref<144x128xbf16, #tpu.memory_space<vmem>>, %arg2: memref<1x128xf32, #tpu.memory_space<vmem>>, %arg3: memref<1x128xf32, #tpu.memory_space<vmem>>, %arg4: memref<32x128xbf16, #tpu.memory_space<vmem>>) attributes {dimension_semantics = [], scalar_prefetch = 0 : i64, scratch_operands = 0 : i64, tpu.core_type = #tpu.core_type<tc>} {
    %c0 = arith.constant 0 : index
    %c0_0 = arith.constant 0 : index
    %0 = vector.load %arg0[%c0, %c0_0] : memref<32x144xbf16, #tpu.memory_space<vmem>>, vector<32x144xbf16>
    %c0_1 = arith.constant 0 : index
    %c0_2 = arith.constant 0 : index
    %1 = vector.load %arg1[%c0_1, %c0_2] : memref<144x128xbf16, #tpu.memory_space<vmem>>, vector<144x128xbf16>
    %cst = arith.constant dense<0.000000e+00> : vector<32x128xf32>
    %2 = tpu.matmul %0, %1, %cst {dimension_numbers = #tpu.dot_dimension_numbers<[1], [0], [0], [1], [0, 0, 1, 1], [], []>} : vector<32x144xbf16>, vector<144x128xbf16>, vector<32x128xf32> -> vector<32x128xf32>
    %cst_3 = arith.constant dense<0.000000e+00> : vector<128xf32>
    %3 = vector.multi_reduction <add>, %2, %cst_3 [0] : vector<32x128xf32> to vector<128xf32>
    %4 = vector.shape_cast %3 : vector<128xf32> to vector<1x128xf32>
    %cst_4 = arith.constant 3.125000e-02 : f32
    %5 = vector.broadcast %cst_4 : f32 to vector<1x128xf32>
    %6 = arith.mulf %4, %5 : vector<1x128xf32>
    %7 = arith.mulf %2, %2 : vector<32x128xf32>
    %cst_5 = arith.constant dense<0.000000e+00> : vector<128xf32>
    %8 = vector.multi_reduction <add>, %7, %cst_5 [0] : vector<32x128xf32> to vector<128xf32>
    %9 = vector.shape_cast %8 : vector<128xf32> to vector<1x128xf32>
    %cst_6 = arith.constant 3.125000e-02 : f32
    %10 = vector.broadcast %cst_6 : f32 to vector<1x128xf32>
    %11 = arith.mulf %9, %10 : vector<1x128xf32>
    %12 = arith.mulf %6, %6 : vector<1x128xf32>
    %13 = arith.subf %11, %12 : vector<1x128xf32>
    %cst_7 = arith.constant 0.000000e+00 : f32
    %14 = vector.broadcast %cst_7 : f32 to vector<1x128xf32>
    %15 = arith.maximumf %13, %14 : vector<1x128xf32>
    %c0_8 = arith.constant 0 : index
    %c0_9 = arith.constant 0 : index
    %16 = vector.load %arg2[%c0_8, %c0_9] : memref<1x128xf32, #tpu.memory_space<vmem>>, vector<1x128xf32>
    %cst_10 = arith.constant 9.99999974E-6 : f32
    %17 = vector.broadcast %cst_10 : f32 to vector<1x128xf32>
    %18 = arith.addf %15, %17 : vector<1x128xf32>
    %19 = math.rsqrt %18 : vector<1x128xf32>
    %20 = arith.mulf %16, %19 : vector<1x128xf32>
    %c0_11 = arith.constant 0 : index
    %c0_12 = arith.constant 0 : index
    %21 = vector.load %arg3[%c0_11, %c0_12] : memref<1x128xf32, #tpu.memory_space<vmem>>, vector<1x128xf32>
    %22 = arith.mulf %6, %20 : vector<1x128xf32>
    %23 = arith.subf %21, %22 : vector<1x128xf32>
    %24 = vector.broadcast %20 : vector<1x128xf32> to vector<32x128xf32>
    %25 = arith.mulf %2, %24 : vector<32x128xf32>
    %26 = vector.broadcast %23 : vector<1x128xf32> to vector<32x128xf32>
    %27 = arith.addf %25, %26 : vector<32x128xf32>
    %cst_13 = arith.constant 0.000000e+00 : f32
    %28 = vector.broadcast %cst_13 : f32 to vector<32x128xf32>
    %29 = arith.maximumf %27, %28 : vector<32x128xf32>
    %30 = arith.truncf %29 : vector<32x128xf32> to vector<32x128xbf16>
    %c0_14 = arith.constant 0 : index
    %c0_15 = arith.constant 0 : index
    %31 = vector.load %arg4[%c0_14, %c0_15] : memref<32x128xbf16, #tpu.memory_space<vmem>>, vector<32x128xbf16>
    tpu.vector_store %arg4[%c0_14, %c0_15], %30 {strides = array<i32>} : memref<32x128xbf16, #tpu.memory_space<vmem>>, vector<32x128xbf16>,
    return
  }
}

module attributes {stable_mosaic.version = 11 : i64} {
  func.func @_fused_conv_bn_relu_kernel(%arg0: memref<8x144xbf16, #tpu.memory_space<vmem>>, %arg1: memref<144x128xbf16, #tpu.memory_space<vmem>>, %arg2: memref<1x128xf32, #tpu.memory_space<vmem>>, %arg3: memref<1x128xf32, #tpu.memory_space<vmem>>, %arg4: memref<8x128xbf16, #tpu.memory_space<vmem>>) attributes {dimension_semantics = [], scalar_prefetch = 0 : i64, scratch_operands = 0 : i64, tpu.core_type = #tpu.core_type<tc>} {
    %c0 = arith.constant 0 : index
    %c0_0 = arith.constant 0 : index
    %0 = vector.load %arg0[%c0, %c0_0] : memref<8x144xbf16, #tpu.memory_space<vmem>>, vector<8x144xbf16>
    %c0_1 = arith.constant 0 : index
    %c0_2 = arith.constant 0 : index
    %1 = vector.load %arg1[%c0_1, %c0_2] : memref<144x128xbf16, #tpu.memory_space<vmem>>, vector<144x128xbf16>
    %cst = arith.constant dense<0.000000e+00> : vector<8x128xf32>
    %2 = tpu.matmul %0, %1, %cst {dimension_numbers = #tpu.dot_dimension_numbers<[1], [0], [0], [1], [0, 0, 1, 1], [], []>} : vector<8x144xbf16>, vector<144x128xbf16>, vector<8x128xf32> -> vector<8x128xf32>
    %cst_3 = arith.constant dense<0.000000e+00> : vector<128xf32>
    %3 = vector.multi_reduction <add>, %2, %cst_3 [0] : vector<8x128xf32> to vector<128xf32>
    %4 = vector.shape_cast %3 : vector<128xf32> to vector<1x128xf32>
    %cst_4 = arith.constant 1.250000e-01 : f32
    %5 = vector.broadcast %cst_4 : f32 to vector<1x128xf32>
    %6 = arith.mulf %4, %5 : vector<1x128xf32>
    %7 = arith.mulf %2, %2 : vector<8x128xf32>
    %cst_5 = arith.constant dense<0.000000e+00> : vector<128xf32>
    %8 = vector.multi_reduction <add>, %7, %cst_5 [0] : vector<8x128xf32> to vector<128xf32>
    %9 = vector.shape_cast %8 : vector<128xf32> to vector<1x128xf32>
    %cst_6 = arith.constant 1.250000e-01 : f32
    %10 = vector.broadcast %cst_6 : f32 to vector<1x128xf32>
    %11 = arith.mulf %9, %10 : vector<1x128xf32>
    %12 = arith.mulf %6, %6 : vector<1x128xf32>
    %13 = arith.subf %11, %12 : vector<1x128xf32>
    %cst_7 = arith.constant 0.000000e+00 : f32
    %14 = vector.broadcast %cst_7 : f32 to vector<1x128xf32>
    %15 = arith.maximumf %13, %14 : vector<1x128xf32>
    %c0_8 = arith.constant 0 : index
    %c0_9 = arith.constant 0 : index
    %16 = vector.load %arg2[%c0_8, %c0_9] : memref<1x128xf32, #tpu.memory_space<vmem>>, vector<1x128xf32>
    %cst_10 = arith.constant 9.99999974E-6 : f32
    %17 = vector.broadcast %cst_10 : f32 to vector<1x128xf32>
    %18 = arith.addf %15, %17 : vector<1x128xf32>
    %19 = math.rsqrt %18 : vector<1x128xf32>
    %20 = arith.mulf %16, %19 : vector<1x128xf32>
    %c0_11 = arith.constant 0 : index
    %c0_12 = arith.constant 0 : index
    %21 = vector.load %arg3[%c0_11, %c0_12] : memref<1x128xf32, #tpu.memory_space<vmem>>, vector<1x128xf32>
    %22 = arith.mulf %6, %20 : vector<1x128xf32>
    %23 = arith.subf %21, %22 : vector<1x128xf32>
    %24 = vector.broadcast %20 : vector<1x128xf32> to vector<8x128xf32>
    %25 = arith.mulf %2, %24 : vector<8x128xf32>
    %26 = vector.broadcast %23 : vector<1x128xf32> to vector<8x128xf32>
    %27 = arith.addf %25, %26 : vector<8x128xf32>
    %cst_13 = arith.constant 0.000000e+00 : f32
    %28 = vector.broadcast %cst_13 : f32 to vector<8x128xf32>
    %29 = arith.maximumf %27, %28 : vector<8x128xf32>
    %30 = arith.truncf %29 : vector<8x128xf32> to vector<8x128xbf16>
    %c0_14 = arith.constant 0 : index
    %c0_15 = arith.constant 0 : index
    %31 = vector.load %arg4[%c0_14, %c0_15] : memref<8x128xbf16, #tpu.memory_space<vmem>>, vector<8x128xbf16>
    tpu.vector_store %arg4[%c0_14, %c0_15], %30 {strides = array<i32>} : memref<8x128xbf16, #tpu.memory_space<vmem>>, vector<8x128xbf16>,
    return
  }
}

module attributes {stable_mosaic.version = 11 : i64} {
  func.func @_fused_conv_bn_relu_kernel(%arg0: memref<8x288xbf16, #tpu.memory_space<vmem>>, %arg1: memref<288x128xbf16, #tpu.memory_space<vmem>>, %arg2: memref<1x128xf32, #tpu.memory_space<vmem>>, %arg3: memref<1x128xf32, #tpu.memory_space<vmem>>, %arg4: memref<8x128xbf16, #tpu.memory_space<vmem>>) attributes {dimension_semantics = [], scalar_prefetch = 0 : i64, scratch_operands = 0 : i64, tpu.core_type = #tpu.core_type<tc>} {
    %c0 = arith.constant 0 : index
    %c0_0 = arith.constant 0 : index
    %0 = vector.load %arg0[%c0, %c0_0] : memref<8x288xbf16, #tpu.memory_space<vmem>>, vector<8x288xbf16>
    %c0_1 = arith.constant 0 : index
    %c0_2 = arith.constant 0 : index
    %1 = vector.load %arg1[%c0_1, %c0_2] : memref<288x128xbf16, #tpu.memory_space<vmem>>, vector<288x128xbf16>
    %cst = arith.constant dense<0.000000e+00> : vector<8x128xf32>
    %2 = tpu.matmul %0, %1, %cst {dimension_numbers = #tpu.dot_dimension_numbers<[1], [0], [0], [1], [0, 0, 1, 1], [], []>} : vector<8x288xbf16>, vector<288x128xbf16>, vector<8x128xf32> -> vector<8x128xf32>
    %cst_3 = arith.constant dense<0.000000e+00> : vector<128xf32>
    %3 = vector.multi_reduction <add>, %2, %cst_3 [0] : vector<8x128xf32> to vector<128xf32>
    %4 = vector.shape_cast %3 : vector<128xf32> to vector<1x128xf32>
    %cst_4 = arith.constant 5.000000e-01 : f32
    %5 = vector.broadcast %cst_4 : f32 to vector<1x128xf32>
    %6 = arith.mulf %4, %5 : vector<1x128xf32>
    %7 = arith.mulf %2, %2 : vector<8x128xf32>
    %cst_5 = arith.constant dense<0.000000e+00> : vector<128xf32>
    %8 = vector.multi_reduction <add>, %7, %cst_5 [0] : vector<8x128xf32> to vector<128xf32>
    %9 = vector.shape_cast %8 : vector<128xf32> to vector<1x128xf32>
    %cst_6 = arith.constant 5.000000e-01 : f32
    %10 = vector.broadcast %cst_6 : f32 to vector<1x128xf32>
    %11 = arith.mulf %9, %10 : vector<1x128xf32>
    %12 = arith.mulf %6, %6 : vector<1x128xf32>
    %13 = arith.subf %11, %12 : vector<1x128xf32>
    %cst_7 = arith.constant 0.000000e+00 : f32
    %14 = vector.broadcast %cst_7 : f32 to vector<1x128xf32>
    %15 = arith.maximumf %13, %14 : vector<1x128xf32>
    %c0_8 = arith.constant 0 : index
    %c0_9 = arith.constant 0 : index
    %16 = vector.load %arg2[%c0_8, %c0_9] : memref<1x128xf32, #tpu.memory_space<vmem>>, vector<1x128xf32>
    %cst_10 = arith.constant 9.99999974E-6 : f32
    %17 = vector.broadcast %cst_10 : f32 to vector<1x128xf32>
    %18 = arith.addf %15, %17 : vector<1x128xf32>
    %19 = math.rsqrt %18 : vector<1x128xf32>
    %20 = arith.mulf %16, %19 : vector<1x128xf32>
    %c0_11 = arith.constant 0 : index
    %c0_12 = arith.constant 0 : index
    %21 = vector.load %arg3[%c0_11, %c0_12] : memref<1x128xf32, #tpu.memory_space<vmem>>, vector<1x128xf32>
    %22 = arith.mulf %6, %20 : vector<1x128xf32>
    %23 = arith.subf %21, %22 : vector<1x128xf32>
    %24 = vector.broadcast %20 : vector<1x128xf32> to vector<8x128xf32>
    %25 = arith.mulf %2, %24 : vector<8x128xf32>
    %26 = vector.broadcast %23 : vector<1x128xf32> to vector<8x128xf32>
    %27 = arith.addf %25, %26 : vector<8x128xf32>
    %cst_13 = arith.constant 0.000000e+00 : f32
    %28 = vector.broadcast %cst_13 : f32 to vector<8x128xf32>
    %29 = arith.maximumf %27, %28 : vector<8x128xf32>
    %30 = arith.truncf %29 : vector<8x128xf32> to vector<8x128xbf16>
    %c0_14 = arith.constant 0 : index
    %c0_15 = arith.constant 0 : index
    %31 = vector.load %arg4[%c0_14, %c0_15] : memref<8x128xbf16, #tpu.memory_space<vmem>>, vector<8x128xbf16>
    tpu.vector_store %arg4[%c0_14, %c0_15], %30 {strides = array<i32>} : memref<8x128xbf16, #tpu.memory_space<vmem>>, vector<8x128xbf16>,
    return
  }
}

module attributes {stable_mosaic.version = 11 : i64} {
  func.func @_fused_conv_bn_relu_kernel(%arg0: memref<8x144xbf16, #tpu.memory_space<vmem>>, %arg1: memref<144x128xbf16, #tpu.memory_space<vmem>>, %arg2: memref<1x128xf32, #tpu.memory_space<vmem>>, %arg3: memref<1x128xf32, #tpu.memory_space<vmem>>, %arg4: memref<8x128xbf16, #tpu.memory_space<vmem>>) attributes {dimension_semantics = [], scalar_prefetch = 0 : i64, scratch_operands = 0 : i64, tpu.core_type = #tpu.core_type<tc>} {
    %c0 = arith.constant 0 : index
    %c0_0 = arith.constant 0 : index
    %0 = vector.load %arg0[%c0, %c0_0] : memref<8x144xbf16, #tpu.memory_space<vmem>>, vector<8x144xbf16>
    %c0_1 = arith.constant 0 : index
    %c0_2 = arith.constant 0 : index
    %1 = vector.load %arg1[%c0_1, %c0_2] : memref<144x128xbf16, #tpu.memory_space<vmem>>, vector<144x128xbf16>
    %cst = arith.constant dense<0.000000e+00> : vector<8x128xf32>
    %2 = tpu.matmul %0, %1, %cst {dimension_numbers = #tpu.dot_dimension_numbers<[1], [0], [0], [1], [0, 0, 1, 1], [], []>} : vector<8x144xbf16>, vector<144x128xbf16>, vector<8x128xf32> -> vector<8x128xf32>
    %cst_3 = arith.constant dense<0.000000e+00> : vector<128xf32>
    %3 = vector.multi_reduction <add>, %2, %cst_3 [0] : vector<8x128xf32> to vector<128xf32>
    %4 = vector.shape_cast %3 : vector<128xf32> to vector<1x128xf32>
    %cst_4 = arith.constant 5.000000e-01 : f32
    %5 = vector.broadcast %cst_4 : f32 to vector<1x128xf32>
    %6 = arith.mulf %4, %5 : vector<1x128xf32>
    %7 = arith.mulf %2, %2 : vector<8x128xf32>
    %cst_5 = arith.constant dense<0.000000e+00> : vector<128xf32>
    %8 = vector.multi_reduction <add>, %7, %cst_5 [0] : vector<8x128xf32> to vector<128xf32>
    %9 = vector.shape_cast %8 : vector<128xf32> to vector<1x128xf32>
    %cst_6 = arith.constant 5.000000e-01 : f32
    %10 = vector.broadcast %cst_6 : f32 to vector<1x128xf32>
    %11 = arith.mulf %9, %10 : vector<1x128xf32>
    %12 = arith.mulf %6, %6 : vector<1x128xf32>
    %13 = arith.subf %11, %12 : vector<1x128xf32>
    %cst_7 = arith.constant 0.000000e+00 : f32
    %14 = vector.broadcast %cst_7 : f32 to vector<1x128xf32>
    %15 = arith.maximumf %13, %14 : vector<1x128xf32>
    %c0_8 = arith.constant 0 : index
    %c0_9 = arith.constant 0 : index
    %16 = vector.load %arg2[%c0_8, %c0_9] : memref<1x128xf32, #tpu.memory_space<vmem>>, vector<1x128xf32>
    %cst_10 = arith.constant 9.99999974E-6 : f32
    %17 = vector.broadcast %cst_10 : f32 to vector<1x128xf32>
    %18 = arith.addf %15, %17 : vector<1x128xf32>
    %19 = math.rsqrt %18 : vector<1x128xf32>
    %20 = arith.mulf %16, %19 : vector<1x128xf32>
    %c0_11 = arith.constant 0 : index
    %c0_12 = arith.constant 0 : index
    %21 = vector.load %arg3[%c0_11, %c0_12] : memref<1x128xf32, #tpu.memory_space<vmem>>, vector<1x128xf32>
    %22 = arith.mulf %6, %20 : vector<1x128xf32>
    %23 = arith.subf %21, %22 : vector<1x128xf32>
    %24 = vector.broadcast %20 : vector<1x128xf32> to vector<8x128xf32>
    %25 = arith.mulf %2, %24 : vector<8x128xf32>
    %26 = vector.broadcast %23 : vector<1x128xf32> to vector<8x128xf32>
    %27 = arith.addf %25, %26 : vector<8x128xf32>
    %cst_13 = arith.constant 0.000000e+00 : f32
    %28 = vector.broadcast %cst_13 : f32 to vector<8x128xf32>
    %29 = arith.maximumf %27, %28 : vector<8x128xf32>
    %30 = arith.mulf %29, %29 : vector<8x128xf32>
    %cst_14 = arith.constant dense<0.000000e+00> : vector<8xf32>
    %31 = vector.multi_reduction <add>, %30, %cst_14 [1] : vector<8x128xf32> to vector<8xf32>
    %32 = vector.shape_cast %31 : vector<8xf32> to vector<8x1xf32>
    %33 = math.sqrt %32 : vector<8x1xf32>
    %cst_15 = arith.constant 9.99999996E-13 : f32
    %34 = vector.broadcast %cst_15 : f32 to vector<8x1xf32>
    %35 = arith.maximumf %33, %34 : vector<8x1xf32>
    %36 = vector.broadcast %35 : vector<8x1xf32> to vector<8x128xf32>
    %37 = arith.divf %29, %36 : vector<8x128xf32>
    %38 = arith.truncf %37 : vector<8x128xf32> to vector<8x128xbf16>
    %c0_16 = arith.constant 0 : index
    %c0_17 = arith.constant 0 : index
    %39 = vector.load %arg4[%c0_16, %c0_17] : memref<8x128xbf16, #tpu.memory_space<vmem>>, vector<8x128xbf16>
    tpu.vector_store %arg4[%c0_16, %c0_17], %38 {strides = array<i32>} : memref<8x128xbf16, #tpu.memory_space<vmem>>, vector<8x128xbf16>,
    return
  }
}

module attributes {stable_mosaic.version = 11 : i64} {
  func.func @_fused_conv_bn_relu_kernel(%arg0: memref<8x432xbf16, #tpu.memory_space<vmem>>, %arg1: memref<432x128xbf16, #tpu.memory_space<vmem>>, %arg2: memref<1x128xf32, #tpu.memory_space<vmem>>, %arg3: memref<1x128xf32, #tpu.memory_space<vmem>>, %arg4: memref<8x128xbf16, #tpu.memory_space<vmem>>) attributes {dimension_semantics = [], scalar_prefetch = 0 : i64, scratch_operands = 0 : i64, tpu.core_type = #tpu.core_type<tc>} {
    %c0 = arith.constant 0 : index
    %c0_0 = arith.constant 0 : index
    %0 = vector.load %arg0[%c0, %c0_0] : memref<8x432xbf16, #tpu.memory_space<vmem>>, vector<8x432xbf16>
    %c0_1 = arith.constant 0 : index
    %c0_2 = arith.constant 0 : index
    %1 = vector.load %arg1[%c0_1, %c0_2] : memref<432x128xbf16, #tpu.memory_space<vmem>>, vector<432x128xbf16>
    %cst = arith.constant dense<0.000000e+00> : vector<8x128xf32>
    %2 = tpu.matmul %0, %1, %cst {dimension_numbers = #tpu.dot_dimension_numbers<[1], [0], [0], [1], [0, 0, 1, 1], [], []>} : vector<8x432xbf16>, vector<432x128xbf16>, vector<8x128xf32> -> vector<8x128xf32>
    %cst_3 = arith.constant dense<0.000000e+00> : vector<128xf32>
    %3 = vector.multi_reduction <add>, %2, %cst_3 [0] : vector<8x128xf32> to vector<128xf32>
    %4 = vector.shape_cast %3 : vector<128xf32> to vector<1x128xf32>
    %cst_4 = arith.constant 1.250000e-01 : f32
    %5 = vector.broadcast %cst_4 : f32 to vector<1x128xf32>
    %6 = arith.mulf %4, %5 : vector<1x128xf32>
    %7 = arith.mulf %2, %2 : vector<8x128xf32>
    %cst_5 = arith.constant dense<0.000000e+00> : vector<128xf32>
    %8 = vector.multi_reduction <add>, %7, %cst_5 [0] : vector<8x128xf32> to vector<128xf32>
    %9 = vector.shape_cast %8 : vector<128xf32> to vector<1x128xf32>
    %cst_6 = arith.constant 1.250000e-01 : f32
    %10 = vector.broadcast %cst_6 : f32 to vector<1x128xf32>
    %11 = arith.mulf %9, %10 : vector<1x128xf32>
    %12 = arith.mulf %6, %6 : vector<1x128xf32>
    %13 = arith.subf %11, %12 : vector<1x128xf32>
    %cst_7 = arith.constant 0.000000e+00 : f32
    %14 = vector.broadcast %cst_7 : f32 to vector<1x128xf32>
    %15 = arith.maximumf %13, %14 : vector<1x128xf32>
    %c0_8 = arith.constant 0 : index
    %c0_9 = arith.constant 0 : index
    %16 = vector.load %arg2[%c0_8, %c0_9] : memref<1x128xf32, #tpu.memory_space<vmem>>, vector<1x128xf32>
    %cst_10 = arith.constant 9.99999974E-6 : f32
    %17 = vector.broadcast %cst_10 : f32 to vector<1x128xf32>
    %18 = arith.addf %15, %17 : vector<1x128xf32>
    %19 = math.rsqrt %18 : vector<1x128xf32>
    %20 = arith.mulf %16, %19 : vector<1x128xf32>
    %c0_11 = arith.constant 0 : index
    %c0_12 = arith.constant 0 : index
    %21 = vector.load %arg3[%c0_11, %c0_12] : memref<1x128xf32, #tpu.memory_space<vmem>>, vector<1x128xf32>
    %22 = arith.mulf %6, %20 : vector<1x128xf32>
    %23 = arith.subf %21, %22 : vector<1x128xf32>
    %24 = vector.broadcast %20 : vector<1x128xf32> to vector<8x128xf32>
    %25 = arith.mulf %2, %24 : vector<8x128xf32>
    %26 = vector.broadcast %23 : vector<1x128xf32> to vector<8x128xf32>
    %27 = arith.addf %25, %26 : vector<8x128xf32>
    %cst_13 = arith.constant 0.000000e+00 : f32
    %28 = vector.broadcast %cst_13 : f32 to vector<8x128xf32>
    %29 = arith.maximumf %27, %28 : vector<8x128xf32>
    %30 = arith.truncf %29 : vector<8x128xf32> to vector<8x128xbf16>
    %c0_14 = arith.constant 0 : index
    %c0_15 = arith.constant 0 : index
    %31 = vector.load %arg4[%c0_14, %c0_15] : memref<8x128xbf16, #tpu.memory_space<vmem>>, vector<8x128xbf16>
    tpu.vector_store %arg4[%c0_14, %c0_15], %30 {strides = array<i32>} : memref<8x128xbf16, #tpu.memory_space<vmem>>, vector<8x128xbf16>,
    return
  }
}

module attributes {stable_mosaic.version = 11 : i64} {
  func.func @_fused_conv_bn_relu_kernel(%arg0: memref<32x432xbf16, #tpu.memory_space<vmem>>, %arg1: memref<432x128xbf16, #tpu.memory_space<vmem>>, %arg2: memref<1x128xf32, #tpu.memory_space<vmem>>, %arg3: memref<1x128xf32, #tpu.memory_space<vmem>>, %arg4: memref<32x128xbf16, #tpu.memory_space<vmem>>) attributes {dimension_semantics = [], scalar_prefetch = 0 : i64, scratch_operands = 0 : i64, tpu.core_type = #tpu.core_type<tc>} {
    %c0 = arith.constant 0 : index
    %c0_0 = arith.constant 0 : index
    %0 = vector.load %arg0[%c0, %c0_0] : memref<32x432xbf16, #tpu.memory_space<vmem>>, vector<32x432xbf16>
    %c0_1 = arith.constant 0 : index
    %c0_2 = arith.constant 0 : index
    %1 = vector.load %arg1[%c0_1, %c0_2] : memref<432x128xbf16, #tpu.memory_space<vmem>>, vector<432x128xbf16>
    %cst = arith.constant dense<0.000000e+00> : vector<32x128xf32>
    %2 = tpu.matmul %0, %1, %cst {dimension_numbers = #tpu.dot_dimension_numbers<[1], [0], [0], [1], [0, 0, 1, 1], [], []>} : vector<32x432xbf16>, vector<432x128xbf16>, vector<32x128xf32> -> vector<32x128xf32>
    %cst_3 = arith.constant dense<0.000000e+00> : vector<128xf32>
    %3 = vector.multi_reduction <add>, %2, %cst_3 [0] : vector<32x128xf32> to vector<128xf32>
    %4 = vector.shape_cast %3 : vector<128xf32> to vector<1x128xf32>
    %cst_4 = arith.constant 3.125000e-02 : f32
    %5 = vector.broadcast %cst_4 : f32 to vector<1x128xf32>
    %6 = arith.mulf %4, %5 : vector<1x128xf32>
    %7 = arith.mulf %2, %2 : vector<32x128xf32>
    %cst_5 = arith.constant dense<0.000000e+00> : vector<128xf32>
    %8 = vector.multi_reduction <add>, %7, %cst_5 [0] : vector<32x128xf32> to vector<128xf32>
    %9 = vector.shape_cast %8 : vector<128xf32> to vector<1x128xf32>
    %cst_6 = arith.constant 3.125000e-02 : f32
    %10 = vector.broadcast %cst_6 : f32 to vector<1x128xf32>
    %11 = arith.mulf %9, %10 : vector<1x128xf32>
    %12 = arith.mulf %6, %6 : vector<1x128xf32>
    %13 = arith.subf %11, %12 : vector<1x128xf32>
    %cst_7 = arith.constant 0.000000e+00 : f32
    %14 = vector.broadcast %cst_7 : f32 to vector<1x128xf32>
    %15 = arith.maximumf %13, %14 : vector<1x128xf32>
    %c0_8 = arith.constant 0 : index
    %c0_9 = arith.constant 0 : index
    %16 = vector.load %arg2[%c0_8, %c0_9] : memref<1x128xf32, #tpu.memory_space<vmem>>, vector<1x128xf32>
    %cst_10 = arith.constant 9.99999974E-6 : f32
    %17 = vector.broadcast %cst_10 : f32 to vector<1x128xf32>
    %18 = arith.addf %15, %17 : vector<1x128xf32>
    %19 = math.rsqrt %18 : vector<1x128xf32>
    %20 = arith.mulf %16, %19 : vector<1x128xf32>
    %c0_11 = arith.constant 0 : index
    %c0_12 = arith.constant 0 : index
    %21 = vector.load %arg3[%c0_11, %c0_12] : memref<1x128xf32, #tpu.memory_space<vmem>>, vector<1x128xf32>
    %22 = arith.mulf %6, %20 : vector<1x128xf32>
    %23 = arith.subf %21, %22 : vector<1x128xf32>
    %24 = vector.broadcast %20 : vector<1x128xf32> to vector<32x128xf32>
    %25 = arith.mulf %2, %24 : vector<32x128xf32>
    %26 = vector.broadcast %23 : vector<1x128xf32> to vector<32x128xf32>
    %27 = arith.addf %25, %26 : vector<32x128xf32>
    %cst_13 = arith.constant 0.000000e+00 : f32
    %28 = vector.broadcast %cst_13 : f32 to vector<32x128xf32>
    %29 = arith.maximumf %27, %28 : vector<32x128xf32>
    %30 = arith.truncf %29 : vector<32x128xf32> to vector<32x128xbf16>
    %c0_14 = arith.constant 0 : index
    %c0_15 = arith.constant 0 : index
    %31 = vector.load %arg4[%c0_14, %c0_15] : memref<32x128xbf16, #tpu.memory_space<vmem>>, vector<32x128xbf16>
    tpu.vector_store %arg4[%c0_14, %c0_15], %30 {strides = array<i32>} : memref<32x128xbf16, #tpu.memory_space<vmem>>, vector<32x128xbf16>,
    return
  }
}

module attributes {stable_mosaic.version = 11 : i64} {
  func.func @_fused_conv_bn_relu_kernel(%arg0: memref<128x432xbf16, #tpu.memory_space<vmem>>, %arg1: memref<432x128xbf16, #tpu.memory_space<vmem>>, %arg2: memref<1x128xf32, #tpu.memory_space<vmem>>, %arg3: memref<1x128xf32, #tpu.memory_space<vmem>>, %arg4: memref<128x128xbf16, #tpu.memory_space<vmem>>) attributes {dimension_semantics = [], scalar_prefetch = 0 : i64, scratch_operands = 0 : i64, tpu.core_type = #tpu.core_type<tc>} {
    %c0 = arith.constant 0 : index
    %c0_0 = arith.constant 0 : index
    %0 = vector.load %arg0[%c0, %c0_0] : memref<128x432xbf16, #tpu.memory_space<vmem>>, vector<128x432xbf16>
    %c0_1 = arith.constant 0 : index
    %c0_2 = arith.constant 0 : index
    %1 = vector.load %arg1[%c0_1, %c0_2] : memref<432x128xbf16, #tpu.memory_space<vmem>>, vector<432x128xbf16>
    %cst = arith.constant dense<0.000000e+00> : vector<128x128xf32>
    %2 = tpu.matmul %0, %1, %cst {dimension_numbers = #tpu.dot_dimension_numbers<[1], [0], [0], [1], [0, 0, 1, 1], [], []>} : vector<128x432xbf16>, vector<432x128xbf16>, vector<128x128xf32> -> vector<128x128xf32>
    %cst_3 = arith.constant dense<0.000000e+00> : vector<128xf32>
    %3 = vector.multi_reduction <add>, %2, %cst_3 [0] : vector<128x128xf32> to vector<128xf32>
    %4 = vector.shape_cast %3 : vector<128xf32> to vector<1x128xf32>
    %cst_4 = arith.constant 7.812500e-03 : f32
    %5 = vector.broadcast %cst_4 : f32 to vector<1x128xf32>
    %6 = arith.mulf %4, %5 : vector<1x128xf32>
    %7 = arith.mulf %2, %2 : vector<128x128xf32>
    %cst_5 = arith.constant dense<0.000000e+00> : vector<128xf32>
    %8 = vector.multi_reduction <add>, %7, %cst_5 [0] : vector<128x128xf32> to vector<128xf32>
    %9 = vector.shape_cast %8 : vector<128xf32> to vector<1x128xf32>
    %cst_6 = arith.constant 7.812500e-03 : f32
    %10 = vector.broadcast %cst_6 : f32 to vector<1x128xf32>
    %11 = arith.mulf %9, %10 : vector<1x128xf32>
    %12 = arith.mulf %6, %6 : vector<1x128xf32>
    %13 = arith.subf %11, %12 : vector<1x128xf32>
    %cst_7 = arith.constant 0.000000e+00 : f32
    %14 = vector.broadcast %cst_7 : f32 to vector<1x128xf32>
    %15 = arith.maximumf %13, %14 : vector<1x128xf32>
    %c0_8 = arith.constant 0 : index
    %c0_9 = arith.constant 0 : index
    %16 = vector.load %arg2[%c0_8, %c0_9] : memref<1x128xf32, #tpu.memory_space<vmem>>, vector<1x128xf32>
    %cst_10 = arith.constant 9.99999974E-6 : f32
    %17 = vector.broadcast %cst_10 : f32 to vector<1x128xf32>
    %18 = arith.addf %15, %17 : vector<1x128xf32>
    %19 = math.rsqrt %18 : vector<1x128xf32>
    %20 = arith.mulf %16, %19 : vector<1x128xf32>
    %c0_11 = arith.constant 0 : index
    %c0_12 = arith.constant 0 : index
    %21 = vector.load %arg3[%c0_11, %c0_12] : memref<1x128xf32, #tpu.memory_space<vmem>>, vector<1x128xf32>
    %22 = arith.mulf %6, %20 : vector<1x128xf32>
    %23 = arith.subf %21, %22 : vector<1x128xf32>
    %24 = vector.broadcast %20 : vector<1x128xf32> to vector<128x128xf32>
    %25 = arith.mulf %2, %24 : vector<128x128xf32>
    %26 = vector.broadcast %23 : vector<1x128xf32> to vector<128x128xf32>
    %27 = arith.addf %25, %26 : vector<128x128xf32>
    %cst_13 = arith.constant 0.000000e+00 : f32
    %28 = vector.broadcast %cst_13 : f32 to vector<128x128xf32>
    %29 = arith.maximumf %27, %28 : vector<128x128xf32>
    %30 = arith.truncf %29 : vector<128x128xf32> to vector<128x128xbf16>
    %c0_14 = arith.constant 0 : index
    %c0_15 = arith.constant 0 : index
    %31 = vector.load %arg4[%c0_14, %c0_15] : memref<128x128xbf16, #tpu.memory_space<vmem>>, vector<128x128xbf16>
    tpu.vector_store %arg4[%c0_14, %c0_15], %30 {strides = array<i32>} : memref<128x128xbf16, #tpu.memory_space<vmem>>, vector<128x128xbf16>,
    return
  }
}

module attributes {stable_mosaic.version = 11 : i64} {
  func.func @_fused_conv_bn_relu_kernel(%arg0: memref<512x576xbf16, #tpu.memory_space<vmem>>, %arg1: memref<576x128xbf16, #tpu.memory_space<vmem>>, %arg2: memref<1x128xf32, #tpu.memory_space<vmem>>, %arg3: memref<1x128xf32, #tpu.memory_space<vmem>>, %arg4: memref<512x128xbf16, #tpu.memory_space<vmem>>) attributes {dimension_semantics = [], scalar_prefetch = 0 : i64, scratch_operands = 0 : i64, tpu.core_type = #tpu.core_type<tc>} {
    %c0 = arith.constant 0 : index
    %c0_0 = arith.constant 0 : index
    %0 = vector.load %arg0[%c0, %c0_0] : memref<512x576xbf16, #tpu.memory_space<vmem>>, vector<512x576xbf16>
    %c0_1 = arith.constant 0 : index
    %c0_2 = arith.constant 0 : index
    %1 = vector.load %arg1[%c0_1, %c0_2] : memref<576x128xbf16, #tpu.memory_space<vmem>>, vector<576x128xbf16>
    %cst = arith.constant dense<0.000000e+00> : vector<512x128xf32>
    %2 = tpu.matmul %0, %1, %cst {dimension_numbers = #tpu.dot_dimension_numbers<[1], [0], [0], [1], [0, 0, 1, 1], [], []>} : vector<512x576xbf16>, vector<576x128xbf16>, vector<512x128xf32> -> vector<512x128xf32>
    %cst_3 = arith.constant dense<0.000000e+00> : vector<128xf32>
    %3 = vector.multi_reduction <add>, %2, %cst_3 [0] : vector<512x128xf32> to vector<128xf32>
    %4 = vector.shape_cast %3 : vector<128xf32> to vector<1x128xf32>
    %cst_4 = arith.constant 0.001953125 : f32
    %5 = vector.broadcast %cst_4 : f32 to vector<1x128xf32>
    %6 = arith.mulf %4, %5 : vector<1x128xf32>
    %7 = arith.mulf %2, %2 : vector<512x128xf32>
    %cst_5 = arith.constant dense<0.000000e+00> : vector<128xf32>
    %8 = vector.multi_reduction <add>, %7, %cst_5 [0] : vector<512x128xf32> to vector<128xf32>
    %9 = vector.shape_cast %8 : vector<128xf32> to vector<1x128xf32>
    %cst_6 = arith.constant 0.001953125 : f32
    %10 = vector.broadcast %cst_6 : f32 to vector<1x128xf32>
    %11 = arith.mulf %9, %10 : vector<1x128xf32>
    %12 = arith.mulf %6, %6 : vector<1x128xf32>
    %13 = arith.subf %11, %12 : vector<1x128xf32>
    %cst_7 = arith.constant 0.000000e+00 : f32
    %14 = vector.broadcast %cst_7 : f32 to vector<1x128xf32>
    %15 = arith.maximumf %13, %14 : vector<1x128xf32>
    %c0_8 = arith.constant 0 : index
    %c0_9 = arith.constant 0 : index
    %16 = vector.load %arg2[%c0_8, %c0_9] : memref<1x128xf32, #tpu.memory_space<vmem>>, vector<1x128xf32>
    %cst_10 = arith.constant 9.99999974E-6 : f32
    %17 = vector.broadcast %cst_10 : f32 to vector<1x128xf32>
    %18 = arith.addf %15, %17 : vector<1x128xf32>
    %19 = math.rsqrt %18 : vector<1x128xf32>
    %20 = arith.mulf %16, %19 : vector<1x128xf32>
    %c0_11 = arith.constant 0 : index
    %c0_12 = arith.constant 0 : index
    %21 = vector.load %arg3[%c0_11, %c0_12] : memref<1x128xf32, #tpu.memory_space<vmem>>, vector<1x128xf32>
    %22 = arith.mulf %6, %20 : vector<1x128xf32>
    %23 = arith.subf %21, %22 : vector<1x128xf32>
    %24 = vector.broadcast %20 : vector<1x128xf32> to vector<512x128xf32>
    %25 = arith.mulf %2, %24 : vector<512x128xf32>
    %26 = vector.broadcast %23 : vector<1x128xf32> to vector<512x128xf32>
    %27 = arith.addf %25, %26 : vector<512x128xf32>
    %cst_13 = arith.constant 0.000000e+00 : f32
    %28 = vector.broadcast %cst_13 : f32 to vector<512x128xf32>
    %29 = arith.maximumf %27, %28 : vector<512x128xf32>
    %30 = arith.truncf %29 : vector<512x128xf32> to vector<512x128xbf16>
    %c0_14 = arith.constant 0 : index
    %c0_15 = arith.constant 0 : index
    %31 = vector.load %arg4[%c0_14, %c0_15] : memref<512x128xbf16, #tpu.memory_space<vmem>>, vector<512x128xbf16>
    tpu.vector_store %arg4[%c0_14, %c0_15], %30 {strides = array<i32>} : memref<512x128xbf16, #tpu.memory_space<vmem>>, vector<512x128xbf16>,
    return
  }
}

module attributes {stable_mosaic.version = 11 : i64} {
  func.func @_mm_bias_kernel(%arg0: i32, %arg1: i32, %arg2: memref<512x128xbf16, #tpu.memory_space<vmem>>, %arg3: memref<128x128xbf16, #tpu.memory_space<vmem>>, %arg4: memref<1x128xf32, #tpu.memory_space<vmem>>, %arg5: memref<512x128xf32, #tpu.memory_space<vmem>>) attributes {dimension_semantics = [#tpu.dimension_semantics<parallel>, #tpu.dimension_semantics<parallel>], iteration_bounds = array<i64: 1, 1>, scalar_prefetch = 0 : i64, scratch_operands = 0 : i64, tpu.core_type = #tpu.core_type<tc>, window_params = [{transform_indices = @transform_0, window_bounds = array<i64: 512, 128>}, {transform_indices = @transform_1, window_bounds = array<i64: 128, 128>}, {transform_indices = @transform_2, window_bounds = array<i64: 1, 128>}, {transform_indices = @transform_3, window_bounds = array<i64: 512, 128>}]} {
    %c0 = arith.constant 0 : index
    %c0_0 = arith.constant 0 : index
    %0 = vector.load %arg2[%c0, %c0_0] : memref<512x128xbf16, #tpu.memory_space<vmem>>, vector<512x128xbf16>
    %c0_1 = arith.constant 0 : index
    %c0_2 = arith.constant 0 : index
    %1 = vector.load %arg3[%c0_1, %c0_2] : memref<128x128xbf16, #tpu.memory_space<vmem>>, vector<128x128xbf16>
    %cst = arith.constant dense<0.000000e+00> : vector<512x128xf32>
    %2 = tpu.matmul %0, %1, %cst {dimension_numbers = #tpu.dot_dimension_numbers<[1], [0], [0], [1], [0, 0, 1, 1], [], []>} : vector<512x128xbf16>, vector<128x128xbf16>, vector<512x128xf32> -> vector<512x128xf32>
    %c0_3 = arith.constant 0 : index
    %c0_4 = arith.constant 0 : index
    %3 = vector.load %arg4[%c0_3, %c0_4] : memref<1x128xf32, #tpu.memory_space<vmem>>, vector<1x128xf32>
    %4 = vector.broadcast %3 : vector<1x128xf32> to vector<512x128xf32>
    %5 = arith.addf %2, %4 : vector<512x128xf32>
    %c0_5 = arith.constant 0 : index
    %c0_6 = arith.constant 0 : index
    %6 = vector.load %arg5[%c0_5, %c0_6] : memref<512x128xf32, #tpu.memory_space<vmem>>, vector<512x128xf32>
    tpu.vector_store %arg5[%c0_5, %c0_6], %5 {strides = array<i32>} : memref<512x128xf32, #tpu.memory_space<vmem>>, vector<512x128xf32>,
    return
  }
  func.func @transform_0(%arg0: i32, %arg1: i32) -> (i32, i32) {
    %c0_i32 = arith.constant 0 : i32
    %c0_i32_0 = arith.constant 0 : i32
    return %arg0, %c0_i32 : i32, i32
  }
  func.func @transform_1(%arg0: i32, %arg1: i32) -> (i32, i32) {
    %c0_i32 = arith.constant 0 : i32
    %c0_i32_0 = arith.constant 0 : i32
    return %c0_i32, %arg1 : i32, i32
  }
  func.func @transform_2(%arg0: i32, %arg1: i32) -> (i32, i32) {
    %c0_i32 = arith.constant 0 : i32
    %c0_i32_0 = arith.constant 0 : i32
    return %c0_i32, %arg1 : i32, i32
  }
  func.func @transform_3(%arg0: i32, %arg1: i32) -> (i32, i32) {
    %c0_i32 = arith.constant 0 : i32
    return %arg0, %arg1 : i32, i32
  }
}

</mosaic_0001>

<bundles_post_ra>
// kernel: lightweight_unetx_forward.27
= control target key start
LH: loop header
LB: loop body
LE: loop exit
PB: predicated region body
PF: predicated region fallthrough
CT: control target
= control target key end

     0   :  { %s758_s12 = smov 0   ;;  %s760_s13 = smov 0   ;;  %s847_s0 = inlined_call_operand.vmem [shape: bf16[8,128], index: 0, kind: input, shape index: {}]   ;;  %s848_s1 = inlined_call_operand.vmem [shape: bf16[128,512], index: 1, kind: input, shape index: {}]   ;;  %s849_s2 = inlined_call_operand.vmem [shape: f32[1,512], index: 2, kind: input, shape index: {}]   ;;  %s850_s3 = inlined_call_operand.vmem [shape: bf16[8,512], index: 3, kind: output, shape index: {}]  }
   0x1   :  { %s762_s14 = smov 0   ;;  %s764_s15 = smov 0  }
   0x2   :  { %s766_s16 = smov 0  }
   0x3 LB: > { %s22_s17 = sadd.s32 1, %s731_s15  ;;  %p65_p1 = scmp.ne.s32.totalorder %s723_s13, %s719_s12  ;;  %s735_s16 = sphi %s766_s16, %s13_s16   ;;  %s731_s15 = sphi %s764_s15, %s854_s15   ;;  %s727_s14 = sphi %s762_s14, %s853_s14   ;;  %s723_s13 = sphi %s760_s13, %s852_s13   ;;  %s719_s12 = sphi %s758_s12, %s851_s12  }
   0x4   : > { %p23_p0 = scmp.ge.s32.totalorder %s22_s17, 2  ;;  %p66_p2 = scmp.eq.s32.totalorder %s735_s16, 0 }
   0x5   : > { %s58_s19 = sadd.s32 1, %s723_s13  ;;  %p602_p5 = scmp.ge.s32.totalorder %s735_s16, 2 }
   0x6   : > { %s856_s17 = smov (%p23_p0, %s22_s17), 0  ;;  %p67_p3 = por %p66_p2, %p65_p1 }
   0x7   : > { %s55_s18 = ssub.s32 %s731_s15, %s856_s17  ;;  %152 = sbr.rel (%p602_p5) target bundleno = 24 (0x18), region = 20 }
   0x8   : > { %p56_p4 = scmp.eq.s32.totalorder %s55_s18, 0 }
   0xa   : > { %s793_s20 = scalar_select %p56_p4, %s723_s13, %s58_s19  }
   0xc   : > { %155 = sbr.rel (!%p67_p3) target bundleno = 24 (0x18), region = 24  ;;  %s157_s21 = sand.u32 (%p67_p3), 1, %s723_s13  }
   0xd   : > { %s630_s22 = sshll.u32 (%p67_p3), %s731_s15, 3  ;;  %s603_s23 = sshll.u32 (%p67_p3), %s157_s21, 7 }
   0xe   : > { %s801_s26 = scalar_lea.vmem (%p67_p3), %s848_s1, %s630_s22  ;;  %s159_s27 = scalar_lea.vmem (%p67_p3), [#allocation2], %s603_s23 }
   0xf   : > { %v221_v0 = vld [vmem:[%s801_s26] sm:$0xff] (%p67_p3)  ;;  %v223_v1 = vld [vmem:[%s801_s26 + $0x10] sm:$0xff] (%p67_p3) }
  0x10   : > { %v225_v2 = vld [vmem:[%s801_s26 + $0x20] sm:$0xff] (%p67_p3)  ;;  %222 = vst [vmem:[%s159_s27] sm:$0xff] (%p67_p3), %v221_v0  ;;  %224 = vst [vmem:[%s159_s27 + $0x8] sm:$0xff] (%p67_p3), %v223_v1  ;;  %v227_v3 = vld [vmem:[%s801_s26 + $0x30] sm:$0xff] (%p67_p3) }
  0x11   : > { %226 = vst [vmem:[%s159_s27 + $0x10] sm:$0xff] %v225_v2  ;;  %v229_v4 = vld [vmem:[%s801_s26 + $0x40] sm:$0xff]  ;;  %v231_v5 = vld [vmem:[%s801_s26 + $0x50] sm:$0xff]  ;;  %228 = vst [vmem:[%s159_s27 + $0x18] sm:$0xff] %v227_v3 }
  0x12   : > { %230 = vst [vmem:[%s159_s27 + $0x20] sm:$0xff] %v229_v4  ;;  %232 = vst [vmem:[%s159_s27 + $0x28] sm:$0xff] %v231_v5  ;;  %v233_v6 = vld [vmem:[%s801_s26 + $0x60] sm:$0xff]  ;;  %v235_v7 = vld [vmem:[%s801_s26 + $0x70] sm:$0xff] }
  0x13   : > { %v237_v8 = vld [vmem:[%s801_s26 + $0x80] sm:$0xff]  ;;  %234 = vst [vmem:[%s159_s27 + $0x30] sm:$0xff] %v233_v6  ;;  %236 = vst [vmem:[%s159_s27 + $0x38] sm:$0xff] %v235_v7  ;;  %v239_v9 = vld [vmem:[%s801_s26 + $0x90] sm:$0xff] }
  0x14   : > { %238 = vst [vmem:[%s159_s27 + $0x40] sm:$0xff] %v237_v8  ;;  %v241_v10 = vld [vmem:[%s801_s26 + $0xa0] sm:$0xff]  ;;  %v243_v11 = vld [vmem:[%s801_s26 + $0xb0] sm:$0xff]  ;;  %240 = vst [vmem:[%s159_s27 + $0x48] sm:$0xff] %v239_v9 }
  0x15   : > { %242 = vst [vmem:[%s159_s27 + $0x50] sm:$0xff] %v241_v10  ;;  %244 = vst [vmem:[%s159_s27 + $0x58] sm:$0xff] %v243_v11  ;;  %v245_v12 = vld [vmem:[%s801_s26 + $0xc0] sm:$0xff]  ;;  %v247_v13 = vld [vmem:[%s801_s26 + $0xd0] sm:$0xff] }
  0x16   : > { %v249_v14 = vld [vmem:[%s801_s26 + $0xe0] sm:$0xff]  ;;  %246 = vst [vmem:[%s159_s27 + $0x60] sm:$0xff] %v245_v12  ;;  %248 = vst [vmem:[%s159_s27 + $0x68] sm:$0xff] %v247_v13  ;;  %v251_v15 = vld [vmem:[%s801_s26 + $0xf0] sm:$0xff] }
  0x17   : > { %250 = vst [vmem:[%s159_s27 + $0x70] sm:$0xff] %v249_v14  ;;  %252 = vst [vmem:[%s159_s27 + $0x78] sm:$0xff] %v251_v15 }
  0x18 PF: > { %p606_p6 = scmp.ge.s32.totalorder %s735_s16, 1  ;;  %p265_p7 = scmp.lt.s32.totalorder %s735_s16, 3 }
  0x1a   : > { %p266_p8 = pnand %p606_p6, %p265_p7 }
  0x1b   : > { %s272_s28 = sand.u32 (!%p266_p8), 1, %s719_s12   ;;  %s608_s6 = sshll.u32 (!%p266_p8), %s727_s14, 1 }
  0x1c   : > { %269 = sbr.rel (%p266_p8) target bundleno = 266 (0x10a), region = 66  ;;  %s607_s29 = sshll.u32 (!%p266_p8), %s272_s28, 7 }
  0x1d   : > { %s274_s30 = scalar_lea.vmem (!%p266_p8), [#allocation2], %s607_s29  ;;  %p313_p9 = scmp.lt.s32.totalorder (!%p266_p8), %s608_s6, 3 }
  0x21   : > { %v737_v16 = vmov 0   ;;  %v673_v17 = vld [vmem:[%s274_s30 + $0x74] ss:$8 sps:$4 sm:$0xff]   ;;  %v675_v18 = vld [vmem:[%s274_s30 + $0x70] ss:$8 sps:$4 sm:$0xff]   ;;  %v347_v34 = vlaneseq  ;;  %s858_s6 = smov (!%p313_p9, %s608_s6), 3 }
  0x22   : > { %469 = vmatprep.mubr.bf16.mxu0 %v737_v16  ;;  %437 = vmatprep.subr.bf16.mxu0 %v673_v17  ;;  %v676_v19 = vld [vmem:[%s274_s30 + $0x64] ss:$8 sps:$4 sm:$0xff]   ;;  %v678_v20 = vld [vmem:[%s274_s30 + $0x60] ss:$8 sps:$4 sm:$0xff]   ;;  %v679_v21 = vld [vmem:[%s274_s30 + $0x54] ss:$8 sps:$4 sm:$0xff]   ;;  %s315_s9 = scalar_lea.vmem %s849_s2, %s858_s6 }
  0x23   : > { %438 = vmatpush1.bf16.msra.mxu0 %v675_v18  ;;  %v681_v22 = vld [vmem:[%s274_s30 + $0x50] ss:$8 sps:$4 sm:$0xff]   ;;  %v682_v23 = vld [vmem:[%s274_s30 + $0x44] ss:$8 sps:$4 sm:$0xff]   ;;  %v684_v24 = vld [vmem:[%s274_s30 + $0x40] ss:$8 sps:$4 sm:$0xff]  }
  0x24   : > { %439 = vmatprep.subr.bf16.mxu0 %v676_v19  ;;  %v685_v25 = vld [vmem:[%s274_s30 + $0x34] ss:$8 sps:$4 sm:$0xff]   ;;  %v687_v26 = vld [vmem:[%s274_s30 + $0x30] ss:$8 sps:$4 sm:$0xff]   ;;  %v688_v27 = vld [vmem:[%s274_s30 + $0x24] ss:$8 sps:$4 sm:$0xff]  }
  0x25   : > { %v690_v28 = vld [vmem:[%s274_s30 + $0x20] ss:$8 sps:$4 sm:$0xff]   ;;  %v691_v29 = vld [vmem:[%s274_s30 + $0x14] ss:$8 sps:$4 sm:$0xff]   ;;  %v693_v30 = vld [vmem:[%s274_s30 + $0x10] ss:$8 sps:$4 sm:$0xff]  }
  0x26   : > { %v694_v31 = vld [vmem:[%s274_s30 + $0x4] ss:$8 sps:$4 sm:$0xff]   ;;  %v696_v32 = vld [vmem:[%s274_s30] ss:$8 sps:$4 sm:$0xff]   ;;  %v348_v35 = vshrl.u32 %v347_v34, 7  ;;  %s610_s10 = sshll.u32 %s858_s6, 2 }
  0x27   : > { %440 = vmatpush1.bf16.msra.mxu0 %v678_v20  ;;  %v328_v33 = vld [vmem:[%s847_s0] sm:$0xf]  ;;  %s325_s14 = scalar_lea.vmem %s850_s3, %s610_s10 }
  0x28   : > { %441 = vmatprep.subr.bf16.mxu0 %v679_v21  ;;  %v349_v36 = vsub.s32 0, %v348_v35  ;;  %v353_v37 = vsub.s32 1, %v348_v35  ;;  %v345_v38 = vld [vmem:[%s315_s9] sm:$0x3] }
  0x2a   : > { %v350_v39 = vrot.slane %v345_v38, %v349_v36  ;;  %v354_v40 = vrot.slane %v345_v38, %v353_v37 }
  0x2b   : > { %442 = vmatpush1.bf16.msra.mxu0 %v681_v22 }
  0x2c   : > { %443 = vmatprep.subr.bf16.mxu0 %v682_v23 }
  0x2f   : > { %444 = vmatpush1.bf16.msra.mxu0 %v684_v24 }
  0x30   : > { %445 = vmatprep.subr.bf16.mxu0 %v685_v25 }
  0x33   : > { %446 = vmatpush1.bf16.msra.mxu0 %v687_v26 }
  0x34   : > { %447 = vmatprep.subr.bf16.mxu0 %v688_v27 }
  0x37   : > { %448 = vmatpush1.bf16.msra.mxu0 %v690_v28 }
  0x38   : > { %449 = vmatprep.subr.bf16.mxu0 %v691_v29 }
  0x3b   : > { %450 = vmatpush1.bf16.msra.mxu0 %v693_v30 }
  0x3c   : > { %451 = vmatprep.subr.bf16.mxu0 %v694_v31 }
  0x3f   : > { %452 = vmatpush1.bf16.msra.mxu0 %v696_v32 }
  0x42   : > { %470 = vmatmul.mubr.bf16.vlgmr.msra.gmra.mxu0 %v328_v33 }
 0x102   : > { %v471_v41 = vpop.f32.mrf.mxu0 }
 0x103   : > { %v472_v43 = vadd.f32 %v471_v41, %v350_v39 }
 0x104   : > { %v473_v42 = vpop.f32.mrf.mxu0 }
 0x105   : > { %v474_v44 = vadd.f32 %v473_v42, %v354_v40 }
 0x106   : > { %v475_v45 = vpop.f32.mrf.mxu0 }
 0x107   : > { %v631_v46 = vpack.c.bf16 %v474_v44, %v472_v43 }
 0x108   : > { %v476_v47 = vpop.f32.mrf.mxu0 }
 0x109   : > { %486 = vst [vmem:[%s325_s14] sm:$0xff] %v631_v46 }
 0x10a PF: > { %s13_s16 = sadd.s32 1, %s735_s16   ;;  %s851_s12 = smov %s723_s13 }
 0x10b   : > { %p10_p10 = scmp.ge.s32.totalorder %s13_s16, 4   ;;  %s852_s13 = smov %s793_s20 }
 0x10c   : > { %s853_s14 = smov %s731_s15  ;;  %s854_s15 = smov %s856_s17 }
 0x10d   :  { %12 = sbr.rel (!%p10_p10) target bundleno = 3 (0x3), region = 111 }

// kernel: lightweight_unetx_forward.24
= control target key start
LH: loop header
LB: loop body
LE: loop exit
PB: predicated region body
PF: predicated region fallthrough
CT: control target
= control target key end

     0   :  { %8 = vsyncpa [#allocation3], 0  ;;  %s870_s0 = inlined_call_operand.vmem [shape: bf16[8,128], index: 0, kind: input, shape index: {}]   ;;  %s871_s1 = inlined_call_operand.hbm [shape: bf16[128,512], index: 1, kind: input, shape index: {}]   ;;  %s872_s2 = inlined_call_operand.vmem [shape: f32[1,512], index: 2, kind: input, shape index: {}]   ;;  %s873_s3 = inlined_call_operand.vmem [shape: bf16[8,512], index: 3, kind: output, shape index: {}]  }
   0x1   :  { %10 = vsyncpa [#allocation3 + $0x1], 0  ;;  %s749_s12 = smov 0   ;;  %s751_s13 = smov 0  }
   0x2   :  { %s753_s14 = smov 0   ;;  %s755_s15 = smov 0  }
   0x3   :  { %s757_s16 = smov 0   ;;  %s759_s17 = smov 0  }
   0x4 LB: > { %s527_s18 = sadd.s32 4294967295, %s722_s17   ;;  %s25_s19 = sadd.s32 1, %s718_s16  ;;  %s722_s17 = sphi %s759_s17, %s16_s17   ;;  %s718_s16 = sphi %s757_s16, %s881_s16   ;;  %s714_s15 = sphi %s755_s15, %s880_s15   ;;  %s710_s14 = sphi %s753_s14, %s879_s14   ;;  %s706_s13 = sphi %s751_s13, %s878_s13   ;;  %s702_s12 = sphi %s749_s12, %s877_s12  }
   0x5   : > { %p26_p0 = scmp.ge.s32.totalorder %s25_s19, 2  ;;  %s61_s20 = sadd.s32 1, %s710_s14 }
   0x6   : > { %p68_p1 = scmp.ne.s32.totalorder %s710_s14, %s706_s13  ;;  %p69_p2 = scmp.eq.s32.totalorder %s722_s17, 0 }
   0x7   : > { %s883_s19 = smov (%p26_p0, %s25_s19), 0  ;;  %p74_p4 = scmp.ne.s32.totalorder %s706_s13, %s702_s12 }
   0x8   : > { %p785_p3 = por %p69_p2, %p68_p1  ;;  %s58_s22 = ssub.s32 %s718_s16, %s883_s19 }
   0x9   : > { %p75_p5 = scmp.eq.s32.totalorder %s527_s18, 0  ;;  %p59_p6 = scmp.eq.s32.totalorder %s58_s22, 0 }
   0xa   : > { %p567_p8 = scmp.lt.s32.totalorder %s722_s17, 2  ;;  %s159_s25 = sand.u32 1, %s710_s14  }
   0xb   : > { %p792_p7 = por %p75_p5, %p74_p4  ;;  %s559_s26 = sshll.u32 %s718_s16, 7 }
   0xc   : > { %s798_s24 = scalar_select %p59_p6, %s710_s14, %s61_s20  }
   0xd   : > { %s532_s27 = sshll.u32 %s159_s25, 7  ;;  %s169_s30 = scalar_lea.hbm %s871_s1, %s559_s26 }
   0xe   : > { %s163_s4 = scalar_lea.vmem [#allocation2], %s532_s27  ;;  %p807_p9 = pnand %p567_p8, %p785_p3 }
   0xf   : > { %s170_s5 = sshll.u32 %s163_s4, 4  ;;  %p535_p10 = scmp.ge.s32.totalorder %s722_s17, 1  ;;  %s171_s5 = int_to_ptr.vmem [resolvable:$true] %s170_s5 }
  0x10   : > { %s160_s7 = scalar_lea.sflag [#allocation3], %s159_s25  ;;  %p646_p11 = pneg %p807_p9 }
  0x11   : > { %s657_s8 = scalar_lea.vmem %s171_s5, 2048  ;;  %s724_s9 = smov [#allocation2]  }
  0x12   : > { %p658_p12 = scmp.ne.s32.totalorder %s171_s5, %s657_s8  ;;  %s662_s10 = sshll.u32 %s724_s9, 4  ;;  %s663_s10 = int_to_ptr.vmem [resolvable:$false] %s662_s10 }
  0x13   : > { %s664_s11 = scalar_lea.vmem %s663_s10, 4096  ;;  %p665_p1 = scmp.lt.s32.totalorder %s171_s5, %s663_s10 }
  0x14   : > { %p660_p13 = pnand %p658_p12, %p646_p11  ;;  %p666_p2 = scmp.lt.s32.totalorder %s664_s11, %s657_s8 }
  0x16   : > { %p661_p0 = pneg %p660_p13  ;;  %p667_p3 = por %p666_p2, %p665_p1 }
  0x18   : > { %p668_p4 = pnand %p667_p3, %p661_p0 }
  0x1a   : > { %671 = shalt.err (!%p668_p4)
}
  0x1b   : > { %s725_s12 = smov 256   ;;  %s726_s18 = smov 128  }
  0x1c   : > { %s727_s20 = smov 8   ;;  %p186_p5 = scmp.lt.s32.totalorder %s722_s17, 3 }
  0x1d   : > { %566 = dma.hbm_to_vmem [thread:$0]  (!%p807_p9), %s169_s30, 2048, %s171_s5, %s160_s7, %s725_s12, %s726_s18, %s727_s20  }
  0x1e   : > { %p187_p6 = pnand %p535_p10, %p186_p5 }
  0x1f   : > { %s192_s21 = sand.u32 (!%p187_p6), 1, %s706_s13  }
  0x20   : > { %190 = sbr.rel (%p187_p6) target bundleno = 271 (0x10f), region = 32  ;;  %s536_s22 = sshll.u32 (!%p187_p6), %s192_s21, 7 }
  0x21   : > { %s193_s25 = scalar_lea.sflag (!%p187_p6), [#allocation3], %s192_s21  ;;  %s820_s26 = scalar_lea.vmem (!%p187_p6), [#allocation2], %s536_s22 }
  0x25   : > { %697 = dma.done.wait (%p792_p7), %s193_s25, 2048  }
  0x26   : > { %699 = vsyncadd (%p792_p7), %s193_s25, 4294965248  ;;  %v728_v0 = vmov 0   ;;  %v620_v1 = vld [vmem:[%s820_s26 + $0x74] ss:$8 sps:$4 sm:$0xff]   ;;  %v622_v2 = vld [vmem:[%s820_s26 + $0x70] ss:$8 sps:$4 sm:$0xff]   ;;  %v271_v18 = vlaneseq }
  0x27   : > { %393 = vmatprep.mubr.bf16.mxu0 %v728_v0  ;;  %361 = vmatprep.subr.bf16.mxu0 %v620_v1  ;;  %v623_v3 = vld [vmem:[%s820_s26 + $0x64] ss:$8 sps:$4 sm:$0xff]   ;;  %v625_v4 = vld [vmem:[%s820_s26 + $0x60] ss:$8 sps:$4 sm:$0xff]   ;;  %v626_v5 = vld [vmem:[%s820_s26 + $0x54] ss:$8 sps:$4 sm:$0xff]  }
  0x28   : > { %362 = vmatpush1.bf16.msra.mxu0 %v622_v2  ;;  %v628_v6 = vld [vmem:[%s820_s26 + $0x50] ss:$8 sps:$4 sm:$0xff]   ;;  %v629_v7 = vld [vmem:[%s820_s26 + $0x44] ss:$8 sps:$4 sm:$0xff]   ;;  %v631_v8 = vld [vmem:[%s820_s26 + $0x40] ss:$8 sps:$4 sm:$0xff]  }
  0x29   : > { %363 = vmatprep.subr.bf16.mxu0 %v623_v3  ;;  %v632_v9 = vld [vmem:[%s820_s26 + $0x34] ss:$8 sps:$4 sm:$0xff]   ;;  %v634_v10 = vld [vmem:[%s820_s26 + $0x30] ss:$8 sps:$4 sm:$0xff]   ;;  %v635_v11 = vld [vmem:[%s820_s26 + $0x24] ss:$8 sps:$4 sm:$0xff]  }
  0x2a   : > { %v637_v12 = vld [vmem:[%s820_s26 + $0x20] ss:$8 sps:$4 sm:$0xff]   ;;  %v638_v13 = vld [vmem:[%s820_s26 + $0x14] ss:$8 sps:$4 sm:$0xff]   ;;  %v640_v14 = vld [vmem:[%s820_s26 + $0x10] ss:$8 sps:$4 sm:$0xff]  }
  0x2b   : > { %v641_v15 = vld [vmem:[%s820_s26 + $0x4] ss:$8 sps:$4 sm:$0xff]   ;;  %v643_v16 = vld [vmem:[%s820_s26] ss:$8 sps:$4 sm:$0xff]   ;;  %s537_s28 = sshll.u32 %s714_s15, 1  ;;  %v272_v19 = vshrl.u32 %v271_v18, 7 }
  0x2c   : > { %364 = vmatpush1.bf16.msra.mxu0 %v625_v4  ;;  %v252_v17 = vld [vmem:[%s870_s0] sm:$0xf]  ;;  %p237_p7 = scmp.lt.s32.totalorder %s537_s28, 3 }
  0x2d   : > { %365 = vmatprep.subr.bf16.mxu0 %v626_v5  ;;  %v273_v20 = vsub.s32 0, %v272_v19  ;;  %v277_v21 = vsub.s32 1, %v272_v19 }
  0x2e   : > { %s885_s28 = smov (!%p237_p7, %s537_s28), 3 }
  0x2f   : > { %s239_s4 = scalar_lea.vmem %s872_s2, %s885_s28  ;;  %s539_s5 = sshll.u32 %s885_s28, 2 }
  0x30   : > { %366 = vmatpush1.bf16.msra.mxu0 %v628_v6  ;;  %v269_v22 = vld [vmem:[%s239_s4] sm:$0x3]  ;;  %s249_s7 = scalar_lea.vmem %s873_s3, %s539_s5 }
  0x31   : > { %367 = vmatprep.subr.bf16.mxu0 %v629_v7  ;;  %v274_v23 = vrot.slane %v269_v22, %v273_v20  ;;  %v278_v24 = vrot.slane %v269_v22, %v277_v21 }
  0x34   : > { %368 = vmatpush1.bf16.msra.mxu0 %v631_v8 }
  0x35   : > { %369 = vmatprep.subr.bf16.mxu0 %v632_v9 }
  0x38   : > { %370 = vmatpush1.bf16.msra.mxu0 %v634_v10 }
  0x39   : > { %371 = vmatprep.subr.bf16.mxu0 %v635_v11 }
  0x3c   : > { %372 = vmatpush1.bf16.msra.mxu0 %v637_v12 }
  0x3d   : > { %373 = vmatprep.subr.bf16.mxu0 %v638_v13 }
  0x40   : > { %374 = vmatpush1.bf16.msra.mxu0 %v640_v14 }
  0x41   : > { %375 = vmatprep.subr.bf16.mxu0 %v641_v15 }
  0x44   : > { %376 = vmatpush1.bf16.msra.mxu0 %v643_v16 }
  0x47   : > { %394 = vmatmul.mubr.bf16.vlgmr.msra.gmra.mxu0 %v252_v17 }
 0x107   : > { %v395_v25 = vpop.f32.mrf.mxu0 }
 0x108   : > { %v396_v27 = vadd.f32 %v395_v25, %v274_v23 }
 0x109   : > { %v397_v26 = vpop.f32.mrf.mxu0 }
 0x10a   : > { %v398_v28 = vadd.f32 %v397_v26, %v278_v24 }
 0x10b   : > { %v399_v29 = vpop.f32.mrf.mxu0 }
 0x10c   : > { %v560_v30 = vpack.c.bf16 %v398_v28, %v396_v27 }
 0x10d   : > { %v400_v31 = vpop.f32.mrf.mxu0 }
 0x10e   : > { %410 = vst [vmem:[%s249_s7] sm:$0xff] %v560_v30 }
 0x10f PF: > { %s16_s17 = sadd.s32 1, %s722_s17   ;;  %s877_s12 = smov %s706_s13 }
 0x110   : > { %p13_p8 = scmp.ge.s32.totalorder %s16_s17, 4   ;;  %s878_s13 = smov %s710_s14 }
 0x111   : > { %s879_s14 = smov %s798_s24  ;;  %s880_s15 = smov %s718_s16 }
 0x112   : > { %s881_s16 = smov %s883_s19  ;;  %15 = sbr.rel (!%p13_p8) target bundleno = 4 (0x4), region = 78 }
 0x117   :  { %441 = vsyncpa [#allocation3], 1 }
 0x118   :  { %443 = vsyncpa [#allocation3 + $0x1], 1 }

// kernel: lightweight_unetx_forward.30
= control target key start
LH: loop header
LB: loop body
LE: loop exit
PB: predicated region body
PF: predicated region fallthrough
CT: control target
= control target key end

     0   :  { %s864_s12 = smov 0   ;;  %s866_s13 = smov 0   ;;  %s986_s0 = inlined_call_operand.vmem [shape: bf16[32,128], index: 0, kind: input, shape index: {}]   ;;  %s987_s1 = inlined_call_operand.vmem [shape: bf16[128,512], index: 1, kind: input, shape index: {}]   ;;  %s988_s2 = inlined_call_operand.vmem [shape: f32[1,512], index: 2, kind: input, shape index: {}]   ;;  %s989_s3 = inlined_call_operand.vmem [shape: bf16[32,512], index: 3, kind: output, shape index: {}]  }
   0x1   :  { %s868_s14 = smov 0   ;;  %s870_s15 = smov 0  }
   0x2   :  { %s872_s16 = smov 0  }
   0x3 LB: > { %s22_s17 = sadd.s32 1, %s837_s15  ;;  %s675_s18 = sadd.s32 4294967295, %s841_s16   ;;  %s841_s16 = sphi %s872_s16, %s13_s16   ;;  %s837_s15 = sphi %s870_s15, %s994_s15   ;;  %s833_s14 = sphi %s868_s14, %s993_s14   ;;  %s829_s13 = sphi %s866_s13, %s992_s13   ;;  %s825_s12 = sphi %s864_s12, %s991_s12  }
   0x4   : > { %p23_p0 = scmp.ge.s32.totalorder %s22_s17, 2  ;;  %p65_p1 = scmp.ne.s32.totalorder %s829_s13, %s825_s12 }
   0x5   : > { %p66_p2 = scmp.eq.s32.totalorder %s841_s16, 0  ;;  %p123_p4 = scmp.eq.s32.totalorder %s675_s18, 1 }
   0x6   : > { %s996_s17 = smov (%p23_p0, %s22_s17), 0  ;;  %s58_s20 = sadd.s32 1, %s829_s13 }
   0x7   : > { %p67_p3 = por %p66_p2, %p65_p1  ;;  %s55_s19 = ssub.s32 %s837_s15, %s996_s17 }
   0x8   : > { %p56_p5 = scmp.eq.s32.totalorder %s55_s19, 0  ;;  %p899_p6 = por %p123_p4, %p65_p1 }
   0x9   : > { %p679_p7 = scmp.ge.s32.totalorder %s841_s16, 2 }
   0xa   : > { %s904_s22 = scalar_select %p56_p5, %s829_s13, %s58_s20  }
   0xb   : > { %154 = sbr.rel (%p679_p7) target bundleno = 28 (0x1c), region = 20 }
  0x10   : > { %157 = sbr.rel (!%p67_p3) target bundleno = 28 (0x1c), region = 24  ;;  %s159_s23 = sand.u32 (%p67_p3), 1, %s829_s13  }
  0x11   : > { %s714_s24 = sshll.u32 (%p67_p3), %s837_s15, 3  ;;  %s680_s25 = sshll.u32 (%p67_p3), %s159_s23, 7 }
  0x12   : > { %s912_s28 = scalar_lea.vmem (%p67_p3), %s987_s1, %s714_s24  ;;  %s161_s29 = scalar_lea.vmem (%p67_p3), [#allocation2], %s680_s25 }
  0x13   : > { %v223_v0 = vld [vmem:[%s912_s28] sm:$0xff] (%p67_p3)  ;;  %v225_v1 = vld [vmem:[%s912_s28 + $0x10] sm:$0xff] (%p67_p3) }
  0x14   : > { %v227_v2 = vld [vmem:[%s912_s28 + $0x20] sm:$0xff] (%p67_p3)  ;;  %224 = vst [vmem:[%s161_s29] sm:$0xff] (%p67_p3), %v223_v0  ;;  %226 = vst [vmem:[%s161_s29 + $0x8] sm:$0xff] (%p67_p3), %v225_v1  ;;  %v229_v3 = vld [vmem:[%s912_s28 + $0x30] sm:$0xff] (%p67_p3) }
  0x15   : > { %228 = vst [vmem:[%s161_s29 + $0x10] sm:$0xff] %v227_v2  ;;  %v231_v4 = vld [vmem:[%s912_s28 + $0x40] sm:$0xff]  ;;  %v233_v5 = vld [vmem:[%s912_s28 + $0x50] sm:$0xff]  ;;  %230 = vst [vmem:[%s161_s29 + $0x18] sm:$0xff] %v229_v3 }
  0x16   : > { %232 = vst [vmem:[%s161_s29 + $0x20] sm:$0xff] %v231_v4  ;;  %234 = vst [vmem:[%s161_s29 + $0x28] sm:$0xff] %v233_v5  ;;  %v235_v6 = vld [vmem:[%s912_s28 + $0x60] sm:$0xff]  ;;  %v237_v7 = vld [vmem:[%s912_s28 + $0x70] sm:$0xff] }
  0x17   : > { %v239_v8 = vld [vmem:[%s912_s28 + $0x80] sm:$0xff]  ;;  %236 = vst [vmem:[%s161_s29 + $0x30] sm:$0xff] %v235_v6  ;;  %238 = vst [vmem:[%s161_s29 + $0x38] sm:$0xff] %v237_v7  ;;  %v241_v9 = vld [vmem:[%s912_s28 + $0x90] sm:$0xff] }
  0x18   : > { %240 = vst [vmem:[%s161_s29 + $0x40] sm:$0xff] %v239_v8  ;;  %v243_v10 = vld [vmem:[%s912_s28 + $0xa0] sm:$0xff]  ;;  %v245_v11 = vld [vmem:[%s912_s28 + $0xb0] sm:$0xff]  ;;  %242 = vst [vmem:[%s161_s29 + $0x48] sm:$0xff] %v241_v9 }
  0x19   : > { %244 = vst [vmem:[%s161_s29 + $0x50] sm:$0xff] %v243_v10  ;;  %246 = vst [vmem:[%s161_s29 + $0x58] sm:$0xff] %v245_v11  ;;  %v247_v12 = vld [vmem:[%s912_s28 + $0xc0] sm:$0xff]  ;;  %v249_v13 = vld [vmem:[%s912_s28 + $0xd0] sm:$0xff] }
  0x1a   : > { %v251_v14 = vld [vmem:[%s912_s28 + $0xe0] sm:$0xff]  ;;  %248 = vst [vmem:[%s161_s29 + $0x60] sm:$0xff] %v247_v12  ;;  %250 = vst [vmem:[%s161_s29 + $0x68] sm:$0xff] %v249_v13  ;;  %v253_v15 = vld [vmem:[%s912_s28 + $0xf0] sm:$0xff] }
  0x1b   : > { %252 = vst [vmem:[%s161_s29 + $0x70] sm:$0xff] %v251_v14  ;;  %254 = vst [vmem:[%s161_s29 + $0x78] sm:$0xff] %v253_v15 }
  0x1c PF: > { %p683_p8 = scmp.ge.s32.totalorder %s841_s16, 1  ;;  %p267_p9 = scmp.lt.s32.totalorder %s841_s16, 3 }
  0x1e   : > { %p268_p10 = pnand %p683_p8, %p267_p9 }
  0x1f   : > { %s274_s30 = sand.u32 (!%p268_p10), 1, %s825_s12   ;;  %s686_s10 = sshll.u32 (!%p268_p10), %s833_s14, 1 }
  0x20   : > { %271 = sbr.rel (%p268_p10) target bundleno = 283 (0x11b), region = 66  ;;  %s684_s4 = sshll.u32 (!%p268_p10), %s274_s30, 7 }
  0x21   : > { %s935_s5 = scalar_lea.vmem (!%p268_p10), [#allocation2], %s684_s4  ;;  %p313_p11 = scmp.lt.s32.totalorder (!%p268_p10), %s686_s10, 3 }
  0x22   : > { %s685_s20 = sshll.u32 (!%p268_p10), %s274_s30, 5 }
  0x23   : > { %s304_s23 = scalar_lea.vmem (!%p268_p10), [#allocation3], %s685_s20 }
  0x25   : > { %v843_v16 = vmov 0   ;;  %v777_v17 = vld [vmem:[%s935_s5 + $0x74] ss:$8 sps:$4 sm:$0xff]   ;;  %v779_v18 = vld [vmem:[%s935_s5 + $0x70] ss:$8 sps:$4 sm:$0xff]   ;;  %v801_v33 = vld [vmem:[%s986_s0] sm:$0xff]   ;;  %v342_v35 = vlaneseq }
  0x26   : > { %476 = vmatprep.mubr.bf16.mxu0 %v843_v16  ;;  %486 = vmatprep.mubr.bf16.mxu1 %v843_v16  ;;  %v780_v19 = vld [vmem:[%s935_s5 + $0x64] ss:$8 sps:$4 sm:$0xff]   ;;  %v782_v20 = vld [vmem:[%s935_s5 + $0x60] ss:$8 sps:$4 sm:$0xff]   ;;  %v783_v21 = vld [vmem:[%s935_s5 + $0x54] ss:$8 sps:$4 sm:$0xff]  }
  0x27   : > { %444 = vmatprep.subr.bf16.mxu0 %v777_v17  ;;  %720 = vmatprep.subr.bf16.mxu1 %v777_v17  ;;  %v785_v22 = vld [vmem:[%s935_s5 + $0x50] ss:$8 sps:$4 sm:$0xff]   ;;  %v786_v23 = vld [vmem:[%s935_s5 + $0x44] ss:$8 sps:$4 sm:$0xff]   ;;  %v788_v24 = vld [vmem:[%s935_s5 + $0x40] ss:$8 sps:$4 sm:$0xff]  }
  0x28   : > { %445 = vmatpush1.bf16.msra.mxu0 %v779_v18  ;;  %728 = vmatpush1.bf16.msra.mxu1 %v779_v18  ;;  %v789_v25 = vld [vmem:[%s935_s5 + $0x34] ss:$8 sps:$4 sm:$0xff]   ;;  %v791_v26 = vld [vmem:[%s935_s5 + $0x30] ss:$8 sps:$4 sm:$0xff]   ;;  %v792_v27 = vld [vmem:[%s935_s5 + $0x24] ss:$8 sps:$4 sm:$0xff]  }
  0x29   : > { %446 = vmatprep.subr.bf16.mxu0 %v780_v19  ;;  %721 = vmatprep.subr.bf16.mxu1 %v780_v19  ;;  %v794_v28 = vld [vmem:[%s935_s5 + $0x20] ss:$8 sps:$4 sm:$0xff]   ;;  %v795_v29 = vld [vmem:[%s935_s5 + $0x14] ss:$8 sps:$4 sm:$0xff]   ;;  %v797_v30 = vld [vmem:[%s935_s5 + $0x10] ss:$8 sps:$4 sm:$0xff]  }
  0x2a   : > { %v798_v31 = vld [vmem:[%s935_s5 + $0x4] ss:$8 sps:$4 sm:$0xff]   ;;  %v800_v32 = vld [vmem:[%s935_s5] ss:$8 sps:$4 sm:$0xff]   ;;  %s998_s10 = smov (!%p313_p11, %s686_s10), 3  ;;  %v343_v36 = vshrl.u32 %v342_v35, 7 }
  0x2b   : > { %v802_v34 = vld [vmem:[%s986_s0 + $0x8] sm:$0xff]   ;;  %s315_s19 = scalar_lea.vmem %s988_s2, %s998_s10  ;;  %s719_s12 = sshll.u32 (%p899_p6), %s833_s14, 3 }
  0x2c   : > { %447 = vmatpush1.bf16.msra.mxu0 %v782_v20  ;;  %729 = vmatpush1.bf16.msra.mxu1 %v782_v20  ;;  %v344_v37 = vsub.s32 0, %v343_v36  ;;  %v348_v38 = vsub.s32 1, %v343_v36  ;;  %v340_v39 = vld [vmem:[%s315_s19] sm:$0x3]  ;;  %s537_s26 = scalar_lea.vmem (%p899_p6), %s989_s3, %s719_s12 }
  0x2d   : > { %448 = vmatprep.subr.bf16.mxu0 %v783_v21  ;;  %722 = vmatprep.subr.bf16.mxu1 %v783_v21 }
  0x2e   : > { %v345_v40 = vrot.slane %v340_v39, %v344_v37  ;;  %v349_v41 = vrot.slane %v340_v39, %v348_v38 }
  0x30   : > { %449 = vmatpush1.bf16.msra.mxu0 %v785_v22  ;;  %730 = vmatpush1.bf16.msra.mxu1 %v785_v22 }
  0x31   : > { %450 = vmatprep.subr.bf16.mxu0 %v786_v23  ;;  %723 = vmatprep.subr.bf16.mxu1 %v786_v23 }
  0x34   : > { %451 = vmatpush1.bf16.msra.mxu0 %v788_v24  ;;  %731 = vmatpush1.bf16.msra.mxu1 %v788_v24 }
  0x35   : > { %452 = vmatprep.subr.bf16.mxu0 %v789_v25  ;;  %724 = vmatprep.subr.bf16.mxu1 %v789_v25 }
  0x38   : > { %453 = vmatpush1.bf16.msra.mxu0 %v791_v26  ;;  %732 = vmatpush1.bf16.msra.mxu1 %v791_v26 }
  0x39   : > { %454 = vmatprep.subr.bf16.mxu0 %v792_v27  ;;  %725 = vmatprep.subr.bf16.mxu1 %v792_v27 }
  0x3c   : > { %455 = vmatpush1.bf16.msra.mxu0 %v794_v28  ;;  %733 = vmatpush1.bf16.msra.mxu1 %v794_v28 }
  0x3d   : > { %456 = vmatprep.subr.bf16.mxu0 %v795_v29  ;;  %726 = vmatprep.subr.bf16.mxu1 %v795_v29 }
  0x40   : > { %457 = vmatpush1.bf16.msra.mxu0 %v797_v30  ;;  %734 = vmatpush1.bf16.msra.mxu1 %v797_v30 }
  0x41   : > { %458 = vmatprep.subr.bf16.mxu0 %v798_v31  ;;  %727 = vmatprep.subr.bf16.mxu1 %v798_v31 }
  0x44   : > { %459 = vmatpush1.bf16.msra.mxu0 %v800_v32  ;;  %735 = vmatpush1.bf16.msra.mxu1 %v800_v32 }
  0x47   : > { %477 = vmatmul.mubr.bf16.vlgmr.msra.gmra.mxu0 %v801_v33  ;;  %487 = vmatmul.mubr.bf16.vlgmr.msra.gmra.mxu1 %v802_v34 }
 0x107   : > { %v478_v42 = vpop.f32.mrf.mxu0  ;;  %v488_v43 = vpop.f32.mrf.mxu1 }
 0x108   : > { %v479_v46 = vadd.f32 %v478_v42, %v345_v40  ;;  %v489_v47 = vadd.f32 %v488_v43, %v345_v40 }
 0x109   : > { %v480_v44 = vpop.f32.mrf.mxu0  ;;  %v490_v45 = vpop.f32.mrf.mxu1 }
 0x10a   : > { %v481_v48 = vadd.f32 %v480_v44, %v349_v41  ;;  %v491_v49 = vadd.f32 %v490_v45, %v349_v41 }
 0x10b   : > { %v482_v50 = vpop.f32.mrf.mxu0  ;;  %v492_v51 = vpop.f32.mrf.mxu1 }
 0x10c   : > { %v715_v52 = vpack.c.bf16 %v481_v48, %v479_v46  ;;  %v717_v53 = vpack.c.bf16 %v491_v49, %v489_v47  ;;  %v483_v56 = vadd.f32 %v482_v50, %v345_v40  ;;  %v493_v57 = vadd.f32 %v492_v51, %v345_v40 }
 0x10d   : > { %v484_v54 = vpop.f32.mrf.mxu0  ;;  %v494_v55 = vpop.f32.mrf.mxu1 }
 0x10e   : > { %521 = vst [vmem:[%s304_s23] sm:$0xff] %v715_v52  ;;  %523 = vst [vmem:[%s304_s23 + $0x10] sm:$0xff] %v717_v53  ;;  %v485_v58 = vadd.f32 %v484_v54, %v349_v41  ;;  %v495_v59 = vadd.f32 %v494_v55, %v349_v41  ;;  %531 = sbr.rel (!%p899_p6) target bundleno = 283 (0x11b), region = 74 }
 0x110   : > { %v716_v60 = vpack.c.bf16 %v485_v58, %v483_v56  ;;  %v718_v61 = vpack.c.bf16 %v495_v59, %v493_v57 }
 0x112   : > { %522 = vst [vmem:[%s304_s23 + $0x8] sm:$0xff] %v716_v60  ;;  %524 = vst [vmem:[%s304_s23 + $0x18] sm:$0xff] %v718_v61 }
 0x115   : > { %v572_v62 = vld [vmem:[%s304_s23] sm:$0xff]  ;;  %v576_v0 = vld [vmem:[%s304_s23 + $0x10] sm:$0xff] }
 0x116   : > { %573 = vst [vmem:[%s537_s26] sm:$0xff] %v572_v62  ;;  %577 = vst [vmem:[%s537_s26 + $0x20] sm:$0xff] %v576_v0 }
 0x119   : > { %v574_v63 = vld [vmem:[%s304_s23 + $0x8] sm:$0xff]  ;;  %v578_v1 = vld [vmem:[%s304_s23 + $0x18] sm:$0xff] }
 0x11a   : > { %575 = vst [vmem:[%s537_s26 + $0x10] sm:$0xff] %v574_v63  ;;  %579 = vst [vmem:[%s537_s26 + $0x30] sm:$0xff] %v578_v1 }
 0x11b PF: > { %s13_s16 = sadd.s32 1, %s841_s16   ;;  %s991_s12 = smov %s829_s13 }
 0x11c   : > { %p10_p12 = scmp.ge.s32.totalorder %s13_s16, 4   ;;  %s992_s13 = smov %s904_s22 }
 0x11d   : > { %s993_s14 = smov %s837_s15  ;;  %s994_s15 = smov %s996_s17 }
 0x11e   :  { %12 = sbr.rel (!%p10_p12) target bundleno = 3 (0x3), region = 149 }

// kernel: lightweight_unetx_forward.33
= control target key start
LH: loop header
LB: loop body
LE: loop exit
PB: predicated region body
PF: predicated region fallthrough
CT: control target
= control target key end

     0   :  { %s1140_s12 = smov 0   ;;  %s1142_s13 = smov 0   ;;  %s1358_s0 = inlined_call_operand.vmem [shape: bf16[128,128], index: 0, kind: input, shape index: {}]   ;;  %s1359_s1 = inlined_call_operand.vmem [shape: bf16[128,512], index: 1, kind: input, shape index: {}]   ;;  %s1360_s2 = inlined_call_operand.vmem [shape: f32[1,512], index: 2, kind: input, shape index: {}]   ;;  %s1361_s3 = inlined_call_operand.vmem [shape: bf16[128,512], index: 3, kind: output, shape index: {}]  }
   0x1   :  { %s1144_s14 = smov 0   ;;  %s1146_s15 = smov 0  }
   0x2   :  { %s1148_s16 = smov 0  }
   0x3 LB: > { %s22_s17 = sadd.s32 1, %s1113_s15  ;;  %s915_s18 = sadd.s32 4294967295, %s1117_s16   ;;  %s1117_s16 = sphi %s1148_s16, %s13_s16   ;;  %s1113_s15 = sphi %s1146_s15, %s1366_s15   ;;  %s1109_s14 = sphi %s1144_s14, %s1365_s14   ;;  %s1105_s13 = sphi %s1142_s13, %s1364_s13   ;;  %s1101_s12 = sphi %s1140_s12, %s1363_s12  }
   0x4   : > { %p23_p0 = scmp.ge.s32.totalorder %s22_s17, 2  ;;  %p65_p1 = scmp.ne.s32.totalorder %s1105_s13, %s1101_s12 }
   0x5   : > { %p66_p2 = scmp.eq.s32.totalorder %s1117_s16, 0  ;;  %p123_p4 = scmp.eq.s32.totalorder %s915_s18, 1 }
   0x6   : > { %s1368_s17 = smov (%p23_p0, %s22_s17), 0  ;;  %s58_s20 = sadd.s32 1, %s1105_s13 }
   0x7   : > { %p67_p3 = por %p66_p2, %p65_p1  ;;  %s55_s19 = ssub.s32 %s1113_s15, %s1368_s17 }
   0x8   : > { %p56_p5 = scmp.eq.s32.totalorder %s55_s19, 0  ;;  %p1175_p6 = por %p123_p4, %p65_p1 }
   0x9   : > { %p919_p7 = scmp.ge.s32.totalorder %s1117_s16, 2 }
   0xa   : > { %s1180_s22 = scalar_select %p56_p5, %s1105_s13, %s58_s20  }
   0xb   : > { %154 = sbr.rel (%p919_p7) target bundleno = 28 (0x1c), region = 20 }
  0x10   : > { %157 = sbr.rel (!%p67_p3) target bundleno = 28 (0x1c), region = 24  ;;  %s159_s23 = sand.u32 (%p67_p3), 1, %s1105_s13  }
  0x11   : > { %s972_s24 = sshll.u32 (%p67_p3), %s1113_s15, 3  ;;  %s920_s25 = sshll.u32 (%p67_p3), %s159_s23, 7 }
  0x12   : > { %s1188_s28 = scalar_lea.vmem (%p67_p3), %s1359_s1, %s972_s24  ;;  %s161_s29 = scalar_lea.vmem (%p67_p3), [#allocation2], %s920_s25 }
  0x13   : > { %v223_v0 = vld [vmem:[%s1188_s28] sm:$0xff] (%p67_p3)  ;;  %v225_v1 = vld [vmem:[%s1188_s28 + $0x10] sm:$0xff] (%p67_p3) }
  0x14   : > { %v227_v2 = vld [vmem:[%s1188_s28 + $0x20] sm:$0xff] (%p67_p3)  ;;  %224 = vst [vmem:[%s161_s29] sm:$0xff] (%p67_p3), %v223_v0  ;;  %226 = vst [vmem:[%s161_s29 + $0x8] sm:$0xff] (%p67_p3), %v225_v1  ;;  %v229_v3 = vld [vmem:[%s1188_s28 + $0x30] sm:$0xff] (%p67_p3) }
  0x15   : > { %228 = vst [vmem:[%s161_s29 + $0x10] sm:$0xff] %v227_v2  ;;  %v231_v4 = vld [vmem:[%s1188_s28 + $0x40] sm:$0xff]  ;;  %v233_v5 = vld [vmem:[%s1188_s28 + $0x50] sm:$0xff]  ;;  %230 = vst [vmem:[%s161_s29 + $0x18] sm:$0xff] %v229_v3 }
  0x16   : > { %232 = vst [vmem:[%s161_s29 + $0x20] sm:$0xff] %v231_v4  ;;  %234 = vst [vmem:[%s161_s29 + $0x28] sm:$0xff] %v233_v5  ;;  %v235_v6 = vld [vmem:[%s1188_s28 + $0x60] sm:$0xff]  ;;  %v237_v7 = vld [vmem:[%s1188_s28 + $0x70] sm:$0xff] }
  0x17   : > { %v239_v8 = vld [vmem:[%s1188_s28 + $0x80] sm:$0xff]  ;;  %236 = vst [vmem:[%s161_s29 + $0x30] sm:$0xff] %v235_v6  ;;  %238 = vst [vmem:[%s161_s29 + $0x38] sm:$0xff] %v237_v7  ;;  %v241_v9 = vld [vmem:[%s1188_s28 + $0x90] sm:$0xff] }
  0x18   : > { %240 = vst [vmem:[%s161_s29 + $0x40] sm:$0xff] %v239_v8  ;;  %v243_v10 = vld [vmem:[%s1188_s28 + $0xa0] sm:$0xff]  ;;  %v245_v11 = vld [vmem:[%s1188_s28 + $0xb0] sm:$0xff]  ;;  %242 = vst [vmem:[%s161_s29 + $0x48] sm:$0xff] %v241_v9 }
  0x19   : > { %244 = vst [vmem:[%s161_s29 + $0x50] sm:$0xff] %v243_v10  ;;  %246 = vst [vmem:[%s161_s29 + $0x58] sm:$0xff] %v245_v11  ;;  %v247_v12 = vld [vmem:[%s1188_s28 + $0xc0] sm:$0xff]  ;;  %v249_v13 = vld [vmem:[%s1188_s28 + $0xd0] sm:$0xff] }
  0x1a   : > { %v251_v14 = vld [vmem:[%s1188_s28 + $0xe0] sm:$0xff]  ;;  %248 = vst [vmem:[%s161_s29 + $0x60] sm:$0xff] %v247_v12  ;;  %250 = vst [vmem:[%s161_s29 + $0x68] sm:$0xff] %v249_v13  ;;  %v253_v15 = vld [vmem:[%s1188_s28 + $0xf0] sm:$0xff] }
  0x1b   : > { %252 = vst [vmem:[%s161_s29 + $0x70] sm:$0xff] %v251_v14  ;;  %254 = vst [vmem:[%s161_s29 + $0x78] sm:$0xff] %v253_v15 }
  0x1c PF: > { %p923_p8 = scmp.ge.s32.totalorder %s1117_s16, 1  ;;  %p267_p9 = scmp.lt.s32.totalorder %s1117_s16, 3 }
  0x1e   : > { %p268_p10 = pnand %p923_p8, %p267_p9 }
  0x1f   : > { %s274_s30 = sand.u32 (!%p268_p10), 1, %s1101_s12   ;;  %s926_s29 = sshll.u32 (!%p268_p10), %s1109_s14, 1 }
  0x20   : > { %271 = sbr.rel (%p268_p10) target bundleno = 308 (0x134), region = 66  ;;  %s1209_s4 = sshll.u32 (!%p268_p10), %s274_s30, 7 }
  0x21   : > { %s1214_s5 = scalar_lea.vmem (!%p268_p10), [#allocation2], %s1209_s4  ;;  %p313_p11 = scmp.lt.s32.totalorder (!%p268_p10), %s926_s29, 3 }
  0x22   : > { %s1275_s7 = scalar_lea.vmem (!%p268_p10), [#allocation3], %s1209_s4 }
  0x25   : > { %v1119_v16 = vmov 0   ;;  %v1047_v17 = vld [vmem:[%s1214_s5 + $0x74] ss:$8 sps:$4 sm:$0xff]   ;;  %v1049_v18 = vld [vmem:[%s1214_s5 + $0x70] ss:$8 sps:$4 sm:$0xff]   ;;  %v1071_v33 = vld [vmem:[%s1358_s0] sm:$0xff]   ;;  %v354_v41 = vlaneseq }
  0x26   : > { %524 = vmatprep.mubr.bf16.mxu0 %v1119_v16  ;;  %564 = vmatprep.mubr.bf16.mxu1 %v1119_v16  ;;  %v1050_v19 = vld [vmem:[%s1214_s5 + $0x64] ss:$8 sps:$4 sm:$0xff]   ;;  %v1052_v20 = vld [vmem:[%s1214_s5 + $0x60] ss:$8 sps:$4 sm:$0xff]   ;;  %v1053_v21 = vld [vmem:[%s1214_s5 + $0x54] ss:$8 sps:$4 sm:$0xff]  }
  0x27   : > { %492 = vmatprep.subr.bf16.mxu0 %v1047_v17  ;;  %990 = vmatprep.subr.bf16.mxu1 %v1047_v17  ;;  %v1055_v22 = vld [vmem:[%s1214_s5 + $0x50] ss:$8 sps:$4 sm:$0xff]   ;;  %v1056_v23 = vld [vmem:[%s1214_s5 + $0x44] ss:$8 sps:$4 sm:$0xff]   ;;  %v1058_v24 = vld [vmem:[%s1214_s5 + $0x40] ss:$8 sps:$4 sm:$0xff]  }
  0x28   : > { %493 = vmatpush1.bf16.msra.mxu0 %v1049_v18  ;;  %998 = vmatpush1.bf16.msra.mxu1 %v1049_v18  ;;  %v1059_v25 = vld [vmem:[%s1214_s5 + $0x34] ss:$8 sps:$4 sm:$0xff]   ;;  %v1061_v26 = vld [vmem:[%s1214_s5 + $0x30] ss:$8 sps:$4 sm:$0xff]   ;;  %v1062_v27 = vld [vmem:[%s1214_s5 + $0x24] ss:$8 sps:$4 sm:$0xff]  }
  0x29   : > { %494 = vmatprep.subr.bf16.mxu0 %v1050_v19  ;;  %991 = vmatprep.subr.bf16.mxu1 %v1050_v19  ;;  %v1064_v28 = vld [vmem:[%s1214_s5 + $0x20] ss:$8 sps:$4 sm:$0xff]   ;;  %v1065_v29 = vld [vmem:[%s1214_s5 + $0x14] ss:$8 sps:$4 sm:$0xff]   ;;  %v1067_v30 = vld [vmem:[%s1214_s5 + $0x10] ss:$8 sps:$4 sm:$0xff]  }
  0x2a   : > { %v1068_v31 = vld [vmem:[%s1214_s5 + $0x4] ss:$8 sps:$4 sm:$0xff]   ;;  %v1070_v32 = vld [vmem:[%s1214_s5] ss:$8 sps:$4 sm:$0xff]   ;;  %v1075_v37 = vld [vmem:[%s1358_s0 + $0x10] sm:$0xff]   ;;  %s1370_s29 = smov (!%p313_p11, %s926_s29), 3 }
  0x2b   : > { %v1072_v34 = vld [vmem:[%s1358_s0 + $0x20] sm:$0xff]   ;;  %v1073_v35 = vld [vmem:[%s1358_s0 + $0x8] sm:$0xff]   ;;  %v1076_v38 = vld [vmem:[%s1358_s0 + $0x30] sm:$0xff]   ;;  %v355_v42 = vshrl.u32 %v354_v41, 7  ;;  %s315_s6 = scalar_lea.vmem %s1360_s2, %s1370_s29  ;;  %s989_s4 = sshll.u32 (%p1175_p6), %s1109_s14, 3 }
  0x2c   : > { %495 = vmatpush1.bf16.msra.mxu0 %v1052_v20  ;;  %999 = vmatpush1.bf16.msra.mxu1 %v1052_v20  ;;  %v1074_v36 = vld [vmem:[%s1358_s0 + $0x28] sm:$0xff]   ;;  %v1077_v39 = vld [vmem:[%s1358_s0 + $0x18] sm:$0xff]   ;;  %v352_v45 = vld [vmem:[%s315_s6] sm:$0x3]  ;;  %s729_s10 = scalar_lea.vmem (%p1175_p6), %s1361_s3, %s989_s4 }
  0x2d   : > { %496 = vmatprep.subr.bf16.mxu0 %v1053_v21  ;;  %992 = vmatprep.subr.bf16.mxu1 %v1053_v21  ;;  %v1078_v40 = vld [vmem:[%s1358_s0 + $0x38] sm:$0xff]   ;;  %v356_v43 = vsub.s32 0, %v355_v42  ;;  %v360_v44 = vsub.s32 1, %v355_v42 }
  0x2f   : > { %v1266_v46 = vrot.slane %v352_v45, %v356_v43  ;;  %v1268_v47 = vrot.slane %v352_v45, %v360_v44 }
  0x30   : > { %497 = vmatpush1.bf16.msra.mxu0 %v1055_v22  ;;  %1000 = vmatpush1.bf16.msra.mxu1 %v1055_v22 }
  0x31   : > { %498 = vmatprep.subr.bf16.mxu0 %v1056_v23  ;;  %993 = vmatprep.subr.bf16.mxu1 %v1056_v23 }
  0x34   : > { %499 = vmatpush1.bf16.msra.mxu0 %v1058_v24  ;;  %1001 = vmatpush1.bf16.msra.mxu1 %v1058_v24 }
  0x35   : > { %500 = vmatprep.subr.bf16.mxu0 %v1059_v25  ;;  %994 = vmatprep.subr.bf16.mxu1 %v1059_v25 }
  0x38   : > { %501 = vmatpush1.bf16.msra.mxu0 %v1061_v26  ;;  %1002 = vmatpush1.bf16.msra.mxu1 %v1061_v26 }
  0x39   : > { %502 = vmatprep.subr.bf16.mxu0 %v1062_v27  ;;  %995 = vmatprep.subr.bf16.mxu1 %v1062_v27 }
  0x3c   : > { %503 = vmatpush1.bf16.msra.mxu0 %v1064_v28  ;;  %1003 = vmatpush1.bf16.msra.mxu1 %v1064_v28 }
  0x3d   : > { %504 = vmatprep.subr.bf16.mxu0 %v1065_v29  ;;  %996 = vmatprep.subr.bf16.mxu1 %v1065_v29 }
  0x40   : > { %505 = vmatpush1.bf16.msra.mxu0 %v1067_v30  ;;  %1004 = vmatpush1.bf16.msra.mxu1 %v1067_v30 }
  0x41   : > { %506 = vmatprep.subr.bf16.mxu0 %v1068_v31  ;;  %997 = vmatprep.subr.bf16.mxu1 %v1068_v31 }
  0x44   : > { %507 = vmatpush1.bf16.msra.mxu0 %v1070_v32  ;;  %1005 = vmatpush1.bf16.msra.mxu1 %v1070_v32 }
  0x47   : > { %525 = vmatmul.mubr.bf16.vlgmr.msra.gmra.mxu0 %v1071_v33  ;;  %565 = vmatmul.mubr.bf16.vlgmr.msra.gmra.mxu1 %v1072_v34 }
  0x48   : > { %534 = vmatprep.mubr.bf16.mxu0 %v1119_v16  ;;  %574 = vmatprep.mubr.bf16.mxu1 %v1119_v16 }
  0x4f   : > { %535 = vmatmul.mubr.bf16.gmra.mxu0 %v1073_v35  ;;  %575 = vmatmul.mubr.bf16.gmra.mxu1 %v1074_v36 }
  0x50   : > { %544 = vmatprep.mubr.bf16.mxu0 %v1119_v16  ;;  %584 = vmatprep.mubr.bf16.mxu1 %v1119_v16 }
  0x57   : > { %545 = vmatmul.mubr.bf16.gmra.mxu0 %v1075_v37  ;;  %585 = vmatmul.mubr.bf16.gmra.mxu1 %v1076_v38 }
  0x58   : > { %554 = vmatprep.mubr.bf16.mxu0 %v1119_v16  ;;  %594 = vmatprep.mubr.bf16.mxu1 %v1119_v16 }
  0x5f   : > { %555 = vmatmul.mubr.bf16.gmra.mxu0 %v1077_v39  ;;  %595 = vmatmul.mubr.bf16.gmra.mxu1 %v1078_v40 }
 0x107   : > { %v526_v48 = vpop.f32.mrf.mxu0  ;;  %v566_v49 = vpop.f32.mrf.mxu1 }
 0x108   : > { %v527_v52 = vadd.f32 %v526_v48, %v1266_v46  ;;  %v567_v53 = vadd.f32 %v566_v49, %v1266_v46 }
 0x109   : > { %v528_v50 = vpop.f32.mrf.mxu0  ;;  %v568_v51 = vpop.f32.mrf.mxu1 }
 0x10a   : > { %v529_v54 = vadd.f32 %v528_v50, %v1268_v47  ;;  %v569_v55 = vadd.f32 %v568_v51, %v1268_v47 }
 0x10b   : > { %v530_v56 = vpop.f32.mrf.mxu0  ;;  %v570_v57 = vpop.f32.mrf.mxu1 }
 0x10c   : > { %v973_v58 = vpack.c.bf16 %v529_v54, %v527_v52  ;;  %v981_v59 = vpack.c.bf16 %v569_v55, %v567_v53  ;;  %v531_v62 = vadd.f32 %v530_v56, %v1266_v46  ;;  %v571_v63 = vadd.f32 %v570_v57, %v1266_v46 }
 0x10d   : > { %v532_v60 = vpop.f32.mrf.mxu0  ;;  %v572_v61 = vpop.f32.mrf.mxu1 }
 0x10e   : > { %701 = vst [vmem:[%s1275_s7] sm:$0xff] %v973_v58  ;;  %709 = vst [vmem:[%s1275_s7 + $0x40] sm:$0xff] %v981_v59  ;;  %v533_v0 = vadd.f32 %v532_v60, %v1268_v47  ;;  %v573_v1 = vadd.f32 %v572_v61, %v1268_v47 }
 0x10f   : > { %v536_v2 = vpop.f32.mrf.mxu0  ;;  %v576_v3 = vpop.f32.mrf.mxu1 }
 0x110   : > { %v974_v4 = vpack.c.bf16 %v533_v0, %v531_v62  ;;  %v982_v5 = vpack.c.bf16 %v573_v1, %v571_v63  ;;  %v537_v8 = vadd.f32 %v536_v2, %v1266_v46  ;;  %v577_v9 = vadd.f32 %v576_v3, %v1266_v46 }
 0x111   : > { %v538_v6 = vpop.f32.mrf.mxu0  ;;  %v578_v7 = vpop.f32.mrf.mxu1 }
 0x112   : > { %702 = vst [vmem:[%s1275_s7 + $0x8] sm:$0xff] %v974_v4  ;;  %710 = vst [vmem:[%s1275_s7 + $0x48] sm:$0xff] %v982_v5  ;;  %v539_v10 = vadd.f32 %v538_v6, %v1268_v47  ;;  %v579_v11 = vadd.f32 %v578_v7, %v1268_v47 }
 0x113   : > { %v540_v12 = vpop.f32.mrf.mxu0  ;;  %v580_v13 = vpop.f32.mrf.mxu1 }
 0x114   : > { %v975_v14 = vpack.c.bf16 %v539_v10, %v537_v8  ;;  %v983_v15 = vpack.c.bf16 %v579_v11, %v577_v9  ;;  %v541_v18 = vadd.f32 %v540_v12, %v1266_v46  ;;  %v581_v19 = vadd.f32 %v580_v13, %v1266_v46 }
 0x115   : > { %v542_v16 = vpop.f32.mrf.mxu0  ;;  %v582_v17 = vpop.f32.mrf.mxu1  ;;  %v804_v8 = vld [vmem:[%s1275_s7 + $0x40] sm:$0xff] (%p1175_p6) }
 0x116   : > { %703 = vst [vmem:[%s1275_s7 + $0x10] sm:$0xff] %v975_v14  ;;  %711 = vst [vmem:[%s1275_s7 + $0x50] sm:$0xff] %v983_v15  ;;  %v543_v20 = vadd.f32 %v542_v16, %v1268_v47  ;;  %v583_v21 = vadd.f32 %v582_v17, %v1268_v47 }
 0x117   : > { %v546_v22 = vpop.f32.mrf.mxu0  ;;  %v586_v23 = vpop.f32.mrf.mxu1  ;;  %805 = vst [vmem:[%s729_s10 + $0x80] sm:$0xff] (%p1175_p6), %v804_v8 }
 0x118   : > { %v976_v24 = vpack.c.bf16 %v543_v20, %v541_v18  ;;  %v984_v25 = vpack.c.bf16 %v583_v21, %v581_v19  ;;  %v547_v28 = vadd.f32 %v546_v22, %v1266_v46  ;;  %v587_v29 = vadd.f32 %v586_v23, %v1266_v46 }
 0x119   : > { %v548_v26 = vpop.f32.mrf.mxu0  ;;  %v588_v27 = vpop.f32.mrf.mxu1  ;;  %v806_v9 = vld [vmem:[%s1275_s7 + $0x48] sm:$0xff] (%p1175_p6) }
 0x11a   : > { %704 = vst [vmem:[%s1275_s7 + $0x18] sm:$0xff] %v976_v24  ;;  %712 = vst [vmem:[%s1275_s7 + $0x58] sm:$0xff] %v984_v25  ;;  %v549_v30 = vadd.f32 %v548_v26, %v1268_v47  ;;  %v589_v31 = vadd.f32 %v588_v27, %v1268_v47 }
 0x11b   : > { %v550_v32 = vpop.f32.mrf.mxu0  ;;  %v590_v33 = vpop.f32.mrf.mxu1  ;;  %807 = vst [vmem:[%s729_s10 + $0x90] sm:$0xff] (%p1175_p6), %v806_v9 }
 0x11c   : > { %v977_v34 = vpack.c.bf16 %v549_v30, %v547_v28  ;;  %v985_v35 = vpack.c.bf16 %v589_v31, %v587_v29  ;;  %v551_v38 = vadd.f32 %v550_v32, %v1266_v46  ;;  %v591_v39 = vadd.f32 %v590_v33, %v1266_v46 }
 0x11d   : > { %v552_v36 = vpop.f32.mrf.mxu0  ;;  %v592_v37 = vpop.f32.mrf.mxu1  ;;  %v792_v2 = vld [vmem:[%s1275_s7 + $0x10] sm:$0xff] (%p1175_p6) }
 0x11e   : > { %705 = vst [vmem:[%s1275_s7 + $0x20] sm:$0xff] %v977_v34  ;;  %713 = vst [vmem:[%s1275_s7 + $0x60] sm:$0xff] %v985_v35  ;;  %v553_v40 = vadd.f32 %v552_v36, %v1268_v47  ;;  %v593_v41 = vadd.f32 %v592_v37, %v1268_v47  ;;  %v808_v10 = vld [vmem:[%s1275_s7 + $0x50] sm:$0xff] (%p1175_p6) }
 0x11f   : > { %v556_v42 = vpop.f32.mrf.mxu0  ;;  %v596_v43 = vpop.f32.mrf.mxu1  ;;  %793 = vst [vmem:[%s729_s10 + $0x20] sm:$0xff] (%p1175_p6), %v792_v2  ;;  %809 = vst [vmem:[%s729_s10 + $0xa0] sm:$0xff] (%p1175_p6), %v808_v10 }
 0x120   : > { %v978_v44 = vpack.c.bf16 %v553_v40, %v551_v38  ;;  %v986_v45 = vpack.c.bf16 %v593_v41, %v591_v39  ;;  %v557_v50 = vadd.f32 %v556_v42, %v1266_v46  ;;  %v597_v51 = vadd.f32 %v596_v43, %v1266_v46 }
 0x121   : > { %v558_v48 = vpop.f32.mrf.mxu0  ;;  %v598_v49 = vpop.f32.mrf.mxu1  ;;  %v794_v3 = vld [vmem:[%s1275_s7 + $0x18] sm:$0xff] (%p1175_p6) }
 0x122   : > { %706 = vst [vmem:[%s1275_s7 + $0x28] sm:$0xff] %v978_v44  ;;  %714 = vst [vmem:[%s1275_s7 + $0x68] sm:$0xff] %v986_v45  ;;  %v559_v52 = vadd.f32 %v558_v48, %v1268_v47  ;;  %v599_v53 = vadd.f32 %v598_v49, %v1268_v47  ;;  %v810_v11 = vld [vmem:[%s1275_s7 + $0x58] sm:$0xff] (%p1175_p6) }
 0x123   : > { %v560_v54 = vpop.f32.mrf.mxu0  ;;  %v600_v55 = vpop.f32.mrf.mxu1  ;;  %795 = vst [vmem:[%s729_s10 + $0x30] sm:$0xff] (%p1175_p6), %v794_v3  ;;  %811 = vst [vmem:[%s729_s10 + $0xb0] sm:$0xff] (%p1175_p6), %v810_v11 }
 0x124   : > { %v979_v56 = vpack.c.bf16 %v559_v52, %v557_v50  ;;  %v987_v57 = vpack.c.bf16 %v599_v53, %v597_v51  ;;  %v561_v60 = vadd.f32 %v560_v54, %v1266_v46  ;;  %v601_v61 = vadd.f32 %v600_v55, %v1266_v46  ;;  %v788_v46 = vld [vmem:[%s1275_s7] sm:$0xff] (%p1175_p6) }
 0x125   : > { %v562_v58 = vpop.f32.mrf.mxu0  ;;  %v602_v59 = vpop.f32.mrf.mxu1  ;;  %v796_v4 = vld [vmem:[%s1275_s7 + $0x20] sm:$0xff] (%p1175_p6)  ;;  %789 = vst [vmem:[%s729_s10] sm:$0xff] (%p1175_p6), %v788_v46 }
 0x126   : > { %707 = vst [vmem:[%s1275_s7 + $0x30] sm:$0xff] %v979_v56  ;;  %715 = vst [vmem:[%s1275_s7 + $0x70] sm:$0xff] %v987_v57  ;;  %v563_v62 = vadd.f32 %v562_v58, %v1268_v47  ;;  %v603_v63 = vadd.f32 %v602_v59, %v1268_v47  ;;  %723 = sbr.rel (!%p1175_p6) target bundleno = 308 (0x134), region = 74  ;;  %v790_v47 = vld [vmem:[%s1275_s7 + $0x8] sm:$0xff] (%p1175_p6)  ;;  %v812_v12 = vld [vmem:[%s1275_s7 + $0x60] sm:$0xff] (%p1175_p6) }
 0x127   : > { %791 = vst [vmem:[%s729_s10 + $0x10] sm:$0xff] (%p1175_p6), %v790_v47  ;;  %797 = vst [vmem:[%s729_s10 + $0x40] sm:$0xff] (%p1175_p6), %v796_v4 }
 0x128   : > { %v980_v0 = vpack.c.bf16 %v563_v62, %v561_v60  ;;  %v988_v1 = vpack.c.bf16 %v603_v63, %v601_v61  ;;  %813 = vst [vmem:[%s729_s10 + $0xc0] sm:$0xff] (%p1175_p6), %v812_v12 }
 0x129   : > { %v798_v5 = vld [vmem:[%s1275_s7 + $0x28] sm:$0xff] (%p1175_p6) }
 0x12a   : > { %708 = vst [vmem:[%s1275_s7 + $0x38] sm:$0xff] %v980_v0  ;;  %716 = vst [vmem:[%s1275_s7 + $0x78] sm:$0xff] %v988_v1  ;;  %v814_v13 = vld [vmem:[%s1275_s7 + $0x68] sm:$0xff] (%p1175_p6) }
 0x12b   : > { %799 = vst [vmem:[%s729_s10 + $0x50] sm:$0xff] %v798_v5  ;;  %815 = vst [vmem:[%s729_s10 + $0xd0] sm:$0xff] %v814_v13 }
 0x12d   : > { %v800_v6 = vld [vmem:[%s1275_s7 + $0x30] sm:$0xff] }
 0x12e   : > { %801 = vst [vmem:[%s729_s10 + $0x60] sm:$0xff] %v800_v6  ;;  %v816_v14 = vld [vmem:[%s1275_s7 + $0x70] sm:$0xff] }
 0x12f   : > { %817 = vst [vmem:[%s729_s10 + $0xe0] sm:$0xff] %v816_v14 }
 0x131   : > { %v802_v7 = vld [vmem:[%s1275_s7 + $0x38] sm:$0xff] }
 0x132   : > { %803 = vst [vmem:[%s729_s10 + $0x70] sm:$0xff] %v802_v7  ;;  %v818_v15 = vld [vmem:[%s1275_s7 + $0x78] sm:$0xff] }
 0x133   : > { %819 = vst [vmem:[%s729_s10 + $0xf0] sm:$0xff] %v818_v15 }
 0x134 PF: > { %s13_s16 = sadd.s32 1, %s1117_s16   ;;  %s1363_s12 = smov %s1105_s13 }
 0x135   : > { %p10_p12 = scmp.ge.s32.totalorder %s13_s16, 4   ;;  %s1364_s13 = smov %s1180_s22 }
 0x136   : > { %s1365_s14 = smov %s1113_s15  ;;  %s1366_s15 = smov %s1368_s17 }
 0x137   :  { %12 = sbr.rel (!%p10_p12) target bundleno = 3 (0x3), region = 149 }

// kernel: lightweight_unetx_forward.18
= control target key start
LH: loop header
LB: loop body
LE: loop exit
PB: predicated region body
PF: predicated region fallthrough
CT: control target
= control target key end

     0   :  { %vm314_vm0 = vcmask 261120   ;;  %s1329_s1 = inlined_call_operand.vmem [shape: bf16[288,128], index: 1, kind: input, shape index: {}]   ;;  %s1330_s0 = inlined_call_operand.vmem [shape: bf16[128,288], index: 0, kind: input, shape index: {}]   ;;  %s1331_s2 = inlined_call_operand.vmem [shape: f32[1,128], index: 2, kind: input, shape index: {}]   ;;  %s1332_s3 = inlined_call_operand.vmem [shape: f32[1,128], index: 3, kind: input, shape index: {}]   ;;  %s1333_s4 = inlined_call_operand.vmem [shape: bf16[128,128], index: 4, kind: output, shape index: {}]  }
   0x1   :  { %v986_v0 = vld [vmem:[%s1329_s1 + $0x78] sm:$0xff]   ;;  %v988_v2 = vld [vmem:[%s1329_s1 + $0x70] sm:$0xff]   ;;  %v990_v4 = vld [vmem:[%s1329_s1 + $0x68] sm:$0xff]  }
   0x2   :  { %v987_v1 = vld [vmem:[%s1329_s1 + $0x38] sm:$0xff]   ;;  %876 = vmatprep.subr.bf16.mxu0 %v986_v0  ;;  %970 = vmatprep.subr.bf16.mxu1 %v986_v0  ;;  %v989_v3 = vld [vmem:[%s1329_s1 + $0x30] sm:$0xff]   ;;  %v991_v5 = vld [vmem:[%s1329_s1 + $0x28] sm:$0xff]  }
   0x3   :  { %877 = vmatpush3.bf16.msra.mxu0 %v987_v1  ;;  %978 = vmatpush3.bf16.msra.mxu1 %v987_v1  ;;  %v992_v6 = vld [vmem:[%s1329_s1 + $0x60] sm:$0xff]   ;;  %v994_v8 = vld [vmem:[%s1329_s1 + $0x58] sm:$0xff]   ;;  %v996_v10 = vld [vmem:[%s1329_s1 + $0x50] sm:$0xff]  }
   0x4   :  { %878 = vmatprep.subr.bf16.mxu0 %v988_v2  ;;  %971 = vmatprep.subr.bf16.mxu1 %v988_v2  ;;  %v993_v7 = vld [vmem:[%s1329_s1 + $0x20] sm:$0xff]   ;;  %v995_v9 = vld [vmem:[%s1329_s1 + $0x18] sm:$0xff]   ;;  %v997_v13 = vld [vmem:[%s1329_s1 + $0x10] sm:$0xff]  }
   0x5   :  { %v1004_v11 = vld [vmem:[%s1330_s0 + $0x4] ss:$12 sps:$4 sm:$0xff]   ;;  %v1007_v12 = vld [vmem:[%s1330_s0 + $0x94] ss:$12 sps:$4 sm:$0xff]   ;;  %v998_v14 = vld [vmem:[%s1329_s1 + $0x48] sm:$0xff]  }
   0x6   :  { %371 = vmatprep.mubr.bf16.mxu0 %v1004_v11  ;;  %419 = vmatprep.mubr.bf16.mxu1 %v1007_v12  ;;  %v999_v15 = vld [vmem:[%s1329_s1 + $0x8] sm:$0xff]   ;;  %v1000_v16 = vld [vmem:[%s1329_s1 + $0x40] sm:$0xff]   ;;  %v1005_v20 = vld [vmem:[%s1330_s0 + $0x90] ss:$12 sps:$4 sm:$0xff]  }
   0x7   :  { %879 = vmatpush3.bf16.msra.mxu0 %v989_v3  ;;  %979 = vmatpush3.bf16.msra.mxu1 %v989_v3  ;;  %v1001_v17 = vld [vmem:[%s1329_s1] sm:$0xff]   ;;  %v1008_v19 = vld [vmem:[%s1329_s1 + $0x88] sm:$0xff]   ;;  %v1019_v28 = vld [vmem:[%s1330_s0 + $0x30] ss:$12 sps:$4 sm:$0xff]  }
   0x8   :  { %880 = vmatprep.subr.bf16.mxu0 %v990_v4  ;;  %972 = vmatprep.subr.bf16.mxu1 %v990_v4  ;;  %v1002_v18 = vld [vmem:[%s1330_s0] ss:$12 sps:$4 sm:$0xff]   ;;  %v1009_v21 = vld [vmem:[%s1330_s0 + $0x1c] ss:$12 sps:$4 sm:$0xff]   ;;  %v1013_v24 = vld [vmem:[%s1330_s0 + $0x18] ss:$12 sps:$4 sm:$0xff]  }
   0x9   :  { %v1011_v22 = vld [vmem:[%s1330_s0 + $0xac] ss:$12 sps:$4 sm:$0xff]   ;;  %v1015_v23 = vld [vmem:[%s1329_s1 + $0x80] sm:$0xff]   ;;  %v1014_v25 = vld [vmem:[%s1330_s0 + $0xa8] ss:$12 sps:$4 sm:$0xff]  }
   0xa   :  { %v1016_v26 = vld [vmem:[%s1330_s0 + $0x34] ss:$12 sps:$4 sm:$0xff]   ;;  %v1021_v30 = vld [vmem:[%s1330_s0 + $0x4c] ss:$12 sps:$4 sm:$0xff]   ;;  %v1025_v33 = vld [vmem:[%s1330_s0 + $0x50] ss:$12 sps:$4 sm:$0xff]  }
   0xb   :  { %881 = vmatpush3.bf16.msra.mxu0 %v991_v5  ;;  %980 = vmatpush3.bf16.msra.mxu1 %v991_v5  ;;  %v1018_v27 = vld [vmem:[%s1330_s0 + $0x8] ss:$12 sps:$4 sm:$0xff]   ;;  %v1020_v29 = vld [vmem:[%s1330_s0 + $0x20] ss:$12 sps:$4 sm:$0xff]   ;;  %v1023_v31 = vld [vmem:[%s1330_s0 + $0x38] ss:$12 sps:$4 sm:$0xff]  }
   0xc   :  { %882 = vmatprep.subr.bf16.mxu0 %v992_v6  ;;  %973 = vmatprep.subr.bf16.mxu1 %v992_v6  ;;  %v1024_v32 = vld [vmem:[%s1330_s0 + $0x48] ss:$12 sps:$4 sm:$0xff]   ;;  %v1026_v34 = vld [vmem:[%s1330_s0 + $0x64] ss:$12 sps:$4 sm:$0xff]   ;;  %v1029_v36 = vld [vmem:[%s1330_s0 + $0x60] ss:$12 sps:$4 sm:$0xff]  }
   0xd   :  { %v1028_v35 = vld [vmem:[%s1330_s0 + $0x68] ss:$12 sps:$4 sm:$0xff]   ;;  %v1030_v37 = vld [vmem:[%s1330_s0 + $0x80] ss:$12 sps:$4 sm:$0xff]   ;;  %v1033_v39 = vld [vmem:[%s1330_s0 + $0x98] ss:$12 sps:$4 sm:$0xff]  }
   0xe   :  { %v1031_v38 = vld [vmem:[%s1330_s0 + $0x7c] ss:$12 sps:$4 sm:$0xff]   ;;  %v1034_v40 = vld [vmem:[%s1330_s0 + $0x78] ss:$12 sps:$4 sm:$0xff]  }
   0xf   :  { %883 = vmatpush3.bf16.msra.mxu0 %v993_v7  ;;  %981 = vmatpush3.bf16.msra.mxu1 %v993_v7  ;;  %v1035_v41 = vld [vmem:[%s1330_s0 + $0xb0] ss:$12 sps:$4 sm:$0xff]  }
  0x10   :  { %884 = vmatprep.subr.bf16.mxu0 %v994_v8  ;;  %974 = vmatprep.subr.bf16.mxu1 %v994_v8 }
  0x13   :  { %885 = vmatpush3.bf16.msra.mxu0 %v995_v9  ;;  %982 = vmatpush3.bf16.msra.mxu1 %v995_v9 }
  0x14   :  { %886 = vmatprep.subr.bf16.mxu0 %v996_v10  ;;  %975 = vmatprep.subr.bf16.mxu1 %v996_v10 }
  0x17   :  { %887 = vmatpush3.bf16.msra.mxu0 %v997_v13  ;;  %983 = vmatpush3.bf16.msra.mxu1 %v997_v13 }
  0x18   :  { %888 = vmatprep.subr.bf16.mxu0 %v998_v14  ;;  %976 = vmatprep.subr.bf16.mxu1 %v998_v14 }
  0x1b   :  { %889 = vmatpush3.bf16.msra.mxu0 %v999_v15  ;;  %984 = vmatpush3.bf16.msra.mxu1 %v999_v15 }
  0x1c   :  { %890 = vmatprep.subr.bf16.mxu0 %v1000_v16  ;;  %977 = vmatprep.subr.bf16.mxu1 %v1000_v16 }
  0x1f   :  { %891 = vmatpush3.bf16.msra.mxu0 %v1001_v17  ;;  %985 = vmatpush3.bf16.msra.mxu1 %v1001_v17 }
  0x20   :  { %950 = vmatprep.subr.bf16.mxu1 %v1008_v19 }
  0x22   :  { %372 = vmatmul.mubr.bf16.vlgmr.msra.gmra.mxu0 %v1002_v18  ;;  %420 = vmatmul.mubr.bf16.vlgmr.msra.gmra.mxu1 %v1005_v20 }
  0x23   :  { %951 = vmatpush3.bf16.msra.mxu1 %v1008_v19  ;;  %379 = vmatprep.mubr.bf16.mxu0 %v1009_v21 }
  0x24   :  { %427 = vmatprep.mubr.bf16.mxu1 %v1011_v22  ;;  %952 = vmatprep.subr.bf16.mxu1 %v1015_v23 }
  0x27   :  { %953 = vmatpush3.bf16.msra.mxu1 %v1015_v23 }
  0x2a   :  { %380 = vmatmul.mubr.bf16.gmra.mxu0 %v1013_v24  ;;  %428 = vmatmul.mubr.bf16.gmra.mxu1 %v1014_v25 }
  0x2b   :  { %387 = vmatprep.mubr.bf16.mxu0 %v1016_v26  ;;  %954 = vmatprep.mubr.msk.bf16.mxu1 %vm314_vm0, %v1018_v27 }
  0x32   :  { %388 = vmatmul.mubr.bf16.gmra.mxu0 %v1019_v28  ;;  %955 = vmatmul.mubr.msk.bf16.vlgmr.msra.gmra.mxu1 %vm314_vm0, %v1020_v29 }
  0x33   :  { %395 = vmatprep.mubr.bf16.mxu0 %v1021_v30  ;;  %958 = vmatprep.mubr.msk.bf16.mxu1 %vm314_vm0, %v1023_v31 }
  0x3a   :  { %396 = vmatmul.mubr.bf16.gmra.mxu0 %v1024_v32  ;;  %959 = vmatmul.mubr.msk.bf16.gmra.mxu1 %vm314_vm0, %v1025_v33 }
  0x3b   :  { %403 = vmatprep.mubr.bf16.mxu0 %v1026_v34  ;;  %962 = vmatprep.mubr.msk.bf16.mxu1 %vm314_vm0, %v1028_v35 }
  0x42   :  { %404 = vmatmul.mubr.bf16.gmra.mxu0 %v1029_v36  ;;  %963 = vmatmul.mubr.msk.bf16.gmra.mxu1 %vm314_vm0, %v1030_v37 }
  0x43   :  { %411 = vmatprep.mubr.bf16.mxu0 %v1031_v38  ;;  %966 = vmatprep.mubr.msk.bf16.mxu1 %vm314_vm0, %v1033_v39 }
  0x4a   :  { %412 = vmatmul.mubr.bf16.gmra.mxu0 %v1034_v40  ;;  %967 = vmatmul.mubr.msk.bf16.gmra.mxu1 %vm314_vm0, %v1035_v41 }
  0xe2   :  { %v892_v42 = vpop.f32.mrf.mxu0  ;;  %v1197_v43 = vpop.f32.mrf.mxu1 }
  0xe4   :  { %v893_v44 = vpop.f32.mrf.mxu0  ;;  %v1199_v45 = vpop.f32.mrf.mxu1 }
  0xe5   :  { %v894_v62 = vadd.f32 %v893_v44, %v892_v42 }
  0xe6   :  { %v895_v46 = vpop.f32.mrf.mxu0  ;;  %v1201_v47 = vpop.f32.mrf.mxu1 }
  0xe8   :  { %v896_v48 = vpop.f32.mrf.mxu0  ;;  %v1203_v49 = vpop.f32.mrf.mxu1 }
  0xe9   :  { %v897_v1 = vadd.f32 %v896_v48, %v895_v46 }
  0xea   :  { %v898_v50 = vpop.f32.mrf.mxu0  ;;  %v1205_v51 = vpop.f32.mrf.mxu1 }
  0xec   :  { %v899_v52 = vpop.f32.mrf.mxu0  ;;  %v1207_v53 = vpop.f32.mrf.mxu1 }
  0xed   :  { %v900_v2 = vadd.f32 %v899_v52, %v898_v50 }
  0xee   :  { %v901_v54 = vpop.f32.mrf.mxu0  ;;  %v1209_v55 = vpop.f32.mrf.mxu1 }
  0xf0   :  { %v902_v56 = vpop.f32.mrf.mxu0  ;;  %v1211_v57 = vpop.f32.mrf.mxu1 }
  0xf1   :  { %v903_v6 = vadd.f32 %v902_v56, %v901_v54 }
  0xf2   :  { %v904_v58 = vpop.f32.mrf.mxu0  ;;  %v956_v59 = vpop.f32.mrf.mxu1 }
  0xf3   :  { %v1215_v7 = vadd.f32 %v956_v59, %v900_v2 }
  0xf4   :  { %v905_v60 = vpop.f32.mrf.mxu0  ;;  %v470_v61 = vpop.f32.mrf.mxu1 }
  0xf5   :  { %v1213_v3 = vadd.f32 %v894_v62, %v470_v61  ;;  %v906_v9 = vadd.f32 %v905_v60, %v904_v58  ;;  %v557_v18 = vmul.f32 %v1215_v7, %v1215_v7 }
  0xf6   :  { %v907_v63 = vpop.f32.mrf.mxu0  ;;  %v957_v0 = vpop.f32.mrf.mxu1 }
  0xf7   :  { %v555_v12 = vmul.f32 %v1213_v3, %v1213_v3  ;;  %v1221_v13 = vadd.f32 %v957_v0, %v903_v6 }
  0xf8   :  { %v908_v4 = vpop.f32.mrf.mxu0  ;;  %v473_v5 = vpop.f32.mrf.mxu1 }
  0xf9   :  { %v1217_v8 = vadd.f32 %v897_v1, %v473_v5  ;;  %v558_v24 = vmul.f32 %v1221_v13, %v1221_v13  ;;  %v909_v28 = vadd.f32 %v908_v4, %v907_v63 }
  0xfa   :  { %v910_v10 = vpop.f32.mrf.mxu0  ;;  %v960_v11 = vpop.f32.mrf.mxu1 }
  0xfb   :  { %v533_v14 = vadd.f32 %v1217_v8, %v1213_v3  ;;  %v556_v15 = vmul.f32 %v1217_v8, %v1217_v8 }
  0xfc   :  { %v911_v16 = vpop.f32.mrf.mxu0  ;;  %v486_v17 = vpop.f32.mrf.mxu1 }
  0xfd   :  { %v534_v19 = vadd.f32 %v533_v14, %v1215_v7  ;;  %v571_v20 = vadd.f32 %v556_v15, %v555_v12  ;;  %v1230_v21 = vadd.f32 %v906_v9, %v486_v17  ;;  %v912_v26 = vadd.f32 %v911_v16, %v910_v10 }
  0xfe   :  { %v913_v22 = vpop.f32.mrf.mxu0  ;;  %v961_v23 = vpop.f32.mrf.mxu1 }
  0xff   :  { %v572_v25 = vadd.f32 %v571_v20, %v557_v18  ;;  %v535_v27 = vadd.f32 %v534_v19, %v1221_v13  ;;  %v559_v32 = vmul.f32 %v1230_v21, %v1230_v21  ;;  %v1240_v37 = vadd.f32 %v960_v11, %v912_v26 }
 0x100   :  { %v914_v29 = vpop.f32.mrf.mxu0  ;;  %v489_v30 = vpop.f32.mrf.mxu1  ;;  %v930_v19 = vadd.f32 %v1199_v45, %v1197_v43  ;;  %v933_v26 = vadd.f32 %v1203_v49, %v1201_v47  ;;  %v936_v43 = vadd.f32 %v1207_v53, %v1205_v51  ;;  %v939_v47 = vadd.f32 %v1211_v57, %v1209_v55 }
 0x101   :  { %v536_v31 = vadd.f32 %v535_v27, %v1230_v21  ;;  %v573_v33 = vadd.f32 %v572_v25, %v558_v24  ;;  %v1238_v34 = vadd.f32 %v909_v28, %v489_v30  ;;  %v915_v39 = vadd.f32 %v914_v29, %v913_v22 }
 0x102   :  { %v916_v35 = vpop.f32.mrf.mxu0  ;;  %v964_v36 = vpop.f32.mrf.mxu1  ;;  %v561_v54 = vmul.f32 %v1240_v37, %v1240_v37 }
 0x103   :  { %v574_v38 = vadd.f32 %v573_v33, %v559_v32  ;;  %v537_v40 = vadd.f32 %v536_v31, %v1238_v34  ;;  %v560_v41 = vmul.f32 %v1238_v34, %v1238_v34  ;;  %v1247_v56 = vadd.f32 %v961_v23, %v915_v39 }
 0x104   :  { %v917_v42 = vpop.f32.mrf.mxu0  ;;  %v502_v44 = vpop.f32.mrf.mxu1 }
 0x105   :  { %v918_v46 = vadd.f32 %v917_v42, %v916_v35  ;;  %v575_v48 = vadd.f32 %v574_v38, %v560_v41  ;;  %v538_v58 = vadd.f32 %v537_v40, %v1240_v37  ;;  %v562_v2 = vmul.f32 %v1247_v56, %v1247_v56 }
 0x106   :  { %v919_v50 = vpop.f32.mrf.mxu0  ;;  %v965_v52 = vpop.f32.mrf.mxu1 }
 0x107   :  { %v576_v61 = vadd.f32 %v575_v48, %v561_v54  ;;  %v1250_v62 = vadd.f32 %v918_v46, %v502_v44  ;;  %v539_v4 = vadd.f32 %v538_v58, %v1247_v56 }
 0x108   :  { %v920_v59 = vpop.f32.mrf.mxu0  ;;  %v505_v60 = vpop.f32.mrf.mxu1 }
 0x109   :  { %v921_v63 = vadd.f32 %v920_v59, %v919_v50  ;;  %v563_v10 = vmul.f32 %v1250_v62, %v1250_v62  ;;  %v577_v11 = vadd.f32 %v576_v61, %v562_v2  ;;  %v540_v16 = vadd.f32 %v539_v4, %v1250_v62 }
 0x10a   :  { %v922_v0 = vpop.f32.mrf.mxu0  ;;  %v968_v1 = vpop.f32.mrf.mxu1 }
 0x10b   :  { %v1255_v5 = vadd.f32 %v921_v63, %v505_v60  ;;  %v578_v22 = vadd.f32 %v577_v11, %v563_v10  ;;  %v527_v49 = vadd.f32 %v968_v1, %v936_v43 }
 0x10c   :  { %v923_v6 = vpop.f32.mrf.mxu0  ;;  %v518_v9 = vpop.f32.mrf.mxu1 }
 0x10d   :  { %v924_v12 = vadd.f32 %v923_v6, %v922_v0  ;;  %v564_v17 = vmul.f32 %v1255_v5, %v1255_v5  ;;  %v541_v23 = vadd.f32 %v540_v16, %v1255_v5  ;;  %v1272_v30 = vadd.f32 %v930_v19, %v518_v9  ;;  %v596_v19 = vld [vmem:[%s1331_s2] sm:$0x1] }
 0x10e   :  { %v925_v14 = vpop.f32.mrf.mxu0  ;;  %v969_v15 = vpop.f32.mrf.mxu1  ;;  %v569_v42 = vmul.f32 %v527_v49, %v527_v49  ;;  %v604_v16 = vlaneseq }
 0x10f   :  { %v1262_v18 = vadd.f32 %v964_v36, %v924_v12  ;;  %v579_v28 = vadd.f32 %v578_v22, %v564_v17  ;;  %v567_v36 = vmul.f32 %v1272_v30, %v1272_v30  ;;  %v530_v40 = vadd.f32 %v969_v15, %v939_v47 }
 0x110   :  { %v926_v20 = vpop.f32.mrf.mxu0  ;;  %v521_v27 = vpop.f32.mrf.mxu1  ;;  %v605_v17 = vshrl.u32 %v604_v16, 7 }
 0x111   :  { %v565_v24 = vmul.f32 %v1262_v18, %v1262_v18  ;;  %v927_v25 = vadd.f32 %v926_v20, %v925_v14  ;;  %v542_v29 = vadd.f32 %v541_v23, %v1262_v18  ;;  %v522_v35 = vadd.f32 %v933_v26, %v521_v27 }
 0x112   :  { %v570_v48 = vmul.f32 %v530_v40, %v530_v40  ;;  %v606_v20 = vsub.s32 0, %v605_v17 }
 0x113   :  { %v1274_v31 = vadd.f32 %v965_v52, %v927_v25  ;;  %v580_v45 = vadd.f32 %v579_v28, %v565_v24  ;;  %v568_v51 = vmul.f32 %v522_v35, %v522_v35  ;;  %v600_v24 = vld [vmem:[%s1332_s3] sm:$0x1] }
 0x115   :  { %v543_v32 = vadd.f32 %v542_v29, %v1274_v31  ;;  %v566_v33 = vmul.f32 %v1274_v31, %v1274_v31 }
 0x117   :  { %v581_v38 = vadd.f32 %v580_v45, %v566_v33  ;;  %v544_v39 = vadd.f32 %v543_v32, %v1272_v30 }
 0x119   :  { %v545_v41 = vadd.f32 %v544_v39, %v522_v35  ;;  %v582_v53 = vadd.f32 %v581_v38, %v567_v36 }
 0x11b   :  { %v546_v44 = vadd.f32 %v545_v41, %v527_v49  ;;  %v583_v46 = vadd.f32 %v582_v53, %v568_v51 }
 0x11d   :  { %v547_v50 = vadd.f32 %v546_v44, %v530_v40  ;;  %v584_v52 = vadd.f32 %v583_v46, %v569_v42 }
 0x11f   :  { %v548_v54 = vrot.slane %v547_v50, 4  ;;  %v585_v58 = vadd.f32 %v584_v52, %v570_v48 }
 0x121   :  { %v549_v55 = vadd.f32 %v548_v54, %v547_v50  ;;  %v586_v57 = vrot.slane %v585_v58, 4 }
 0x123   :  { %v550_v59 = vrot.slane %v549_v55, 2  ;;  %v587_v60 = vadd.f32 %v586_v57, %v585_v58 }
 0x125   :  { %v551_v61 = vadd.f32 %v550_v59, %v549_v55  ;;  %v588_v63 = vrot.slane %v587_v60, 2 }
 0x127   :  { %v552_v0 = vrot.slane %v551_v61, 1  ;;  %v589_v1 = vadd.f32 %v588_v63, %v587_v60 }
 0x129   :  { %v553_v2 = vadd.f32 %v552_v0, %v551_v61  ;;  %v590_v4 = vrot.slane %v589_v1, 1 }
 0x12b   :  { %v554_v6 = vmul.f32 0.0078125, %v553_v2  ;;  %v591_v9 = vadd.f32 %v590_v4, %v589_v1 }
 0x12d   :  { %v592_v10 = vmul.f32 0.0078125, %v591_v9  ;;  %v593_v11 = vmul.f32 %v554_v6, %v554_v6 }
 0x12f   :  { %v594_v12 = vsub.f32 %v592_v10, %v593_v11 }
 0x131   :  { %v595_v14 = vmax.f32 %v594_v12, 0.0 }
 0x133   :  { %v597_v15 = vadd.f32 1e-05, %v595_v14 }
 0x135   :  { %1036 = vrsqrt.f32 %v597_v15 }
 0x142   :  { %v1037_v22 = vpop.eup %1036 }
 0x143   :  { %v599_v23 = vmul.f32 %v1037_v22, %v596_v19 }
 0x145   :  { %v601_v25 = vmul.f32 %v599_v23, %v554_v6  ;;  %v607_v26 = vrot.slane %v599_v23, %v606_v20 }
 0x147   :  { %v602_v27 = vsub.f32 %v600_v24, %v601_v25  ;;  %v609_v28 = vmul.f32 %v607_v26, %v1213_v3  ;;  %v610_v29 = vmul.f32 %v607_v26, %v1217_v8  ;;  %v611_v43 = vmul.f32 %v607_v26, %v1215_v7 }
 0x148   :  { %v612_v45 = vmul.f32 %v607_v26, %v1221_v13  ;;  %v613_v32 = vmul.f32 %v607_v26, %v1230_v21  ;;  %v614_v33 = vmul.f32 %v607_v26, %v1238_v34  ;;  %v615_v47 = vmul.f32 %v607_v26, %v1240_v37 }
 0x149   :  { %v616_v36 = vmul.f32 %v607_v26, %v1247_v56  ;;  %v617_v38 = vmul.f32 %v607_v26, %v1250_v62  ;;  %v618_v39 = vmul.f32 %v607_v26, %v1255_v5  ;;  %v619_v3 = vmul.f32 %v607_v26, %v1262_v18 }
 0x14a   :  { %v620_v8 = vmul.f32 %v607_v26, %v1274_v31  ;;  %v629_v41 = vrot.slane %v602_v27, %v606_v20  ;;  %v621_v7 = vmul.f32 %v607_v26, %v1272_v30  ;;  %v622_v13 = vmul.f32 %v607_v26, %v522_v35 }
 0x14b   :  { %v623_v51 = vmul.f32 %v607_v26, %v527_v49  ;;  %v624_v21 = vmul.f32 %v607_v26, %v530_v40 }
 0x14c   :  { %v631_v53 = vadd.f32 %v629_v41, %v609_v28  ;;  %v632_v34 = vadd.f32 %v629_v41, %v610_v29  ;;  %v633_v42 = vadd.f32 %v629_v41, %v611_v43  ;;  %v634_v37 = vadd.f32 %v629_v41, %v612_v45 }
 0x14d   :  { %v635_v44 = vadd.f32 %v629_v41, %v613_v32  ;;  %v636_v56 = vadd.f32 %v629_v41, %v614_v33  ;;  %v637_v46 = vadd.f32 %v629_v41, %v615_v47  ;;  %v638_v62 = vadd.f32 %v629_v41, %v616_v36 }
 0x14e   :  { %v639_v48 = vadd.f32 %v629_v41, %v617_v38  ;;  %v640_v5 = vadd.f32 %v629_v41, %v618_v39  ;;  %v641_v50 = vadd.f32 %v629_v41, %v619_v3  ;;  %v642_v18 = vadd.f32 %v629_v41, %v620_v8 }
 0x14f   :  { %v643_v52 = vadd.f32 %v629_v41, %v621_v7  ;;  %v644_v31 = vadd.f32 %v629_v41, %v622_v13  ;;  %v645_v54 = vadd.f32 %v629_v41, %v623_v51  ;;  %v646_v58 = vadd.f32 %v629_v41, %v624_v21 }
 0x150   :  { %v647_v30 = vmax.f32 %v631_v53, 0.0  ;;  %v648_v35 = vmax.f32 %v632_v34, 0.0  ;;  %v649_v49 = vmax.f32 %v633_v42, 0.0  ;;  %v650_v40 = vmax.f32 %v634_v37, 0.0 }
 0x151   :  { %v651_v55 = vmax.f32 %v635_v44, 0.0  ;;  %v652_v57 = vmax.f32 %v636_v56, 0.0  ;;  %v653_v59 = vmax.f32 %v637_v46, 0.0  ;;  %v654_v60 = vmax.f32 %v638_v62, 0.0 }
 0x152   :  { %v655_v61 = vmax.f32 %v639_v48, 0.0  ;;  %v656_v63 = vmax.f32 %v640_v5, 0.0  ;;  %v657_v0 = vmax.f32 %v641_v50, 0.0  ;;  %v658_v1 = vmax.f32 %v642_v18, 0.0 }
 0x153   :  { %v659_v2 = vmax.f32 %v643_v52, 0.0  ;;  %v660_v4 = vmax.f32 %v644_v31, 0.0  ;;  %v661_v6 = vmax.f32 %v645_v54, 0.0  ;;  %v662_v9 = vmax.f32 %v646_v58, 0.0 }
 0x154   :  { %v832_v10 = vpack.c.bf16 %v648_v35, %v647_v30  ;;  %v837_v11 = vpack.c.bf16 %v650_v40, %v649_v49  ;;  %v842_v12 = vpack.c.bf16 %v652_v57, %v651_v55  ;;  %v847_v14 = vpack.c.bf16 %v654_v60, %v653_v59 }
 0x155   :  { %v852_v15 = vpack.c.bf16 %v656_v63, %v655_v61  ;;  %v857_v16 = vpack.c.bf16 %v658_v1, %v657_v0  ;;  %v862_v17 = vpack.c.bf16 %v660_v4, %v659_v2  ;;  %v867_v19 = vpack.c.bf16 %v662_v9, %v661_v6 }
 0x156   :  { %833 = vst [vmem:[%s1333_s4] sm:$0xff] %v832_v10   ;;  %869 = vst [vmem:[%s1333_s4 + $0x8] sm:$0xff] %v837_v11  }
 0x157   :  { %870 = vst [vmem:[%s1333_s4 + $0x10] sm:$0xff] %v842_v12   ;;  %871 = vst [vmem:[%s1333_s4 + $0x18] sm:$0xff] %v847_v14  }
 0x158   :  { %872 = vst [vmem:[%s1333_s4 + $0x20] sm:$0xff] %v852_v15   ;;  %873 = vst [vmem:[%s1333_s4 + $0x28] sm:$0xff] %v857_v16  }
 0x159   :  { %874 = vst [vmem:[%s1333_s4 + $0x30] sm:$0xff] %v862_v17   ;;  %875 = vst [vmem:[%s1333_s4 + $0x38] sm:$0xff] %v867_v19  }

// kernel: lightweight_unetx_forward.19
= control target key start
LH: loop header
LB: loop body
LE: loop exit
PB: predicated region body
PF: predicated region fallthrough
CT: control target
= control target key end

     0   :  { %v320_v0 = vmov 0   ;;  %vm112_vm0 = vcmask 130048   ;;  %v203_v50 = vlaneseq  ;;  %s397_s1 = inlined_call_operand.vmem [shape: bf16[144,128], index: 1, kind: input, shape index: {}]   ;;  %s398_s0 = inlined_call_operand.vmem [shape: bf16[32,144], index: 0, kind: input, shape index: {}]   ;;  %s399_s2 = inlined_call_operand.vmem [shape: f32[1,128], index: 2, kind: input, shape index: {}]   ;;  %s400_s3 = inlined_call_operand.vmem [shape: f32[1,128], index: 3, kind: input, shape index: {}]   ;;  %s401_s4 = inlined_call_operand.vmem [shape: bf16[32,128], index: 4, kind: output, shape index: {}]  }
   0x1   :  { %119 = vmatprep.subr.bf16.mxu0 %v320_v0  ;;  %284 = vmatprep.subr.bf16.mxu1 %v320_v0  ;;  %v303_v1 = vld [vmem:[%s397_s1 + $0x38] sm:$0xff]   ;;  %v304_v2 = vld [vmem:[%s397_s1 + $0x30] sm:$0xff]   ;;  %v305_v3 = vld [vmem:[%s397_s1 + $0x28] sm:$0xff]  }
   0x2   :  { %120 = vmatpush1.bf16.msra.mxu0 %v303_v1  ;;  %293 = vmatpush1.bf16.msra.mxu1 %v303_v1  ;;  %v306_v4 = vld [vmem:[%s397_s1 + $0x20] sm:$0xff]   ;;  %v317_v6 = vld [vmem:[%s398_s0 + $0x14] ss:$8 sps:$4 sm:$0xff]   ;;  %v309_v9 = vld [vmem:[%s397_s1 + $0x8] sm:$0xff]   ;;  %v204_v51 = vshrl.u32 %v203_v50, 7 }
   0x3   :  { %121 = vmatprep.subr.bf16.mxu0 %v320_v0  ;;  %285 = vmatprep.subr.bf16.mxu1 %v320_v0  ;;  %v314_v5 = vld [vmem:[%s398_s0 + $0x4] ss:$8 sps:$4 sm:$0xff]   ;;  %v307_v7 = vld [vmem:[%s397_s1 + $0x18] sm:$0xff]   ;;  %v308_v8 = vld [vmem:[%s397_s1 + $0x10] sm:$0xff]  }
   0x4   :  { %263 = vmatprep.mubr.msk.bf16.mxu0 %vm112_vm0, %v314_v5  ;;  %264 = vmatprep.mubr.msk.bf16.mxu1 %vm112_vm0, %v317_v6  ;;  %v310_v10 = vld [vmem:[%s397_s1] sm:$0xff]   ;;  %v315_v13 = vld [vmem:[%s398_s0 + $0x10] ss:$8 sps:$4 sm:$0xff]   ;;  %v205_v53 = vsub.s32 0, %v204_v51 }
   0x5   :  { %v311_v11 = vld [vmem:[%s397_s1 + $0x40] sm:$0xff]  }
   0x6   :  { %122 = vmatpush1.bf16.msra.mxu0 %v304_v2  ;;  %294 = vmatpush1.bf16.msra.mxu1 %v304_v2  ;;  %v312_v12 = vld [vmem:[%s398_s0] ss:$8 sps:$4 sm:$0xff]  }
   0x7   :  { %123 = vmatprep.subr.bf16.mxu0 %v320_v0  ;;  %286 = vmatprep.subr.bf16.mxu1 %v320_v0  ;;  %v195_v52 = vld [vmem:[%s399_s2] sm:$0x1] }
   0x8   :  { %v199_v56 = vld [vmem:[%s400_s3] sm:$0x1] }
   0xa   :  { %124 = vmatpush1.bf16.msra.mxu0 %v305_v3  ;;  %295 = vmatpush1.bf16.msra.mxu1 %v305_v3 }
   0xb   :  { %125 = vmatprep.subr.bf16.mxu0 %v320_v0  ;;  %287 = vmatprep.subr.bf16.mxu1 %v320_v0 }
   0xe   :  { %126 = vmatpush1.bf16.msra.mxu0 %v306_v4  ;;  %296 = vmatpush1.bf16.msra.mxu1 %v306_v4 }
   0xf   :  { %127 = vmatprep.subr.bf16.mxu0 %v320_v0  ;;  %288 = vmatprep.subr.bf16.mxu1 %v320_v0 }
  0x12   :  { %128 = vmatpush1.bf16.msra.mxu0 %v307_v7  ;;  %297 = vmatpush1.bf16.msra.mxu1 %v307_v7 }
  0x13   :  { %129 = vmatprep.subr.bf16.mxu0 %v320_v0  ;;  %289 = vmatprep.subr.bf16.mxu1 %v320_v0 }
  0x16   :  { %130 = vmatpush1.bf16.msra.mxu0 %v308_v8  ;;  %298 = vmatpush1.bf16.msra.mxu1 %v308_v8 }
  0x17   :  { %131 = vmatprep.subr.bf16.mxu0 %v320_v0  ;;  %290 = vmatprep.subr.bf16.mxu1 %v320_v0 }
  0x1a   :  { %132 = vmatpush1.bf16.msra.mxu0 %v309_v9  ;;  %299 = vmatpush1.bf16.msra.mxu1 %v309_v9 }
  0x1b   :  { %133 = vmatprep.subr.bf16.mxu0 %v320_v0  ;;  %291 = vmatprep.subr.bf16.mxu1 %v320_v0 }
  0x1e   :  { %134 = vmatpush1.bf16.msra.mxu0 %v310_v10  ;;  %300 = vmatpush1.bf16.msra.mxu1 %v310_v10 }
  0x1f   :  { %149 = vmatprep.subr.bf16.mxu0 %v320_v0  ;;  %292 = vmatprep.subr.bf16.mxu1 %v320_v0 }
  0x22   :  { %150 = vmatpush2.bf16.msra.mxu0 %v311_v11  ;;  %301 = vmatpush2.bf16.msra.mxu1 %v311_v11 }
  0x25   :  { %152 = vmatmul.mubr.bf16.vlgmr.msra.gmra.mxu0 %v312_v12  ;;  %160 = vmatmul.mubr.bf16.vlgmr.msra.gmra.mxu1 %v315_v13 }
  0xe5   :  { %v153_v14 = vpop.f32.mrf.mxu0  ;;  %v161_v15 = vpop.f32.mrf.mxu1 }
  0xe6   :  { %v178_v20 = vmul.f32 %v153_v14, %v153_v14  ;;  %v180_v25 = vmul.f32 %v161_v15, %v161_v15 }
  0xe7   :  { %v155_v16 = vpop.f32.mrf.mxu0  ;;  %v163_v17 = vpop.f32.mrf.mxu1 }
  0xe9   :  { %v156_v18 = vpop.f32.mrf.mxu0  ;;  %v164_v19 = vpop.f32.mrf.mxu1 }
  0xea   :  { %v168_v21 = vadd.f32 %v156_v18, %v153_v14  ;;  %v179_v22 = vmul.f32 %v156_v18, %v156_v18  ;;  %v181_v29 = vmul.f32 %v164_v19, %v164_v19 }
  0xeb   :  { %v158_v23 = vpop.f32.mrf.mxu0  ;;  %v166_v24 = vpop.f32.mrf.mxu1 }
  0xec   :  { %v182_v26 = vadd.f32 %v179_v22, %v178_v20  ;;  %v169_v27 = vadd.f32 %v168_v21, %v161_v15 }
  0xee   :  { %v170_v28 = vadd.f32 %v169_v27, %v164_v19  ;;  %v183_v30 = vadd.f32 %v182_v26, %v180_v25 }
  0xf0   :  { %v171_v31 = vrot.slane %v170_v28, 4  ;;  %v184_v32 = vadd.f32 %v183_v30, %v181_v29 }
  0xf2   :  { %v172_v33 = vadd.f32 %v171_v31, %v170_v28  ;;  %v185_v34 = vrot.slane %v184_v32, 4 }
  0xf4   :  { %v173_v35 = vrot.slane %v172_v33, 2  ;;  %v186_v36 = vadd.f32 %v185_v34, %v184_v32 }
  0xf6   :  { %v174_v37 = vadd.f32 %v173_v35, %v172_v33  ;;  %v187_v38 = vrot.slane %v186_v36, 2 }
  0xf8   :  { %v175_v39 = vrot.slane %v174_v37, 1  ;;  %v188_v40 = vadd.f32 %v187_v38, %v186_v36 }
  0xfa   :  { %v176_v41 = vadd.f32 %v175_v39, %v174_v37  ;;  %v189_v42 = vrot.slane %v188_v40, 1 }
  0xfc   :  { %v177_v43 = vmul.f32 0.03125, %v176_v41  ;;  %v190_v44 = vadd.f32 %v189_v42, %v188_v40 }
  0xfe   :  { %v191_v45 = vmul.f32 0.03125, %v190_v44  ;;  %v192_v46 = vmul.f32 %v177_v43, %v177_v43 }
 0x100   :  { %v193_v47 = vsub.f32 %v191_v45, %v192_v46 }
 0x102   :  { %v194_v48 = vmax.f32 %v193_v47, 0.0 }
 0x104   :  { %v196_v49 = vadd.f32 1e-05, %v194_v48 }
 0x106   :  { %318 = vrsqrt.f32 %v196_v49 }
 0x113   :  { %v319_v54 = vpop.eup %318 }
 0x114   :  { %v198_v55 = vmul.f32 %v319_v54, %v195_v52 }
 0x116   :  { %v200_v57 = vmul.f32 %v198_v55, %v177_v43  ;;  %v206_v58 = vrot.slane %v198_v55, %v205_v53 }
 0x118   :  { %v201_v59 = vsub.f32 %v199_v56, %v200_v57  ;;  %v208_v60 = vmul.f32 %v206_v58, %v153_v14  ;;  %v209_v61 = vmul.f32 %v206_v58, %v156_v18  ;;  %v210_v62 = vmul.f32 %v206_v58, %v161_v15 }
 0x119   :  { %v211_v63 = vmul.f32 %v206_v58, %v164_v19 }
 0x11a   :  { %v216_v0 = vrot.slane %v201_v59, %v205_v53 }
 0x11c   :  { %v218_v1 = vadd.f32 %v216_v0, %v208_v60  ;;  %v219_v2 = vadd.f32 %v216_v0, %v209_v61  ;;  %v220_v3 = vadd.f32 %v216_v0, %v210_v62  ;;  %v221_v4 = vadd.f32 %v216_v0, %v211_v63 }
 0x11e   :  { %v222_v5 = vmax.f32 %v218_v1, 0.0  ;;  %v223_v6 = vmax.f32 %v219_v2, 0.0  ;;  %v224_v7 = vmax.f32 %v220_v3, 0.0  ;;  %v225_v8 = vmax.f32 %v221_v4, 0.0 }
 0x120   :  { %v276_v9 = vpack.c.bf16 %v223_v6, %v222_v5  ;;  %v281_v10 = vpack.c.bf16 %v225_v8, %v224_v7 }
 0x122   :  { %277 = vst [vmem:[%s401_s4] sm:$0xff] %v276_v9   ;;  %283 = vst [vmem:[%s401_s4 + $0x8] sm:$0xff] %v281_v10  }

// kernel: lightweight_unetx_forward.20
= control target key start
LH: loop header
LB: loop body
LE: loop exit
PB: predicated region body
PF: predicated region fallthrough
CT: control target
= control target key end

     0   :  { %v213_v0 = vmov 0   ;;  %vm97_vm0 = vcmask 130048   ;;  %v167_v36 = vlaneseq  ;;  %s278_s1 = inlined_call_operand.vmem [shape: bf16[144,128], index: 1, kind: input, shape index: {}]   ;;  %s279_s0 = inlined_call_operand.vmem [shape: bf16[8,144], index: 0, kind: input, shape index: {}]   ;;  %s280_s2 = inlined_call_operand.vmem [shape: f32[1,128], index: 2, kind: input, shape index: {}]   ;;  %s281_s3 = inlined_call_operand.vmem [shape: f32[1,128], index: 3, kind: input, shape index: {}]   ;;  %s282_s4 = inlined_call_operand.vmem [shape: bf16[8,128], index: 4, kind: output, shape index: {}]  }
   0x1   :  { %101 = vmatprep.subr.bf16.mxu0 %v213_v0  ;;  %v200_v1 = vld [vmem:[%s278_s1 + $0x38] sm:$0xff]   ;;  %v201_v2 = vld [vmem:[%s278_s1 + $0x30] sm:$0xff]   ;;  %v202_v3 = vld [vmem:[%s278_s1 + $0x28] sm:$0xff]  }
   0x2   :  { %102 = vmatpush1.bf16.msra.mxu0 %v200_v1  ;;  %v18_v4 = vld [vmem:[%s279_s0] sm:$0xff]  ;;  %v204_v7 = vld [vmem:[%s278_s1 + $0x18] sm:$0xff]   ;;  %v205_v8 = vld [vmem:[%s278_s1 + $0x10] sm:$0xff]   ;;  %v168_v37 = vshrl.u32 %v167_v36, 7 }
   0x3   :  { %103 = vmatprep.subr.bf16.mxu0 %v213_v0  ;;  %v203_v5 = vld [vmem:[%s278_s1 + $0x20] sm:$0xff]   ;;  %v188_v6 = vcombine.high %v18_v4, %v18_v4  ;;  %v206_v9 = vld [vmem:[%s278_s1 + $0x8] sm:$0xff]   ;;  %v187_v12 = vcombine.low %v18_v4, %v18_v4 }
   0x4   :  { %v207_v10 = vld [vmem:[%s278_s1] sm:$0xff]   ;;  %v169_v39 = vsub.s32 0, %v168_v37 }
   0x5   :  { %198 = vmatprep.mubr.msk.bf16.mxu0 %vm97_vm0, %v188_v6  ;;  %v208_v11 = vld [vmem:[%s278_s1 + $0x40] sm:$0xff]  }
   0x6   :  { %104 = vmatpush1.bf16.msra.mxu0 %v201_v2  ;;  %v159_v38 = vld [vmem:[%s280_s2] sm:$0x1] }
   0x7   :  { %105 = vmatprep.subr.bf16.mxu0 %v213_v0  ;;  %v163_v42 = vld [vmem:[%s281_s3] sm:$0x1] }
   0xa   :  { %106 = vmatpush1.bf16.msra.mxu0 %v202_v3 }
   0xb   :  { %107 = vmatprep.subr.bf16.mxu0 %v213_v0 }
   0xe   :  { %108 = vmatpush1.bf16.msra.mxu0 %v203_v5 }
   0xf   :  { %109 = vmatprep.subr.bf16.mxu0 %v213_v0 }
  0x12   :  { %110 = vmatpush1.bf16.msra.mxu0 %v204_v7 }
  0x13   :  { %111 = vmatprep.subr.bf16.mxu0 %v213_v0 }
  0x16   :  { %112 = vmatpush1.bf16.msra.mxu0 %v205_v8 }
  0x17   :  { %113 = vmatprep.subr.bf16.mxu0 %v213_v0 }
  0x1a   :  { %114 = vmatpush1.bf16.msra.mxu0 %v206_v9 }
  0x1b   :  { %115 = vmatprep.subr.bf16.mxu0 %v213_v0 }
  0x1e   :  { %116 = vmatpush1.bf16.msra.mxu0 %v207_v10 }
  0x1f   :  { %131 = vmatprep.subr.bf16.mxu0 %v213_v0 }
  0x22   :  { %132 = vmatpush2.bf16.msra.mxu0 %v208_v11 }
  0x25   :  { %134 = vmatmul.mubr.bf16.vlgmr.msra.gmra.mxu0 %v187_v12 }
  0xe5   :  { %v135_v13 = vpop.f32.mrf.mxu0 }
  0xe6   :  { %v141_v14 = vrot.slane %v135_v13, 4  ;;  %v148_v15 = vmul.f32 %v135_v13, %v135_v13 }
  0xe7   :  { %v137_v16 = vpop.f32.mrf.mxu0 }
  0xe8   :  { %v142_v17 = vadd.f32 %v141_v14, %v135_v13  ;;  %v149_v18 = vrot.slane %v148_v15, 4 }
  0xe9   :  { %v138_v19 = vpop.f32.mrf.mxu0 }
  0xea   :  { %v143_v20 = vrot.slane %v142_v17, 2  ;;  %v150_v21 = vadd.f32 %v149_v18, %v148_v15 }
  0xeb   :  { %v139_v22 = vpop.f32.mrf.mxu0 }
  0xec   :  { %v144_v23 = vadd.f32 %v143_v20, %v142_v17  ;;  %v151_v24 = vrot.slane %v150_v21, 2 }
  0xee   :  { %v145_v25 = vrot.slane %v144_v23, 1  ;;  %v152_v26 = vadd.f32 %v151_v24, %v150_v21 }
  0xf0   :  { %v146_v27 = vadd.f32 %v145_v25, %v144_v23  ;;  %v153_v28 = vrot.slane %v152_v26, 1 }
  0xf2   :  { %v147_v29 = vmul.f32 0.125, %v146_v27  ;;  %v154_v30 = vadd.f32 %v153_v28, %v152_v26 }
  0xf4   :  { %v155_v31 = vmul.f32 0.125, %v154_v30  ;;  %v156_v32 = vmul.f32 %v147_v29, %v147_v29 }
  0xf6   :  { %v157_v33 = vsub.f32 %v155_v31, %v156_v32 }
  0xf8   :  { %v158_v34 = vmax.f32 %v157_v33, 0.0 }
  0xfa   :  { %v160_v35 = vadd.f32 1e-05, %v158_v34 }
  0xfc   :  { %211 = vrsqrt.f32 %v160_v35 }
 0x109   :  { %v212_v40 = vpop.eup %211 }
 0x10a   :  { %v162_v41 = vmul.f32 %v212_v40, %v159_v38 }
 0x10c   :  { %v164_v43 = vmul.f32 %v162_v41, %v147_v29  ;;  %v170_v44 = vrot.slane %v162_v41, %v169_v39 }
 0x10e   :  { %v165_v45 = vsub.f32 %v163_v42, %v164_v43  ;;  %v172_v46 = vmul.f32 %v170_v44, %v135_v13 }
 0x110   :  { %v177_v47 = vrot.slane %v165_v45, %v169_v39 }
 0x112   :  { %v179_v48 = vadd.f32 %v177_v47, %v172_v46 }
 0x114   :  { %v180_v49 = vmax.f32 %v179_v48, 0.0 }
 0x116   :  { %v181_v50 = vpack.c.bf16 %v180_v49, %v180_v49 }
 0x118   :  { %182 = vst [vmem:[%s282_s4] sm:$0xf] %v181_v50 }

// kernel: lightweight_unetx_forward.22
= control target key start
LH: loop header
LB: loop body
LE: loop exit
PB: predicated region body
PF: predicated region fallthrough
CT: control target
= control target key end

     0   :  { %v384_v1 = vmov 0.0   ;;  %vm385_vm0 = vmmov 0   ;;  %vm174_vm1 = vcmask 261120   ;;  %v284_v52 = vlaneseq  ;;  %s480_s1 = inlined_call_operand.vmem [shape: bf16[288,128], index: 1, kind: input, shape index: {}]   ;;  %s481_s0 = inlined_call_operand.vmem [shape: bf16[8,288], index: 0, kind: input, shape index: {}]   ;;  %s482_s2 = inlined_call_operand.vmem [shape: f32[1,128], index: 2, kind: input, shape index: {}]   ;;  %s483_s3 = inlined_call_operand.vmem [shape: f32[1,128], index: 3, kind: input, shape index: {}]   ;;  %s484_s4 = inlined_call_operand.vmem [shape: bf16[8,128], index: 4, kind: output, shape index: {}]  }
   0x1   :  { %v361_v0 = vld [vmem:[%s480_s1 + $0x78] sm:$0xff]   ;;  %351 = vmatprep.subr.bf16.mxu1 %v384_v1  ;;  %355 = vmatprep.mubr.msk.bf16.mxu1 %vm385_vm0, %v384_v1  ;;  %v363_v3 = vld [vmem:[%s480_s1 + $0x70] sm:$0xff]   ;;  %v365_v5 = vld [vmem:[%s480_s1 + $0x68] sm:$0xff]  }
   0x2   :  { %v362_v2 = vld [vmem:[%s480_s1 + $0x38] sm:$0xff]   ;;  %326 = vmatprep.subr.bf16.mxu0 %v361_v0  ;;  %v364_v4 = vld [vmem:[%s480_s1 + $0x30] sm:$0xff]   ;;  %v366_v6 = vld [vmem:[%s480_s1 + $0x28] sm:$0xff]   ;;  %v285_v53 = vshrl.u32 %v284_v52, 7 }
   0x3   :  { %327 = vmatpush3.bf16.msra.mxu0 %v362_v2  ;;  %v367_v7 = vld [vmem:[%s480_s1 + $0x60] sm:$0xff]   ;;  %v369_v9 = vld [vmem:[%s480_s1 + $0x58] sm:$0xff]   ;;  %v373_v10 = vld [vmem:[%s480_s1 + $0x88] sm:$0xff]  }
   0x4   :  { %328 = vmatprep.subr.bf16.mxu0 %v363_v3  ;;  %v368_v8 = vld [vmem:[%s480_s1 + $0x20] sm:$0xff]   ;;  %v370_v11 = vld [vmem:[%s480_s1 + $0x18] sm:$0xff]   ;;  %352 = vmatpush3.bf16.msra.mxu1 %v373_v10  ;;  %v371_v13 = vld [vmem:[%s480_s1 + $0x50] sm:$0xff]   ;;  %v286_v55 = vsub.s32 0, %v285_v53 }
   0x5   :  { %353 = vmatprep.subr.bf16.mxu1 %v384_v1  ;;  %v376_v12 = vld [vmem:[%s480_s1 + $0x80] sm:$0xff]   ;;  %v379_v14 = vld [vmem:[%s481_s0 + $0x8] ss:$0 sps:$4 sm:$0xff]   ;;  %v372_v16 = vld [vmem:[%s480_s1 + $0x10] sm:$0xff]  }
   0x6   :  { %v18_v15 = vld [vmem:[%s481_s0] sm:$0xff]  ;;  %v374_v18 = vld [vmem:[%s480_s1 + $0x48] sm:$0xff]  }
   0x7   :  { %329 = vmatpush3.bf16.msra.mxu0 %v364_v4  ;;  %v305_v17 = vcombine.high %v18_v15, %v18_v15  ;;  %v375_v19 = vld [vmem:[%s480_s1 + $0x8] sm:$0xff]   ;;  %v377_v20 = vld [vmem:[%s480_s1 + $0x40] sm:$0xff]   ;;  %v304_v22 = vcombine.low %v18_v15, %v18_v15 }
   0x8   :  { %330 = vmatprep.subr.bf16.mxu0 %v365_v5  ;;  %354 = vmatpush3.bf16.msra.mxu1 %v376_v12  ;;  %v378_v21 = vld [vmem:[%s480_s1] sm:$0xff]  }
   0x9   :  { %210 = vmatprep.mubr.bf16.mxu0 %v305_v17  ;;  %v276_v54 = vld [vmem:[%s482_s2] sm:$0x1] }
   0xa   :  { %v280_v58 = vld [vmem:[%s483_s3] sm:$0x1] }
   0xb   :  { %331 = vmatpush3.bf16.msra.mxu0 %v366_v6  ;;  %356 = vmatmul.mubr.msk.bf16.vlgmr.msra.gmra.mxu1 %vm174_vm1, %v379_v14 }
   0xc   :  { %332 = vmatprep.subr.bf16.mxu0 %v367_v7 }
   0xf   :  { %333 = vmatpush3.bf16.msra.mxu0 %v368_v8 }
  0x10   :  { %334 = vmatprep.subr.bf16.mxu0 %v369_v9 }
  0x13   :  { %335 = vmatpush3.bf16.msra.mxu0 %v370_v11 }
  0x14   :  { %336 = vmatprep.subr.bf16.mxu0 %v371_v13 }
  0x17   :  { %337 = vmatpush3.bf16.msra.mxu0 %v372_v16 }
  0x18   :  { %338 = vmatprep.subr.bf16.mxu0 %v374_v18 }
  0x1b   :  { %339 = vmatpush3.bf16.msra.mxu0 %v375_v19 }
  0x1c   :  { %340 = vmatprep.subr.bf16.mxu0 %v377_v20 }
  0x1f   :  { %341 = vmatpush3.bf16.msra.mxu0 %v378_v21 }
  0x22   :  { %211 = vmatmul.mubr.bf16.vlgmr.msra.gmra.mxu0 %v304_v22 }
  0xcb   :  { %v252_v23 = vpop.f32.mrf.mxu1 }
  0xcd   :  { %v357_v24 = vpop.f32.mrf.mxu1 }
  0xcf   :  { %v255_v25 = vpop.f32.mrf.mxu1 }
  0xd1   :  { %v358_v26 = vpop.f32.mrf.mxu1 }
  0xe2   :  { %v342_v27 = vpop.f32.mrf.mxu0 }
  0xe4   :  { %v343_v28 = vpop.f32.mrf.mxu0 }
  0xe5   :  { %v344_v29 = vadd.f32 %v343_v28, %v342_v27 }
  0xe6   :  { %v345_v30 = vpop.f32.mrf.mxu0 }
  0xe7   :  { %v253_v31 = vadd.f32 %v344_v29, %v252_v23 }
  0xe8   :  { %v346_v32 = vpop.f32.mrf.mxu0 }
  0xe9   :  { %v258_v33 = vrot.slane %v253_v31, 4  ;;  %v265_v34 = vmul.f32 %v253_v31, %v253_v31 }
  0xeb   :  { %v259_v35 = vadd.f32 %v258_v33, %v253_v31  ;;  %v266_v36 = vrot.slane %v265_v34, 4 }
  0xed   :  { %v260_v37 = vrot.slane %v259_v35, 2  ;;  %v267_v38 = vadd.f32 %v266_v36, %v265_v34 }
  0xef   :  { %v261_v39 = vadd.f32 %v260_v37, %v259_v35  ;;  %v268_v40 = vrot.slane %v267_v38, 2 }
  0xf1   :  { %v262_v41 = vrot.slane %v261_v39, 1  ;;  %v269_v42 = vadd.f32 %v268_v40, %v267_v38 }
  0xf3   :  { %v263_v43 = vadd.f32 %v262_v41, %v261_v39  ;;  %v270_v44 = vrot.slane %v269_v42, 1 }
  0xf5   :  { %v264_v45 = vmul.f32 0.5, %v263_v43  ;;  %v271_v46 = vadd.f32 %v270_v44, %v269_v42 }
  0xf7   :  { %v272_v47 = vmul.f32 0.5, %v271_v46  ;;  %v273_v48 = vmul.f32 %v264_v45, %v264_v45 }
  0xf9   :  { %v274_v49 = vsub.f32 %v272_v47, %v273_v48 }
  0xfb   :  { %v275_v50 = vmax.f32 %v274_v49, 0.0 }
  0xfd   :  { %v277_v51 = vadd.f32 1e-05, %v275_v50 }
  0xff   :  { %382 = vrsqrt.f32 %v277_v51 }
 0x10c   :  { %v383_v56 = vpop.eup %382 }
 0x10d   :  { %v279_v57 = vmul.f32 %v383_v56, %v276_v54 }
 0x10f   :  { %v281_v59 = vmul.f32 %v279_v57, %v264_v45  ;;  %v287_v60 = vrot.slane %v279_v57, %v286_v55 }
 0x111   :  { %v282_v61 = vsub.f32 %v280_v58, %v281_v59  ;;  %v289_v62 = vmul.f32 %v287_v60, %v253_v31 }
 0x113   :  { %v294_v63 = vrot.slane %v282_v61, %v286_v55 }
 0x115   :  { %v296_v0 = vadd.f32 %v294_v63, %v289_v62 }
 0x117   :  { %v297_v1 = vmax.f32 %v296_v0, 0.0 }
 0x119   :  { %v298_v2 = vpack.c.bf16 %v297_v1, %v297_v1 }
 0x11b   :  { %299 = vst [vmem:[%s484_s4] sm:$0xf] %v298_v2 }

// kernel: lightweight_unetx_forward.21
= control target key start
LH: loop header
LB: loop body
LE: loop exit
PB: predicated region body
PF: predicated region fallthrough
CT: control target
= control target key end

     0   :  { %v230_v0 = vmov 0   ;;  %vm97_vm0 = vcmask 130048   ;;  %v167_v36 = vlaneseq  ;;  %s295_s1 = inlined_call_operand.vmem [shape: bf16[144,128], index: 1, kind: input, shape index: {}]   ;;  %s296_s0 = inlined_call_operand.vmem [shape: bf16[8,144], index: 0, kind: input, shape index: {}]   ;;  %s297_s2 = inlined_call_operand.vmem [shape: f32[1,128], index: 2, kind: input, shape index: {}]   ;;  %s298_s3 = inlined_call_operand.vmem [shape: f32[1,128], index: 3, kind: input, shape index: {}]   ;;  %s299_s4 = inlined_call_operand.vmem [shape: bf16[8,128], index: 4, kind: output, shape index: {}]  }
   0x1   :  { %101 = vmatprep.subr.bf16.mxu0 %v230_v0  ;;  %v213_v1 = vld [vmem:[%s295_s1 + $0x38] sm:$0xff]   ;;  %v214_v2 = vld [vmem:[%s295_s1 + $0x30] sm:$0xff]   ;;  %v215_v3 = vld [vmem:[%s295_s1 + $0x28] sm:$0xff]  }
   0x2   :  { %102 = vmatpush1.bf16.msra.mxu0 %v213_v1  ;;  %v18_v4 = vld [vmem:[%s296_s0] sm:$0xff]  ;;  %v217_v7 = vld [vmem:[%s295_s1 + $0x18] sm:$0xff]   ;;  %v218_v8 = vld [vmem:[%s295_s1 + $0x10] sm:$0xff]   ;;  %v168_v37 = vshrl.u32 %v167_v36, 7 }
   0x3   :  { %103 = vmatprep.subr.bf16.mxu0 %v230_v0  ;;  %v216_v5 = vld [vmem:[%s295_s1 + $0x20] sm:$0xff]   ;;  %v201_v6 = vcombine.high %v18_v4, %v18_v4  ;;  %v219_v9 = vld [vmem:[%s295_s1 + $0x8] sm:$0xff]   ;;  %v200_v12 = vcombine.low %v18_v4, %v18_v4 }
   0x4   :  { %v220_v10 = vld [vmem:[%s295_s1] sm:$0xff]   ;;  %v169_v39 = vsub.s32 0, %v168_v37 }
   0x5   :  { %211 = vmatprep.mubr.msk.bf16.mxu0 %vm97_vm0, %v201_v6  ;;  %v221_v11 = vld [vmem:[%s295_s1 + $0x40] sm:$0xff]  }
   0x6   :  { %104 = vmatpush1.bf16.msra.mxu0 %v214_v2  ;;  %v159_v38 = vld [vmem:[%s297_s2] sm:$0x1] }
   0x7   :  { %105 = vmatprep.subr.bf16.mxu0 %v230_v0  ;;  %v163_v42 = vld [vmem:[%s298_s3] sm:$0x1] }
   0xa   :  { %106 = vmatpush1.bf16.msra.mxu0 %v215_v3 }
   0xb   :  { %107 = vmatprep.subr.bf16.mxu0 %v230_v0 }
   0xe   :  { %108 = vmatpush1.bf16.msra.mxu0 %v216_v5 }
   0xf   :  { %109 = vmatprep.subr.bf16.mxu0 %v230_v0 }
  0x12   :  { %110 = vmatpush1.bf16.msra.mxu0 %v217_v7 }
  0x13   :  { %111 = vmatprep.subr.bf16.mxu0 %v230_v0 }
  0x16   :  { %112 = vmatpush1.bf16.msra.mxu0 %v218_v8 }
  0x17   :  { %113 = vmatprep.subr.bf16.mxu0 %v230_v0 }
  0x1a   :  { %114 = vmatpush1.bf16.msra.mxu0 %v219_v9 }
  0x1b   :  { %115 = vmatprep.subr.bf16.mxu0 %v230_v0 }
  0x1e   :  { %116 = vmatpush1.bf16.msra.mxu0 %v220_v10 }
  0x1f   :  { %131 = vmatprep.subr.bf16.mxu0 %v230_v0 }
  0x22   :  { %132 = vmatpush2.bf16.msra.mxu0 %v221_v11 }
  0x25   :  { %134 = vmatmul.mubr.bf16.vlgmr.msra.gmra.mxu0 %v200_v12 }
  0xe5   :  { %v135_v13 = vpop.f32.mrf.mxu0 }
  0xe6   :  { %v141_v14 = vrot.slane %v135_v13, 4  ;;  %v148_v15 = vmul.f32 %v135_v13, %v135_v13 }
  0xe7   :  { %v137_v16 = vpop.f32.mrf.mxu0 }
  0xe8   :  { %v142_v17 = vadd.f32 %v141_v14, %v135_v13  ;;  %v149_v18 = vrot.slane %v148_v15, 4 }
  0xe9   :  { %v138_v19 = vpop.f32.mrf.mxu0 }
  0xea   :  { %v143_v20 = vrot.slane %v142_v17, 2  ;;  %v150_v21 = vadd.f32 %v149_v18, %v148_v15 }
  0xeb   :  { %v139_v22 = vpop.f32.mrf.mxu0 }
  0xec   :  { %v144_v23 = vadd.f32 %v143_v20, %v142_v17  ;;  %v151_v24 = vrot.slane %v150_v21, 2 }
  0xee   :  { %v145_v25 = vrot.slane %v144_v23, 1  ;;  %v152_v26 = vadd.f32 %v151_v24, %v150_v21 }
  0xf0   :  { %v146_v27 = vadd.f32 %v145_v25, %v144_v23  ;;  %v153_v28 = vrot.slane %v152_v26, 1 }
  0xf2   :  { %v147_v29 = vmul.f32 0.5, %v146_v27  ;;  %v154_v30 = vadd.f32 %v153_v28, %v152_v26 }
  0xf4   :  { %v155_v31 = vmul.f32 0.5, %v154_v30  ;;  %v156_v32 = vmul.f32 %v147_v29, %v147_v29 }
  0xf6   :  { %v157_v33 = vsub.f32 %v155_v31, %v156_v32 }
  0xf8   :  { %v158_v34 = vmax.f32 %v157_v33, 0.0 }
  0xfa   :  { %v160_v35 = vadd.f32 1e-05, %v158_v34 }
  0xfc   :  { %224 = vrsqrt.f32 %v160_v35 }
 0x109   :  { %v225_v40 = vpop.eup %224 }
 0x10a   :  { %v162_v41 = vmul.f32 %v225_v40, %v159_v38 }
 0x10c   :  { %v164_v43 = vmul.f32 %v162_v41, %v147_v29  ;;  %v170_v44 = vrot.slane %v162_v41, %v169_v39 }
 0x10e   :  { %v165_v45 = vsub.f32 %v163_v42, %v164_v43  ;;  %v172_v46 = vmul.f32 %v170_v44, %v135_v13 }
 0x110   :  { %v177_v47 = vrot.slane %v165_v45, %v169_v39 }
 0x112   :  { %v179_v48 = vadd.f32 %v177_v47, %v172_v46 }
 0x114   :  { %v180_v49 = vmax.f32 %v179_v48, 0.0 }
 0x116   :  { %v181_v50 = vmul.f32 %v180_v49, %v180_v49 }
 0x118   :  { %182 = vadd.xlane.f32.xlu0 %v181_v50 }
 0x1a1   :  { %v183_v51 = vpop.xlane.xlu0 %182 }
 0x1a2   :  { %226 = vrsqrt.f32 %v183_v51  ;;  %vm186_vm1 = vcmp.eq.f32.partialorder %v183_v51, inf  ;;  %v189_v54 = vand.u32 2147483648, %v183_v51  ;;  %vm188_vm2 = vcmp.eq.f32.partialorder %v183_v51, 0.0 }
 0x1af   :  { %v227_v52 = vpop.eup %226 }
 0x1b0   :  { %v185_v53 = vmul.f32 %v227_v52, %v183_v51 }
 0x1b2   :  { %v187_v55 = vsel %vm186_vm1, %v183_v51, %v185_v53 }
 0x1b3   :  { %v190_v56 = vsel %vm188_vm2, %v189_v54, %v187_v55 }
 0x1b4   :  { %v191_v57 = vmax.f32 %v190_v56, 1e-12 }
 0x1b6   :  { %228 = vrcp.f32 %v191_v57 }
 0x1c3   :  { %v229_v58 = vpop.eup %228 }
 0x1c4   :  { %v193_v59 = vmul.f32 %v229_v58, %v180_v49 }
 0x1c6   :  { %v194_v60 = vpack.c.bf16 %v193_v59, %v193_v59 }
 0x1c8   :  { %195 = vst [vmem:[%s299_s4] sm:$0xf] %v194_v60 }

// kernel: lightweight_unetx_forward.25
= control target key start
LH: loop header
LB: loop body
LE: loop exit
PB: predicated region body
PF: predicated region fallthrough
CT: control target
= control target key end

     0   :  { %v467_v0 = vmov 0   ;;  %vm249_vm0 = vcmask 392192   ;;  %v359_v63 = vlaneseq  ;;  %s600_s1 = inlined_call_operand.vmem [shape: bf16[432,128], index: 1, kind: input, shape index: {}]   ;;  %s601_s0 = inlined_call_operand.vmem [shape: bf16[8,432], index: 0, kind: input, shape index: {}]   ;;  %s602_s2 = inlined_call_operand.vmem [shape: f32[1,128], index: 2, kind: input, shape index: {}]   ;;  %s603_s3 = inlined_call_operand.vmem [shape: f32[1,128], index: 3, kind: input, shape index: {}]   ;;  %s604_s4 = inlined_call_operand.vmem [shape: bf16[8,128], index: 4, kind: output, shape index: {}]  }
   0x1   :  { %293 = vmatprep.subr.bf16.mxu1 %v467_v0  ;;  %v434_v1 = vld [vmem:[%s600_s1 + $0xb8] sm:$0xff]   ;;  %v437_v4 = vld [vmem:[%s600_s1 + $0xb0] sm:$0xff]   ;;  %v440_v7 = vld [vmem:[%s600_s1 + $0xa8] sm:$0xff]  }
   0x2   :  { %v435_v2 = vld [vmem:[%s600_s1 + $0x78] sm:$0xff]   ;;  %294 = vmatpush1.bf16.msra.mxu1 %v434_v1  ;;  %v438_v5 = vld [vmem:[%s600_s1 + $0x70] sm:$0xff]   ;;  %v441_v8 = vld [vmem:[%s600_s1 + $0x68] sm:$0xff]  }
   0x3   :  { %v436_v3 = vld [vmem:[%s600_s1 + $0x38] sm:$0xff]   ;;  %411 = vmatprep.subr.bf16.mxu0 %v435_v2  ;;  %295 = vmatprep.subr.bf16.mxu1 %v467_v0  ;;  %v439_v6 = vld [vmem:[%s600_s1 + $0x30] sm:$0xff]   ;;  %v442_v9 = vld [vmem:[%s600_s1 + $0x28] sm:$0xff]  }
   0x4   :  { %412 = vmatpush3.bf16.msra.mxu0 %v436_v3  ;;  %v443_v10 = vld [vmem:[%s600_s1 + $0xa0] sm:$0xff]   ;;  %v447_v13 = vld [vmem:[%s600_s1 + $0x58] sm:$0xff]   ;;  %v450_v16 = vld [vmem:[%s600_s1 + $0x50] sm:$0xff]  }
   0x5   :  { %413 = vmatprep.subr.bf16.mxu0 %v438_v5  ;;  %v444_v11 = vld [vmem:[%s600_s1 + $0x60] sm:$0xff]   ;;  %v446_v14 = vld [vmem:[%s600_s1 + $0x98] sm:$0xff]   ;;  %v449_v17 = vld [vmem:[%s600_s1 + $0x90] sm:$0xff]  }
   0x6   :  { %296 = vmatpush1.bf16.msra.mxu1 %v437_v4  ;;  %v445_v12 = vld [vmem:[%s600_s1 + $0x20] sm:$0xff]   ;;  %v448_v15 = vld [vmem:[%s600_s1 + $0x18] sm:$0xff]   ;;  %v451_v18 = vld [vmem:[%s600_s1 + $0x10] sm:$0xff]  }
   0x7   :  { %297 = vmatprep.subr.bf16.mxu1 %v467_v0  ;;  %v453_v19 = vld [vmem:[%s600_s1 + $0x48] sm:$0xff]   ;;  %v18_v22 = vld [vmem:[%s601_s0] sm:$0xff]  ;;  %v460_v29 = vld [vmem:[%s600_s1 + $0xd0] sm:$0xff]  }
   0x8   :  { %414 = vmatpush3.bf16.msra.mxu0 %v439_v6  ;;  %v452_v20 = vld [vmem:[%s600_s1 + $0x88] sm:$0xff]   ;;  %v456_v23 = vld [vmem:[%s600_s1 + $0x40] sm:$0xff]   ;;  %v380_v24 = vcombine.high %v18_v22, %v18_v22  ;;  %v379_v30 = vcombine.low %v18_v22, %v18_v22 }
   0x9   :  { %415 = vmatprep.subr.bf16.mxu0 %v441_v8  ;;  %v454_v21 = vld [vmem:[%s600_s1 + $0x8] sm:$0xff]   ;;  %v455_v25 = vld [vmem:[%s600_s1 + $0x80] sm:$0xff]  }
   0xa   :  { %298 = vmatpush1.bf16.msra.mxu1 %v440_v7  ;;  %285 = vmatprep.mubr.bf16.mxu0 %v380_v24  ;;  %v19_v26 = vld [vmem:[%s601_s0 + $0x8] sm:$0xff]  ;;  %v457_v27 = vld [vmem:[%s600_s1] sm:$0xff]  }
   0xb   :  { %299 = vmatprep.subr.bf16.mxu1 %v467_v0  ;;  %v382_v28 = vcombine.high %v19_v26, %v19_v26  ;;  %v461_v31 = vld [vmem:[%s600_s1 + $0xc8] sm:$0xff]   ;;  %v462_v32 = vld [vmem:[%s600_s1 + $0xc0] sm:$0xff]   ;;  %v381_v33 = vcombine.low %v19_v26, %v19_v26 }
   0xc   :  { %416 = vmatpush3.bf16.msra.mxu0 %v442_v9  ;;  %v351_v1 = vld [vmem:[%s602_s2] sm:$0x1] }
   0xd   :  { %417 = vmatprep.subr.bf16.mxu0 %v444_v11  ;;  %410 = vmatprep.mubr.msk.bf16.mxu1 %vm249_vm0, %v382_v28  ;;  %v355_v5 = vld [vmem:[%s603_s3] sm:$0x1] }
   0xe   :  { %300 = vmatpush1.bf16.msra.mxu1 %v443_v10 }
   0xf   :  { %301 = vmatprep.subr.bf16.mxu1 %v467_v0 }
  0x10   :  { %418 = vmatpush3.bf16.msra.mxu0 %v445_v12 }
  0x11   :  { %419 = vmatprep.subr.bf16.mxu0 %v447_v13 }
  0x12   :  { %302 = vmatpush1.bf16.msra.mxu1 %v446_v14 }
  0x13   :  { %303 = vmatprep.subr.bf16.mxu1 %v467_v0 }
  0x14   :  { %420 = vmatpush3.bf16.msra.mxu0 %v448_v15 }
  0x15   :  { %421 = vmatprep.subr.bf16.mxu0 %v450_v16 }
  0x16   :  { %304 = vmatpush1.bf16.msra.mxu1 %v449_v17 }
  0x17   :  { %305 = vmatprep.subr.bf16.mxu1 %v467_v0 }
  0x18   :  { %422 = vmatpush3.bf16.msra.mxu0 %v451_v18 }
  0x19   :  { %423 = vmatprep.subr.bf16.mxu0 %v453_v19 }
  0x1a   :  { %306 = vmatpush1.bf16.msra.mxu1 %v452_v20 }
  0x1b   :  { %307 = vmatprep.subr.bf16.mxu1 %v467_v0 }
  0x1c   :  { %424 = vmatpush3.bf16.msra.mxu0 %v454_v21 }
  0x1d   :  { %425 = vmatprep.subr.bf16.mxu0 %v456_v23 }
  0x1e   :  { %308 = vmatpush1.bf16.msra.mxu1 %v455_v25 }
  0x1f   :  { %319 = vmatprep.subr.bf16.mxu1 %v467_v0 }
  0x20   :  { %426 = vmatpush3.bf16.msra.mxu0 %v457_v27 }
  0x22   :  { %320 = vmatpush2.bf16.msra.mxu1 %v460_v29 }
  0x23   :  { %286 = vmatmul.mubr.bf16.vlgmr.msra.gmra.mxu0 %v379_v30  ;;  %321 = vmatprep.subr.bf16.mxu1 %v467_v0 }
  0x26   :  { %322 = vmatpush2.bf16.msra.mxu1 %v461_v31 }
  0x27   :  { %323 = vmatprep.subr.bf16.mxu1 %v467_v0  ;;  %v360_v0 = vshrl.u32 %v359_v63, 7 }
  0x29   :  { %v361_v2 = vsub.s32 0, %v360_v0 }
  0x2a   :  { %324 = vmatpush2.bf16.msra.mxu1 %v462_v32 }
  0x2d   :  { %326 = vmatmul.mubr.bf16.vlgmr.msra.gmra.mxu1 %v381_v33 }
  0xe3   :  { %v427_v34 = vpop.f32.mrf.mxu0 }
  0xe5   :  { %v428_v35 = vpop.f32.mrf.mxu0 }
  0xe6   :  { %v429_v38 = vadd.f32 %v428_v35, %v427_v34 }
  0xe7   :  { %v430_v36 = vpop.f32.mrf.mxu0 }
  0xe9   :  { %v431_v37 = vpop.f32.mrf.mxu0 }
  0xed   :  { %v327_v39 = vpop.f32.mrf.mxu1 }
  0xee   :  { %v328_v40 = vadd.f32 %v429_v38, %v327_v39 }
  0xef   :  { %v329_v41 = vpop.f32.mrf.mxu1 }
  0xf0   :  { %v333_v42 = vrot.slane %v328_v40, 4  ;;  %v340_v43 = vmul.f32 %v328_v40, %v328_v40 }
  0xf1   :  { %v330_v44 = vpop.f32.mrf.mxu1 }
  0xf2   :  { %v334_v45 = vadd.f32 %v333_v42, %v328_v40  ;;  %v341_v46 = vrot.slane %v340_v43, 4 }
  0xf3   :  { %v331_v47 = vpop.f32.mrf.mxu1 }
  0xf4   :  { %v335_v48 = vrot.slane %v334_v45, 2  ;;  %v342_v49 = vadd.f32 %v341_v46, %v340_v43 }
  0xf6   :  { %v336_v50 = vadd.f32 %v335_v48, %v334_v45  ;;  %v343_v51 = vrot.slane %v342_v49, 2 }
  0xf8   :  { %v337_v52 = vrot.slane %v336_v50, 1  ;;  %v344_v53 = vadd.f32 %v343_v51, %v342_v49 }
  0xfa   :  { %v338_v54 = vadd.f32 %v337_v52, %v336_v50  ;;  %v345_v55 = vrot.slane %v344_v53, 1 }
  0xfc   :  { %v339_v56 = vmul.f32 0.125, %v338_v54  ;;  %v346_v57 = vadd.f32 %v345_v55, %v344_v53 }
  0xfe   :  { %v347_v58 = vmul.f32 0.125, %v346_v57  ;;  %v348_v59 = vmul.f32 %v339_v56, %v339_v56 }
 0x100   :  { %v349_v60 = vsub.f32 %v347_v58, %v348_v59 }
 0x102   :  { %v350_v61 = vmax.f32 %v349_v60, 0.0 }
 0x104   :  { %v352_v62 = vadd.f32 1e-05, %v350_v61 }
 0x106   :  { %465 = vrsqrt.f32 %v352_v62 }
 0x113   :  { %v466_v3 = vpop.eup %465 }
 0x114   :  { %v354_v4 = vmul.f32 %v466_v3, %v351_v1 }
 0x116   :  { %v356_v6 = vmul.f32 %v354_v4, %v339_v56  ;;  %v362_v7 = vrot.slane %v354_v4, %v361_v2 }
 0x118   :  { %v357_v8 = vsub.f32 %v355_v5, %v356_v6  ;;  %v364_v9 = vmul.f32 %v362_v7, %v328_v40 }
 0x11a   :  { %v369_v10 = vrot.slane %v357_v8, %v361_v2 }
 0x11c   :  { %v371_v11 = vadd.f32 %v369_v10, %v364_v9 }
 0x11e   :  { %v372_v12 = vmax.f32 %v371_v11, 0.0 }
 0x120   :  { %v373_v13 = vpack.c.bf16 %v372_v12, %v372_v12 }
 0x122   :  { %374 = vst [vmem:[%s604_s4] sm:$0xf] %v373_v13 }

// kernel: lightweight_unetx_forward.28
= control target key start
LH: loop header
LB: loop body
LE: loop exit
PB: predicated region body
PF: predicated region fallthrough
CT: control target
= control target key end

     0   :  { %v593_v0 = vmov 0   ;;  %vm280_vm0 = vcmask 392192   ;;  %s749_s1 = inlined_call_operand.vmem [shape: bf16[432,128], index: 1, kind: input, shape index: {}]   ;;  %s750_s0 = inlined_call_operand.vmem [shape: bf16[32,432], index: 0, kind: input, shape index: {}]   ;;  %s751_s2 = inlined_call_operand.vmem [shape: f32[1,128], index: 2, kind: input, shape index: {}]   ;;  %s752_s3 = inlined_call_operand.vmem [shape: f32[1,128], index: 3, kind: input, shape index: {}]   ;;  %s753_s4 = inlined_call_operand.vmem [shape: bf16[32,128], index: 4, kind: output, shape index: {}]  }
   0x1   :  { %336 = vmatprep.subr.bf16.mxu1 %v593_v0  ;;  %v552_v1 = vld [vmem:[%s749_s1 + $0xb8] sm:$0xff]   ;;  %v555_v4 = vld [vmem:[%s749_s1 + $0xb0] sm:$0xff]   ;;  %v558_v7 = vld [vmem:[%s749_s1 + $0xa8] sm:$0xff]  }
   0x2   :  { %v553_v2 = vld [vmem:[%s749_s1 + $0x78] sm:$0xff]   ;;  %337 = vmatpush1.bf16.msra.mxu1 %v552_v1  ;;  %v556_v5 = vld [vmem:[%s749_s1 + $0x70] sm:$0xff]   ;;  %v559_v8 = vld [vmem:[%s749_s1 + $0x68] sm:$0xff]  }
   0x3   :  { %v554_v3 = vld [vmem:[%s749_s1 + $0x38] sm:$0xff]   ;;  %523 = vmatprep.subr.bf16.mxu0 %v553_v2  ;;  %338 = vmatprep.subr.bf16.mxu1 %v593_v0  ;;  %v557_v6 = vld [vmem:[%s749_s1 + $0x30] sm:$0xff]   ;;  %v560_v9 = vld [vmem:[%s749_s1 + $0x28] sm:$0xff]  }
   0x4   :  { %524 = vmatpush3.bf16.msra.mxu0 %v554_v3  ;;  %v561_v10 = vld [vmem:[%s749_s1 + $0xa0] sm:$0xff]   ;;  %v565_v13 = vld [vmem:[%s749_s1 + $0x58] sm:$0xff]   ;;  %v568_v16 = vld [vmem:[%s749_s1 + $0x50] sm:$0xff]  }
   0x5   :  { %525 = vmatprep.subr.bf16.mxu0 %v556_v5  ;;  %v562_v11 = vld [vmem:[%s749_s1 + $0x60] sm:$0xff]   ;;  %v564_v14 = vld [vmem:[%s749_s1 + $0x98] sm:$0xff]   ;;  %v567_v17 = vld [vmem:[%s749_s1 + $0x90] sm:$0xff]  }
   0x6   :  { %339 = vmatpush1.bf16.msra.mxu1 %v555_v4  ;;  %v563_v12 = vld [vmem:[%s749_s1 + $0x20] sm:$0xff]   ;;  %v566_v15 = vld [vmem:[%s749_s1 + $0x18] sm:$0xff]   ;;  %v569_v18 = vld [vmem:[%s749_s1 + $0x10] sm:$0xff]  }
   0x7   :  { %340 = vmatprep.subr.bf16.mxu1 %v593_v0  ;;  %v571_v19 = vld [vmem:[%s749_s1 + $0x48] sm:$0xff]   ;;  %v574_v22 = vld [vmem:[%s749_s1 + $0x40] sm:$0xff]   ;;  %v579_v26 = vld [vmem:[%s749_s1 + $0xd0] sm:$0xff]  }
   0x8   :  { %526 = vmatpush3.bf16.msra.mxu0 %v557_v6  ;;  %v570_v20 = vld [vmem:[%s749_s1 + $0x88] sm:$0xff]   ;;  %v578_v23 = vld [vmem:[%s750_s0 + $0x4] ss:$16 sps:$4 sm:$0xff]   ;;  %v576_v28 = vld [vmem:[%s750_s0] ss:$16 sps:$4 sm:$0xff]  }
   0x9   :  { %527 = vmatprep.subr.bf16.mxu0 %v559_v8  ;;  %v572_v21 = vld [vmem:[%s749_s1 + $0x8] sm:$0xff]   ;;  %v573_v24 = vld [vmem:[%s749_s1 + $0x80] sm:$0xff]   ;;  %319 = vmatprep.mubr.bf16.mxu0 %v578_v23 }
   0xa   :  { %341 = vmatpush1.bf16.msra.mxu1 %v558_v7  ;;  %v575_v25 = vld [vmem:[%s749_s1] sm:$0xff]   ;;  %v587_v27 = vld [vmem:[%s750_s0 + $0xc] ss:$16 sps:$4 sm:$0xff]   ;;  %v585_v33 = vld [vmem:[%s750_s0 + $0x8] ss:$16 sps:$4 sm:$0xff]  }
   0xb   :  { %342 = vmatprep.subr.bf16.mxu1 %v593_v0  ;;  %v581_v29 = vld [vmem:[%s750_s0 + $0x24] ss:$16 sps:$4 sm:$0xff]   ;;  %502 = vmatprep.mubr.msk.bf16.mxu1 %vm280_vm0, %v587_v27  ;;  %v580_v30 = vld [vmem:[%s749_s1 + $0xc8] sm:$0xff]   ;;  %v584_v32 = vld [vmem:[%s750_s0 + $0x20] ss:$16 sps:$4 sm:$0xff]  }
   0xc   :  { %528 = vmatpush3.bf16.msra.mxu0 %v560_v9  ;;  %v583_v31 = vld [vmem:[%s749_s1 + $0xc0] sm:$0xff]   ;;  %v588_v34 = vld [vmem:[%s750_s0 + $0x2c] ss:$16 sps:$4 sm:$0xff]   ;;  %v590_v35 = vld [vmem:[%s750_s0 + $0x28] ss:$16 sps:$4 sm:$0xff]  }
   0xd   :  { %529 = vmatprep.subr.bf16.mxu0 %v562_v11 }
   0xe   :  { %343 = vmatpush1.bf16.msra.mxu1 %v561_v10 }
   0xf   :  { %344 = vmatprep.subr.bf16.mxu1 %v593_v0 }
  0x10   :  { %530 = vmatpush3.bf16.msra.mxu0 %v563_v12 }
  0x11   :  { %531 = vmatprep.subr.bf16.mxu0 %v565_v13 }
  0x12   :  { %345 = vmatpush1.bf16.msra.mxu1 %v564_v14 }
  0x13   :  { %346 = vmatprep.subr.bf16.mxu1 %v593_v0 }
  0x14   :  { %532 = vmatpush3.bf16.msra.mxu0 %v566_v15 }
  0x15   :  { %533 = vmatprep.subr.bf16.mxu0 %v568_v16 }
  0x16   :  { %347 = vmatpush1.bf16.msra.mxu1 %v567_v17 }
  0x17   :  { %348 = vmatprep.subr.bf16.mxu1 %v593_v0 }
  0x18   :  { %534 = vmatpush3.bf16.msra.mxu0 %v569_v18 }
  0x19   :  { %535 = vmatprep.subr.bf16.mxu0 %v571_v19 }
  0x1a   :  { %349 = vmatpush1.bf16.msra.mxu1 %v570_v20 }
  0x1b   :  { %350 = vmatprep.subr.bf16.mxu1 %v593_v0 }
  0x1c   :  { %536 = vmatpush3.bf16.msra.mxu0 %v572_v21 }
  0x1d   :  { %537 = vmatprep.subr.bf16.mxu0 %v574_v22 }
  0x1e   :  { %351 = vmatpush1.bf16.msra.mxu1 %v573_v24  ;;  %v420_v24 = vlaneseq }
  0x1f   :  { %362 = vmatprep.subr.bf16.mxu1 %v593_v0 }
  0x20   :  { %538 = vmatpush3.bf16.msra.mxu0 %v575_v25  ;;  %v421_v25 = vshrl.u32 %v420_v24, 7 }
  0x22   :  { %363 = vmatpush2.bf16.msra.mxu1 %v579_v26  ;;  %v412_v26 = vld [vmem:[%s751_s2] sm:$0x1]  ;;  %v422_v27 = vsub.s32 0, %v421_v25 }
  0x23   :  { %320 = vmatmul.mubr.bf16.vlgmr.msra.gmra.mxu0 %v576_v28  ;;  %364 = vmatprep.subr.bf16.mxu1 %v593_v0 }
  0x24   :  { %327 = vmatprep.mubr.bf16.mxu0 %v581_v29 }
  0x26   :  { %365 = vmatpush2.bf16.msra.mxu1 %v580_v30  ;;  %v416_v30 = vld [vmem:[%s752_s3] sm:$0x1] }
  0x27   :  { %366 = vmatprep.subr.bf16.mxu1 %v593_v0 }
  0x2a   :  { %367 = vmatpush2.bf16.msra.mxu1 %v583_v31 }
  0x2b   :  { %328 = vmatmul.mubr.bf16.gmra.mxu0 %v584_v32 }
  0x2d   :  { %369 = vmatmul.mubr.bf16.vlgmr.msra.gmra.mxu1 %v585_v33 }
  0x2e   :  { %503 = vmatprep.mubr.msk.bf16.mxu1 %vm280_vm0, %v588_v34 }
  0x35   :  { %377 = vmatmul.mubr.bf16.gmra.mxu1 %v590_v35 }
  0xe3   :  { %v539_v36 = vpop.f32.mrf.mxu0 }
  0xe5   :  { %v540_v37 = vpop.f32.mrf.mxu0 }
  0xe6   :  { %v541_v47 = vadd.f32 %v540_v37, %v539_v36 }
  0xe7   :  { %v542_v38 = vpop.f32.mrf.mxu0 }
  0xe9   :  { %v543_v39 = vpop.f32.mrf.mxu0 }
  0xea   :  { %v544_v44 = vadd.f32 %v543_v39, %v542_v38 }
  0xeb   :  { %v545_v40 = vpop.f32.mrf.mxu0 }
  0xed   :  { %v546_v41 = vpop.f32.mrf.mxu0  ;;  %v370_v42 = vpop.f32.mrf.mxu1 }
  0xee   :  { %v547_v50 = vadd.f32 %v546_v41, %v545_v40  ;;  %v371_v51 = vadd.f32 %v541_v47, %v370_v42 }
  0xef   :  { %v372_v43 = vpop.f32.mrf.mxu1  ;;  %v548_v45 = vpop.f32.mrf.mxu0 }
  0xf0   :  { %v395_v57 = vmul.f32 %v371_v51, %v371_v51 }
  0xf1   :  { %v373_v46 = vpop.f32.mrf.mxu1  ;;  %v549_v52 = vpop.f32.mrf.mxu0 }
  0xf2   :  { %v374_v48 = vadd.f32 %v544_v44, %v373_v46  ;;  %v550_v58 = vadd.f32 %v549_v52, %v548_v45 }
  0xf3   :  { %v375_v49 = vpop.f32.mrf.mxu1 }
  0xf4   :  { %v396_v54 = vmul.f32 %v374_v48, %v374_v48  ;;  %v385_v59 = vadd.f32 %v374_v48, %v371_v51 }
  0xf5   :  { %v378_v53 = vpop.f32.mrf.mxu1 }
  0xf6   :  { %v379_v55 = vadd.f32 %v547_v50, %v378_v53  ;;  %v399_v62 = vadd.f32 %v396_v54, %v395_v57 }
  0xf7   :  { %v380_v56 = vpop.f32.mrf.mxu1 }
  0xf8   :  { %v397_v60 = vmul.f32 %v379_v55, %v379_v55  ;;  %v386_v63 = vadd.f32 %v385_v59, %v379_v55 }
  0xf9   :  { %v381_v61 = vpop.f32.mrf.mxu1 }
  0xfa   :  { %v382_v0 = vadd.f32 %v550_v58, %v381_v61  ;;  %v400_v2 = vadd.f32 %v399_v62, %v397_v60 }
  0xfb   :  { %v383_v1 = vpop.f32.mrf.mxu1 }
  0xfc   :  { %v387_v3 = vadd.f32 %v386_v63, %v382_v0  ;;  %v398_v4 = vmul.f32 %v382_v0, %v382_v0 }
  0xfe   :  { %v388_v5 = vrot.slane %v387_v3, 4  ;;  %v401_v6 = vadd.f32 %v400_v2, %v398_v4 }
 0x100   :  { %v389_v7 = vadd.f32 %v388_v5, %v387_v3  ;;  %v402_v8 = vrot.slane %v401_v6, 4 }
 0x102   :  { %v390_v9 = vrot.slane %v389_v7, 2  ;;  %v403_v10 = vadd.f32 %v402_v8, %v401_v6 }
 0x104   :  { %v391_v11 = vadd.f32 %v390_v9, %v389_v7  ;;  %v404_v12 = vrot.slane %v403_v10, 2 }
 0x106   :  { %v392_v13 = vrot.slane %v391_v11, 1  ;;  %v405_v14 = vadd.f32 %v404_v12, %v403_v10 }
 0x108   :  { %v393_v15 = vadd.f32 %v392_v13, %v391_v11  ;;  %v406_v16 = vrot.slane %v405_v14, 1 }
 0x10a   :  { %v394_v17 = vmul.f32 0.03125, %v393_v15  ;;  %v407_v18 = vadd.f32 %v406_v16, %v405_v14 }
 0x10c   :  { %v408_v19 = vmul.f32 0.03125, %v407_v18  ;;  %v409_v20 = vmul.f32 %v394_v17, %v394_v17 }
 0x10e   :  { %v410_v21 = vsub.f32 %v408_v19, %v409_v20 }
 0x110   :  { %v411_v22 = vmax.f32 %v410_v21, 0.0 }
 0x112   :  { %v413_v23 = vadd.f32 1e-05, %v411_v22 }
 0x114   :  { %591 = vrsqrt.f32 %v413_v23 }
 0x121   :  { %v592_v28 = vpop.eup %591 }
 0x122   :  { %v415_v29 = vmul.f32 %v592_v28, %v412_v26 }
 0x124   :  { %v417_v31 = vmul.f32 %v415_v29, %v394_v17  ;;  %v423_v32 = vrot.slane %v415_v29, %v422_v27 }
 0x126   :  { %v418_v33 = vsub.f32 %v416_v30, %v417_v31  ;;  %v425_v34 = vmul.f32 %v423_v32, %v371_v51  ;;  %v426_v35 = vmul.f32 %v423_v32, %v374_v48  ;;  %v427_v36 = vmul.f32 %v423_v32, %v379_v55 }
 0x127   :  { %v428_v37 = vmul.f32 %v423_v32, %v382_v0 }
 0x128   :  { %v433_v38 = vrot.slane %v418_v33, %v422_v27 }
 0x12a   :  { %v435_v39 = vadd.f32 %v433_v38, %v425_v34  ;;  %v436_v40 = vadd.f32 %v433_v38, %v426_v35  ;;  %v437_v41 = vadd.f32 %v433_v38, %v427_v36  ;;  %v438_v42 = vadd.f32 %v433_v38, %v428_v37 }
 0x12c   :  { %v439_v43 = vmax.f32 %v435_v39, 0.0  ;;  %v440_v44 = vmax.f32 %v436_v40, 0.0  ;;  %v441_v45 = vmax.f32 %v437_v41, 0.0  ;;  %v442_v46 = vmax.f32 %v438_v42, 0.0 }
 0x12e   :  { %v515_v47 = vpack.c.bf16 %v440_v44, %v439_v43  ;;  %v520_v49 = vpack.c.bf16 %v442_v46, %v441_v45 }
 0x130   :  { %516 = vst [vmem:[%s753_s4] sm:$0xff] %v515_v47   ;;  %522 = vst [vmem:[%s753_s4 + $0x8] sm:$0xff] %v520_v49  }

// kernel: lightweight_unetx_forward.31
= control target key start
LH: loop header
LB: loop body
LE: loop exit
PB: predicated region body
PF: predicated region fallthrough
CT: control target
= control target key end

     0   :  { %v1139_v0 = vmov 0   ;;  %vm418_vm0 = vcmask 392192   ;;  %s1475_s1 = inlined_call_operand.vmem [shape: bf16[432,128], index: 1, kind: input, shape index: {}]   ;;  %s1476_s0 = inlined_call_operand.vmem [shape: bf16[128,432], index: 0, kind: input, shape index: {}]   ;;  %s1477_s2 = inlined_call_operand.vmem [shape: f32[1,128], index: 2, kind: input, shape index: {}]   ;;  %s1478_s3 = inlined_call_operand.vmem [shape: f32[1,128], index: 3, kind: input, shape index: {}]   ;;  %s1479_s4 = inlined_call_operand.vmem [shape: bf16[128,128], index: 4, kind: output, shape index: {}]  }
   0x1   :  { %540 = vmatprep.subr.bf16.mxu1 %v1139_v0  ;;  %v1062_v1 = vld [vmem:[%s1475_s1 + $0xb8] sm:$0xff]   ;;  %v1065_v4 = vld [vmem:[%s1475_s1 + $0xb0] sm:$0xff]   ;;  %v1068_v7 = vld [vmem:[%s1475_s1 + $0xa8] sm:$0xff]  }
   0x2   :  { %v1063_v2 = vld [vmem:[%s1475_s1 + $0x78] sm:$0xff]   ;;  %541 = vmatpush1.bf16.msra.mxu1 %v1062_v1  ;;  %v1066_v5 = vld [vmem:[%s1475_s1 + $0x70] sm:$0xff]   ;;  %v1069_v8 = vld [vmem:[%s1475_s1 + $0x68] sm:$0xff]  }
   0x3   :  { %v1064_v3 = vld [vmem:[%s1475_s1 + $0x38] sm:$0xff]   ;;  %997 = vmatprep.subr.bf16.mxu0 %v1063_v2  ;;  %542 = vmatprep.subr.bf16.mxu1 %v1139_v0  ;;  %v1067_v6 = vld [vmem:[%s1475_s1 + $0x30] sm:$0xff]   ;;  %v1070_v9 = vld [vmem:[%s1475_s1 + $0x28] sm:$0xff]  }
   0x4   :  { %998 = vmatpush3.bf16.msra.mxu0 %v1064_v3  ;;  %v1071_v10 = vld [vmem:[%s1475_s1 + $0xa0] sm:$0xff]   ;;  %v1075_v13 = vld [vmem:[%s1475_s1 + $0x58] sm:$0xff]   ;;  %v1078_v16 = vld [vmem:[%s1475_s1 + $0x50] sm:$0xff]  }
   0x5   :  { %999 = vmatprep.subr.bf16.mxu0 %v1066_v5  ;;  %v1072_v11 = vld [vmem:[%s1475_s1 + $0x60] sm:$0xff]   ;;  %v1074_v14 = vld [vmem:[%s1475_s1 + $0x98] sm:$0xff]   ;;  %v1077_v17 = vld [vmem:[%s1475_s1 + $0x90] sm:$0xff]  }
   0x6   :  { %543 = vmatpush1.bf16.msra.mxu1 %v1065_v4  ;;  %v1073_v12 = vld [vmem:[%s1475_s1 + $0x20] sm:$0xff]   ;;  %v1076_v15 = vld [vmem:[%s1475_s1 + $0x18] sm:$0xff]   ;;  %v1079_v18 = vld [vmem:[%s1475_s1 + $0x10] sm:$0xff]  }
   0x7   :  { %544 = vmatprep.subr.bf16.mxu1 %v1139_v0  ;;  %v1081_v19 = vld [vmem:[%s1475_s1 + $0x48] sm:$0xff]   ;;  %v1084_v22 = vld [vmem:[%s1475_s1 + $0x40] sm:$0xff]   ;;  %v1089_v26 = vld [vmem:[%s1475_s1 + $0xd0] sm:$0xff]  }
   0x8   :  { %1000 = vmatpush3.bf16.msra.mxu0 %v1067_v6  ;;  %v1080_v20 = vld [vmem:[%s1475_s1 + $0x88] sm:$0xff]   ;;  %v1088_v23 = vld [vmem:[%s1476_s0 + $0x4] ss:$16 sps:$4 sm:$0xff]   ;;  %v1086_v28 = vld [vmem:[%s1476_s0] ss:$16 sps:$4 sm:$0xff]  }
   0x9   :  { %1001 = vmatprep.subr.bf16.mxu0 %v1069_v8  ;;  %v1082_v21 = vld [vmem:[%s1475_s1 + $0x8] sm:$0xff]   ;;  %v1083_v24 = vld [vmem:[%s1475_s1 + $0x80] sm:$0xff]   ;;  %475 = vmatprep.mubr.bf16.mxu0 %v1088_v23 }
   0xa   :  { %545 = vmatpush1.bf16.msra.mxu1 %v1068_v7  ;;  %v1085_v25 = vld [vmem:[%s1475_s1] sm:$0xff]   ;;  %v1097_v27 = vld [vmem:[%s1476_s0 + $0xc] ss:$16 sps:$4 sm:$0xff]   ;;  %v1095_v34 = vld [vmem:[%s1476_s0 + $0x8] ss:$16 sps:$4 sm:$0xff]  }
   0xb   :  { %546 = vmatprep.subr.bf16.mxu1 %v1139_v0  ;;  %v1091_v29 = vld [vmem:[%s1476_s0 + $0x24] ss:$16 sps:$4 sm:$0xff]   ;;  %910 = vmatprep.mubr.msk.bf16.mxu1 %vm418_vm0, %v1097_v27  ;;  %v1090_v30 = vld [vmem:[%s1475_s1 + $0xc8] sm:$0xff]   ;;  %v1094_v32 = vld [vmem:[%s1476_s0 + $0x20] ss:$16 sps:$4 sm:$0xff]  }
   0xc   :  { %1002 = vmatpush3.bf16.msra.mxu0 %v1070_v9  ;;  %v1093_v31 = vld [vmem:[%s1475_s1 + $0xc0] sm:$0xff]   ;;  %v1101_v35 = vld [vmem:[%s1476_s0 + $0x2c] ss:$16 sps:$4 sm:$0xff]   ;;  %v1103_v38 = vld [vmem:[%s1476_s0 + $0x28] ss:$16 sps:$4 sm:$0xff]  }
   0xd   :  { %1003 = vmatprep.subr.bf16.mxu0 %v1072_v11  ;;  %v1098_v33 = vld [vmem:[%s1476_s0 + $0x44] ss:$16 sps:$4 sm:$0xff]   ;;  %v1100_v36 = vld [vmem:[%s1476_s0 + $0x40] ss:$16 sps:$4 sm:$0xff]   ;;  %v1107_v39 = vld [vmem:[%s1476_s0 + $0x4c] ss:$16 sps:$4 sm:$0xff]  }
   0xe   :  { %547 = vmatpush1.bf16.msra.mxu1 %v1071_v10  ;;  %v1104_v37 = vld [vmem:[%s1476_s0 + $0x64] ss:$16 sps:$4 sm:$0xff]   ;;  %v1106_v40 = vld [vmem:[%s1476_s0 + $0x60] ss:$16 sps:$4 sm:$0xff]   ;;  %v1109_v42 = vld [vmem:[%s1476_s0 + $0x48] ss:$16 sps:$4 sm:$0xff]  }
   0xf   :  { %548 = vmatprep.subr.bf16.mxu1 %v1139_v0  ;;  %v1110_v41 = vld [vmem:[%s1476_s0 + $0x84] ss:$16 sps:$4 sm:$0xff]   ;;  %v1113_v43 = vld [vmem:[%s1476_s0 + $0x6c] ss:$16 sps:$4 sm:$0xff]   ;;  %v1112_v44 = vld [vmem:[%s1476_s0 + $0x80] ss:$16 sps:$4 sm:$0xff]  }
  0x10   :  { %1004 = vmatpush3.bf16.msra.mxu0 %v1073_v12  ;;  %v1116_v45 = vld [vmem:[%s1476_s0 + $0xa4] ss:$16 sps:$4 sm:$0xff]   ;;  %v1115_v46 = vld [vmem:[%s1476_s0 + $0x68] ss:$16 sps:$4 sm:$0xff]   ;;  %v1119_v47 = vld [vmem:[%s1476_s0 + $0x8c] ss:$16 sps:$4 sm:$0xff]  }
  0x11   :  { %1005 = vmatprep.subr.bf16.mxu0 %v1075_v13  ;;  %v1118_v48 = vld [vmem:[%s1476_s0 + $0xa0] ss:$16 sps:$4 sm:$0xff]   ;;  %v1122_v49 = vld [vmem:[%s1476_s0 + $0xc4] ss:$16 sps:$4 sm:$0xff]   ;;  %v1121_v50 = vld [vmem:[%s1476_s0 + $0x88] ss:$16 sps:$4 sm:$0xff]  }
  0x12   :  { %549 = vmatpush1.bf16.msra.mxu1 %v1074_v14  ;;  %v1125_v51 = vld [vmem:[%s1476_s0 + $0xac] ss:$16 sps:$4 sm:$0xff]   ;;  %v1124_v52 = vld [vmem:[%s1476_s0 + $0xc0] ss:$16 sps:$4 sm:$0xff]   ;;  %v1128_v53 = vld [vmem:[%s1476_s0 + $0xe4] ss:$16 sps:$4 sm:$0xff]  }
  0x13   :  { %550 = vmatprep.subr.bf16.mxu1 %v1139_v0  ;;  %v1127_v54 = vld [vmem:[%s1476_s0 + $0xa8] ss:$16 sps:$4 sm:$0xff]   ;;  %v1131_v55 = vld [vmem:[%s1476_s0 + $0xcc] ss:$16 sps:$4 sm:$0xff]   ;;  %v1130_v56 = vld [vmem:[%s1476_s0 + $0xe0] ss:$16 sps:$4 sm:$0xff]  }
  0x14   :  { %1006 = vmatpush3.bf16.msra.mxu0 %v1076_v15  ;;  %v1133_v57 = vld [vmem:[%s1476_s0 + $0xc8] ss:$16 sps:$4 sm:$0xff]   ;;  %v1134_v58 = vld [vmem:[%s1476_s0 + $0xec] ss:$16 sps:$4 sm:$0xff]  }
  0x15   :  { %1007 = vmatprep.subr.bf16.mxu0 %v1078_v16  ;;  %v1136_v59 = vld [vmem:[%s1476_s0 + $0xe8] ss:$16 sps:$4 sm:$0xff]  }
  0x16   :  { %551 = vmatpush1.bf16.msra.mxu1 %v1077_v17 }
  0x17   :  { %552 = vmatprep.subr.bf16.mxu1 %v1139_v0 }
  0x18   :  { %1008 = vmatpush3.bf16.msra.mxu0 %v1079_v18 }
  0x19   :  { %1009 = vmatprep.subr.bf16.mxu0 %v1081_v19 }
  0x1a   :  { %553 = vmatpush1.bf16.msra.mxu1 %v1080_v20 }
  0x1b   :  { %554 = vmatprep.subr.bf16.mxu1 %v1139_v0 }
  0x1c   :  { %1010 = vmatpush3.bf16.msra.mxu0 %v1082_v21 }
  0x1d   :  { %1011 = vmatprep.subr.bf16.mxu0 %v1084_v22 }
  0x1e   :  { %555 = vmatpush1.bf16.msra.mxu1 %v1083_v24 }
  0x1f   :  { %566 = vmatprep.subr.bf16.mxu1 %v1139_v0 }
  0x20   :  { %1012 = vmatpush3.bf16.msra.mxu0 %v1085_v25 }
  0x22   :  { %567 = vmatpush2.bf16.msra.mxu1 %v1089_v26 }
  0x23   :  { %476 = vmatmul.mubr.bf16.vlgmr.msra.gmra.mxu0 %v1086_v28  ;;  %568 = vmatprep.subr.bf16.mxu1 %v1139_v0 }
  0x24   :  { %483 = vmatprep.mubr.bf16.mxu0 %v1091_v29 }
  0x26   :  { %569 = vmatpush2.bf16.msra.mxu1 %v1090_v30 }
  0x27   :  { %570 = vmatprep.subr.bf16.mxu1 %v1139_v0 }
  0x2a   :  { %571 = vmatpush2.bf16.msra.mxu1 %v1093_v31 }
  0x2b   :  { %484 = vmatmul.mubr.bf16.gmra.mxu0 %v1094_v32 }
  0x2c   :  { %491 = vmatprep.mubr.bf16.mxu0 %v1098_v33 }
  0x2d   :  { %573 = vmatmul.mubr.bf16.vlgmr.msra.gmra.mxu1 %v1095_v34 }
  0x2e   :  { %911 = vmatprep.mubr.msk.bf16.mxu1 %vm418_vm0, %v1101_v35 }
  0x33   :  { %492 = vmatmul.mubr.bf16.gmra.mxu0 %v1100_v36 }
  0x34   :  { %499 = vmatprep.mubr.bf16.mxu0 %v1104_v37 }
  0x35   :  { %581 = vmatmul.mubr.bf16.gmra.mxu1 %v1103_v38 }
  0x36   :  { %912 = vmatprep.mubr.msk.bf16.mxu1 %vm418_vm0, %v1107_v39 }
  0x3b   :  { %500 = vmatmul.mubr.bf16.gmra.mxu0 %v1106_v40 }
  0x3c   :  { %507 = vmatprep.mubr.bf16.mxu0 %v1110_v41 }
  0x3d   :  { %589 = vmatmul.mubr.bf16.gmra.mxu1 %v1109_v42 }
  0x3e   :  { %913 = vmatprep.mubr.msk.bf16.mxu1 %vm418_vm0, %v1113_v43 }
  0x43   :  { %508 = vmatmul.mubr.bf16.gmra.mxu0 %v1112_v44 }
  0x44   :  { %515 = vmatprep.mubr.bf16.mxu0 %v1116_v45 }
  0x45   :  { %597 = vmatmul.mubr.bf16.gmra.mxu1 %v1115_v46 }
  0x46   :  { %914 = vmatprep.mubr.msk.bf16.mxu1 %vm418_vm0, %v1119_v47 }
  0x4b   :  { %516 = vmatmul.mubr.bf16.gmra.mxu0 %v1118_v48 }
  0x4c   :  { %523 = vmatprep.mubr.bf16.mxu0 %v1122_v49 }
  0x4d   :  { %605 = vmatmul.mubr.bf16.gmra.mxu1 %v1121_v50 }
  0x4e   :  { %915 = vmatprep.mubr.msk.bf16.mxu1 %vm418_vm0, %v1125_v51 }
  0x53   :  { %524 = vmatmul.mubr.bf16.gmra.mxu0 %v1124_v52 }
  0x54   :  { %531 = vmatprep.mubr.bf16.mxu0 %v1128_v53 }
  0x55   :  { %613 = vmatmul.mubr.bf16.gmra.mxu1 %v1127_v54 }
  0x56   :  { %916 = vmatprep.mubr.msk.bf16.mxu1 %vm418_vm0, %v1131_v55 }
  0x5b   :  { %532 = vmatmul.mubr.bf16.gmra.mxu0 %v1130_v56 }
  0x5d   :  { %621 = vmatmul.mubr.bf16.gmra.mxu1 %v1133_v57 }
  0x5e   :  { %917 = vmatprep.mubr.msk.bf16.mxu1 %vm418_vm0, %v1134_v58 }
  0x65   :  { %629 = vmatmul.mubr.bf16.gmra.mxu1 %v1136_v59 }
  0xe3   :  { %v1013_v60 = vpop.f32.mrf.mxu0 }
  0xe5   :  { %v1014_v61 = vpop.f32.mrf.mxu0 }
  0xe6   :  { %v1015_v30 = vadd.f32 %v1014_v61, %v1013_v60 }
  0xe7   :  { %v1016_v62 = vpop.f32.mrf.mxu0 }
  0xe9   :  { %v1017_v63 = vpop.f32.mrf.mxu0 }
  0xea   :  { %v1018_v27 = vadd.f32 %v1017_v63, %v1016_v62 }
  0xeb   :  { %v1019_v0 = vpop.f32.mrf.mxu0 }
  0xed   :  { %v1020_v1 = vpop.f32.mrf.mxu0  ;;  %v574_v2 = vpop.f32.mrf.mxu1 }
  0xee   :  { %v1021_v31 = vadd.f32 %v1020_v1, %v1019_v0  ;;  %v1363_v35 = vadd.f32 %v1015_v30, %v574_v2 }
  0xef   :  { %v1022_v3 = vpop.f32.mrf.mxu0  ;;  %v576_v4 = vpop.f32.mrf.mxu1 }
  0xf0   :  { %v659_v45 = vmul.f32 %v1363_v35, %v1363_v35 }
  0xf1   :  { %v1023_v5 = vpop.f32.mrf.mxu0  ;;  %v577_v6 = vpop.f32.mrf.mxu1 }
  0xf2   :  { %v1361_v32 = vadd.f32 %v1018_v27, %v577_v6  ;;  %v1024_v36 = vadd.f32 %v1023_v5, %v1022_v3 }
  0xf3   :  { %v1025_v7 = vpop.f32.mrf.mxu0  ;;  %v579_v8 = vpop.f32.mrf.mxu1 }
  0xf4   :  { %v660_v40 = vmul.f32 %v1361_v32, %v1361_v32  ;;  %v637_v51 = vadd.f32 %v1361_v32, %v1363_v35 }
  0xf5   :  { %v1026_v9 = vpop.f32.mrf.mxu0  ;;  %v582_v10 = vpop.f32.mrf.mxu1 }
  0xf6   :  { %v1365_v37 = vadd.f32 %v1021_v31, %v582_v10  ;;  %v1027_v41 = vadd.f32 %v1026_v9, %v1025_v7  ;;  %v675_v52 = vadd.f32 %v660_v40, %v659_v45 }
  0xf7   :  { %v1028_v11 = vpop.f32.mrf.mxu0  ;;  %v584_v12 = vpop.f32.mrf.mxu1 }
  0xf8   :  { %v661_v46 = vmul.f32 %v1365_v37, %v1365_v37  ;;  %v638_v58 = vadd.f32 %v637_v51, %v1365_v37 }
  0xf9   :  { %v1029_v13 = vpop.f32.mrf.mxu0  ;;  %v585_v14 = vpop.f32.mrf.mxu1 }
  0xfa   :  { %v1369_v42 = vadd.f32 %v1024_v36, %v585_v14  ;;  %v1030_v47 = vadd.f32 %v1029_v13, %v1028_v11  ;;  %v676_v59 = vadd.f32 %v675_v52, %v661_v46 }
  0xfb   :  { %v1031_v15 = vpop.f32.mrf.mxu0  ;;  %v587_v16 = vpop.f32.mrf.mxu1 }
  0xfc   :  { %v662_v53 = vmul.f32 %v1369_v42, %v1369_v42  ;;  %v639_v1 = vadd.f32 %v638_v58, %v1369_v42 }
  0xfd   :  { %v1032_v17 = vpop.f32.mrf.mxu0  ;;  %v590_v18 = vpop.f32.mrf.mxu1 }
  0xfe   :  { %v1375_v48 = vadd.f32 %v1027_v41, %v590_v18  ;;  %v1033_v54 = vadd.f32 %v1032_v17, %v1031_v15  ;;  %v677_v2 = vadd.f32 %v676_v59, %v662_v53 }
  0xff   :  { %v1034_v19 = vpop.f32.mrf.mxu0  ;;  %v592_v20 = vpop.f32.mrf.mxu1 }
 0x100   :  { %v663_v60 = vmul.f32 %v1375_v48, %v1375_v48  ;;  %v640_v8 = vadd.f32 %v639_v1, %v1375_v48 }
 0x101   :  { %v1035_v21 = vpop.f32.mrf.mxu0  ;;  %v593_v22 = vpop.f32.mrf.mxu1 }
 0x102   :  { %v1381_v55 = vadd.f32 %v1030_v47, %v593_v22  ;;  %v1036_v61 = vadd.f32 %v1035_v21, %v1034_v19  ;;  %v678_v9 = vadd.f32 %v677_v2, %v663_v60 }
 0x103   :  { %v1037_v23 = vpop.f32.mrf.mxu0  ;;  %v595_v24 = vpop.f32.mrf.mxu1 }
 0x104   :  { %v664_v3 = vmul.f32 %v1381_v55, %v1381_v55  ;;  %v641_v14 = vadd.f32 %v640_v8, %v1381_v55 }
 0x105   :  { %v1038_v25 = vpop.f32.mrf.mxu0  ;;  %v598_v26 = vpop.f32.mrf.mxu1 }
 0x106   :  { %v1386_v62 = vadd.f32 %v1033_v54, %v598_v26  ;;  %v1039_v4 = vadd.f32 %v1038_v25, %v1037_v23  ;;  %v679_v16 = vadd.f32 %v678_v9, %v664_v3 }
 0x107   :  { %v1040_v28 = vpop.f32.mrf.mxu0  ;;  %v600_v29 = vpop.f32.mrf.mxu1 }
 0x108   :  { %v665_v10 = vmul.f32 %v1386_v62, %v1386_v62  ;;  %v642_v20 = vadd.f32 %v641_v14, %v1386_v62 }
 0x109   :  { %v1041_v33 = vpop.f32.mrf.mxu0  ;;  %v601_v34 = vpop.f32.mrf.mxu1 }
 0x10a   :  { %v1391_v5 = vadd.f32 %v1036_v61, %v601_v34  ;;  %v1042_v15 = vadd.f32 %v1041_v33, %v1040_v28  ;;  %v680_v23 = vadd.f32 %v679_v16, %v665_v10 }
 0x10b   :  { %v1043_v38 = vpop.f32.mrf.mxu0  ;;  %v603_v39 = vpop.f32.mrf.mxu1 }
 0x10c   :  { %v666_v17 = vmul.f32 %v1391_v5, %v1391_v5  ;;  %v643_v27 = vadd.f32 %v642_v20, %v1391_v5 }
 0x10d   :  { %v1044_v43 = vpop.f32.mrf.mxu0  ;;  %v606_v44 = vpop.f32.mrf.mxu1 }
 0x10e   :  { %v1396_v11 = vadd.f32 %v1039_v4, %v606_v44  ;;  %v1045_v21 = vadd.f32 %v1044_v43, %v1043_v38  ;;  %v681_v30 = vadd.f32 %v680_v23, %v666_v17 }
 0x10f   :  { %v1046_v49 = vpop.f32.mrf.mxu0  ;;  %v608_v50 = vpop.f32.mrf.mxu1 }
 0x110   :  { %v667_v24 = vmul.f32 %v1396_v11, %v1396_v11  ;;  %v644_v34 = vadd.f32 %v643_v27, %v1396_v11 }
 0x111   :  { %v1047_v56 = vpop.f32.mrf.mxu0  ;;  %v609_v57 = vpop.f32.mrf.mxu1 }
 0x112   :  { %v1402_v22 = vadd.f32 %v1042_v15, %v609_v57  ;;  %v1048_v28 = vadd.f32 %v1047_v56, %v1046_v49  ;;  %v682_v40 = vadd.f32 %v681_v30, %v667_v24 }
 0x113   :  { %v1049_v63 = vpop.f32.mrf.mxu0  ;;  %v611_v0 = vpop.f32.mrf.mxu1 }
 0x114   :  { %v668_v36 = vmul.f32 %v1402_v22, %v1402_v22  ;;  %v645_v43 = vadd.f32 %v644_v34, %v1402_v22 }
 0x115   :  { %v1050_v6 = vpop.f32.mrf.mxu0  ;;  %v614_v7 = vpop.f32.mrf.mxu1 }
 0x116   :  { %v1407_v29 = vadd.f32 %v1045_v21, %v614_v7  ;;  %v1051_v38 = vadd.f32 %v1050_v6, %v1049_v63  ;;  %v683_v50 = vadd.f32 %v682_v40, %v668_v36 }
 0x117   :  { %v1052_v12 = vpop.f32.mrf.mxu0  ;;  %v616_v13 = vpop.f32.mrf.mxu1 }
 0x118   :  { %v669_v44 = vmul.f32 %v1407_v29, %v1407_v29  ;;  %v646_v51 = vadd.f32 %v645_v43, %v1407_v29 }
 0x119   :  { %v1053_v18 = vpop.f32.mrf.mxu0  ;;  %v617_v19 = vpop.f32.mrf.mxu1 }
 0x11a   :  { %v1412_v39 = vadd.f32 %v1048_v28, %v617_v19  ;;  %v1054_v45 = vadd.f32 %v1053_v18, %v1052_v12  ;;  %v684_v56 = vadd.f32 %v683_v50, %v669_v44  ;;  %v708_v44 = vlaneseq }
 0x11b   :  { %v1055_v25 = vpop.f32.mrf.mxu0  ;;  %v619_v26 = vpop.f32.mrf.mxu1 }
 0x11c   :  { %v670_v52 = vmul.f32 %v1412_v39, %v1412_v39  ;;  %v647_v57 = vadd.f32 %v646_v51, %v1412_v39 }
 0x11d   :  { %v1056_v31 = vpop.f32.mrf.mxu0  ;;  %v622_v33 = vpop.f32.mrf.mxu1 }
 0x11e   :  { %v1417_v46 = vadd.f32 %v1051_v38, %v622_v33  ;;  %v1057_v58 = vadd.f32 %v1056_v31, %v1055_v25  ;;  %v685_v63 = vadd.f32 %v684_v56, %v670_v52  ;;  %v704_v52 = vld [vmem:[%s1478_s3] sm:$0x1] }
 0x11f   :  { %v624_v41 = vpop.f32.mrf.mxu1  ;;  %v1058_v47 = vpop.f32.mrf.mxu0 }
 0x120   :  { %v671_v59 = vmul.f32 %v1417_v46, %v1417_v46  ;;  %v648_v0 = vadd.f32 %v647_v57, %v1417_v46 }
 0x121   :  { %v625_v49 = vpop.f32.mrf.mxu1  ;;  %v1059_v60 = vpop.f32.mrf.mxu0 }
 0x122   :  { %v1422_v53 = vadd.f32 %v1054_v45, %v625_v49  ;;  %v686_v4 = vadd.f32 %v685_v63, %v671_v59  ;;  %v1060_v6 = vadd.f32 %v1059_v60, %v1058_v47  ;;  %v709_v45 = vshrl.u32 %v708_v44, 7  ;;  %v700_v47 = vld [vmem:[%s1477_s2] sm:$0x1] }
 0x123   :  { %v627_v54 = vpop.f32.mrf.mxu1 }
 0x124   :  { %v672_v1 = vmul.f32 %v1422_v53, %v1422_v53  ;;  %v649_v7 = vadd.f32 %v648_v0, %v1422_v53  ;;  %v710_v49 = vsub.s32 0, %v709_v45 }
 0x125   :  { %v630_v61 = vpop.f32.mrf.mxu1 }
 0x126   :  { %v631_v2 = vadd.f32 %v1057_v58, %v630_v61  ;;  %v687_v10 = vadd.f32 %v686_v4, %v672_v1 }
 0x127   :  { %v632_v3 = vpop.f32.mrf.mxu1 }
 0x128   :  { %v673_v8 = vmul.f32 %v631_v2, %v631_v2  ;;  %v650_v12 = vadd.f32 %v649_v7, %v631_v2 }
 0x129   :  { %v633_v9 = vpop.f32.mrf.mxu1 }
 0x12a   :  { %v634_v13 = vadd.f32 %v1060_v6, %v633_v9  ;;  %v688_v15 = vadd.f32 %v687_v10, %v673_v8 }
 0x12b   :  { %v635_v14 = vpop.f32.mrf.mxu1 }
 0x12c   :  { %v651_v16 = vadd.f32 %v650_v12, %v634_v13  ;;  %v674_v17 = vmul.f32 %v634_v13, %v634_v13 }
 0x12e   :  { %v652_v18 = vrot.slane %v651_v16, 4  ;;  %v689_v19 = vadd.f32 %v688_v15, %v674_v17 }
 0x130   :  { %v653_v20 = vadd.f32 %v652_v18, %v651_v16  ;;  %v690_v21 = vrot.slane %v689_v19, 4 }
 0x132   :  { %v654_v23 = vrot.slane %v653_v20, 2  ;;  %v691_v24 = vadd.f32 %v690_v21, %v689_v19 }
 0x134   :  { %v655_v25 = vadd.f32 %v654_v23, %v653_v20  ;;  %v692_v26 = vrot.slane %v691_v24, 2 }
 0x136   :  { %v656_v27 = vrot.slane %v655_v25, 1  ;;  %v693_v28 = vadd.f32 %v692_v26, %v691_v24 }
 0x138   :  { %v657_v30 = vadd.f32 %v656_v27, %v655_v25  ;;  %v694_v31 = vrot.slane %v693_v28, 1 }
 0x13a   :  { %v658_v33 = vmul.f32 0.0078125, %v657_v30  ;;  %v695_v34 = vadd.f32 %v694_v31, %v693_v28 }
 0x13c   :  { %v696_v36 = vmul.f32 0.0078125, %v695_v34  ;;  %v697_v38 = vmul.f32 %v658_v33, %v658_v33 }
 0x13e   :  { %v698_v40 = vsub.f32 %v696_v36, %v697_v38 }
 0x140   :  { %v699_v41 = vmax.f32 %v698_v40, 0.0 }
 0x142   :  { %v701_v43 = vadd.f32 1e-05, %v699_v41 }
 0x144   :  { %1137 = vrsqrt.f32 %v701_v43 }
 0x151   :  { %v1138_v50 = vpop.eup %1137 }
 0x152   :  { %v703_v51 = vmul.f32 %v1138_v50, %v700_v47 }
 0x154   :  { %v705_v54 = vmul.f32 %v703_v51, %v658_v33  ;;  %v711_v56 = vrot.slane %v703_v51, %v710_v49 }
 0x156   :  { %v706_v57 = vsub.f32 %v704_v52, %v705_v54  ;;  %v713_v58 = vmul.f32 %v711_v56, %v1363_v35  ;;  %v714_v59 = vmul.f32 %v711_v56, %v1361_v32  ;;  %v715_v60 = vmul.f32 %v711_v56, %v1365_v37 }
 0x157   :  { %v716_v61 = vmul.f32 %v711_v56, %v1369_v42  ;;  %v717_v63 = vmul.f32 %v711_v56, %v1375_v48  ;;  %v718_v0 = vmul.f32 %v711_v56, %v1381_v55  ;;  %v719_v1 = vmul.f32 %v711_v56, %v1386_v62 }
 0x158   :  { %v720_v3 = vmul.f32 %v711_v56, %v1391_v5  ;;  %v721_v4 = vmul.f32 %v711_v56, %v1396_v11  ;;  %v722_v6 = vmul.f32 %v711_v56, %v1402_v22  ;;  %v723_v35 = vmul.f32 %v711_v56, %v1407_v29 }
 0x159   :  { %v724_v32 = vmul.f32 %v711_v56, %v1412_v39  ;;  %v733_v7 = vrot.slane %v706_v57, %v710_v49  ;;  %v725_v37 = vmul.f32 %v711_v56, %v1417_v46  ;;  %v726_v42 = vmul.f32 %v711_v56, %v1422_v53 }
 0x15a   :  { %v727_v48 = vmul.f32 %v711_v56, %v631_v2  ;;  %v728_v8 = vmul.f32 %v711_v56, %v634_v13 }
 0x15b   :  { %v735_v55 = vadd.f32 %v733_v7, %v713_v58  ;;  %v736_v9 = vadd.f32 %v733_v7, %v714_v59  ;;  %v737_v62 = vadd.f32 %v733_v7, %v715_v60  ;;  %v738_v10 = vadd.f32 %v733_v7, %v716_v61 }
 0x15c   :  { %v739_v5 = vadd.f32 %v733_v7, %v717_v63  ;;  %v740_v12 = vadd.f32 %v733_v7, %v718_v0  ;;  %v741_v11 = vadd.f32 %v733_v7, %v719_v1  ;;  %v742_v14 = vadd.f32 %v733_v7, %v720_v3 }
 0x15d   :  { %v743_v22 = vadd.f32 %v733_v7, %v721_v4  ;;  %v744_v15 = vadd.f32 %v733_v7, %v722_v6  ;;  %v745_v29 = vadd.f32 %v733_v7, %v723_v35  ;;  %v746_v16 = vadd.f32 %v733_v7, %v724_v32 }
 0x15e   :  { %v747_v39 = vadd.f32 %v733_v7, %v725_v37  ;;  %v748_v17 = vadd.f32 %v733_v7, %v726_v42  ;;  %v749_v18 = vadd.f32 %v733_v7, %v727_v48  ;;  %v750_v46 = vadd.f32 %v733_v7, %v728_v8 }
 0x15f   :  { %v751_v19 = vmax.f32 %v735_v55, 0.0  ;;  %v752_v53 = vmax.f32 %v736_v9, 0.0  ;;  %v753_v2 = vmax.f32 %v737_v62, 0.0  ;;  %v754_v13 = vmax.f32 %v738_v10, 0.0 }
 0x160   :  { %v755_v20 = vmax.f32 %v739_v5, 0.0  ;;  %v756_v21 = vmax.f32 %v740_v12, 0.0  ;;  %v757_v23 = vmax.f32 %v741_v11, 0.0  ;;  %v758_v24 = vmax.f32 %v742_v14, 0.0 }
 0x161   :  { %v759_v25 = vmax.f32 %v743_v22, 0.0  ;;  %v760_v26 = vmax.f32 %v744_v15, 0.0  ;;  %v761_v27 = vmax.f32 %v745_v29, 0.0  ;;  %v762_v28 = vmax.f32 %v746_v16, 0.0 }
 0x162   :  { %v763_v30 = vmax.f32 %v747_v39, 0.0  ;;  %v764_v31 = vmax.f32 %v748_v17, 0.0  ;;  %v765_v33 = vmax.f32 %v749_v18, 0.0  ;;  %v766_v34 = vmax.f32 %v750_v46, 0.0 }
 0x163   :  { %v953_v36 = vpack.c.bf16 %v752_v53, %v751_v19  ;;  %v958_v38 = vpack.c.bf16 %v754_v13, %v753_v2  ;;  %v963_v40 = vpack.c.bf16 %v756_v21, %v755_v20  ;;  %v968_v41 = vpack.c.bf16 %v758_v24, %v757_v23 }
 0x164   :  { %v973_v43 = vpack.c.bf16 %v760_v26, %v759_v25  ;;  %v978_v44 = vpack.c.bf16 %v762_v28, %v761_v27  ;;  %v983_v45 = vpack.c.bf16 %v764_v31, %v763_v30  ;;  %v988_v47 = vpack.c.bf16 %v766_v34, %v765_v33 }
 0x165   :  { %954 = vst [vmem:[%s1479_s4] sm:$0xff] %v953_v36   ;;  %990 = vst [vmem:[%s1479_s4 + $0x8] sm:$0xff] %v958_v38  }
 0x166   :  { %991 = vst [vmem:[%s1479_s4 + $0x10] sm:$0xff] %v963_v40   ;;  %992 = vst [vmem:[%s1479_s4 + $0x18] sm:$0xff] %v968_v41  }
 0x167   :  { %993 = vst [vmem:[%s1479_s4 + $0x20] sm:$0xff] %v973_v43   ;;  %994 = vst [vmem:[%s1479_s4 + $0x28] sm:$0xff] %v978_v44  }
 0x168   :  { %995 = vst [vmem:[%s1479_s4 + $0x30] sm:$0xff] %v983_v45   ;;  %996 = vst [vmem:[%s1479_s4 + $0x38] sm:$0xff] %v988_v47  }

// kernel: lightweight_unetx_forward.35
= control target key start
LH: loop header
LB: loop body
LE: loop exit
PB: predicated region body
PF: predicated region fallthrough
CT: control target
= control target key end

     0   :  { %s1317_s1 = inlined_call_operand.vmem [shape: bf16[128,128], index: 1, kind: input, shape index: {}]   ;;  %s1318_s0 = inlined_call_operand.vmem [shape: bf16[512,128], index: 0, kind: input, shape index: {}]   ;;  %s1319_s2 = inlined_call_operand.vmem [shape: f32[1,128], index: 2, kind: input, shape index: {}]   ;;  %s1320_s3 = inlined_call_operand.vmem [shape: f32[512,128], index: 3, kind: output, shape index: {}]  }
   0x1   :  { %v876_v0 = vld [vmem:[%s1317_s1 + $0x38] sm:$0xff]   ;;  %v877_v1 = vld [vmem:[%s1317_s1 + $0x30] sm:$0xff]   ;;  %v878_v2 = vld [vmem:[%s1317_s1 + $0x28] sm:$0xff]  }
   0x2   :  { %780 = vmatprep.subr.bf16.mxu0 %v876_v0  ;;  %860 = vmatprep.subr.bf16.mxu1 %v876_v0  ;;  %v879_v3 = vld [vmem:[%s1317_s1 + $0x20] sm:$0xff]   ;;  %v880_v6 = vld [vmem:[%s1317_s1 + $0x18] sm:$0xff]   ;;  %v881_v7 = vld [vmem:[%s1317_s1 + $0x10] sm:$0xff]  }
   0x3   :  { %781 = vmatpush3.bf16.msra.mxu0 %v876_v0  ;;  %868 = vmatpush3.bf16.msra.mxu1 %v876_v0  ;;  %v884_v4 = vld [vmem:[%s1318_s0] sm:$0xff]   ;;  %v882_v8 = vld [vmem:[%s1317_s1 + $0x8] sm:$0xff]   ;;  %v888_v12 = vld [vmem:[%s1318_s0 + $0x10] sm:$0xff]  }
   0x4   :  { %782 = vmatprep.subr.bf16.mxu0 %v877_v1  ;;  %861 = vmatprep.subr.bf16.mxu1 %v877_v1  ;;  %v885_v5 = vld [vmem:[%s1318_s0 + $0x80] sm:$0xff]   ;;  %v886_v10 = vld [vmem:[%s1318_s0 + $0x8] sm:$0xff]   ;;  %v889_v13 = vld [vmem:[%s1318_s0 + $0x90] sm:$0xff]  }
   0x5   :  { %796 = vmatprep.mubr.bf16.mxu0 %v884_v4  ;;  %828 = vmatprep.mubr.bf16.mxu1 %v885_v5  ;;  %v883_v9 = vld [vmem:[%s1317_s1] sm:$0xff]   ;;  %v887_v11 = vld [vmem:[%s1318_s0 + $0x88] sm:$0xff]   ;;  %v890_v14 = vld [vmem:[%s1318_s0 + $0x18] sm:$0xff]  }
   0x6   :  { %v891_v15 = vld [vmem:[%s1318_s0 + $0x98] sm:$0xff]   ;;  %v892_v16 = vld [vmem:[%s1318_s0 + $0x20] sm:$0xff]   ;;  %v894_v18 = vld [vmem:[%s1318_s0 + $0x28] sm:$0xff]  }
   0x7   :  { %783 = vmatpush3.bf16.msra.mxu0 %v877_v1  ;;  %869 = vmatpush3.bf16.msra.mxu1 %v877_v1  ;;  %v893_v17 = vld [vmem:[%s1318_s0 + $0xa0] sm:$0xff]   ;;  %v895_v19 = vld [vmem:[%s1318_s0 + $0xa8] sm:$0xff]   ;;  %v896_v20 = vld [vmem:[%s1318_s0 + $0x30] sm:$0xff]  }
   0x8   :  { %784 = vmatprep.subr.bf16.mxu0 %v878_v2  ;;  %862 = vmatprep.subr.bf16.mxu1 %v878_v2  ;;  %v897_v21 = vld [vmem:[%s1318_s0 + $0xb0] sm:$0xff]   ;;  %v898_v22 = vld [vmem:[%s1318_s0 + $0x38] sm:$0xff]   ;;  %v900_v24 = vld [vmem:[%s1318_s0 + $0x40] sm:$0xff]  }
   0x9   :  { %v899_v23 = vld [vmem:[%s1318_s0 + $0xb8] sm:$0xff]   ;;  %v901_v25 = vld [vmem:[%s1318_s0 + $0xc0] sm:$0xff]   ;;  %v902_v26 = vld [vmem:[%s1318_s0 + $0x48] sm:$0xff]  }
   0xa   :  { %v903_v27 = vld [vmem:[%s1318_s0 + $0xc8] sm:$0xff]   ;;  %v904_v28 = vld [vmem:[%s1318_s0 + $0x50] sm:$0xff]   ;;  %v906_v30 = vld [vmem:[%s1318_s0 + $0x58] sm:$0xff]  }
   0xb   :  { %785 = vmatpush3.bf16.msra.mxu0 %v878_v2  ;;  %870 = vmatpush3.bf16.msra.mxu1 %v878_v2  ;;  %v905_v29 = vld [vmem:[%s1318_s0 + $0xd0] sm:$0xff]   ;;  %v907_v31 = vld [vmem:[%s1318_s0 + $0xd8] sm:$0xff]   ;;  %v908_v32 = vld [vmem:[%s1318_s0 + $0x60] sm:$0xff]  }
   0xc   :  { %786 = vmatprep.subr.bf16.mxu0 %v879_v3  ;;  %863 = vmatprep.subr.bf16.mxu1 %v879_v3  ;;  %v909_v33 = vld [vmem:[%s1318_s0 + $0xe0] sm:$0xff]   ;;  %v910_v34 = vld [vmem:[%s1318_s0 + $0x68] sm:$0xff]   ;;  %v912_v36 = vld [vmem:[%s1318_s0 + $0x70] sm:$0xff]  }
   0xd   :  { %v911_v35 = vld [vmem:[%s1318_s0 + $0xe8] sm:$0xff]   ;;  %v913_v37 = vld [vmem:[%s1318_s0 + $0xf0] sm:$0xff]   ;;  %v914_v38 = vld [vmem:[%s1318_s0 + $0x78] sm:$0xff]  }
   0xe   :  { %v915_v39 = vld [vmem:[%s1318_s0 + $0xf8] sm:$0xff]   ;;  %v1059_v40 = vld [vmem:[%s1319_s2] ss:$0 sm:$0xff] }
   0xf   :  { %787 = vmatpush3.bf16.msra.mxu0 %v879_v3  ;;  %871 = vmatpush3.bf16.msra.mxu1 %v879_v3 }
  0x10   :  { %788 = vmatprep.subr.bf16.mxu0 %v880_v6  ;;  %864 = vmatprep.subr.bf16.mxu1 %v880_v6 }
  0x13   :  { %789 = vmatpush3.bf16.msra.mxu0 %v880_v6  ;;  %872 = vmatpush3.bf16.msra.mxu1 %v880_v6 }
  0x14   :  { %790 = vmatprep.subr.bf16.mxu0 %v881_v7  ;;  %865 = vmatprep.subr.bf16.mxu1 %v881_v7 }
  0x17   :  { %791 = vmatpush3.bf16.msra.mxu0 %v881_v7  ;;  %873 = vmatpush3.bf16.msra.mxu1 %v881_v7 }
  0x18   :  { %792 = vmatprep.subr.bf16.mxu0 %v882_v8  ;;  %866 = vmatprep.subr.bf16.mxu1 %v882_v8 }
  0x1b   :  { %793 = vmatpush3.bf16.msra.mxu0 %v882_v8  ;;  %874 = vmatpush3.bf16.msra.mxu1 %v882_v8 }
  0x1c   :  { %794 = vmatprep.subr.bf16.mxu0 %v883_v9  ;;  %867 = vmatprep.subr.bf16.mxu1 %v883_v9 }
  0x1f   :  { %795 = vmatpush3.bf16.msra.mxu0 %v883_v9  ;;  %875 = vmatpush3.bf16.msra.mxu1 %v883_v9 }
  0x22   :  { %797 = vmatmul.mubr.bf16.vlgmr.msra.gmra.mxu0 %v886_v10  ;;  %829 = vmatmul.mubr.bf16.vlgmr.msra.gmra.mxu1 %v887_v11 }
  0x23   :  { %800 = vmatprep.mubr.bf16.mxu0 %v888_v12  ;;  %832 = vmatprep.mubr.bf16.mxu1 %v889_v13 }
  0x2a   :  { %801 = vmatmul.mubr.bf16.gmra.mxu0 %v890_v14  ;;  %833 = vmatmul.mubr.bf16.gmra.mxu1 %v891_v15 }
  0x2b   :  { %804 = vmatprep.mubr.bf16.mxu0 %v892_v16  ;;  %836 = vmatprep.mubr.bf16.mxu1 %v893_v17 }
  0x32   :  { %805 = vmatmul.mubr.bf16.gmra.mxu0 %v894_v18  ;;  %837 = vmatmul.mubr.bf16.gmra.mxu1 %v895_v19 }
  0x33   :  { %808 = vmatprep.mubr.bf16.mxu0 %v896_v20  ;;  %840 = vmatprep.mubr.bf16.mxu1 %v897_v21 }
  0x3a   :  { %809 = vmatmul.mubr.bf16.gmra.mxu0 %v898_v22  ;;  %841 = vmatmul.mubr.bf16.gmra.mxu1 %v899_v23 }
  0x3b   :  { %812 = vmatprep.mubr.bf16.mxu0 %v900_v24  ;;  %844 = vmatprep.mubr.bf16.mxu1 %v901_v25 }
  0x42   :  { %813 = vmatmul.mubr.bf16.gmra.mxu0 %v902_v26  ;;  %845 = vmatmul.mubr.bf16.gmra.mxu1 %v903_v27 }
  0x43   :  { %816 = vmatprep.mubr.bf16.mxu0 %v904_v28  ;;  %848 = vmatprep.mubr.bf16.mxu1 %v905_v29 }
  0x4a   :  { %817 = vmatmul.mubr.bf16.gmra.mxu0 %v906_v30  ;;  %849 = vmatmul.mubr.bf16.gmra.mxu1 %v907_v31 }
  0x4b   :  { %820 = vmatprep.mubr.bf16.mxu0 %v908_v32  ;;  %852 = vmatprep.mubr.bf16.mxu1 %v909_v33 }
  0x52   :  { %821 = vmatmul.mubr.bf16.gmra.mxu0 %v910_v34  ;;  %853 = vmatmul.mubr.bf16.gmra.mxu1 %v911_v35 }
  0x53   :  { %824 = vmatprep.mubr.bf16.mxu0 %v912_v36  ;;  %856 = vmatprep.mubr.bf16.mxu1 %v913_v37 }
  0x5a   :  { %825 = vmatmul.mubr.bf16.gmra.mxu0 %v914_v38  ;;  %857 = vmatmul.mubr.bf16.gmra.mxu1 %v915_v39 }
  0xe2   :  { %v798_v41 = vpop.f32.mrf.mxu0  ;;  %v830_v42 = vpop.f32.mrf.mxu1 }
  0xe3   :  { %v385_v43 = vadd.f32 %v798_v41, %v1059_v40  ;;  %v513_v44 = vadd.f32 %v830_v42, %v1059_v40 }
  0xe4   :  { %v376_v45 = vpop.f32.mrf.mxu0  ;;  %v504_v46 = vpop.f32.mrf.mxu1 }
  0xe5   :  { %633 = vst [vmem:[%s1320_s3 + $0x10] sm:$0xff] %v385_v43  ;;  %665 = vst [vmem:[%s1320_s3 + $0x110] sm:$0xff] %v513_v44  ;;  %v377_v47 = vadd.f32 %v1059_v40, %v376_v45  ;;  %v505_v48 = vadd.f32 %v1059_v40, %v504_v46 }
  0xe6   :  { %v799_v49 = vpop.f32.mrf.mxu0  ;;  %v831_v50 = vpop.f32.mrf.mxu1 }
  0xe7   :  { %631 = vst [vmem:[%s1320_s3] sm:$0xff] %v377_v47  ;;  %663 = vst [vmem:[%s1320_s3 + $0x100] sm:$0xff] %v505_v48  ;;  %v388_v51 = vadd.f32 %v799_v49, %v1059_v40  ;;  %v516_v52 = vadd.f32 %v831_v50, %v1059_v40 }
  0xe8   :  { %v379_v53 = vpop.f32.mrf.mxu0  ;;  %v507_v54 = vpop.f32.mrf.mxu1 }
  0xe9   :  { %634 = vst [vmem:[%s1320_s3 + $0x18] sm:$0xff] %v388_v51  ;;  %666 = vst [vmem:[%s1320_s3 + $0x118] sm:$0xff] %v516_v52  ;;  %v380_v55 = vadd.f32 %v1059_v40, %v379_v53  ;;  %v508_v56 = vadd.f32 %v1059_v40, %v507_v54 }
  0xea   :  { %v802_v57 = vpop.f32.mrf.mxu0  ;;  %v834_v58 = vpop.f32.mrf.mxu1 }
  0xeb   :  { %632 = vst [vmem:[%s1320_s3 + $0x8] sm:$0xff] %v380_v55  ;;  %664 = vst [vmem:[%s1320_s3 + $0x108] sm:$0xff] %v508_v56  ;;  %v401_v59 = vadd.f32 %v802_v57, %v1059_v40  ;;  %v529_v60 = vadd.f32 %v834_v58, %v1059_v40 }
  0xec   :  { %v392_v61 = vpop.f32.mrf.mxu0  ;;  %v520_v62 = vpop.f32.mrf.mxu1 }
  0xed   :  { %637 = vst [vmem:[%s1320_s3 + $0x30] sm:$0xff] %v401_v59  ;;  %669 = vst [vmem:[%s1320_s3 + $0x130] sm:$0xff] %v529_v60  ;;  %v393_v63 = vadd.f32 %v1059_v40, %v392_v61  ;;  %v521_v0 = vadd.f32 %v1059_v40, %v520_v62 }
  0xee   :  { %v803_v1 = vpop.f32.mrf.mxu0  ;;  %v835_v2 = vpop.f32.mrf.mxu1 }
  0xef   :  { %635 = vst [vmem:[%s1320_s3 + $0x20] sm:$0xff] %v393_v63  ;;  %667 = vst [vmem:[%s1320_s3 + $0x120] sm:$0xff] %v521_v0  ;;  %v404_v3 = vadd.f32 %v803_v1, %v1059_v40  ;;  %v532_v4 = vadd.f32 %v835_v2, %v1059_v40 }
  0xf0   :  { %v395_v5 = vpop.f32.mrf.mxu0  ;;  %v523_v6 = vpop.f32.mrf.mxu1 }
  0xf1   :  { %638 = vst [vmem:[%s1320_s3 + $0x38] sm:$0xff] %v404_v3  ;;  %670 = vst [vmem:[%s1320_s3 + $0x138] sm:$0xff] %v532_v4  ;;  %v396_v7 = vadd.f32 %v1059_v40, %v395_v5  ;;  %v524_v8 = vadd.f32 %v1059_v40, %v523_v6 }
  0xf2   :  { %v806_v9 = vpop.f32.mrf.mxu0  ;;  %v838_v10 = vpop.f32.mrf.mxu1 }
  0xf3   :  { %636 = vst [vmem:[%s1320_s3 + $0x28] sm:$0xff] %v396_v7  ;;  %668 = vst [vmem:[%s1320_s3 + $0x128] sm:$0xff] %v524_v8  ;;  %v417_v11 = vadd.f32 %v806_v9, %v1059_v40  ;;  %v545_v12 = vadd.f32 %v838_v10, %v1059_v40 }
  0xf4   :  { %v408_v13 = vpop.f32.mrf.mxu0  ;;  %v536_v14 = vpop.f32.mrf.mxu1 }
  0xf5   :  { %641 = vst [vmem:[%s1320_s3 + $0x50] sm:$0xff] %v417_v11  ;;  %673 = vst [vmem:[%s1320_s3 + $0x150] sm:$0xff] %v545_v12  ;;  %v409_v15 = vadd.f32 %v1059_v40, %v408_v13  ;;  %v537_v16 = vadd.f32 %v1059_v40, %v536_v14 }
  0xf6   :  { %v807_v17 = vpop.f32.mrf.mxu0  ;;  %v839_v18 = vpop.f32.mrf.mxu1 }
  0xf7   :  { %639 = vst [vmem:[%s1320_s3 + $0x40] sm:$0xff] %v409_v15  ;;  %671 = vst [vmem:[%s1320_s3 + $0x140] sm:$0xff] %v537_v16  ;;  %v420_v19 = vadd.f32 %v807_v17, %v1059_v40  ;;  %v548_v20 = vadd.f32 %v839_v18, %v1059_v40 }
  0xf8   :  { %v411_v21 = vpop.f32.mrf.mxu0  ;;  %v539_v22 = vpop.f32.mrf.mxu1 }
  0xf9   :  { %642 = vst [vmem:[%s1320_s3 + $0x58] sm:$0xff] %v420_v19  ;;  %674 = vst [vmem:[%s1320_s3 + $0x158] sm:$0xff] %v548_v20  ;;  %v412_v23 = vadd.f32 %v1059_v40, %v411_v21  ;;  %v540_v24 = vadd.f32 %v1059_v40, %v539_v22 }
  0xfa   :  { %v810_v25 = vpop.f32.mrf.mxu0  ;;  %v842_v26 = vpop.f32.mrf.mxu1 }
  0xfb   :  { %640 = vst [vmem:[%s1320_s3 + $0x48] sm:$0xff] %v412_v23  ;;  %672 = vst [vmem:[%s1320_s3 + $0x148] sm:$0xff] %v540_v24  ;;  %v433_v27 = vadd.f32 %v810_v25, %v1059_v40  ;;  %v561_v28 = vadd.f32 %v842_v26, %v1059_v40 }
  0xfc   :  { %v424_v29 = vpop.f32.mrf.mxu0  ;;  %v552_v30 = vpop.f32.mrf.mxu1 }
  0xfd   :  { %645 = vst [vmem:[%s1320_s3 + $0x70] sm:$0xff] %v433_v27  ;;  %677 = vst [vmem:[%s1320_s3 + $0x170] sm:$0xff] %v561_v28  ;;  %v425_v31 = vadd.f32 %v1059_v40, %v424_v29  ;;  %v553_v32 = vadd.f32 %v1059_v40, %v552_v30 }
  0xfe   :  { %v811_v33 = vpop.f32.mrf.mxu0  ;;  %v843_v34 = vpop.f32.mrf.mxu1 }
  0xff   :  { %643 = vst [vmem:[%s1320_s3 + $0x60] sm:$0xff] %v425_v31  ;;  %675 = vst [vmem:[%s1320_s3 + $0x160] sm:$0xff] %v553_v32  ;;  %v436_v35 = vadd.f32 %v811_v33, %v1059_v40  ;;  %v564_v36 = vadd.f32 %v843_v34, %v1059_v40 }
 0x100   :  { %v427_v37 = vpop.f32.mrf.mxu0  ;;  %v555_v38 = vpop.f32.mrf.mxu1 }
 0x101   :  { %646 = vst [vmem:[%s1320_s3 + $0x78] sm:$0xff] %v436_v35  ;;  %678 = vst [vmem:[%s1320_s3 + $0x178] sm:$0xff] %v564_v36  ;;  %v428_v39 = vadd.f32 %v1059_v40, %v427_v37  ;;  %v556_v41 = vadd.f32 %v1059_v40, %v555_v38 }
 0x102   :  { %v814_v42 = vpop.f32.mrf.mxu0  ;;  %v846_v43 = vpop.f32.mrf.mxu1 }
 0x103   :  { %644 = vst [vmem:[%s1320_s3 + $0x68] sm:$0xff] %v428_v39  ;;  %676 = vst [vmem:[%s1320_s3 + $0x168] sm:$0xff] %v556_v41  ;;  %v449_v44 = vadd.f32 %v814_v42, %v1059_v40  ;;  %v577_v45 = vadd.f32 %v846_v43, %v1059_v40 }
 0x104   :  { %v440_v46 = vpop.f32.mrf.mxu0  ;;  %v568_v47 = vpop.f32.mrf.mxu1 }
 0x105   :  { %649 = vst [vmem:[%s1320_s3 + $0x90] sm:$0xff] %v449_v44  ;;  %681 = vst [vmem:[%s1320_s3 + $0x190] sm:$0xff] %v577_v45  ;;  %v441_v48 = vadd.f32 %v1059_v40, %v440_v46  ;;  %v569_v49 = vadd.f32 %v1059_v40, %v568_v47 }
 0x106   :  { %v815_v50 = vpop.f32.mrf.mxu0  ;;  %v847_v51 = vpop.f32.mrf.mxu1 }
 0x107   :  { %647 = vst [vmem:[%s1320_s3 + $0x80] sm:$0xff] %v441_v48  ;;  %679 = vst [vmem:[%s1320_s3 + $0x180] sm:$0xff] %v569_v49  ;;  %v452_v52 = vadd.f32 %v815_v50, %v1059_v40  ;;  %v580_v53 = vadd.f32 %v847_v51, %v1059_v40 }
 0x108   :  { %v443_v54 = vpop.f32.mrf.mxu0  ;;  %v571_v55 = vpop.f32.mrf.mxu1 }
 0x109   :  { %650 = vst [vmem:[%s1320_s3 + $0x98] sm:$0xff] %v452_v52  ;;  %682 = vst [vmem:[%s1320_s3 + $0x198] sm:$0xff] %v580_v53  ;;  %v444_v56 = vadd.f32 %v1059_v40, %v443_v54  ;;  %v572_v57 = vadd.f32 %v1059_v40, %v571_v55 }
 0x10a   :  { %v818_v58 = vpop.f32.mrf.mxu0  ;;  %v850_v59 = vpop.f32.mrf.mxu1 }
 0x10b   :  { %648 = vst [vmem:[%s1320_s3 + $0x88] sm:$0xff] %v444_v56  ;;  %680 = vst [vmem:[%s1320_s3 + $0x188] sm:$0xff] %v572_v57  ;;  %v465_v60 = vadd.f32 %v818_v58, %v1059_v40  ;;  %v593_v61 = vadd.f32 %v850_v59, %v1059_v40 }
 0x10c   :  { %v456_v62 = vpop.f32.mrf.mxu0  ;;  %v584_v63 = vpop.f32.mrf.mxu1 }
 0x10d   :  { %653 = vst [vmem:[%s1320_s3 + $0xb0] sm:$0xff] %v465_v60  ;;  %685 = vst [vmem:[%s1320_s3 + $0x1b0] sm:$0xff] %v593_v61  ;;  %v457_v0 = vadd.f32 %v1059_v40, %v456_v62  ;;  %v585_v1 = vadd.f32 %v1059_v40, %v584_v63 }
 0x10e   :  { %v819_v2 = vpop.f32.mrf.mxu0  ;;  %v851_v3 = vpop.f32.mrf.mxu1 }
 0x10f   :  { %651 = vst [vmem:[%s1320_s3 + $0xa0] sm:$0xff] %v457_v0  ;;  %683 = vst [vmem:[%s1320_s3 + $0x1a0] sm:$0xff] %v585_v1  ;;  %v468_v4 = vadd.f32 %v819_v2, %v1059_v40  ;;  %v596_v5 = vadd.f32 %v851_v3, %v1059_v40 }
 0x110   :  { %v459_v6 = vpop.f32.mrf.mxu0  ;;  %v587_v7 = vpop.f32.mrf.mxu1 }
 0x111   :  { %654 = vst [vmem:[%s1320_s3 + $0xb8] sm:$0xff] %v468_v4  ;;  %686 = vst [vmem:[%s1320_s3 + $0x1b8] sm:$0xff] %v596_v5  ;;  %v460_v8 = vadd.f32 %v1059_v40, %v459_v6  ;;  %v588_v9 = vadd.f32 %v1059_v40, %v587_v7 }
 0x112   :  { %v822_v10 = vpop.f32.mrf.mxu0  ;;  %v854_v11 = vpop.f32.mrf.mxu1 }
 0x113   :  { %652 = vst [vmem:[%s1320_s3 + $0xa8] sm:$0xff] %v460_v8  ;;  %684 = vst [vmem:[%s1320_s3 + $0x1a8] sm:$0xff] %v588_v9  ;;  %v481_v12 = vadd.f32 %v822_v10, %v1059_v40  ;;  %v609_v13 = vadd.f32 %v854_v11, %v1059_v40 }
 0x114   :  { %v472_v14 = vpop.f32.mrf.mxu0  ;;  %v600_v15 = vpop.f32.mrf.mxu1 }
 0x115   :  { %657 = vst [vmem:[%s1320_s3 + $0xd0] sm:$0xff] %v481_v12  ;;  %689 = vst [vmem:[%s1320_s3 + $0x1d0] sm:$0xff] %v609_v13  ;;  %v473_v16 = vadd.f32 %v1059_v40, %v472_v14  ;;  %v601_v17 = vadd.f32 %v1059_v40, %v600_v15 }
 0x116   :  { %v823_v18 = vpop.f32.mrf.mxu0  ;;  %v855_v19 = vpop.f32.mrf.mxu1 }
 0x117   :  { %655 = vst [vmem:[%s1320_s3 + $0xc0] sm:$0xff] %v473_v16  ;;  %687 = vst [vmem:[%s1320_s3 + $0x1c0] sm:$0xff] %v601_v17  ;;  %v484_v20 = vadd.f32 %v823_v18, %v1059_v40  ;;  %v612_v21 = vadd.f32 %v855_v19, %v1059_v40 }
 0x118   :  { %v475_v22 = vpop.f32.mrf.mxu0  ;;  %v603_v23 = vpop.f32.mrf.mxu1 }
 0x119   :  { %658 = vst [vmem:[%s1320_s3 + $0xd8] sm:$0xff] %v484_v20  ;;  %690 = vst [vmem:[%s1320_s3 + $0x1d8] sm:$0xff] %v612_v21  ;;  %v476_v24 = vadd.f32 %v1059_v40, %v475_v22  ;;  %v604_v25 = vadd.f32 %v1059_v40, %v603_v23 }
 0x11a   :  { %v826_v26 = vpop.f32.mrf.mxu0  ;;  %v858_v27 = vpop.f32.mrf.mxu1 }
 0x11b   :  { %656 = vst [vmem:[%s1320_s3 + $0xc8] sm:$0xff] %v476_v24  ;;  %688 = vst [vmem:[%s1320_s3 + $0x1c8] sm:$0xff] %v604_v25  ;;  %v497_v28 = vadd.f32 %v826_v26, %v1059_v40  ;;  %v625_v29 = vadd.f32 %v858_v27, %v1059_v40 }
 0x11c   :  { %v488_v30 = vpop.f32.mrf.mxu0  ;;  %v616_v31 = vpop.f32.mrf.mxu1 }
 0x11d   :  { %661 = vst [vmem:[%s1320_s3 + $0xf0] sm:$0xff] %v497_v28  ;;  %693 = vst [vmem:[%s1320_s3 + $0x1f0] sm:$0xff] %v625_v29  ;;  %v489_v32 = vadd.f32 %v1059_v40, %v488_v30  ;;  %v617_v33 = vadd.f32 %v1059_v40, %v616_v31 }
 0x11e   :  { %v827_v34 = vpop.f32.mrf.mxu0  ;;  %v859_v35 = vpop.f32.mrf.mxu1 }
 0x11f   :  { %659 = vst [vmem:[%s1320_s3 + $0xe0] sm:$0xff] %v489_v32  ;;  %691 = vst [vmem:[%s1320_s3 + $0x1e0] sm:$0xff] %v617_v33  ;;  %v500_v36 = vadd.f32 %v827_v34, %v1059_v40  ;;  %v628_v37 = vadd.f32 %v859_v35, %v1059_v40 }
 0x120   :  { %v491_v38 = vpop.f32.mrf.mxu0  ;;  %v619_v39 = vpop.f32.mrf.mxu1 }
 0x121   :  { %662 = vst [vmem:[%s1320_s3 + $0xf8] sm:$0xff] %v500_v36  ;;  %694 = vst [vmem:[%s1320_s3 + $0x1f8] sm:$0xff] %v628_v37  ;;  %v492_v41 = vadd.f32 %v1059_v40, %v491_v38  ;;  %v620_v42 = vadd.f32 %v1059_v40, %v619_v39 }
 0x123   :  { %660 = vst [vmem:[%s1320_s3 + $0xe8] sm:$0xff] %v492_v41  ;;  %692 = vst [vmem:[%s1320_s3 + $0x1e8] sm:$0xff] %v620_v42 }

// kernel: lightweight_unetx_forward.34
= control target key start
LH: loop header
LB: loop body
LE: loop exit
PB: predicated region body
PF: predicated region fallthrough
CT: control target
= control target key end

     0   :  { %v3954_v0 = vmov 0   ;;  %vm1298_vm0 = vcmask 523264   ;;  %s6030_s1 = inlined_call_operand.vmem [shape: bf16[576,128], index: 1, kind: input, shape index: {}]   ;;  %s6031_s0 = inlined_call_operand.vmem [shape: bf16[512,576], index: 0, kind: input, shape index: {}]   ;;  %s6032_s2 = inlined_call_operand.vmem [shape: f32[1,128], index: 2, kind: input, shape index: {}]   ;;  %s6033_s3 = inlined_call_operand.vmem [shape: f32[1,128], index: 3, kind: input, shape index: {}]   ;;  %s6034_s4 = inlined_call_operand.vmem [shape: bf16[512,128], index: 4, kind: output, shape index: {}]  }
   0x1   :  { %1395 = vmatprep.subr.bf16.mxu0 %v3954_v0  ;;  %3659 = vmatprep.subr.bf16.mxu1 %v3954_v0  ;;  %v3692_v1 = vld [vmem:[%s6030_s1 + $0x38] sm:$0xff]   ;;  %v3693_v2 = vld [vmem:[%s6030_s1 + $0x30] sm:$0xff]   ;;  %v3694_v3 = vld [vmem:[%s6030_s1 + $0x28] sm:$0xff]  }
   0x2   :  { %1396 = vmatpush1.bf16.msra.mxu0 %v3692_v1  ;;  %3675 = vmatpush1.bf16.msra.mxu1 %v3692_v1  ;;  %v3695_v4 = vld [vmem:[%s6030_s1 + $0x20] sm:$0xff]   ;;  %v3696_v5 = vld [vmem:[%s6030_s1 + $0x18] sm:$0xff]   ;;  %v3697_v7 = vld [vmem:[%s6030_s1 + $0x10] sm:$0xff]  }
   0x3   :  { %1397 = vmatprep.subr.bf16.mxu0 %v3954_v0  ;;  %3660 = vmatprep.subr.bf16.mxu1 %v3954_v0  ;;  %v3710_v6 = vld [vmem:[%s6031_s0 + $0x4] ss:$20 sps:$4 sm:$0xff]   ;;  %v3698_v9 = vld [vmem:[%s6030_s1 + $0x8] sm:$0xff]   ;;  %v3701_v12 = vld [vmem:[%s6030_s1 + $0x70] sm:$0xff]  }
   0x4   :  { %v3713_v8 = vld [vmem:[%s6031_s0 + $0x3c4] ss:$20 sps:$4 sm:$0xff]   ;;  %1427 = vmatprep.mubr.bf16.mxu0 %v3710_v6  ;;  %v3702_v13 = vld [vmem:[%s6030_s1 + $0x68] sm:$0xff]   ;;  %v3705_v16 = vld [vmem:[%s6030_s1 + $0x50] sm:$0xff]  }
   0x5   :  { %1619 = vmatprep.mubr.bf16.mxu1 %v3713_v8  ;;  %v3699_v10 = vld [vmem:[%s6030_s1] sm:$0xff]   ;;  %v3700_v11 = vld [vmem:[%s6030_s1 + $0x78] sm:$0xff]   ;;  %v3706_v17 = vld [vmem:[%s6030_s1 + $0x48] sm:$0xff]  }
   0x6   :  { %1398 = vmatpush1.bf16.msra.mxu0 %v3693_v2  ;;  %3676 = vmatpush1.bf16.msra.mxu1 %v3693_v2  ;;  %v3703_v14 = vld [vmem:[%s6030_s1 + $0x60] sm:$0xff]   ;;  %v3704_v15 = vld [vmem:[%s6030_s1 + $0x58] sm:$0xff]   ;;  %v3763_v25 = vld [vmem:[%s6030_s1 + $0x110] sm:$0xff]  }
   0x7   :  { %1399 = vmatprep.subr.bf16.mxu0 %v3954_v0  ;;  %3661 = vmatprep.subr.bf16.mxu1 %v3954_v0  ;;  %v3707_v18 = vld [vmem:[%s6030_s1 + $0x40] sm:$0xff]   ;;  %v3714_v19 = vld [vmem:[%s6030_s1 + $0x118] sm:$0xff]   ;;  %v3716_v26 = vld [vmem:[%s6030_s1 + $0xb0] sm:$0xff]  }
   0x8   :  { %v3708_v20 = vld [vmem:[%s6031_s0] ss:$20 sps:$4 sm:$0xff]   ;;  %v3715_v22 = vld [vmem:[%s6030_s1 + $0xb8] sm:$0xff]   ;;  %v3723_v29 = vld [vmem:[%s6030_s1 + $0xa8] sm:$0xff]  }
   0x9   :  { %v3711_v21 = vld [vmem:[%s6031_s0 + $0x3c0] ss:$20 sps:$4 sm:$0xff]   ;;  %v3721_v27 = vld [vmem:[%s6031_s0 + $0x28] ss:$20 sps:$4 sm:$0xff]   ;;  %v3729_v34 = vld [vmem:[%s6031_s0 + $0x50] ss:$20 sps:$4 sm:$0xff]  }
   0xa   :  { %1400 = vmatpush1.bf16.msra.mxu0 %v3694_v3  ;;  %3677 = vmatpush1.bf16.msra.mxu1 %v3694_v3  ;;  %v3717_v23 = vld [vmem:[%s6031_s0 + $0x2c] ss:$20 sps:$4 sm:$0xff]   ;;  %v3722_v28 = vld [vmem:[%s6031_s0 + $0x3e8] ss:$20 sps:$4 sm:$0xff]   ;;  %v3730_v35 = vld [vmem:[%s6031_s0 + $0x410] ss:$20 sps:$4 sm:$0xff]  }
   0xb   :  { %1401 = vmatprep.subr.bf16.mxu0 %v3954_v0  ;;  %3662 = vmatprep.subr.bf16.mxu1 %v3954_v0  ;;  %v3719_v24 = vld [vmem:[%s6031_s0 + $0x3ec] ss:$20 sps:$4 sm:$0xff]   ;;  %v3725_v31 = vld [vmem:[%s6031_s0 + $0x54] ss:$20 sps:$4 sm:$0xff]   ;;  %v3731_v36 = vld [vmem:[%s6030_s1 + $0x98] sm:$0xff]  }
   0xc   :  { %v3804_v30 = vld [vmem:[%s6030_s1 + $0x108] sm:$0xff]   ;;  %v3724_v33 = vld [vmem:[%s6030_s1 + $0xa0] sm:$0xff]   ;;  %v3733_v37 = vld [vmem:[%s6031_s0 + $0x7c] ss:$20 sps:$4 sm:$0xff]  }
   0xd   :  { %v3727_v32 = vld [vmem:[%s6031_s0 + $0x414] ss:$20 sps:$4 sm:$0xff]   ;;  %v3735_v38 = vld [vmem:[%s6031_s0 + $0x43c] ss:$20 sps:$4 sm:$0xff]   ;;  %v3737_v40 = vld [vmem:[%s6031_s0 + $0x78] ss:$20 sps:$4 sm:$0xff]  }
   0xe   :  { %1402 = vmatpush1.bf16.msra.mxu0 %v3695_v4  ;;  %3678 = vmatpush1.bf16.msra.mxu1 %v3695_v4  ;;  %v3732_v39 = vld [vmem:[%s6030_s1 + $0x90] sm:$0xff]   ;;  %v3738_v41 = vld [vmem:[%s6031_s0 + $0x438] ss:$20 sps:$4 sm:$0xff]   ;;  %v3841_v44 = vld [vmem:[%s6030_s1 + $0x100] sm:$0xff]  }
   0xf   :  { %1403 = vmatprep.subr.bf16.mxu0 %v3954_v0  ;;  %3663 = vmatprep.subr.bf16.mxu1 %v3954_v0  ;;  %v3739_v42 = vld [vmem:[%s6030_s1 + $0x88] sm:$0xff]   ;;  %v3741_v43 = vld [vmem:[%s6031_s0 + $0xa4] ss:$20 sps:$4 sm:$0xff]   ;;  %v3745_v47 = vld [vmem:[%s6031_s0 + $0xa0] ss:$20 sps:$4 sm:$0xff]  }
  0x10   :  { %v3743_v45 = vld [vmem:[%s6031_s0 + $0x464] ss:$20 sps:$4 sm:$0xff]   ;;  %v3746_v48 = vld [vmem:[%s6031_s0 + $0x460] ss:$20 sps:$4 sm:$0xff]   ;;  %v3753_v53 = vld [vmem:[%s6031_s0 + $0xc8] ss:$20 sps:$4 sm:$0xff]  }
  0x11   :  { %v3740_v46 = vld [vmem:[%s6030_s1 + $0x80] sm:$0xff]   ;;  %v3747_v49 = vld [vmem:[%s6030_s1 + $0xf8] sm:$0xff]   ;;  %v3748_v52 = vld [vmem:[%s6030_s1 + $0xf0] sm:$0xff]  }
  0x12   :  { %1404 = vmatpush1.bf16.msra.mxu0 %v3696_v5  ;;  %3679 = vmatpush1.bf16.msra.mxu1 %v3696_v5  ;;  %v3749_v50 = vld [vmem:[%s6031_s0 + $0xcc] ss:$20 sps:$4 sm:$0xff]   ;;  %v3754_v54 = vld [vmem:[%s6031_s0 + $0x488] ss:$20 sps:$4 sm:$0xff]   ;;  %v3761_v59 = vld [vmem:[%s6031_s0 + $0xf0] ss:$20 sps:$4 sm:$0xff]  }
  0x13   :  { %1405 = vmatprep.subr.bf16.mxu0 %v3954_v0  ;;  %3664 = vmatprep.subr.bf16.mxu1 %v3954_v0  ;;  %v3751_v51 = vld [vmem:[%s6031_s0 + $0x48c] ss:$20 sps:$4 sm:$0xff]   ;;  %v3757_v56 = vld [vmem:[%s6031_s0 + $0xf4] ss:$20 sps:$4 sm:$0xff]   ;;  %v3762_v60 = vld [vmem:[%s6031_s0 + $0x4b0] ss:$20 sps:$4 sm:$0xff]  }
  0x14   :  { %v3755_v55 = vld [vmem:[%s6030_s1 + $0xe8] sm:$0xff]   ;;  %v3756_v58 = vld [vmem:[%s6030_s1 + $0xe0] sm:$0xff]   ;;  %v3764_v61 = vld [vmem:[%s6030_s1 + $0xd8] sm:$0xff]  }
  0x15   :  { %v3759_v57 = vld [vmem:[%s6031_s0 + $0x4b4] ss:$20 sps:$4 sm:$0xff]   ;;  %v3766_v62 = vld [vmem:[%s6031_s0 + $0x11c] ss:$20 sps:$4 sm:$0xff]   ;;  %v3770_v2 = vld [vmem:[%s6031_s0 + $0x118] ss:$20 sps:$4 sm:$0xff]  }
  0x16   :  { %1406 = vmatpush1.bf16.msra.mxu0 %v3697_v7  ;;  %3680 = vmatpush1.bf16.msra.mxu1 %v3697_v7  ;;  %v3768_v63 = vld [vmem:[%s6031_s0 + $0x4dc] ss:$20 sps:$4 sm:$0xff]   ;;  %v3771_v3 = vld [vmem:[%s6031_s0 + $0x4d8] ss:$20 sps:$4 sm:$0xff]   ;;  %v3773_v7 = vld [vmem:[%s6030_s1 + $0xc0] sm:$0xff]  }
  0x17   :  { %1407 = vmatprep.subr.bf16.mxu0 %v3954_v0  ;;  %3665 = vmatprep.subr.bf16.mxu1 %v3954_v0  ;;  %v3765_v1 = vld [vmem:[%s6030_s1 + $0xd0] sm:$0xff]   ;;  %v3772_v4 = vld [vmem:[%s6030_s1 + $0xc8] sm:$0xff]   ;;  %v3774_v5 = vld [vmem:[%s6031_s0 + $0x144] ss:$20 sps:$4 sm:$0xff]  }
  0x18   :  { %v3778_v6 = vld [vmem:[%s6031_s0 + $0xc] ss:$20 sps:$4 sm:$0xff]   ;;  %v3776_v8 = vld [vmem:[%s6031_s0 + $0x8] ss:$20 sps:$4 sm:$0xff]  }
  0x1a   :  { %1408 = vmatpush1.bf16.msra.mxu0 %v3698_v9  ;;  %3681 = vmatpush1.bf16.msra.mxu1 %v3698_v9  ;;  %v3779_v9 = vld [vmem:[%s6031_s0 + $0x140] ss:$20 sps:$4 sm:$0xff]  }
  0x1b   :  { %1409 = vmatprep.subr.bf16.mxu0 %v3954_v0  ;;  %3666 = vmatprep.subr.bf16.mxu1 %v3954_v0 }
  0x1e   :  { %1410 = vmatpush1.bf16.msra.mxu0 %v3699_v10  ;;  %3682 = vmatpush1.bf16.msra.mxu1 %v3699_v10  ;;  %v3780_v10 = vld [vmem:[%s6031_s0 + $0x16c] ss:$20 sps:$4 sm:$0xff]  }
  0x1f   :  { %1411 = vmatprep.subr.bf16.mxu0 %v3954_v0  ;;  %3667 = vmatprep.subr.bf16.mxu1 %v3954_v0 }
  0x22   :  { %1412 = vmatpush2.bf16.msra.mxu0 %v3700_v11  ;;  %3683 = vmatpush2.bf16.msra.mxu1 %v3700_v11  ;;  %v3782_v11 = vld [vmem:[%s6031_s0 + $0x34] ss:$20 sps:$4 sm:$0xff]  }
  0x23   :  { %1413 = vmatprep.subr.bf16.mxu0 %v3954_v0  ;;  %3668 = vmatprep.subr.bf16.mxu1 %v3954_v0 }
  0x26   :  { %1414 = vmatpush2.bf16.msra.mxu0 %v3701_v12  ;;  %3684 = vmatpush2.bf16.msra.mxu1 %v3701_v12  ;;  %v3785_v12 = vld [vmem:[%s6031_s0 + $0x30] ss:$20 sps:$4 sm:$0xff]  }
  0x27   :  { %1415 = vmatprep.subr.bf16.mxu0 %v3954_v0  ;;  %3669 = vmatprep.subr.bf16.mxu1 %v3954_v0 }
  0x2a   :  { %1416 = vmatpush2.bf16.msra.mxu0 %v3702_v13  ;;  %3685 = vmatpush2.bf16.msra.mxu1 %v3702_v13  ;;  %v3786_v13 = vld [vmem:[%s6031_s0 + $0x194] ss:$20 sps:$4 sm:$0xff]  }
  0x2b   :  { %1417 = vmatprep.subr.bf16.mxu0 %v3954_v0  ;;  %3670 = vmatprep.subr.bf16.mxu1 %v3954_v0 }
  0x2e   :  { %1418 = vmatpush2.bf16.msra.mxu0 %v3703_v14  ;;  %3686 = vmatpush2.bf16.msra.mxu1 %v3703_v14  ;;  %v3788_v14 = vld [vmem:[%s6031_s0 + $0x5c] ss:$20 sps:$4 sm:$0xff]  }
  0x2f   :  { %1419 = vmatprep.subr.bf16.mxu0 %v3954_v0  ;;  %3671 = vmatprep.subr.bf16.mxu1 %v3954_v0 }
  0x32   :  { %1420 = vmatpush2.bf16.msra.mxu0 %v3704_v15  ;;  %3687 = vmatpush2.bf16.msra.mxu1 %v3704_v15  ;;  %v3790_v15 = vld [vmem:[%s6031_s0 + $0x190] ss:$20 sps:$4 sm:$0xff]  }
  0x33   :  { %1421 = vmatprep.subr.bf16.mxu0 %v3954_v0  ;;  %3672 = vmatprep.subr.bf16.mxu1 %v3954_v0 }
  0x36   :  { %1422 = vmatpush2.bf16.msra.mxu0 %v3705_v16  ;;  %3688 = vmatpush2.bf16.msra.mxu1 %v3705_v16  ;;  %v3791_v16 = vld [vmem:[%s6031_s0 + $0x58] ss:$20 sps:$4 sm:$0xff]  }
  0x37   :  { %1423 = vmatprep.subr.bf16.mxu0 %v3954_v0  ;;  %3673 = vmatprep.subr.bf16.mxu1 %v3954_v0 }
  0x3a   :  { %1424 = vmatpush2.bf16.msra.mxu0 %v3706_v17  ;;  %3689 = vmatpush2.bf16.msra.mxu1 %v3706_v17  ;;  %v3792_v17 = vld [vmem:[%s6031_s0 + $0x1bc] ss:$20 sps:$4 sm:$0xff]  }
  0x3b   :  { %1425 = vmatprep.subr.bf16.mxu0 %v3954_v0  ;;  %3674 = vmatprep.subr.bf16.mxu1 %v3954_v0 }
  0x3e   :  { %1426 = vmatpush2.bf16.msra.mxu0 %v3707_v18  ;;  %3690 = vmatpush2.bf16.msra.mxu1 %v3707_v18  ;;  %v3794_v18 = vld [vmem:[%s6031_s0 + $0x84] ss:$20 sps:$4 sm:$0xff]  }
  0x3f   :  { %1684 = vmatprep.subr.bf16.mxu1 %v3954_v0  ;;  %3587 = vmatprep.subr.bf16.mxu0 %v3714_v19 }
  0x41   :  { %1428 = vmatmul.mubr.bf16.vlgmr.msra.gmra.mxu0 %v3708_v20  ;;  %1620 = vmatmul.mubr.bf16.vlgmr.msra.gmra.mxu1 %v3711_v21  ;;  %v3797_v20 = vld [vmem:[%s6031_s0 + $0x80] ss:$20 sps:$4 sm:$0xff]   ;;  %v3798_v21 = vld [vmem:[%s6031_s0 + $0x1e4] ss:$20 sps:$4 sm:$0xff]  }
  0x42   :  { %1685 = vmatpush1.bf16.msra.mxu1 %v3715_v22  ;;  %3588 = vmatpush3.bf16.msra.mxu0 %v3714_v19  ;;  %v3796_v19 = vld [vmem:[%s6031_s0 + $0x1b8] ss:$20 sps:$4 sm:$0xff]  }
  0x43   :  { %1686 = vmatprep.subr.bf16.mxu1 %v3954_v0  ;;  %1435 = vmatprep.mubr.bf16.mxu0 %v3717_v23  ;;  %v3800_v22 = vld [vmem:[%s6031_s0 + $0xac] ss:$20 sps:$4 sm:$0xff]  }
  0x44   :  { %1627 = vmatprep.mubr.bf16.mxu1 %v3719_v24  ;;  %3589 = vmatprep.subr.bf16.mxu0 %v3763_v25  ;;  %v3802_v23 = vld [vmem:[%s6031_s0 + $0x1e0] ss:$20 sps:$4 sm:$0xff]   ;;  %v3803_v24 = vld [vmem:[%s6031_s0 + $0xa8] ss:$20 sps:$4 sm:$0xff]  }
  0x46   :  { %1687 = vmatpush1.bf16.msra.mxu1 %v3716_v26  ;;  %3590 = vmatpush3.bf16.msra.mxu0 %v3763_v25  ;;  %v3805_v25 = vld [vmem:[%s6031_s0 + $0x20c] ss:$20 sps:$4 sm:$0xff]   ;;  %v3807_v26 = vld [vmem:[%s6031_s0 + $0xd4] ss:$20 sps:$4 sm:$0xff]  }
  0x47   :  { %1688 = vmatprep.subr.bf16.mxu1 %v3954_v0  ;;  %3591 = vmatprep.subr.bf16.mxu0 %v3804_v30 }
  0x49   :  { %1436 = vmatmul.mubr.bf16.gmra.mxu0 %v3721_v27  ;;  %1628 = vmatmul.mubr.bf16.gmra.mxu1 %v3722_v28  ;;  %v3809_v27 = vld [vmem:[%s6031_s0 + $0x208] ss:$20 sps:$4 sm:$0xff]   ;;  %v3810_v28 = vld [vmem:[%s6031_s0 + $0xd0] ss:$20 sps:$4 sm:$0xff]  }
  0x4a   :  { %1689 = vmatpush1.bf16.msra.mxu1 %v3723_v29  ;;  %1443 = vmatprep.mubr.bf16.mxu0 %v3725_v31  ;;  %v3811_v29 = vld [vmem:[%s6031_s0 + $0x234] ss:$20 sps:$4 sm:$0xff]   ;;  %v3815_v31 = vld [vmem:[%s6031_s0 + $0x230] ss:$20 sps:$4 sm:$0xff]  }
  0x4b   :  { %1690 = vmatprep.subr.bf16.mxu1 %v3954_v0  ;;  %1635 = vmatprep.mubr.bf16.mxu1 %v3727_v32  ;;  %v3816_v32 = vld [vmem:[%s6031_s0 + $0xf8] ss:$20 sps:$4 sm:$0xff]  }
  0x4c   :  { %3592 = vmatpush3.bf16.msra.mxu0 %v3804_v30  ;;  %v3813_v30 = vld [vmem:[%s6031_s0 + $0xfc] ss:$20 sps:$4 sm:$0xff]  }
  0x4d   :  { %3593 = vmatprep.subr.bf16.mxu0 %v3841_v44 }
  0x4e   :  { %1691 = vmatpush1.bf16.msra.mxu1 %v3724_v33  ;;  %v3817_v33 = vld [vmem:[%s6031_s0 + $0x25c] ss:$20 sps:$4 sm:$0xff]  }
  0x4f   :  { %1692 = vmatprep.subr.bf16.mxu1 %v3954_v0 }
  0x50   :  { %3594 = vmatpush3.bf16.msra.mxu0 %v3841_v44  ;;  %v3834_v44 = vld [vmem:[%s6031_s0 + $0x170] ss:$20 sps:$4 sm:$0xff]  }
  0x51   :  { %1444 = vmatmul.mubr.bf16.gmra.mxu0 %v3729_v34  ;;  %1636 = vmatmul.mubr.bf16.gmra.mxu1 %v3730_v35  ;;  %v3819_v34 = vld [vmem:[%s6031_s0 + $0x124] ss:$20 sps:$4 sm:$0xff]  }
  0x52   :  { %1693 = vmatpush1.bf16.msra.mxu1 %v3731_v36  ;;  %1451 = vmatprep.mubr.bf16.mxu0 %v3733_v37  ;;  %v3821_v35 = vld [vmem:[%s6031_s0 + $0x258] ss:$20 sps:$4 sm:$0xff]   ;;  %v3822_v36 = vld [vmem:[%s6031_s0 + $0x120] ss:$20 sps:$4 sm:$0xff]  }
  0x53   :  { %1694 = vmatprep.subr.bf16.mxu1 %v3954_v0  ;;  %1643 = vmatprep.mubr.bf16.mxu1 %v3735_v38  ;;  %v3823_v37 = vld [vmem:[%s6031_s0 + $0x284] ss:$20 sps:$4 sm:$0xff]   ;;  %v3825_v38 = vld [vmem:[%s6031_s0 + $0x14c] ss:$20 sps:$4 sm:$0xff]  }
  0x56   :  { %1695 = vmatpush1.bf16.msra.mxu1 %v3732_v39  ;;  %v3827_v39 = vld [vmem:[%s6031_s0 + $0x280] ss:$20 sps:$4 sm:$0xff]  }
  0x57   :  { %1696 = vmatprep.subr.bf16.mxu1 %v3954_v0 }
  0x59   :  { %1452 = vmatmul.mubr.bf16.gmra.mxu0 %v3737_v40  ;;  %1644 = vmatmul.mubr.bf16.gmra.mxu1 %v3738_v41  ;;  %v3828_v40 = vld [vmem:[%s6031_s0 + $0x148] ss:$20 sps:$4 sm:$0xff]   ;;  %v3829_v41 = vld [vmem:[%s6031_s0 + $0x2ac] ss:$20 sps:$4 sm:$0xff]  }
  0x5a   :  { %1697 = vmatpush1.bf16.msra.mxu1 %v3739_v42  ;;  %1459 = vmatprep.mubr.bf16.mxu0 %v3741_v43  ;;  %v3831_v42 = vld [vmem:[%s6031_s0 + $0x174] ss:$20 sps:$4 sm:$0xff]  }
  0x5b   :  { %1698 = vmatprep.subr.bf16.mxu1 %v3954_v0  ;;  %1651 = vmatprep.mubr.bf16.mxu1 %v3743_v45  ;;  %v3833_v43 = vld [vmem:[%s6031_s0 + $0x2a8] ss:$20 sps:$4 sm:$0xff]  }
  0x5c   :  { %v3835_v45 = vld [vmem:[%s6031_s0 + $0x2d4] ss:$20 sps:$4 sm:$0xff]  }
  0x5e   :  { %1699 = vmatpush1.bf16.msra.mxu1 %v3740_v46  ;;  %v3837_v46 = vld [vmem:[%s6031_s0 + $0x19c] ss:$20 sps:$4 sm:$0xff]  }
  0x5f   :  { %1700 = vmatprep.subr.bf16.mxu1 %v3954_v0 }
  0x61   :  { %1460 = vmatmul.mubr.bf16.gmra.mxu0 %v3745_v47  ;;  %1652 = vmatmul.mubr.bf16.gmra.mxu1 %v3746_v48  ;;  %v3839_v47 = vld [vmem:[%s6031_s0 + $0x2d0] ss:$20 sps:$4 sm:$0xff]   ;;  %v3840_v48 = vld [vmem:[%s6031_s0 + $0x198] ss:$20 sps:$4 sm:$0xff]  }
  0x62   :  { %1701 = vmatpush2.bf16.msra.mxu1 %v3747_v49  ;;  %1467 = vmatprep.mubr.bf16.mxu0 %v3749_v50  ;;  %v3842_v49 = vld [vmem:[%s6031_s0 + $0x2fc] ss:$20 sps:$4 sm:$0xff]   ;;  %v3844_v50 = vld [vmem:[%s6031_s0 + $0x1c4] ss:$20 sps:$4 sm:$0xff]  }
  0x63   :  { %1702 = vmatprep.subr.bf16.mxu1 %v3954_v0  ;;  %1659 = vmatprep.mubr.bf16.mxu1 %v3751_v51  ;;  %v3846_v51 = vld [vmem:[%s6031_s0 + $0x2f8] ss:$20 sps:$4 sm:$0xff]  }
  0x66   :  { %1703 = vmatpush2.bf16.msra.mxu1 %v3748_v52  ;;  %v3847_v52 = vld [vmem:[%s6031_s0 + $0x1c0] ss:$20 sps:$4 sm:$0xff]  }
  0x67   :  { %1704 = vmatprep.subr.bf16.mxu1 %v3954_v0 }
  0x69   :  { %1468 = vmatmul.mubr.bf16.gmra.mxu0 %v3753_v53  ;;  %1660 = vmatmul.mubr.bf16.gmra.mxu1 %v3754_v54  ;;  %v3848_v53 = vld [vmem:[%s6031_s0 + $0x324] ss:$20 sps:$4 sm:$0xff]   ;;  %v3850_v54 = vld [vmem:[%s6031_s0 + $0x1ec] ss:$20 sps:$4 sm:$0xff]  }
  0x6a   :  { %1705 = vmatpush2.bf16.msra.mxu1 %v3755_v55  ;;  %1475 = vmatprep.mubr.bf16.mxu0 %v3757_v56  ;;  %v3852_v55 = vld [vmem:[%s6031_s0 + $0x320] ss:$20 sps:$4 sm:$0xff]   ;;  %v3853_v56 = vld [vmem:[%s6031_s0 + $0x1e8] ss:$20 sps:$4 sm:$0xff]  }
  0x6b   :  { %1706 = vmatprep.subr.bf16.mxu1 %v3954_v0  ;;  %1667 = vmatprep.mubr.bf16.mxu1 %v3759_v57  ;;  %v3854_v57 = vld [vmem:[%s6031_s0 + $0x34c] ss:$20 sps:$4 sm:$0xff]  }
  0x6e   :  { %1707 = vmatpush2.bf16.msra.mxu1 %v3756_v58  ;;  %v3856_v58 = vld [vmem:[%s6031_s0 + $0x214] ss:$20 sps:$4 sm:$0xff]  }
  0x6f   :  { %1708 = vmatprep.subr.bf16.mxu1 %v3954_v0 }
  0x71   :  { %1476 = vmatmul.mubr.bf16.gmra.mxu0 %v3761_v59  ;;  %1668 = vmatmul.mubr.bf16.gmra.mxu1 %v3762_v60  ;;  %v3858_v59 = vld [vmem:[%s6031_s0 + $0x348] ss:$20 sps:$4 sm:$0xff]   ;;  %v3859_v60 = vld [vmem:[%s6031_s0 + $0x210] ss:$20 sps:$4 sm:$0xff]  }
  0x72   :  { %1709 = vmatpush2.bf16.msra.mxu1 %v3764_v61  ;;  %1483 = vmatprep.mubr.bf16.mxu0 %v3766_v62  ;;  %v3860_v61 = vld [vmem:[%s6031_s0 + $0x374] ss:$20 sps:$4 sm:$0xff]   ;;  %v3862_v62 = vld [vmem:[%s6031_s0 + $0x23c] ss:$20 sps:$4 sm:$0xff]  }
  0x73   :  { %1710 = vmatprep.subr.bf16.mxu1 %v3954_v0  ;;  %1675 = vmatprep.mubr.bf16.mxu1 %v3768_v63  ;;  %v3864_v63 = vld [vmem:[%s6031_s0 + $0x370] ss:$20 sps:$4 sm:$0xff]  }
  0x76   :  { %1711 = vmatpush2.bf16.msra.mxu1 %v3765_v1  ;;  %v3865_v1 = vld [vmem:[%s6031_s0 + $0x238] ss:$20 sps:$4 sm:$0xff]  }
  0x77   :  { %1712 = vmatprep.subr.bf16.mxu1 %v3954_v0 }
  0x79   :  { %1484 = vmatmul.mubr.bf16.gmra.mxu0 %v3770_v2  ;;  %1676 = vmatmul.mubr.bf16.gmra.mxu1 %v3771_v3  ;;  %v3866_v2 = vld [vmem:[%s6031_s0 + $0x39c] ss:$20 sps:$4 sm:$0xff]   ;;  %v3868_v3 = vld [vmem:[%s6031_s0 + $0x264] ss:$20 sps:$4 sm:$0xff]  }
  0x7a   :  { %1713 = vmatpush2.bf16.msra.mxu1 %v3772_v4  ;;  %1491 = vmatprep.mubr.bf16.mxu0 %v3774_v5  ;;  %v3870_v4 = vld [vmem:[%s6031_s0 + $0x398] ss:$20 sps:$4 sm:$0xff]   ;;  %v3871_v5 = vld [vmem:[%s6031_s0 + $0x260] ss:$20 sps:$4 sm:$0xff]  }
  0x7b   :  { %1714 = vmatprep.subr.bf16.mxu1 %v3954_v0  ;;  %1716 = vmatprep.mubr.bf16.mxu1 %v3778_v6  ;;  %v3784_v0 = vld [vmem:[%s6031_s0 + $0x168] ss:$20 sps:$4 sm:$0xff]   ;;  %v3872_v6 = vld [vmem:[%s6031_s0 + $0x28c] ss:$20 sps:$4 sm:$0xff]  }
  0x7e   :  { %1715 = vmatpush2.bf16.msra.mxu1 %v3773_v7  ;;  %v3874_v7 = vld [vmem:[%s6031_s0 + $0x10] ss:$20 sps:$4 sm:$0xff]  }
  0x81   :  { %1492 = vmatmul.mubr.bf16.gmra.mxu0 %v3779_v9  ;;  %1717 = vmatmul.mubr.bf16.vlgmr.msra.gmra.mxu1 %v3776_v8  ;;  %v3875_v8 = vld [vmem:[%s6031_s0 + $0x288] ss:$20 sps:$4 sm:$0xff]   ;;  %v3876_v9 = vld [vmem:[%s6031_s0 + $0x38] ss:$20 sps:$4 sm:$0xff]  }
  0x82   :  { %1499 = vmatprep.mubr.bf16.mxu0 %v3780_v10  ;;  %1724 = vmatprep.mubr.bf16.mxu1 %v3782_v11  ;;  %v3877_v10 = vld [vmem:[%s6031_s0 + $0x2b4] ss:$20 sps:$4 sm:$0xff]  }
  0x83   :  { %v3879_v11 = vld [vmem:[%s6031_s0 + $0x60] ss:$20 sps:$4 sm:$0xff]  }
  0x89   :  { %1500 = vmatmul.mubr.bf16.gmra.mxu0 %v3784_v0  ;;  %1725 = vmatmul.mubr.bf16.gmra.mxu1 %v3785_v12 }
  0x8a   :  { %1507 = vmatprep.mubr.bf16.mxu0 %v3786_v13  ;;  %1732 = vmatprep.mubr.bf16.mxu1 %v3788_v14 }
  0x91   :  { %1508 = vmatmul.mubr.bf16.gmra.mxu0 %v3790_v15  ;;  %1733 = vmatmul.mubr.bf16.gmra.mxu1 %v3791_v16 }
  0x92   :  { %1515 = vmatprep.mubr.bf16.mxu0 %v3792_v17  ;;  %1740 = vmatprep.mubr.bf16.mxu1 %v3794_v18  ;;  %v3880_v17 = vld [vmem:[%s6031_s0 + $0x2b0] ss:$20 sps:$4 sm:$0xff]   ;;  %v3881_v18 = vld [vmem:[%s6031_s0 + $0x88] ss:$20 sps:$4 sm:$0xff]  }
  0x99   :  { %1516 = vmatmul.mubr.bf16.gmra.mxu0 %v3796_v19  ;;  %1741 = vmatmul.mubr.bf16.gmra.mxu1 %v3797_v20  ;;  %v3882_v19 = vld [vmem:[%s6031_s0 + $0x2dc] ss:$20 sps:$4 sm:$0xff]  }
  0x9a   :  { %1523 = vmatprep.mubr.bf16.mxu0 %v3798_v21  ;;  %1748 = vmatprep.mubr.bf16.mxu1 %v3800_v22  ;;  %v3884_v20 = vld [vmem:[%s6031_s0 + $0xb0] ss:$20 sps:$4 sm:$0xff]  }
  0xa1   :  { %1524 = vmatmul.mubr.bf16.gmra.mxu0 %v3802_v23  ;;  %1749 = vmatmul.mubr.bf16.gmra.mxu1 %v3803_v24 }
  0xa2   :  { %1531 = vmatprep.mubr.bf16.mxu0 %v3805_v25  ;;  %1756 = vmatprep.mubr.bf16.mxu1 %v3807_v26 }
  0xa9   :  { %1532 = vmatmul.mubr.bf16.gmra.mxu0 %v3809_v27  ;;  %1757 = vmatmul.mubr.bf16.gmra.mxu1 %v3810_v28 }
  0xaa   :  { %1539 = vmatprep.mubr.bf16.mxu0 %v3811_v29  ;;  %1764 = vmatprep.mubr.bf16.mxu1 %v3813_v30  ;;  %v3885_v29 = vld [vmem:[%s6031_s0 + $0x2d8] ss:$20 sps:$4 sm:$0xff]  }
  0xab   :  { %v3886_v30 = vld [vmem:[%s6031_s0 + $0xd8] ss:$20 sps:$4 sm:$0xff]  }
  0xb1   :  { %1540 = vmatmul.mubr.bf16.gmra.mxu0 %v3815_v31  ;;  %1765 = vmatmul.mubr.bf16.gmra.mxu1 %v3816_v32  ;;  %v3887_v31 = vld [vmem:[%s6031_s0 + $0x304] ss:$20 sps:$4 sm:$0xff]   ;;  %v3889_v32 = vld [vmem:[%s6031_s0 + $0x100] ss:$20 sps:$4 sm:$0xff]  }
  0xb2   :  { %1547 = vmatprep.mubr.bf16.mxu0 %v3817_v33  ;;  %1772 = vmatprep.mubr.bf16.mxu1 %v3819_v34 }
  0xb9   :  { %1548 = vmatmul.mubr.bf16.gmra.mxu0 %v3821_v35  ;;  %1773 = vmatmul.mubr.bf16.gmra.mxu1 %v3822_v36 }
  0xba   :  { %1555 = vmatprep.mubr.bf16.mxu0 %v3823_v37  ;;  %1780 = vmatprep.mubr.bf16.mxu1 %v3825_v38 }
  0xc1   :  { %1556 = vmatmul.mubr.bf16.gmra.mxu0 %v3827_v39  ;;  %1781 = vmatmul.mubr.bf16.gmra.mxu1 %v3828_v40 }
  0xc2   :  { %1563 = vmatprep.mubr.bf16.mxu0 %v3829_v41  ;;  %1788 = vmatprep.mubr.bf16.mxu1 %v3831_v42  ;;  %v3890_v41 = vld [vmem:[%s6031_s0 + $0x300] ss:$20 sps:$4 sm:$0xff]   ;;  %v3891_v42 = vld [vmem:[%s6031_s0 + $0x128] ss:$20 sps:$4 sm:$0xff]  }
  0xc9   :  { %1564 = vmatmul.mubr.bf16.gmra.mxu0 %v3833_v43  ;;  %1789 = vmatmul.mubr.bf16.gmra.mxu1 %v3834_v44  ;;  %v3894_v43 = vld [vmem:[%s6031_s0 + $0x32c] ss:$20 sps:$4 sm:$0xff]   ;;  %v3895_v44 = vld [vmem:[%s6031_s0 + $0x150] ss:$20 sps:$4 sm:$0xff]  }
  0xca   :  { %1571 = vmatprep.mubr.bf16.mxu0 %v3835_v45  ;;  %1796 = vmatprep.mubr.bf16.mxu1 %v3837_v46 }
  0xd1   :  { %1572 = vmatmul.mubr.bf16.gmra.mxu0 %v3839_v47  ;;  %1797 = vmatmul.mubr.bf16.gmra.mxu1 %v3840_v48 }
  0xd2   :  { %1579 = vmatprep.mubr.bf16.mxu0 %v3842_v49  ;;  %1804 = vmatprep.mubr.bf16.mxu1 %v3844_v50 }
  0xd9   :  { %1580 = vmatmul.mubr.bf16.gmra.mxu0 %v3846_v51  ;;  %1805 = vmatmul.mubr.bf16.gmra.mxu1 %v3847_v52 }
  0xda   :  { %1587 = vmatprep.mubr.bf16.mxu0 %v3848_v53  ;;  %1812 = vmatprep.mubr.bf16.mxu1 %v3850_v54  ;;  %v3892_v53 = vld [vmem:[%s6031_s0 + $0x328] ss:$20 sps:$4 sm:$0xff]   ;;  %v3896_v54 = vld [vmem:[%s6031_s0 + $0x178] ss:$20 sps:$4 sm:$0xff]  }
  0xe1   :  { %1588 = vmatmul.mubr.bf16.gmra.mxu0 %v3852_v55  ;;  %1813 = vmatmul.mubr.bf16.gmra.mxu1 %v3853_v56  ;;  %v3899_v55 = vld [vmem:[%s6031_s0 + $0x354] ss:$20 sps:$4 sm:$0xff]  }
  0xe2   :  { %1595 = vmatprep.mubr.bf16.mxu0 %v3854_v57  ;;  %1820 = vmatprep.mubr.bf16.mxu1 %v3856_v58  ;;  %v3900_v56 = vld [vmem:[%s6031_s0 + $0x1a0] ss:$20 sps:$4 sm:$0xff]  }
  0xe9   :  { %1596 = vmatmul.mubr.bf16.gmra.mxu0 %v3858_v59  ;;  %1821 = vmatmul.mubr.bf16.gmra.mxu1 %v3859_v60 }
  0xea   :  { %1603 = vmatprep.mubr.bf16.mxu0 %v3860_v61  ;;  %1828 = vmatprep.mubr.bf16.mxu1 %v3862_v62 }
  0xf1   :  { %1604 = vmatmul.mubr.bf16.gmra.mxu0 %v3864_v63  ;;  %1829 = vmatmul.mubr.bf16.gmra.mxu1 %v3865_v1 }
  0xf2   :  { %1611 = vmatprep.mubr.bf16.mxu0 %v3866_v2  ;;  %1836 = vmatprep.mubr.bf16.mxu1 %v3868_v3  ;;  %v3897_v2 = vld [vmem:[%s6031_s0 + $0x350] ss:$20 sps:$4 sm:$0xff]   ;;  %v3901_v3 = vld [vmem:[%s6031_s0 + $0x1c8] ss:$20 sps:$4 sm:$0xff]  }
  0xf9   :  { %1612 = vmatmul.mubr.bf16.gmra.mxu0 %v3870_v4  ;;  %1837 = vmatmul.mubr.bf16.gmra.mxu1 %v3871_v5  ;;  %v3904_v4 = vld [vmem:[%s6031_s0 + $0x37c] ss:$20 sps:$4 sm:$0xff]  }
  0xfa   :  { %1844 = vmatprep.mubr.bf16.mxu1 %v3872_v6  ;;  %3595 = vmatprep.mubr.msk.bf16.mxu0 %vm1298_vm0, %v3874_v7  ;;  %v3905_v5 = vld [vmem:[%s6031_s0 + $0x1f0] ss:$20 sps:$4 sm:$0xff]  }
 0x101   :  { %v4443_v0 = vpop.f32.mrf.mxu0  ;;  %v4445_v12 = vpop.f32.mrf.mxu1  ;;  %1845 = vmatmul.mubr.bf16.gmra.mxu1 %v3875_v8  ;;  %3596 = vmatmul.mubr.msk.bf16.vlgmr.msra.gmra.mxu0 %vm1298_vm0, %v3876_v9 }
 0x102   :  { %1852 = vmatprep.mubr.bf16.mxu1 %v3877_v10  ;;  %3599 = vmatprep.mubr.msk.bf16.mxu0 %vm1298_vm0, %v3879_v11 }
 0x103   :  { %v1431_v13 = vpop.f32.mrf.mxu0  ;;  %v1623_v14 = vpop.f32.mrf.mxu1 }
 0x105   :  { %v4449_v15 = vpop.f32.mrf.mxu0  ;;  %v4451_v16 = vpop.f32.mrf.mxu1 }
 0x106   :  { %6065 = vst [vmem:[#allocation2_spill] sm:$0xff] %v4451_v16 }
 0x107   :  { %v1434_v21 = vpop.f32.mrf.mxu0  ;;  %v1626_v22 = vpop.f32.mrf.mxu1 }
 0x109   :  { %v4465_v23 = vpop.f32.mrf.mxu0  ;;  %v4467_v24 = vpop.f32.mrf.mxu1  ;;  %1853 = vmatmul.mubr.bf16.gmra.mxu1 %v3880_v17  ;;  %3600 = vmatmul.mubr.msk.bf16.gmra.mxu0 %vm1298_vm0, %v3881_v18  ;;  %v3902_v17 = vld [vmem:[%s6031_s0 + $0x378] ss:$20 sps:$4 sm:$0xff]  }
 0x10a   :  { %6066 = vst [vmem:[#allocation3_spill] sm:$0xff] %v4467_v24  ;;  %1860 = vmatprep.mubr.bf16.mxu1 %v3882_v19  ;;  %3603 = vmatprep.mubr.msk.bf16.mxu0 %vm1298_vm0, %v3884_v20  ;;  %v3906_v18 = vld [vmem:[%s6031_s0 + $0x218] ss:$20 sps:$4 sm:$0xff]   ;;  %v3910_v20 = vld [vmem:[%s6031_s0 + $0x240] ss:$20 sps:$4 sm:$0xff]  }
 0x10b   :  { %v1439_v25 = vpop.f32.mrf.mxu0  ;;  %v1631_v26 = vpop.f32.mrf.mxu1  ;;  %v3909_v19 = vld [vmem:[%s6031_s0 + $0x3a4] ss:$20 sps:$4 sm:$0xff]  }
 0x10d   :  { %v4471_v27 = vpop.f32.mrf.mxu0  ;;  %v4473_v28 = vpop.f32.mrf.mxu1 }
 0x10e   :  { %6067 = vst [vmem:[#allocation4_spill] sm:$0xff] %v4473_v28 }
 0x10f   :  { %v1442_v33 = vpop.f32.mrf.mxu0  ;;  %v1634_v34 = vpop.f32.mrf.mxu1 }
 0x110   :  { %v3907_v33 = vld [vmem:[%s6031_s0 + $0x3a0] ss:$20 sps:$4 sm:$0xff]   ;;  %v3911_v34 = vld [vmem:[%s6031_s0 + $0x268] ss:$20 sps:$4 sm:$0xff]  }
 0x111   :  { %v4487_v35 = vpop.f32.mrf.mxu0  ;;  %v4489_v36 = vpop.f32.mrf.mxu1  ;;  %1861 = vmatmul.mubr.bf16.gmra.mxu1 %v3885_v29  ;;  %3604 = vmatmul.mubr.msk.bf16.gmra.mxu0 %vm1298_vm0, %v3886_v30 }
 0x112   :  { %6068 = vst [vmem:[#allocation5_spill] sm:$0xff] %v4489_v36  ;;  %1868 = vmatprep.mubr.bf16.mxu1 %v3887_v31  ;;  %3607 = vmatprep.mubr.msk.bf16.mxu0 %vm1298_vm0, %v3889_v32 }
 0x113   :  { %v1447_v37 = vpop.f32.mrf.mxu0  ;;  %v1639_v38 = vpop.f32.mrf.mxu1 }
 0x114   :  { %v3914_v37 = vld [vmem:[%s6031_s0 + $0x3cc] ss:$20 sps:$4 sm:$0xff]   ;;  %v3915_v38 = vld [vmem:[%s6031_s0 + $0x290] ss:$20 sps:$4 sm:$0xff]  }
 0x115   :  { %v4493_v39 = vpop.f32.mrf.mxu0  ;;  %v4495_v40 = vpop.f32.mrf.mxu1 }
 0x116   :  { %6069 = vst [vmem:[#allocation6_spill] sm:$0xff] %v4495_v40 }
 0x117   :  { %v1450_v45 = vpop.f32.mrf.mxu0  ;;  %v1642_v46 = vpop.f32.mrf.mxu1 }
 0x119   :  { %v4509_v47 = vpop.f32.mrf.mxu0  ;;  %v4511_v48 = vpop.f32.mrf.mxu1  ;;  %1869 = vmatmul.mubr.bf16.gmra.mxu1 %v3890_v41  ;;  %3608 = vmatmul.mubr.msk.bf16.gmra.mxu0 %vm1298_vm0, %v3891_v42 }
 0x11a   :  { %6070 = vst [vmem:[#allocation7_spill] sm:$0xff] %v4511_v48  ;;  %1876 = vmatprep.mubr.bf16.mxu1 %v3894_v43  ;;  %3611 = vmatprep.mubr.msk.bf16.mxu0 %vm1298_vm0, %v3895_v44 }
 0x11b   :  { %v1455_v49 = vpop.f32.mrf.mxu0  ;;  %v1647_v50 = vpop.f32.mrf.mxu1 }
 0x11d   :  { %v4515_v51 = vpop.f32.mrf.mxu0  ;;  %v4517_v52 = vpop.f32.mrf.mxu1 }
 0x11e   :  { %6071 = vst [vmem:[#allocation8_spill] sm:$0xff] %v4517_v52 }
 0x11f   :  { %v1458_v57 = vpop.f32.mrf.mxu0  ;;  %v1650_v58 = vpop.f32.mrf.mxu1 }
 0x121   :  { %v4531_v59 = vpop.f32.mrf.mxu0  ;;  %v4533_v60 = vpop.f32.mrf.mxu1  ;;  %1877 = vmatmul.mubr.bf16.gmra.mxu1 %v3892_v53  ;;  %3612 = vmatmul.mubr.msk.bf16.gmra.mxu0 %vm1298_vm0, %v3896_v54  ;;  %v3912_v53 = vld [vmem:[%s6031_s0 + $0x3c8] ss:$20 sps:$4 sm:$0xff]   ;;  %v3916_v54 = vld [vmem:[%s6031_s0 + $0x2b8] ss:$20 sps:$4 sm:$0xff]  }
 0x122   :  { %6072 = vst [vmem:[#allocation9_spill] sm:$0xff] %v4533_v60  ;;  %1884 = vmatprep.mubr.bf16.mxu1 %v3899_v55  ;;  %3615 = vmatprep.mubr.msk.bf16.mxu0 %vm1298_vm0, %v3900_v56  ;;  %v3919_v55 = vld [vmem:[%s6031_s0 + $0x3f4] ss:$20 sps:$4 sm:$0xff]  }
 0x123   :  { %v1463_v61 = vpop.f32.mrf.mxu0  ;;  %v1655_v62 = vpop.f32.mrf.mxu1  ;;  %v3920_v56 = vld [vmem:[%s6031_s0 + $0x2e0] ss:$20 sps:$4 sm:$0xff]  }
 0x125   :  { %v4537_v63 = vpop.f32.mrf.mxu0  ;;  %v4539_v1 = vpop.f32.mrf.mxu1 }
 0x126   :  { %6073 = vst [vmem:[#allocation10_spill] sm:$0xff] %v4539_v1 }
 0x127   :  { %v1466_v6 = vpop.f32.mrf.mxu0  ;;  %v1658_v7 = vpop.f32.mrf.mxu1 }
 0x128   :  { %v3917_v7 = vld [vmem:[%s6031_s0 + $0x3f0] ss:$20 sps:$4 sm:$0xff]  }
 0x129   :  { %v4553_v8 = vpop.f32.mrf.mxu0  ;;  %v4555_v9 = vpop.f32.mrf.mxu1  ;;  %1885 = vmatmul.mubr.bf16.gmra.mxu1 %v3897_v2  ;;  %3616 = vmatmul.mubr.msk.bf16.gmra.mxu0 %vm1298_vm0, %v3901_v3 }
 0x12a   :  { %6074 = vst [vmem:[#allocation11_spill] sm:$0xff] %v4555_v9  ;;  %1892 = vmatprep.mubr.bf16.mxu1 %v3904_v4  ;;  %3619 = vmatprep.mubr.msk.bf16.mxu0 %vm1298_vm0, %v3905_v5 }
 0x12b   :  { %v1471_v10 = vpop.f32.mrf.mxu0  ;;  %v1663_v11 = vpop.f32.mrf.mxu1 }
 0x12c   :  { %v3921_v10 = vld [vmem:[%s6031_s0 + $0x308] ss:$20 sps:$4 sm:$0xff]  }
 0x12d   :  { %v4559_v13 = vpop.f32.mrf.mxu0  ;;  %v4561_v14 = vpop.f32.mrf.mxu1 }
 0x12e   :  { %6075 = vst [vmem:[#allocation12_spill] sm:$0xff] %v4561_v14 }
 0x12f   :  { %v1474_v21 = vpop.f32.mrf.mxu0  ;;  %v1666_v22 = vpop.f32.mrf.mxu1 }
 0x131   :  { %v4575_v25 = vpop.f32.mrf.mxu0  ;;  %v4577_v26 = vpop.f32.mrf.mxu1  ;;  %1893 = vmatmul.mubr.bf16.gmra.mxu1 %v3902_v17  ;;  %3620 = vmatmul.mubr.msk.bf16.gmra.mxu0 %vm1298_vm0, %v3906_v18  ;;  %v3925_v17 = vld [vmem:[%s6031_s0 + $0x330] ss:$20 sps:$4 sm:$0xff]  }
 0x132   :  { %6076 = vst [vmem:[#allocation13_spill] sm:$0xff] %v4577_v26  ;;  %1900 = vmatprep.mubr.bf16.mxu1 %v3909_v19  ;;  %3623 = vmatprep.mubr.msk.bf16.mxu0 %vm1298_vm0, %v3910_v20 }
 0x133   :  { %v1479_v29 = vpop.f32.mrf.mxu0  ;;  %v1671_v30 = vpop.f32.mrf.mxu1 }
 0x135   :  { %v4581_v31 = vpop.f32.mrf.mxu0  ;;  %v4583_v32 = vpop.f32.mrf.mxu1 }
 0x136   :  { %6077 = vst [vmem:[#allocation14_spill] sm:$0xff] %v4583_v32 }
 0x137   :  { %v1482_v41 = vpop.f32.mrf.mxu0  ;;  %v1674_v42 = vpop.f32.mrf.mxu1 }
 0x138   :  { %v3930_v41 = vld [vmem:[%s6031_s0 + $0x380] ss:$20 sps:$4 sm:$0xff]  }
 0x139   :  { %v4597_v43 = vpop.f32.mrf.mxu0  ;;  %v4599_v44 = vpop.f32.mrf.mxu1  ;;  %1901 = vmatmul.mubr.bf16.gmra.mxu1 %v3907_v33  ;;  %3624 = vmatmul.mubr.msk.bf16.gmra.mxu0 %vm1298_vm0, %v3911_v34  ;;  %v3922_v34 = vld [vmem:[%s6031_s0 + $0x418] ss:$20 sps:$4 sm:$0xff]  }
 0x13a   :  { %6078 = vst [vmem:[#allocation15_spill] sm:$0xff] %v4599_v44  ;;  %1908 = vmatprep.mubr.bf16.mxu1 %v3914_v37  ;;  %3627 = vmatprep.mubr.msk.bf16.mxu0 %vm1298_vm0, %v3915_v38  ;;  %v3926_v37 = vld [vmem:[%s6031_s0 + $0x358] ss:$20 sps:$4 sm:$0xff]  }
 0x13b   :  { %v1487_v45 = vpop.f32.mrf.mxu0  ;;  %v1679_v46 = vpop.f32.mrf.mxu1 }
 0x13d   :  { %v4603_v49 = vpop.f32.mrf.mxu0  ;;  %v4605_v50 = vpop.f32.mrf.mxu1 }
 0x13e   :  { %6079 = vst [vmem:[#allocation16_spill] sm:$0xff] %v4605_v50 }
 0x13f   :  { %v1490_v57 = vpop.f32.mrf.mxu0  ;;  %v1682_v58 = vpop.f32.mrf.mxu1 }
 0x140   :  { %v3927_v58 = vld [vmem:[%s6031_s0 + $0x440] ss:$20 sps:$4 sm:$0xff]  }
 0x141   :  { %v4619_v61 = vpop.f32.mrf.mxu0  ;;  %v1718_v62 = vpop.f32.mrf.mxu1  ;;  %1909 = vmatmul.mubr.bf16.gmra.mxu1 %v3912_v53  ;;  %3628 = vmatmul.mubr.msk.bf16.gmra.mxu0 %vm1298_vm0, %v3916_v54 }
 0x142   :  { %v4623_v2 = vadd.f32 %v1718_v62, %v4443_v0  ;;  %1916 = vmatprep.mubr.bf16.mxu1 %v3919_v55  ;;  %3631 = vmatprep.mubr.msk.bf16.mxu0 %vm1298_vm0, %v3920_v56  ;;  %v3924_v0 = vld [vmem:[%s6031_s0 + $0x41c] ss:$20 sps:$4 sm:$0xff]  }
 0x143   :  { %v1495_v3 = vpop.f32.mrf.mxu0  ;;  %v1720_v4 = vpop.f32.mrf.mxu1  ;;  %v3931_v62 = vld [vmem:[%s6031_s0 + $0x3a8] ss:$20 sps:$4 sm:$0xff]  }
 0x144   :  { %v3935_v4 = vld [vmem:[%s6031_s0 + $0x3d0] ss:$20 sps:$4 sm:$0xff]  }
 0x145   :  { %v4626_v5 = vpop.f32.mrf.mxu0  ;;  %v1721_v6 = vpop.f32.mrf.mxu1 }
 0x146   :  { %v4635_v11 = vadd.f32 %v1721_v6, %v4449_v15 }
 0x147   :  { %v1498_v18 = vpop.f32.mrf.mxu0  ;;  %v1723_v19 = vpop.f32.mrf.mxu1 }
 0x149   :  { %v4643_v20 = vpop.f32.mrf.mxu0  ;;  %v1726_v21 = vpop.f32.mrf.mxu1  ;;  %1917 = vmatmul.mubr.bf16.gmra.mxu1 %v3917_v7  ;;  %3632 = vmatmul.mubr.msk.bf16.gmra.mxu0 %vm1298_vm0, %v3921_v10 }
 0x14a   :  { %v4647_v22 = vadd.f32 %v1726_v21, %v4465_v23  ;;  %1924 = vmatprep.mubr.bf16.mxu1 %v3924_v0  ;;  %3635 = vmatprep.mubr.msk.bf16.mxu0 %vm1298_vm0, %v3925_v17  ;;  %v3929_v23 = vld [vmem:[%s6031_s0 + $0x444] ss:$20 sps:$4 sm:$0xff]  }
 0x14b   :  { %v1503_v15 = vpop.f32.mrf.mxu0  ;;  %v1728_v29 = vpop.f32.mrf.mxu1 }
 0x14c   :  { %v3932_v15 = vld [vmem:[%s6031_s0 + $0x468] ss:$20 sps:$4 sm:$0xff]   ;;  %v3936_v29 = vld [vmem:[%s6031_s0 + $0x3f8] ss:$20 sps:$4 sm:$0xff]  }
 0x14d   :  { %v4650_v30 = vpop.f32.mrf.mxu0  ;;  %v1729_v33 = vpop.f32.mrf.mxu1 }
 0x14e   :  { %v4659_v38 = vadd.f32 %v1729_v33, %v4471_v27 }
 0x14f   :  { %v1506_v42 = vpop.f32.mrf.mxu0  ;;  %v1731_v45 = vpop.f32.mrf.mxu1 }
 0x151   :  { %v4667_v46 = vpop.f32.mrf.mxu0  ;;  %v1734_v53 = vpop.f32.mrf.mxu1  ;;  %1925 = vmatmul.mubr.bf16.gmra.mxu1 %v3922_v34  ;;  %3636 = vmatmul.mubr.msk.bf16.gmra.mxu0 %vm1298_vm0, %v3926_v37  ;;  %v3940_v34 = vld [vmem:[%s6031_s0 + $0x420] ss:$20 sps:$4 sm:$0xff]  }
 0x152   :  { %v4671_v54 = vadd.f32 %v1734_v53, %v4487_v35  ;;  %1932 = vmatprep.mubr.bf16.mxu1 %v3929_v23  ;;  %3639 = vmatprep.mubr.msk.bf16.mxu0 %vm1298_vm0, %v3930_v41  ;;  %v3934_v35 = vld [vmem:[%s6031_s0 + $0x46c] ss:$20 sps:$4 sm:$0xff]  }
 0x153   :  { %v1511_v27 = vpop.f32.mrf.mxu0  ;;  %v1736_v55 = vpop.f32.mrf.mxu1 }
 0x155   :  { %v4674_v56 = vpop.f32.mrf.mxu0  ;;  %v1737_v57 = vpop.f32.mrf.mxu1 }
 0x156   :  { %v4683_v3 = vadd.f32 %v1737_v57, %v4493_v39  ;;  %v3937_v57 = vld [vmem:[%s6031_s0 + $0x490] ss:$20 sps:$4 sm:$0xff]  }
 0x157   :  { %v1514_v6 = vpop.f32.mrf.mxu0  ;;  %v1739_v7 = vpop.f32.mrf.mxu1 }
 0x159   :  { %v4691_v10 = vpop.f32.mrf.mxu0  ;;  %v1742_v0 = vpop.f32.mrf.mxu1  ;;  %1933 = vmatmul.mubr.bf16.gmra.mxu1 %v3927_v58  ;;  %3640 = vmatmul.mubr.msk.bf16.gmra.mxu0 %vm1298_vm0, %v3931_v62  ;;  %v3941_v58 = vld [vmem:[%s6031_s0 + $0x448] ss:$20 sps:$4 sm:$0xff]  }
 0x15a   :  { %v4695_v17 = vadd.f32 %v1742_v0, %v4509_v47  ;;  %1940 = vmatprep.mubr.bf16.mxu1 %v3934_v35  ;;  %3643 = vmatprep.mubr.msk.bf16.mxu0 %vm1298_vm0, %v3935_v4  ;;  %v3939_v47 = vld [vmem:[%s6031_s0 + $0x494] ss:$20 sps:$4 sm:$0xff]   ;;  %v3945_v35 = vld [vmem:[%s6031_s0 + $0x470] ss:$20 sps:$4 sm:$0xff]  }
 0x15b   :  { %v1519_v39 = vpop.f32.mrf.mxu0  ;;  %v1744_v18 = vpop.f32.mrf.mxu1 }
 0x15d   :  { %v4698_v19 = vpop.f32.mrf.mxu0  ;;  %v1745_v21 = vpop.f32.mrf.mxu1 }
 0x15e   :  { %v4707_v33 = vadd.f32 %v1745_v21, %v4515_v51 }
 0x15f   :  { %v1522_v37 = vpop.f32.mrf.mxu0  ;;  %v1747_v23 = vpop.f32.mrf.mxu1 }
 0x160   :  { %v3950_v37 = vld [vmem:[%s6031_s0 + $0x4c0] ss:$20 sps:$4 sm:$0xff]  }
 0x161   :  { %v4715_v41 = vpop.f32.mrf.mxu0  ;;  %v1750_v42 = vpop.f32.mrf.mxu1  ;;  %1941 = vmatmul.mubr.bf16.gmra.mxu1 %v3932_v15  ;;  %3644 = vmatmul.mubr.msk.bf16.gmra.mxu0 %vm1298_vm0, %v3936_v29  ;;  %v3942_v29 = vld [vmem:[%s6031_s0 + $0x4b8] ss:$20 sps:$4 sm:$0xff]  }
 0x162   :  { %v4719_v45 = vadd.f32 %v1750_v42, %v4531_v59  ;;  %1948 = vmatprep.mubr.bf16.mxu1 %v3939_v47  ;;  %3647 = vmatprep.mubr.msk.bf16.mxu0 %vm1298_vm0, %v3940_v34  ;;  %v3944_v59 = vld [vmem:[%s6031_s0 + $0x4bc] ss:$20 sps:$4 sm:$0xff]   ;;  %v3946_v47 = vld [vmem:[%s6031_s0 + $0x498] ss:$20 sps:$4 sm:$0xff]  }
 0x163   :  { %v1527_v51 = vpop.f32.mrf.mxu0  ;;  %v1752_v53 = vpop.f32.mrf.mxu1 }
 0x165   :  { %v4722_v27 = vpop.f32.mrf.mxu0  ;;  %v1753_v55 = vpop.f32.mrf.mxu1 }
 0x166   :  { %v4731_v62 = vadd.f32 %v1753_v55, %v4537_v63 }
 0x167   :  { %v1530_v4 = vpop.f32.mrf.mxu0  ;;  %v1755_v6 = vpop.f32.mrf.mxu1 }
 0x168   :  { %v3951_v4 = vld [vmem:[%s6031_s0 + $0x4e8] ss:$20 sps:$4 sm:$0xff]  }
 0x169   :  { %v4739_v7 = vpop.f32.mrf.mxu0  ;;  %v1758_v0 = vpop.f32.mrf.mxu1  ;;  %1949 = vmatmul.mubr.bf16.gmra.mxu1 %v3937_v57  ;;  %3648 = vmatmul.mubr.msk.bf16.gmra.mxu0 %vm1298_vm0, %v3941_v58 }
 0x16a   :  { %v4743_v39 = vadd.f32 %v1758_v0, %v4553_v8  ;;  %1956 = vmatprep.mubr.bf16.mxu1 %v3944_v59  ;;  %3651 = vmatprep.mubr.msk.bf16.mxu0 %vm1298_vm0, %v3945_v35  ;;  %v3949_v8 = vld [vmem:[%s6031_s0 + $0x4e4] ss:$20 sps:$4 sm:$0xff]   ;;  %v3947_v35 = vld [vmem:[%s6031_s0 + $0x4e0] ss:$20 sps:$4 sm:$0xff]  }
 0x16b   :  { %v1535_v63 = vpop.f32.mrf.mxu0  ;;  %v1760_v18 = vpop.f32.mrf.mxu1 }
 0x16d   :  { %v4746_v21 = vpop.f32.mrf.mxu0  ;;  %v1761_v15 = vpop.f32.mrf.mxu1 }
 0x16e   :  { %v4755_v34 = vadd.f32 %v1761_v15, %v4559_v13 }
 0x16f   :  { %v1538_v23 = vpop.f32.mrf.mxu0  ;;  %v1763_v42 = vpop.f32.mrf.mxu1 }
 0x171   :  { %v4763_v51 = vpop.f32.mrf.mxu0  ;;  %v1766_v53 = vpop.f32.mrf.mxu1  ;;  %1957 = vmatmul.mubr.bf16.gmra.mxu1 %v3942_v29  ;;  %3652 = vmatmul.mubr.msk.bf16.gmra.mxu0 %vm1298_vm0, %v3946_v47 }
 0x172   :  { %v4767_v55 = vadd.f32 %v1766_v53, %v4575_v25  ;;  %1964 = vmatprep.mubr.bf16.mxu1 %v3949_v8  ;;  %3655 = vmatprep.mubr.msk.bf16.mxu0 %vm1298_vm0, %v3950_v37 }
 0x173   :  { %v1543_v13 = vpop.f32.mrf.mxu0  ;;  %v1768_v57 = vpop.f32.mrf.mxu1 }
 0x175   :  { %v4770_v58 = vpop.f32.mrf.mxu0  ;;  %v1769_v59 = vpop.f32.mrf.mxu1 }
 0x176   :  { %v4779_v6 = vadd.f32 %v1769_v59, %v4581_v31 }
 0x177   :  { %v1546_v25 = vpop.f32.mrf.mxu0  ;;  %v1771_v0 = vpop.f32.mrf.mxu1 }
 0x179   :  { %v4781_v63 = vpop.f32.mrf.mxu0  ;;  %v1774_v18 = vpop.f32.mrf.mxu1  ;;  %1965 = vmatmul.mubr.bf16.gmra.mxu1 %v3947_v35  ;;  %3656 = vmatmul.mubr.msk.bf16.gmra.mxu0 %vm1298_vm0, %v3951_v4 }
 0x17a   :  { %v4785_v15 = vadd.f32 %v1774_v18, %v4597_v43 }
 0x17b   :  { %v1551_v29 = vpop.f32.mrf.mxu0  ;;  %v1776_v47 = vpop.f32.mrf.mxu1 }
 0x17d   :  { %v4787_v8 = vpop.f32.mrf.mxu0  ;;  %v1777_v37 = vpop.f32.mrf.mxu1 }
 0x17e   :  { %v4790_v23 = vadd.f32 %v1777_v37, %v4603_v49 }
 0x17f   :  { %v1554_v31 = vpop.f32.mrf.mxu0  ;;  %v1779_v42 = vpop.f32.mrf.mxu1 }
 0x181   :  { %v4792_v53 = vpop.f32.mrf.mxu0  ;;  %v1782_v13 = vpop.f32.mrf.mxu1 }
 0x182   :  { %v4795_v57 = vadd.f32 %v1782_v13, %v4619_v61 }
 0x183   :  { %v1559_v59 = vpop.f32.mrf.mxu0  ;;  %v1784_v35 = vpop.f32.mrf.mxu1 }
 0x185   :  { %v4797_v43 = vpop.f32.mrf.mxu0  ;;  %v1785_v4 = vpop.f32.mrf.mxu1 }
 0x186   :  { %v4800_v25 = vadd.f32 %v1785_v4, %v4626_v5 }
 0x187   :  { %v1562_v0 = vpop.f32.mrf.mxu0  ;;  %v1787_v18 = vpop.f32.mrf.mxu1 }
 0x189   :  { %v4802_v49 = vpop.f32.mrf.mxu0  ;;  %v1790_v29 = vpop.f32.mrf.mxu1 }
 0x18a   :  { %v4805_v47 = vadd.f32 %v1790_v29, %v4643_v20 }
 0x18b   :  { %v1567_v37 = vpop.f32.mrf.mxu0  ;;  %v1792_v31 = vpop.f32.mrf.mxu1 }
 0x18d   :  { %v4807_v61 = vpop.f32.mrf.mxu0  ;;  %v1793_v42 = vpop.f32.mrf.mxu1 }
 0x18e   :  { %v4810_v13 = vadd.f32 %v1793_v42, %v4650_v30 }
 0x18f   :  { %v1570_v59 = vpop.f32.mrf.mxu0  ;;  %v1795_v35 = vpop.f32.mrf.mxu1 }
 0x191   :  { %v4812_v5 = vpop.f32.mrf.mxu0  ;;  %v1798_v4 = vpop.f32.mrf.mxu1 }
 0x192   :  { %v4815_v0 = vadd.f32 %v1798_v4, %v4667_v46 }
 0x193   :  { %v1575_v18 = vpop.f32.mrf.mxu0  ;;  %v1800_v50 = vpop.f32.mrf.mxu1 }
 0x195   :  { %v4817_v20 = vpop.f32.mrf.mxu0  ;;  %v1801_v29 = vpop.f32.mrf.mxu1 }
 0x196   :  { %v4820_v37 = vadd.f32 %v1801_v29, %v4674_v56 }
 0x197   :  { %v1578_v31 = vpop.f32.mrf.mxu0  ;;  %v1803_v32 = vpop.f32.mrf.mxu1 }
 0x199   :  { %v4822_v30 = vpop.f32.mrf.mxu0  ;;  %v1806_v42 = vpop.f32.mrf.mxu1 }
 0x19a   :  { %v4825_v59 = vadd.f32 %v1806_v42, %v4691_v10 }
 0x19b   :  { %v1583_v35 = vpop.f32.mrf.mxu0  ;;  %v1808_v44 = vpop.f32.mrf.mxu1 }
 0x19d   :  { %v4827_v46 = vpop.f32.mrf.mxu0  ;;  %v1809_v4 = vpop.f32.mrf.mxu1 }
 0x19e   :  { %v4830_v50 = vadd.f32 %v1809_v4, %v4698_v19 }
 0x19f   :  { %v1586_v18 = vpop.f32.mrf.mxu0  ;;  %v1811_v26 = vpop.f32.mrf.mxu1 }
 0x1a1   :  { %v4832_v56 = vpop.f32.mrf.mxu0  ;;  %v1814_v29 = vpop.f32.mrf.mxu1 }
 0x1a2   :  { %v4835_v32 = vadd.f32 %v1814_v29, %v4715_v41 }
 0x1a3   :  { %v1591_v31 = vpop.f32.mrf.mxu0  ;;  %v1816_v14 = vpop.f32.mrf.mxu1 }
 0x1a5   :  { %v4837_v10 = vpop.f32.mrf.mxu0  ;;  %v1817_v42 = vpop.f32.mrf.mxu1 }
 0x1a6   :  { %v4840_v44 = vadd.f32 %v1817_v42, %v4722_v27 }
 0x1a7   :  { %v1594_v35 = vpop.f32.mrf.mxu0  ;;  %v1819_v1 = vpop.f32.mrf.mxu1 }
 0x1a9   :  { %v4842_v19 = vpop.f32.mrf.mxu0  ;;  %v1822_v4 = vpop.f32.mrf.mxu1 }
 0x1aa   :  { %v4845_v26 = vadd.f32 %v1822_v4, %v4739_v7 }
 0x1ab   :  { %v1599_v18 = vpop.f32.mrf.mxu0  ;;  %v1824_v9 = vpop.f32.mrf.mxu1 }
 0x1ad   :  { %v4847_v41 = vpop.f32.mrf.mxu0  ;;  %v1825_v29 = vpop.f32.mrf.mxu1 }
 0x1ae   :  { %v4850_v14 = vadd.f32 %v1825_v29, %v4746_v21 }
 0x1af   :  { %v1602_v31 = vpop.f32.mrf.mxu0  ;;  %v1827_v60 = vpop.f32.mrf.mxu1 }
 0x1b1   :  { %v4852_v27 = vpop.f32.mrf.mxu0  ;;  %v1830_v42 = vpop.f32.mrf.mxu1 }
 0x1b2   :  { %v4855_v1 = vadd.f32 %v1830_v42, %v4763_v51 }
 0x1b3   :  { %v1607_v35 = vpop.f32.mrf.mxu0  ;;  %v1832_v52 = vpop.f32.mrf.mxu1 }
 0x1b5   :  { %v4857_v7 = vpop.f32.mrf.mxu0  ;;  %v1833_v4 = vpop.f32.mrf.mxu1 }
 0x1b6   :  { %v4860_v9 = vadd.f32 %v1833_v4, %v4770_v58 }
 0x1b7   :  { %v1610_v18 = vpop.f32.mrf.mxu0  ;;  %v1835_v40 = vpop.f32.mrf.mxu1 }
 0x1b9   :  { %v4862_v21 = vpop.f32.mrf.mxu0  ;;  %v1838_v29 = vpop.f32.mrf.mxu1 }
 0x1ba   :  { %v4865_v60 = vadd.f32 %v1838_v29, %v4781_v63 }
 0x1bb   :  { %v1615_v31 = vpop.f32.mrf.mxu0  ;;  %v1840_v48 = vpop.f32.mrf.mxu1 }
 0x1bd   :  { %v4867_v51 = vpop.f32.mrf.mxu0  ;;  %v1841_v42 = vpop.f32.mrf.mxu1 }
 0x1be   :  { %v4870_v52 = vadd.f32 %v1841_v42, %v4787_v8 }
 0x1bf   :  { %v1618_v35 = vpop.f32.mrf.mxu0  ;;  %v1843_v36 = vpop.f32.mrf.mxu1 }
 0x1c1   :  { %v1846_v58 = vpop.f32.mrf.mxu1  ;;  %v3597_v4 = vpop.f32.mrf.mxu0 }
 0x1c2   :  { %v4873_v40 = vadd.f32 %v1846_v58, %v4792_v53  ;;  %v4882_v42 = vadd.f32 %v3597_v4, %v4647_v22 }
 0x1c3   :  { %v1848_v18 = vpop.f32.mrf.mxu1  ;;  %v2007_v28 = vpop.f32.mrf.mxu0 }
 0x1c4   :  { %v4876_v63 = vadd.f32 %v2007_v28, %v4623_v2  ;;  %v2334_v4 = vmul.f32 %v4882_v42, %v4882_v42 }
 0x1c5   :  { %v1849_v29 = vpop.f32.mrf.mxu1  ;;  %v3598_v48 = vpop.f32.mrf.mxu0 }
 0x1c6   :  { %6080 = vst [vmem:[#allocation17_spill] sm:$0xff] %v4876_v63  ;;  %v4879_v31 = vadd.f32 %v1849_v29, %v4797_v43  ;;  %v2332_v53 = vmul.f32 %v4876_v63, %v4876_v63  ;;  %v4890_v28 = vadd.f32 %v3598_v48, %v4659_v38 }
 0x1c7   :  { %v1851_v16 = vpop.f32.mrf.mxu1  ;;  %v2010_v8 = vpop.f32.mrf.mxu0 }
 0x1c8   :  { %v4885_v36 = vadd.f32 %v2010_v8, %v4635_v11 }
 0x1c9   :  { %v1854_v35 = vpop.f32.mrf.mxu1  ;;  %v3601_v58 = vpop.f32.mrf.mxu0 }
 0x1ca   :  { %6081 = vst [vmem:[#allocation18_spill] sm:$0xff] %v4885_v36  ;;  %v2262_v2 = vadd.f32 %v4885_v36, %v4876_v63  ;;  %v2333_v16 = vmul.f32 %v4885_v36, %v4885_v36  ;;  %v4897_v22 = vadd.f32 %v1854_v35, %v4802_v49  ;;  %v2335_v63 = vmul.f32 %v4890_v28, %v4890_v28 }
 0x1cb   :  { %v1856_v43 = vpop.f32.mrf.mxu1  ;;  %v2023_v11 = vpop.f32.mrf.mxu0 }
 0x1cc   :  { %v2263_v18 = vadd.f32 %v2262_v2, %v4882_v42  ;;  %v2396_v29 = vadd.f32 %v2333_v16, %v2332_v53  ;;  %v4903_v38 = vadd.f32 %v2023_v11, %v4671_v54  ;;  %v4912_v43 = vadd.f32 %v3601_v58, %v4695_v17 }
 0x1cd   :  { %v1857_v48 = vpop.f32.mrf.mxu1  ;;  %v3602_v8 = vpop.f32.mrf.mxu0 }
 0x1ce   :  { %v2397_v36 = vadd.f32 %v2396_v29, %v2334_v4  ;;  %v2264_v49 = vadd.f32 %v2263_v18, %v4890_v28  ;;  %v4909_v35 = vadd.f32 %v1857_v48, %v4807_v61  ;;  %v2336_v54 = vmul.f32 %v4903_v38, %v4903_v38 }
 0x1cf   :  { %v1859_v24 = vpop.f32.mrf.mxu1  ;;  %v2026_v2 = vpop.f32.mrf.mxu0  ;;  %v4921_v4 = vadd.f32 %v3602_v8, %v4707_v33 }
 0x1d0   :  { %v2265_v53 = vadd.f32 %v2264_v49, %v4903_v38  ;;  %v2398_v16 = vadd.f32 %v2397_v36, %v2335_v63  ;;  %v4918_v11 = vadd.f32 %v2026_v2, %v4683_v3  ;;  %v2338_v3 = vmul.f32 %v4912_v43, %v4912_v43 }
 0x1d1   :  { %v1862_v18 = vpop.f32.mrf.mxu1  ;;  %v3605_v61 = vpop.f32.mrf.mxu0 }
 0x1d2   :  { %v2399_v29 = vadd.f32 %v2398_v16, %v2336_v54  ;;  %v2266_v17 = vadd.f32 %v2265_v53, %v4918_v11  ;;  %v2337_v24 = vmul.f32 %v4918_v11, %v4918_v11  ;;  %v4927_v58 = vadd.f32 %v1862_v18, %v4812_v5 }
 0x1d3   :  { %v1864_v48 = vpop.f32.mrf.mxu1  ;;  %v2039_v49 = vpop.f32.mrf.mxu0  ;;  %v2339_v53 = vmul.f32 %v4921_v4, %v4921_v4  ;;  %v4942_v18 = vadd.f32 %v3605_v61, %v4743_v39 }
 0x1d4   :  { %v2267_v63 = vadd.f32 %v2266_v17, %v4912_v43  ;;  %v2400_v33 = vadd.f32 %v2399_v29, %v2337_v24  ;;  %v4933_v36 = vadd.f32 %v2039_v49, %v4719_v45 }
 0x1d5   :  { %v1865_v8 = vpop.f32.mrf.mxu1  ;;  %v3606_v2 = vpop.f32.mrf.mxu0 }
 0x1d6   :  { %v2401_v54 = vadd.f32 %v2400_v33, %v2338_v3  ;;  %v2268_v5 = vadd.f32 %v2267_v63, %v4921_v4  ;;  %v4939_v16 = vadd.f32 %v1865_v8, %v4817_v20  ;;  %v2340_v45 = vmul.f32 %v4933_v36, %v4933_v36 }
 0x1d7   :  { %v1867_v48 = vpop.f32.mrf.mxu1  ;;  %v2042_v17 = vpop.f32.mrf.mxu0  ;;  %v4951_v3 = vadd.f32 %v3606_v2, %v4755_v34 }
 0x1d8   :  { %v2269_v29 = vadd.f32 %v2268_v5, %v4933_v36  ;;  %v2402_v24 = vadd.f32 %v2401_v54, %v2339_v53  ;;  %v4948_v49 = vadd.f32 %v2042_v17, %v4731_v62  ;;  %v2342_v62 = vmul.f32 %v4942_v18, %v4942_v18 }
 0x1d9   :  { %v1870_v63 = vpop.f32.mrf.mxu1  ;;  %v3609_v20 = vpop.f32.mrf.mxu0 }
 0x1da   :  { %v2403_v33 = vadd.f32 %v2402_v24, %v2340_v45  ;;  %v2270_v39 = vadd.f32 %v2269_v29, %v4948_v49  ;;  %v2341_v61 = vmul.f32 %v4948_v49, %v4948_v49  ;;  %v4957_v8 = vadd.f32 %v1870_v63, %v4822_v30 }
 0x1db   :  { %v1872_v5 = vpop.f32.mrf.mxu1  ;;  %v2055_v48 = vpop.f32.mrf.mxu0  ;;  %v2343_v29 = vmul.f32 %v4951_v3, %v4951_v3  ;;  %v4972_v63 = vadd.f32 %v3609_v20, %v4785_v15 }
 0x1dc   :  { %v2271_v53 = vadd.f32 %v2270_v39, %v4942_v18  ;;  %v2404_v34 = vadd.f32 %v2403_v33, %v2341_v61  ;;  %v4963_v2 = vadd.f32 %v2055_v48, %v4767_v55 }
 0x1dd   :  { %v1873_v54 = vpop.f32.mrf.mxu1  ;;  %v3610_v17 = vpop.f32.mrf.mxu0 }
 0x1de   :  { %v2405_v45 = vadd.f32 %v2404_v34, %v2342_v62  ;;  %v2272_v30 = vadd.f32 %v2271_v53, %v4951_v3  ;;  %v4969_v24 = vadd.f32 %v1873_v54, %v4827_v46  ;;  %v2344_v55 = vmul.f32 %v4963_v2, %v4963_v2 }
 0x1df   :  { %v1875_v5 = vpop.f32.mrf.mxu1  ;;  %v2058_v39 = vpop.f32.mrf.mxu0  ;;  %v4981_v62 = vadd.f32 %v3610_v17, %v4790_v23 }
 0x1e0   :  { %v2273_v33 = vadd.f32 %v2272_v30, %v4963_v2  ;;  %v2406_v61 = vadd.f32 %v2405_v45, %v2343_v29  ;;  %v4978_v48 = vadd.f32 %v2058_v39, %v4779_v6  ;;  %v2346_v6 = vmul.f32 %v4972_v63, %v4972_v63 }
 0x1e1   :  { %v1878_v53 = vpop.f32.mrf.mxu1  ;;  %v3613_v46 = vpop.f32.mrf.mxu0 }
 0x1e2   :  { %v2407_v34 = vadd.f32 %v2406_v61, %v2344_v55  ;;  %v2274_v15 = vadd.f32 %v2273_v33, %v4978_v48  ;;  %v2345_v20 = vmul.f32 %v4978_v48, %v4978_v48  ;;  %v4987_v54 = vadd.f32 %v1878_v53, %v4832_v56 }
 0x1e3   :  { %v1880_v30 = vpop.f32.mrf.mxu1  ;;  %v2071_v5 = vpop.f32.mrf.mxu0  ;;  %v2347_v33 = vmul.f32 %v4981_v62, %v4981_v62  ;;  %v5002_v53 = vadd.f32 %v3613_v46, %v4805_v47 }
 0x1e4   :  { %v2275_v29 = vadd.f32 %v2274_v15, %v4972_v63  ;;  %v2408_v23 = vadd.f32 %v2407_v34, %v2345_v20  ;;  %v4993_v17 = vadd.f32 %v2071_v5, %v4795_v57 }
 0x1e5   :  { %v1881_v45 = vpop.f32.mrf.mxu1  ;;  %v3614_v39 = vpop.f32.mrf.mxu0 }
 0x1e6   :  { %v2409_v55 = vadd.f32 %v2408_v23, %v2346_v6  ;;  %v2276_v56 = vadd.f32 %v2275_v29, %v4981_v62  ;;  %v4999_v61 = vadd.f32 %v1881_v45, %v4837_v10  ;;  %v2348_v57 = vmul.f32 %v4993_v17, %v4993_v17 }
 0x1e7   :  { %v1883_v30 = vpop.f32.mrf.mxu1  ;;  %v2074_v15 = vpop.f32.mrf.mxu0  ;;  %v5011_v6 = vadd.f32 %v3614_v39, %v4810_v13 }
 0x1e8   :  { %v2277_v34 = vadd.f32 %v2276_v56, %v4993_v17  ;;  %v2410_v20 = vadd.f32 %v2409_v55, %v2347_v33  ;;  %v5008_v5 = vadd.f32 %v2074_v15, %v4800_v25  ;;  %v2350_v25 = vmul.f32 %v5002_v53, %v5002_v53 }
 0x1e9   :  { %v1886_v29 = vpop.f32.mrf.mxu1  ;;  %v3617_v10 = vpop.f32.mrf.mxu0 }
 0x1ea   :  { %v2411_v23 = vadd.f32 %v2410_v20, %v2348_v57  ;;  %v2278_v47 = vadd.f32 %v2277_v34, %v5008_v5  ;;  %v2349_v46 = vmul.f32 %v5008_v5, %v5008_v5  ;;  %v5017_v45 = vadd.f32 %v1886_v29, %v4842_v19 }
 0x1eb   :  { %v1888_v56 = vpop.f32.mrf.mxu1  ;;  %v2087_v30 = vpop.f32.mrf.mxu0  ;;  %v2351_v34 = vmul.f32 %v5011_v6, %v5011_v6  ;;  %v5032_v29 = vadd.f32 %v3617_v10, %v4825_v59 }
 0x1ec   :  { %v2279_v33 = vadd.f32 %v2278_v47, %v5002_v53  ;;  %v2412_v13 = vadd.f32 %v2411_v23, %v2349_v46  ;;  %v5023_v39 = vadd.f32 %v2087_v30, %v4815_v0 }
 0x1ed   :  { %v1889_v55 = vpop.f32.mrf.mxu1  ;;  %v3618_v15 = vpop.f32.mrf.mxu0 }
 0x1ee   :  { %v2413_v57 = vadd.f32 %v2412_v13, %v2350_v25  ;;  %v2280_v19 = vadd.f32 %v2279_v33, %v5011_v6  ;;  %v5029_v20 = vadd.f32 %v1889_v55, %v4847_v41  ;;  %v2352_v0 = vmul.f32 %v5023_v39, %v5023_v39 }
 0x1ef   :  { %v1891_v56 = vpop.f32.mrf.mxu1  ;;  %v2090_v47 = vpop.f32.mrf.mxu0  ;;  %v5041_v25 = vadd.f32 %v3618_v15, %v4830_v50 }
 0x1f0   :  { %v2281_v23 = vadd.f32 %v2280_v19, %v5023_v39  ;;  %v2414_v46 = vadd.f32 %v2413_v57, %v2351_v34  ;;  %v5038_v30 = vadd.f32 %v2090_v47, %v4820_v37  ;;  %v2354_v37 = vmul.f32 %v5032_v29, %v5032_v29 }
 0x1f1   :  { %v1894_v33 = vpop.f32.mrf.mxu1  ;;  %v3621_v41 = vpop.f32.mrf.mxu0 }
 0x1f2   :  { %v2415_v13 = vadd.f32 %v2414_v46, %v2352_v0  ;;  %v2282_v59 = vadd.f32 %v2281_v23, %v5038_v30  ;;  %v2353_v10 = vmul.f32 %v5038_v30, %v5038_v30  ;;  %v5047_v55 = vadd.f32 %v1894_v33, %v4852_v27 }
 0x1f3   :  { %v1896_v19 = vpop.f32.mrf.mxu1  ;;  %v2103_v56 = vpop.f32.mrf.mxu0  ;;  %v2355_v23 = vmul.f32 %v5041_v25, %v5041_v25  ;;  %v5062_v33 = vadd.f32 %v3621_v41, %v4845_v26 }
 0x1f4   :  { %v2283_v34 = vadd.f32 %v2282_v59, %v5032_v29  ;;  %v2416_v50 = vadd.f32 %v2415_v13, %v2353_v10  ;;  %v5053_v15 = vadd.f32 %v2103_v56, %v4835_v32 }
 0x1f5   :  { %v1897_v57 = vpop.f32.mrf.mxu1  ;;  %v3622_v47 = vpop.f32.mrf.mxu0 }
 0x1f6   :  { %v2417_v0 = vadd.f32 %v2416_v50, %v2354_v37  ;;  %v2284_v27 = vadd.f32 %v2283_v34, %v5041_v25  ;;  %v5059_v46 = vadd.f32 %v1897_v57, %v4857_v7  ;;  %v2356_v32 = vmul.f32 %v5053_v15, %v5053_v15 }
 0x1f7   :  { %v1899_v19 = vpop.f32.mrf.mxu1  ;;  %v2106_v59 = vpop.f32.mrf.mxu0  ;;  %v5071_v37 = vadd.f32 %v3622_v47, %v4850_v14 }
 0x1f8   :  { %v2285_v13 = vadd.f32 %v2284_v27, %v5053_v15  ;;  %v2418_v10 = vadd.f32 %v2417_v0, %v2355_v23  ;;  %v5068_v56 = vadd.f32 %v2106_v59, %v4840_v44  ;;  %v2358_v44 = vmul.f32 %v5062_v33, %v5062_v33 }
 0x1f9   :  { %v1902_v34 = vpop.f32.mrf.mxu1  ;;  %v3625_v7 = vpop.f32.mrf.mxu0 }
 0x1fa   :  { %v2419_v50 = vadd.f32 %v2418_v10, %v2356_v32  ;;  %v2286_v26 = vadd.f32 %v2285_v13, %v5068_v56  ;;  %v2357_v41 = vmul.f32 %v5068_v56, %v5068_v56  ;;  %v5077_v57 = vadd.f32 %v1902_v34, %v4862_v21 }
 0x1fb   :  { %v1904_v27 = vpop.f32.mrf.mxu1  ;;  %v2119_v19 = vpop.f32.mrf.mxu0  ;;  %v2359_v13 = vmul.f32 %v5071_v37, %v5071_v37  ;;  %v5092_v34 = vadd.f32 %v3625_v7, %v4865_v60 }
 0x1fc   :  { %v2287_v23 = vadd.f32 %v2286_v26, %v5062_v33  ;;  %v2420_v14 = vadd.f32 %v2419_v50, %v2357_v41  ;;  %v5083_v47 = vadd.f32 %v2119_v19, %v4855_v1 }
 0x1fd   :  { %v1905_v0 = vpop.f32.mrf.mxu1  ;;  %v3626_v59 = vpop.f32.mrf.mxu0  ;;  %6082 = vst [vmem:[#allocation19_spill] sm:$0xff] %v5092_v34 }
 0x1fe   :  { %v2421_v32 = vadd.f32 %v2420_v14, %v2358_v44  ;;  %v2288_v21 = vadd.f32 %v2287_v23, %v5071_v37  ;;  %v5089_v10 = vadd.f32 %v1905_v0, %v4867_v51  ;;  %v2360_v1 = vmul.f32 %v5083_v47, %v5083_v47 }
 0x1ff   :  { %v1907_v27 = vpop.f32.mrf.mxu1  ;;  %v2122_v26 = vpop.f32.mrf.mxu0  ;;  %v5103_v51 = vadd.f32 %v3626_v59, %v4870_v52 }
 0x200   :  { %v2289_v50 = vadd.f32 %v2288_v21, %v5083_v47  ;;  %v2422_v41 = vadd.f32 %v2421_v32, %v2359_v13  ;;  %v5098_v19 = vadd.f32 %v2122_v26, %v4860_v9  ;;  %v2362_v13 = vmul.f32 %v5092_v34, %v5092_v34 }
 0x201   :  { %v5100_v44 = vpop.f32.mrf.mxu1  ;;  %v3629_v23 = vpop.f32.mrf.mxu0  ;;  %v2363_v59 = vmul.f32 %v5103_v51, %v5103_v51 }
 0x202   :  { %6083 = vst [vmem:[#allocation20_spill] sm:$0xff] %v5098_v19  ;;  %v2423_v14 = vadd.f32 %v2422_v41, %v2360_v1  ;;  %v2290_v60 = vadd.f32 %v2289_v50, %v5098_v19  ;;  %v2361_v7 = vmul.f32 %v5098_v19, %v5098_v19  ;;  %v5120_v41 = vadd.f32 %v3629_v23, %v4897_v22 }
 0x203   :  { %v1912_v0 = vpop.f32.mrf.mxu1  ;;  %v2135_v21 = vpop.f32.mrf.mxu0 }
 0x204   :  { %v2291_v9 = vadd.f32 %v2290_v60, %v5092_v34  ;;  %v2424_v32 = vadd.f32 %v2423_v14, %v2361_v7  ;;  %v5112_v27 = vadd.f32 %v2135_v21, %v4873_v40  ;;  %6084 = vst [vmem:[#allocation21_spill] sm:$0xff] %v5120_v41 }
 0x205   :  { %v5114_v26 = vpop.f32.mrf.mxu1  ;;  %v3630_v52 = vpop.f32.mrf.mxu0 }
 0x206   :  { %v2425_v50 = vadd.f32 %v2424_v32, %v2362_v13  ;;  %v2292_v1 = vadd.f32 %v2291_v9, %v5103_v51  ;;  %v2364_v40 = vmul.f32 %v5112_v27, %v5112_v27  ;;  %v5131_v9 = vadd.f32 %v3630_v52, %v4909_v35 }
 0x207   :  { %v1915_v0 = vpop.f32.mrf.mxu1  ;;  %v2138_v19 = vpop.f32.mrf.mxu0 }
 0x208   :  { %v2293_v60 = vadd.f32 %v2292_v1, %v5112_v27  ;;  %v2426_v14 = vadd.f32 %v2425_v50, %v2363_v59  ;;  %v5126_v7 = vadd.f32 %v2138_v19, %v4879_v31  ;;  %v2366_v59 = vmul.f32 %v5120_v41, %v5120_v41 }
 0x209   :  { %v5128_v21 = vpop.f32.mrf.mxu1  ;;  %v3633_v34 = vpop.f32.mrf.mxu0  ;;  %v2367_v52 = vmul.f32 %v5131_v9, %v5131_v9 }
 0x20a   :  { %6085 = vst [vmem:[#allocation22_spill] sm:$0xff] %v5126_v7  ;;  %v2427_v13 = vadd.f32 %v2426_v14, %v2364_v40  ;;  %v2294_v22 = vadd.f32 %v2293_v60, %v5126_v7  ;;  %v2365_v23 = vmul.f32 %v5126_v7, %v5126_v7  ;;  %v5148_v14 = vadd.f32 %v3633_v34, %v4957_v8 }
 0x20b   :  { %v1920_v32 = vpop.f32.mrf.mxu1  ;;  %v2151_v1 = vpop.f32.mrf.mxu0 }
 0x20c   :  { %v2295_v31 = vadd.f32 %v2294_v22, %v5120_v41  ;;  %v2428_v19 = vadd.f32 %v2427_v13, %v2365_v23  ;;  %v5140_v50 = vadd.f32 %v2151_v1, %v4927_v58  ;;  %6086 = vst [vmem:[#allocation23_spill] sm:$0xff] %v5148_v14 }
 0x20d   :  { %v5142_v0 = vpop.f32.mrf.mxu1  ;;  %v3634_v35 = vpop.f32.mrf.mxu0 }
 0x20e   :  { %v2429_v60 = vadd.f32 %v2428_v19, %v2366_v59  ;;  %v2296_v40 = vadd.f32 %v2295_v31, %v5131_v9  ;;  %v2368_v58 = vmul.f32 %v5140_v50, %v5140_v50  ;;  %v5159_v31 = vadd.f32 %v3634_v35, %v4969_v24 }
 0x20f   :  { %v1923_v32 = vpop.f32.mrf.mxu1  ;;  %v2154_v7 = vpop.f32.mrf.mxu0 }
 0x210   :  { %v2297_v22 = vadd.f32 %v2296_v40, %v5140_v50  ;;  %v2430_v13 = vadd.f32 %v2429_v60, %v2367_v52  ;;  %v5154_v23 = vadd.f32 %v2154_v7, %v4939_v16  ;;  %v2370_v52 = vmul.f32 %v5148_v14, %v5148_v14 }
 0x211   :  { %v5156_v1 = vpop.f32.mrf.mxu1  ;;  %v3637_v41 = vpop.f32.mrf.mxu0  ;;  %v2371_v35 = vmul.f32 %v5159_v31, %v5159_v31 }
 0x212   :  { %6087 = vst [vmem:[#allocation24_spill] sm:$0xff] %v5154_v23  ;;  %v2431_v59 = vadd.f32 %v2430_v13, %v2368_v58  ;;  %v2298_v8 = vadd.f32 %v2297_v22, %v5154_v23  ;;  %v2369_v34 = vmul.f32 %v5154_v23, %v5154_v23  ;;  %v5176_v13 = vadd.f32 %v3637_v41, %v5017_v45 }
 0x213   :  { %v1928_v19 = vpop.f32.mrf.mxu1  ;;  %v2167_v40 = vpop.f32.mrf.mxu0 }
 0x214   :  { %v2299_v16 = vadd.f32 %v2298_v8, %v5148_v14  ;;  %v2432_v7 = vadd.f32 %v2431_v59, %v2369_v34  ;;  %v5168_v60 = vadd.f32 %v2167_v40, %v4987_v54 }
 0x215   :  { %v5170_v32 = vpop.f32.mrf.mxu1  ;;  %v3638_v24 = vpop.f32.mrf.mxu0 }
 0x216   :  { %6088 = vst [vmem:[#allocation25_spill] sm:$0xff] %v5168_v60  ;;  %v2433_v22 = vadd.f32 %v2432_v7, %v2370_v52  ;;  %v2300_v58 = vadd.f32 %v2299_v16, %v5159_v31  ;;  %v2372_v54 = vmul.f32 %v5168_v60, %v5168_v60  ;;  %v5187_v16 = vadd.f32 %v3638_v24, %v5029_v20 }
 0x217   :  { %v1931_v19 = vpop.f32.mrf.mxu1  ;;  %v2170_v23 = vpop.f32.mrf.mxu0 }
 0x218   :  { %v2301_v8 = vadd.f32 %v2300_v58, %v5168_v60  ;;  %v2434_v59 = vadd.f32 %v2433_v22, %v2371_v35  ;;  %v5182_v34 = vadd.f32 %v2170_v23, %v4999_v61  ;;  %v2374_v35 = vmul.f32 %v5176_v13, %v5176_v13 }
 0x219   :  { %v5184_v40 = vpop.f32.mrf.mxu1  ;;  %v3641_v14 = vpop.f32.mrf.mxu0  ;;  %v2375_v20 = vmul.f32 %v5187_v16, %v5187_v16 }
 0x21a   :  { %6089 = vst [vmem:[#allocation26_spill] sm:$0xff] %v5182_v34  ;;  %v2435_v52 = vadd.f32 %v2434_v59, %v2372_v54  ;;  %v2302_v45 = vadd.f32 %v2301_v8, %v5182_v34  ;;  %v2373_v41 = vmul.f32 %v5182_v34, %v5182_v34  ;;  %v5202_v59 = vadd.f32 %v3641_v14, %v5077_v57 }
 0x21b   :  { %v1936_v7 = vpop.f32.mrf.mxu1  ;;  %v2183_v58 = vpop.f32.mrf.mxu0 }
 0x21c   :  { %v2303_v61 = vadd.f32 %v2302_v45, %v5176_v13  ;;  %v2436_v23 = vadd.f32 %v2435_v52, %v2373_v41  ;;  %v5196_v22 = vadd.f32 %v2183_v58, %v5047_v55  ;;  %6091 = vst [vmem:[#allocation28_spill] sm:$0xff] %v5202_v59  ;;  %v1911_v41 = vadd.f32 %v5100_v44, %v4445_v12  ;;  %v6094_v44 = vld [vmem:[#allocation3_spill] sm:$0xff] }
 0x21d   :  { %v1937_v19 = vpop.f32.mrf.mxu1  ;;  %v3642_v54 = vpop.f32.mrf.mxu0 }
 0x21e   :  { %6090 = vst [vmem:[#allocation27_spill] sm:$0xff] %v5196_v22  ;;  %v2437_v24 = vadd.f32 %v2436_v23, %v2374_v35  ;;  %v2304_v8 = vadd.f32 %v2303_v61, %v5187_v16  ;;  %v2376_v52 = vmul.f32 %v5196_v22, %v5196_v22  ;;  %v5213_v57 = vadd.f32 %v3642_v54, %v5089_v10 }
 0x21f   :  { %v1939_v7 = vpop.f32.mrf.mxu1  ;;  %v2186_v34 = vpop.f32.mrf.mxu0 }
 0x220   :  { %v2305_v60 = vadd.f32 %v2304_v8, %v5196_v22  ;;  %v2438_v55 = vadd.f32 %v2437_v24, %v2375_v20  ;;  %v5208_v45 = vadd.f32 %v2186_v34, %v5059_v46  ;;  %6093 = vst [vmem:[#allocation30_spill] sm:$0xff] %v5213_v57  ;;  %v2378_v46 = vmul.f32 %v5202_v59, %v5202_v59  ;;  %v6096_v22 = vld [vmem:[#allocation4_spill] sm:$0xff] }
 0x221   :  { %v1942_v58 = vpop.f32.mrf.mxu1  ;;  %v3645_v35 = vpop.f32.mrf.mxu0  ;;  %v1919_v24 = vadd.f32 %v5128_v21, %v6094_v44 }
 0x222   :  { %6092 = vst [vmem:[#allocation29_spill] sm:$0xff] %v5208_v45  ;;  %v2439_v61 = vadd.f32 %v2438_v55, %v2376_v52  ;;  %v2306_v14 = vadd.f32 %v2305_v60, %v5208_v45  ;;  %v2377_v23 = vmul.f32 %v5208_v45, %v5208_v45  ;;  %v6095_v52 = vld [vmem:[#allocation2_spill] sm:$0xff]  ;;  %v2379_v55 = vmul.f32 %v5213_v57, %v5213_v57 }
 0x223   :  { %v1944_v8 = vpop.f32.mrf.mxu1  ;;  %v2199_v7 = vpop.f32.mrf.mxu0  ;;  %v1914_v60 = vadd.f32 %v5114_v26, %v6095_v52  ;;  %v6099_v52 = vld [vmem:[#allocation5_spill] sm:$0xff] }
 0x224   :  { %v2307_v34 = vadd.f32 %v2306_v14, %v5202_v59  ;;  %v2440_v20 = vadd.f32 %v2439_v61, %v2377_v23  ;;  %v5221_v12 = vadd.f32 %v2199_v7, %v1911_v41  ;;  %v1922_v14 = vadd.f32 %v5142_v0, %v6096_v22 }
 0x225   :  { %v1945_v10 = vpop.f32.mrf.mxu1  ;;  %v3646_v54 = vpop.f32.mrf.mxu0  ;;  %v5232_v61 = vadd.f32 %v3645_v35, %v1919_v24 }
 0x226   :  { %v2441_v8 = vadd.f32 %v2440_v20, %v2378_v46  ;;  %v2308_v45 = vadd.f32 %v2307_v34, %v5213_v57  ;;  %v2380_v7 = vmul.f32 %v5221_v12, %v5221_v12  ;;  %v1927_v46 = vadd.f32 %v5156_v1, %v6099_v52  ;;  %v6101_v1 = vld [vmem:[#allocation7_spill] sm:$0xff] }
 0x227   :  { %6097 = vst [vmem:[#allocation3_spill] sm:$0xff] %v5232_v61  ;;  %v1947_v41 = vpop.f32.mrf.mxu1  ;;  %v2202_v23 = vpop.f32.mrf.mxu0  ;;  %v5241_v59 = vadd.f32 %v3646_v54, %v1922_v14  ;;  %v2382_v24 = vmul.f32 %v5232_v61, %v5232_v61 }
 0x228   :  { %v2309_v21 = vadd.f32 %v2308_v45, %v5221_v12  ;;  %v2442_v44 = vadd.f32 %v2441_v8, %v2379_v55  ;;  %v5237_v26 = vadd.f32 %v2202_v23, %v1914_v60  ;;  %v1935_v41 = vadd.f32 %v5184_v40, %v6101_v1  ;;  %v6102_v23 = vld [vmem:[#allocation6_spill] sm:$0xff] }
 0x229   :  { %v1950_v20 = vpop.f32.mrf.mxu1  ;;  %v3649_v34 = vpop.f32.mrf.mxu0 }
 0x22a   :  { %6098 = vst [vmem:[#allocation2_spill] sm:$0xff] %v5237_v26  ;;  %v2443_v57 = vadd.f32 %v2442_v44, %v2380_v7  ;;  %v2310_v0 = vadd.f32 %v2309_v21, %v5237_v26  ;;  %v2381_v22 = vmul.f32 %v5237_v26, %v5237_v26  ;;  %v1930_v21 = vadd.f32 %v5170_v32, %v6102_v23  ;;  %v6105_v32 = vld [vmem:[#allocation9_spill] sm:$0xff] }
 0x22b   :  { %v1952_v45 = vpop.f32.mrf.mxu1  ;;  %v2215_v35 = vpop.f32.mrf.mxu0  ;;  %v2383_v7 = vmul.f32 %v5241_v59, %v5241_v59  ;;  %v1943_v23 = vadd.f32 %v1942_v58, %v6105_v32  ;;  %v6107_v58 = vld [vmem:[#allocation11_spill] sm:$0xff] }
 0x22c   :  { %v2311_v60 = vadd.f32 %v2310_v0, %v5232_v61  ;;  %v2444_v55 = vadd.f32 %v2443_v57, %v2381_v22  ;;  %v5249_v8 = vadd.f32 %v2215_v35, %v1927_v46  ;;  %v6103_v45 = vld [vmem:[#allocation8_spill] sm:$0xff]  ;;  %v5259_v0 = vadd.f32 %v3649_v34, %v1935_v41 }
 0x22d   :  { %v1953_v54 = vpop.f32.mrf.mxu1  ;;  %v3650_v14 = vpop.f32.mrf.mxu0  ;;  %v1938_v26 = vadd.f32 %v1937_v19, %v6103_v45 }
 0x22e   :  { %6100 = vst [vmem:[#allocation4_spill] sm:$0xff] %v5249_v8  ;;  %v2445_v44 = vadd.f32 %v2444_v55, %v2382_v24  ;;  %v2312_v52 = vadd.f32 %v2311_v60, %v5241_v59  ;;  %v2384_v40 = vmul.f32 %v5249_v8, %v5249_v8  ;;  %v2386_v45 = vmul.f32 %v5259_v0, %v5259_v0 }
 0x22f   :  { %v1955_v57 = vpop.f32.mrf.mxu1  ;;  %v2218_v46 = vpop.f32.mrf.mxu0  ;;  %v5267_v60 = vadd.f32 %v3650_v14, %v1938_v26  ;;  %v6108_v14 = vld [vmem:[#allocation10_spill] sm:$0xff] }
 0x230   :  { %v2313_v22 = vadd.f32 %v2312_v52, %v5249_v8  ;;  %v2446_v35 = vadd.f32 %v2445_v44, %v2383_v7  ;;  %v5264_v1 = vadd.f32 %v2218_v46, %v1930_v21  ;;  %v1951_v57 = vadd.f32 %v1950_v20, %v6107_v58 }
 0x231   :  { %v1958_v61 = vpop.f32.mrf.mxu1  ;;  %v3653_v24 = vpop.f32.mrf.mxu0 }
 0x232   :  { %6104 = vst [vmem:[#allocation5_spill] sm:$0xff] %v5264_v1  ;;  %v2447_v55 = vadd.f32 %v2446_v35, %v2384_v40  ;;  %v2314_v19 = vadd.f32 %v2313_v22, %v5264_v1  ;;  %v2385_v34 = vmul.f32 %v5264_v1, %v5264_v1  ;;  %v1946_v40 = vadd.f32 %v1945_v10, %v6108_v14  ;;  %v6111_v10 = vld [vmem:[#allocation13_spill] sm:$0xff] }
 0x233   :  { %v1960_v41 = vpop.f32.mrf.mxu1  ;;  %v2231_v52 = vpop.f32.mrf.mxu0  ;;  %v2387_v22 = vmul.f32 %v5267_v60, %v5267_v60  ;;  %v5283_v8 = vadd.f32 %v3653_v24, %v1951_v57  ;;  %v1959_v58 = vadd.f32 %v1958_v61, %v6111_v10  ;;  %v6113_v57 = vld [vmem:[#allocation15_spill] sm:$0xff] }
 0x234   :  { %v2315_v21 = vadd.f32 %v2314_v19, %v5259_v0  ;;  %v2448_v7 = vadd.f32 %v2447_v55, %v2385_v34  ;;  %v5275_v44 = vadd.f32 %v2231_v52, %v1943_v23  ;;  %v6109_v41 = vld [vmem:[#allocation12_spill] sm:$0xff] }
 0x235   :  { %v1961_v46 = vpop.f32.mrf.mxu1  ;;  %v3654_v26 = vpop.f32.mrf.mxu0  ;;  %v1954_v1 = vadd.f32 %v1953_v54, %v6109_v41 }
 0x236   :  { %6106 = vst [vmem:[#allocation7_spill] sm:$0xff] %v5275_v44  ;;  %v2449_v35 = vadd.f32 %v2448_v7, %v2386_v45  ;;  %v2316_v32 = vadd.f32 %v2315_v21, %v5267_v60  ;;  %v2388_v20 = vmul.f32 %v5275_v44, %v5275_v44 }
 0x237   :  { %v1963_v19 = vpop.f32.mrf.mxu1  ;;  %v2234_v55 = vpop.f32.mrf.mxu0  ;;  %v5291_v21 = vadd.f32 %v3654_v26, %v1954_v1  ;;  %v6115_v26 = vld [vmem:[#allocation14_spill] sm:$0xff] }
 0x238   :  { %v2317_v23 = vadd.f32 %v2316_v32, %v5275_v44  ;;  %v2450_v34 = vadd.f32 %v2449_v35, %v2387_v22  ;;  %v5288_v52 = vadd.f32 %v2234_v55, %v1946_v40  ;;  %v2390_v40 = vmul.f32 %v5283_v8, %v5283_v8 }
 0x239   :  { %v1966_v14 = vpop.f32.mrf.mxu1  ;;  %v3657_v45 = vpop.f32.mrf.mxu0  ;;  %6112 = vst [vmem:[#allocation8_spill] sm:$0xff] %v5291_v21 }
 0x23a   :  { %6110 = vst [vmem:[#allocation6_spill] sm:$0xff] %v5288_v52  ;;  %v2451_v7 = vadd.f32 %v2450_v34, %v2388_v20  ;;  %v2318_v54 = vadd.f32 %v2317_v23, %v5288_v52  ;;  %v2389_v24 = vmul.f32 %v5288_v52, %v5288_v52  ;;  %v1967_v32 = vadd.f32 %v1966_v14, %v6113_v57  ;;  %v6117_v57 = vld [vmem:[#allocation16_spill] sm:$0xff] }
 0x23b   :  { %v1968_v41 = vpop.f32.mrf.mxu1  ;;  %v2247_v19 = vpop.f32.mrf.mxu0  ;;  %v1962_v20 = vadd.f32 %v1961_v46, %v6115_v26  ;;  %v2391_v23 = vmul.f32 %v5291_v21, %v5291_v21 }
 0x23c   :  { %v2319_v22 = vadd.f32 %v2318_v54, %v5283_v8  ;;  %v2452_v61 = vadd.f32 %v2451_v7, %v2389_v24  ;;  %v5300_v35 = vadd.f32 %v2247_v19, %v1959_v58  ;;  %v5306_v14 = vadd.f32 %v3657_v45, %v1967_v32 }
 0x23d   :  { %v1969_v55 = vpop.f32.mrf.mxu1  ;;  %v3658_v1 = vpop.f32.mrf.mxu0 }
 0x23e   :  { %6114 = vst [vmem:[#allocation9_spill] sm:$0xff] %v5300_v35  ;;  %v2453_v34 = vadd.f32 %v2452_v61, %v2390_v40  ;;  %v2320_v10 = vadd.f32 %v2319_v22, %v5291_v21  ;;  %6116 = vst [vmem:[#allocation11_spill] sm:$0xff] %v5306_v14  ;;  %v1970_v41 = vadd.f32 %v1969_v55, %v6117_v57 }
 0x23f   :  { %v1971_v52 = vpop.f32.mrf.mxu1  ;;  %v2250_v44 = vpop.f32.mrf.mxu0  ;;  %v2392_v58 = vmul.f32 %v5300_v35, %v5300_v35 }
 0x240   :  { %v2321_v7 = vadd.f32 %v2320_v10, %v5300_v35  ;;  %v2454_v54 = vadd.f32 %v2453_v34, %v2391_v23  ;;  %v5312_v24 = vadd.f32 %v2250_v44, %v1962_v20  ;;  %v5314_v19 = vadd.f32 %v3658_v1, %v1970_v41 }
 0x241   :  { %v2394_v52 = vmul.f32 %v5306_v14, %v5306_v14 }
 0x242   :  { %6118 = vst [vmem:[#allocation10_spill] sm:$0xff] %v5312_v24  ;;  %v2455_v46 = vadd.f32 %v2454_v54, %v2392_v58  ;;  %v2322_v40 = vadd.f32 %v2321_v7, %v5312_v24  ;;  %v2393_v45 = vmul.f32 %v5312_v24, %v5312_v24  ;;  %v2395_v61 = vmul.f32 %v5314_v19, %v5314_v19 }
 0x244   :  { %v2323_v32 = vadd.f32 %v2322_v40, %v5306_v14  ;;  %v2456_v22 = vadd.f32 %v2455_v46, %v2393_v45 }
 0x246   :  { %v2324_v44 = vadd.f32 %v2323_v32, %v5314_v19  ;;  %v2457_v55 = vadd.f32 %v2456_v22, %v2394_v52  ;;  %v2477_v52 = vlaneseq }
 0x248   :  { %v2325_v26 = vrot.slane %v2324_v44, 4  ;;  %v2458_v1 = vadd.f32 %v2457_v55, %v2395_v61  ;;  %v5325_v22 = vshrl.u32 %v2477_v52, 7  ;;  %v2469_v61 = vld [vmem:[%s6032_s2] sm:$0x1] }
 0x24a   :  { %v2326_v20 = vadd.f32 %v2325_v26, %v2324_v44  ;;  %v2459_v23 = vrot.slane %v2458_v1, 4  ;;  %v6059_v44 = vsub.s32 0, %v5325_v22 }
 0x24c   :  { %v2327_v34 = vrot.slane %v2326_v20, 2  ;;  %v2460_v10 = vadd.f32 %v2459_v23, %v2458_v1  ;;  %v6119_v1 = vld [vmem:[#allocation17_spill] sm:$0xff]  ;;  %v6120_v23 = vld [vmem:[#allocation18_spill] sm:$0xff] }
 0x24e   :  { %v2328_v57 = vadd.f32 %v2327_v34, %v2326_v20  ;;  %v2461_v41 = vrot.slane %v2460_v10, 2 }
 0x250   :  { %v2329_v7 = vrot.slane %v2328_v57, 1  ;;  %v2462_v58 = vadd.f32 %v2461_v41, %v2460_v10 }
 0x252   :  { %v2330_v54 = vadd.f32 %v2329_v7, %v2328_v57  ;;  %v2463_v24 = vrot.slane %v2462_v58, 1 }
 0x254   :  { %v2331_v40 = vmul.f32 0.001953125, %v2330_v54  ;;  %v2464_v46 = vadd.f32 %v2463_v24, %v2462_v58  ;;  %v5334_v24 = vld [vmem:[%s6033_s3] sm:$0x1]  ;;  %v6121_v54 = vld [vmem:[#allocation20_spill] sm:$0xff] }
 0x256   :  { %v2465_v45 = vmul.f32 0.001953125, %v2464_v46  ;;  %v2466_v14 = vmul.f32 %v2331_v40, %v2331_v40  ;;  %v6123_v46 = vld [vmem:[#allocation22_spill] sm:$0xff] }
 0x258   :  { %v2467_v35 = vsub.f32 %v2465_v45, %v2466_v14  ;;  %v6124_v45 = vld [vmem:[#allocation21_spill] sm:$0xff] }
 0x25a   :  { %v2468_v21 = vmax.f32 %v2467_v35, 0.0 }
 0x25c   :  { %v2470_v32 = vadd.f32 1e-05, %v2468_v21 }
 0x25e   :  { %3952 = vrsqrt.f32 %v2470_v32 }
 0x26b   :  { %v3953_v55 = vpop.eup %3952 }
 0x26c   :  { %v2472_v26 = vmul.f32 %v3953_v55, %v2469_v61  ;;  %v6125_v61 = vld [vmem:[#allocation24_spill] sm:$0xff]  ;;  %v6126_v55 = vld [vmem:[#allocation23_spill] sm:$0xff] }
 0x26e   :  { %v5336_v14 = vmul.f32 %v2472_v26, %v2331_v40  ;;  %v5340_v21 = vrot.slane %v2472_v26, %v6059_v44  ;;  %v6122_v40 = vld [vmem:[#allocation19_spill] sm:$0xff] }
 0x26f   :  { %v6136_v44 = vld [vmem:[#allocation3_spill] sm:$0xff] }
 0x270   :  { %v2475_v35 = vsub.f32 %v5334_v24, %v5336_v14  ;;  %v5346_v20 = vmul.f32 %v5340_v21, %v6119_v1  ;;  %v5350_v34 = vmul.f32 %v5340_v21, %v6120_v23  ;;  %v5354_v10 = vmul.f32 %v5340_v21, %v4882_v42  ;;  %v6127_v14 = vld [vmem:[#allocation25_spill] sm:$0xff]  ;;  %v6128_v1 = vld [vmem:[#allocation26_spill] sm:$0xff] }
 0x271   :  { %v5358_v57 = vmul.f32 %v5340_v21, %v4890_v28  ;;  %v5362_v41 = vmul.f32 %v5340_v21, %v4903_v38  ;;  %v5366_v7 = vmul.f32 %v5340_v21, %v4918_v11  ;;  %v5370_v58 = vmul.f32 %v5340_v21, %v4912_v43 }
 0x272   :  { %v5374_v42 = vmul.f32 %v5340_v21, %v4921_v4  ;;  %v5378_v28 = vmul.f32 %v5340_v21, %v4933_v36  ;;  %v5382_v38 = vmul.f32 %v5340_v21, %v4948_v49  ;;  %v5386_v11 = vmul.f32 %v5340_v21, %v4942_v18 }
 0x273   :  { %v5390_v43 = vmul.f32 %v5340_v21, %v4951_v3  ;;  %v5394_v4 = vmul.f32 %v5340_v21, %v4963_v2  ;;  %v5398_v36 = vmul.f32 %v5340_v21, %v4978_v48  ;;  %v5402_v49 = vmul.f32 %v5340_v21, %v4972_v63 }
 0x274   :  { %v5406_v18 = vmul.f32 %v5340_v21, %v4981_v62  ;;  %v5410_v3 = vmul.f32 %v5340_v21, %v4993_v17  ;;  %v5414_v2 = vmul.f32 %v5340_v21, %v5008_v5  ;;  %v5418_v48 = vmul.f32 %v5340_v21, %v5002_v53 }
 0x275   :  { %v5422_v63 = vmul.f32 %v5340_v21, %v5011_v6  ;;  %v5426_v62 = vmul.f32 %v5340_v21, %v5023_v39  ;;  %v5430_v17 = vmul.f32 %v5340_v21, %v5038_v30  ;;  %v5434_v5 = vmul.f32 %v5340_v21, %v5032_v29 }
 0x276   :  { %v5438_v53 = vmul.f32 %v5340_v21, %v5041_v25  ;;  %v5442_v6 = vmul.f32 %v5340_v21, %v5053_v15  ;;  %v5446_v39 = vmul.f32 %v5340_v21, %v5068_v56  ;;  %v5450_v30 = vmul.f32 %v5340_v21, %v5062_v33 }
 0x277   :  { %v5454_v29 = vmul.f32 %v5340_v21, %v5071_v37  ;;  %v5458_v25 = vmul.f32 %v5340_v21, %v5083_v47  ;;  %v5462_v15 = vmul.f32 %v5340_v21, %v6121_v54  ;;  %v5466_v56 = vmul.f32 %v5340_v21, %v6122_v40  ;;  %v6129_v40 = vld [vmem:[#allocation27_spill] sm:$0xff] }
 0x278   :  { %v5470_v33 = vmul.f32 %v5340_v21, %v5103_v51  ;;  %v5474_v37 = vmul.f32 %v5340_v21, %v5112_v27  ;;  %v5478_v47 = vmul.f32 %v5340_v21, %v6123_v46  ;;  %v5482_v32 = vmul.f32 %v5340_v21, %v6124_v45  ;;  %v6130_v46 = vld [vmem:[#allocation29_spill] sm:$0xff] }
 0x279   :  { %v5486_v52 = vmul.f32 %v5340_v21, %v5131_v9  ;;  %v5490_v51 = vmul.f32 %v5340_v21, %v5140_v50  ;;  %v5494_v27 = vmul.f32 %v5340_v21, %v6125_v61  ;;  %v5498_v26 = vmul.f32 %v5340_v21, %v6126_v55  ;;  %v6131_v61 = vld [vmem:[#allocation28_spill] sm:$0xff] }
 0x27a   :  { %v5502_v24 = vmul.f32 %v5340_v21, %v5159_v31  ;;  %v5506_v9 = vmul.f32 %v5340_v21, %v6127_v14  ;;  %v5510_v50 = vmul.f32 %v5340_v21, %v6128_v1  ;;  %v5514_v23 = vmul.f32 %v5340_v21, %v5176_v13  ;;  %v6133_v14 = vld [vmem:[#allocation30_spill] sm:$0xff] }
 0x27b   :  { %v5518_v54 = vmul.f32 %v5340_v21, %v5187_v16  ;;  %v5522_v31 = vmul.f32 %v5340_v21, %v6129_v40  ;;  %v5526_v45 = vmul.f32 %v5340_v21, %v6130_v46  ;;  %v5530_v55 = vmul.f32 %v5340_v21, %v6131_v61  ;;  %v6135_v1 = vld [vmem:[#allocation2_spill] sm:$0xff] }
 0x27c   :  { %v5534_v13 = vmul.f32 %v5340_v21, %v6133_v14  ;;  %v5538_v16 = vmul.f32 %v5340_v21, %v5221_v12  ;;  %v5542_v40 = vmul.f32 %v5340_v21, %v6135_v1  ;;  %v5546_v46 = vmul.f32 %v5340_v21, %v6136_v44 }
 0x27d   :  { %6132 = vst [vmem:[#allocation12_spill] sm:$0xff] %v5530_v55  ;;  %v5550_v61 = vmul.f32 %v5340_v21, %v5241_v59  ;;  %v6139_v55 = vld [vmem:[#allocation4_spill] sm:$0xff]  ;;  %v5562_v1 = vmul.f32 %v5340_v21, %v5259_v0  ;;  %v5566_v44 = vmul.f32 %v5340_v21, %v5267_v60 }
 0x27e   :  { %6134 = vst [vmem:[#allocation13_spill] sm:$0xff] %v5534_v13  ;;  %6137 = vst [vmem:[#allocation15_spill] sm:$0xff] %v5546_v46  ;;  %v5554_v14 = vmul.f32 %v5340_v21, %v6139_v55  ;;  %v6140_v13 = vld [vmem:[#allocation5_spill] sm:$0xff]  ;;  %v6144_v46 = vld [vmem:[#allocation7_spill] sm:$0xff] }
 0x27f   :  { %6138 = vst [vmem:[#allocation14_spill] sm:$0xff] %v5550_v61  ;;  %v5558_v12 = vmul.f32 %v5340_v21, %v6140_v13  ;;  %6142 = vst [vmem:[#allocation17_spill] sm:$0xff] %v5562_v1  ;;  %v5570_v59 = vmul.f32 %v5340_v21, %v6144_v46  ;;  %v6146_v61 = vld [vmem:[#allocation6_spill] sm:$0xff]  ;;  %v5578_v13 = vmul.f32 %v5340_v21, %v5283_v8  ;;  %v6149_v1 = vsub.s32 0, %v5325_v22 }
 0x280   :  { %6143 = vst [vmem:[#allocation18_spill] sm:$0xff] %v5566_v44  ;;  %v5574_v55 = vmul.f32 %v5340_v21, %v6146_v61  ;;  %v6150_v44 = vld [vmem:[#allocation9_spill] sm:$0xff] }
 0x281   :  { %6141 = vst [vmem:[#allocation16_spill] sm:$0xff] %v5558_v12  ;;  %6145 = vst [vmem:[#allocation20_spill] sm:$0xff] %v5570_v59  ;;  %v6148_v12 = vld [vmem:[#allocation8_spill] sm:$0xff]  ;;  %v5586_v60 = vrot.slane %v2475_v35, %v6149_v1  ;;  %v5590_v46 = vmul.f32 %v5340_v21, %v6150_v44  ;;  %v6151_v59 = vld [vmem:[#allocation10_spill] sm:$0xff] }
 0x282   :  { %6147 = vst [vmem:[#allocation19_spill] sm:$0xff] %v5574_v55  ;;  %v5582_v0 = vmul.f32 %v5340_v21, %v6148_v12  ;;  %v5594_v61 = vmul.f32 %v5340_v21, %v6151_v59  ;;  %v6152_v55 = vld [vmem:[#allocation11_spill] sm:$0xff]  ;;  %v5602_v12 = vmul.f32 %v5340_v21, %v5314_v19 }
 0x283   :  { %v5598_v8 = vmul.f32 %v5340_v21, %v6152_v55  ;;  %v5606_v22 = vadd.f32 %v5586_v60, %v5346_v20  ;;  %v5610_v35 = vadd.f32 %v5586_v60, %v5350_v34  ;;  %v5614_v1 = vadd.f32 %v5586_v60, %v5354_v10 }
 0x284   :  { %v5618_v44 = vadd.f32 %v5586_v60, %v5358_v57  ;;  %v5622_v19 = vadd.f32 %v5586_v60, %v5362_v41  ;;  %v5626_v21 = vadd.f32 %v5586_v60, %v5366_v7  ;;  %v5630_v20 = vadd.f32 %v5586_v60, %v5370_v58 }
 0x285   :  { %6153 = vst [vmem:[#allocation22_spill] sm:$0xff] %v5606_v22  ;;  %6154 = vst [vmem:[#allocation21_spill] sm:$0xff] %v5610_v35  ;;  %v5634_v34 = vadd.f32 %v5586_v60, %v5374_v42  ;;  %v5638_v10 = vadd.f32 %v5586_v60, %v5378_v28  ;;  %v5642_v57 = vadd.f32 %v5586_v60, %v5382_v38  ;;  %v6160_v59 = vld [vmem:[#allocation13_spill] sm:$0xff]  ;;  %v6164_v55 = vld [vmem:[#allocation15_spill] sm:$0xff] }
 0x286   :  { %6155 = vst [vmem:[#allocation24_spill] sm:$0xff] %v5614_v1  ;;  %6156 = vst [vmem:[#allocation23_spill] sm:$0xff] %v5618_v44  ;;  %v5646_v41 = vadd.f32 %v5586_v60, %v5386_v11  ;;  %v5650_v7 = vadd.f32 %v5586_v60, %v5390_v43  ;;  %v5654_v58 = vadd.f32 %v5586_v60, %v5394_v4 }
 0x287   :  { %6157 = vst [vmem:[#allocation25_spill] sm:$0xff] %v5622_v19  ;;  %v5658_v42 = vadd.f32 %v5586_v60, %v5398_v36  ;;  %v5662_v28 = vadd.f32 %v5586_v60, %v5402_v49  ;;  %v5666_v38 = vadd.f32 %v5586_v60, %v5406_v18  ;;  %v5670_v11 = vadd.f32 %v5586_v60, %v5410_v3 }
 0x288   :  { %v5674_v43 = vadd.f32 %v5586_v60, %v5414_v2  ;;  %v5678_v4 = vadd.f32 %v5586_v60, %v5418_v48  ;;  %v5682_v36 = vadd.f32 %v5586_v60, %v5422_v63  ;;  %v5686_v49 = vadd.f32 %v5586_v60, %v5426_v62 }
 0x289   :  { %v5690_v18 = vadd.f32 %v5586_v60, %v5430_v17  ;;  %v5694_v3 = vadd.f32 %v5586_v60, %v5434_v5  ;;  %v5698_v2 = vadd.f32 %v5586_v60, %v5438_v53  ;;  %v5702_v48 = vadd.f32 %v5586_v60, %v5442_v6 }
 0x28a   :  { %v5706_v63 = vadd.f32 %v5586_v60, %v5446_v39  ;;  %v5710_v62 = vadd.f32 %v5586_v60, %v5450_v30  ;;  %v5714_v17 = vadd.f32 %v5586_v60, %v5454_v29  ;;  %v5718_v5 = vadd.f32 %v5586_v60, %v5458_v25 }
 0x28b   :  { %v5722_v53 = vadd.f32 %v5586_v60, %v5462_v15  ;;  %v5726_v6 = vadd.f32 %v5586_v60, %v5466_v56  ;;  %v5730_v39 = vadd.f32 %v5586_v60, %v5470_v33  ;;  %v5734_v30 = vadd.f32 %v5586_v60, %v5474_v37 }
 0x28c   :  { %v5738_v29 = vadd.f32 %v5586_v60, %v5478_v47  ;;  %v5742_v25 = vadd.f32 %v5586_v60, %v5482_v32  ;;  %v5746_v15 = vadd.f32 %v5586_v60, %v5486_v52  ;;  %v5750_v56 = vadd.f32 %v5586_v60, %v5490_v51 }
 0x28d   :  { %v5754_v33 = vadd.f32 %v5586_v60, %v5494_v27  ;;  %v5758_v37 = vadd.f32 %v5586_v60, %v5498_v26  ;;  %v5762_v47 = vadd.f32 %v5586_v60, %v5502_v24  ;;  %v5766_v32 = vadd.f32 %v5586_v60, %v5506_v9  ;;  %v6159_v9 = vld [vmem:[#allocation12_spill] sm:$0xff] }
 0x28e   :  { %v5770_v52 = vadd.f32 %v5586_v60, %v5510_v50  ;;  %v5774_v51 = vadd.f32 %v5586_v60, %v5514_v23  ;;  %v5778_v27 = vadd.f32 %v5586_v60, %v5518_v54  ;;  %v5782_v26 = vadd.f32 %v5586_v60, %v5522_v31 }
 0x28f   :  { %v5786_v24 = vadd.f32 %v5586_v60, %v5526_v45  ;;  %v5790_v50 = vadd.f32 %v5586_v60, %v6159_v9  ;;  %v5794_v23 = vadd.f32 %v5586_v60, %v6160_v59  ;;  %v5798_v54 = vadd.f32 %v5586_v60, %v5538_v16 }
 0x290   :  { %v5802_v31 = vadd.f32 %v5586_v60, %v5542_v40  ;;  %v5806_v45 = vadd.f32 %v5586_v60, %v6164_v55  ;;  %v5814_v59 = vadd.f32 %v5586_v60, %v5554_v14 }
 0x291   :  { %6158 = vst [vmem:[#allocation26_spill] sm:$0xff] %v5786_v24  ;;  %6161 = vst [vmem:[#allocation27_spill] sm:$0xff] %v5794_v23  ;;  %v6166_v24 = vld [vmem:[#allocation14_spill] sm:$0xff]  ;;  %v6168_v23 = vld [vmem:[#allocation16_spill] sm:$0xff] }
 0x292   :  { %6162 = vst [vmem:[#allocation29_spill] sm:$0xff] %v5798_v54  ;;  %6163 = vst [vmem:[#allocation28_spill] sm:$0xff] %v5802_v31  ;;  %v5810_v9 = vadd.f32 %v5586_v60, %v6166_v24  ;;  %v5818_v16 = vadd.f32 %v5586_v60, %v6168_v23  ;;  %v6169_v54 = vld [vmem:[#allocation17_spill] sm:$0xff]  ;;  %v6170_v31 = vld [vmem:[#allocation18_spill] sm:$0xff]  ;;  %v5838_v23 = vadd.f32 %v5586_v60, %v5578_v13 }
 0x293   :  { %6165 = vst [vmem:[#allocation30_spill] sm:$0xff] %v5806_v45  ;;  %v5822_v40 = vadd.f32 %v5586_v60, %v6169_v54  ;;  %v5826_v55 = vadd.f32 %v5586_v60, %v6170_v31  ;;  %v6171_v45 = vld [vmem:[#allocation20_spill] sm:$0xff]  ;;  %v5842_v54 = vadd.f32 %v5586_v60, %v5582_v0  ;;  %v5846_v31 = vadd.f32 %v5586_v60, %v5590_v46 }
 0x294   :  { %6167 = vst [vmem:[#allocation2_spill] sm:$0xff] %v5810_v9  ;;  %v5830_v24 = vadd.f32 %v5586_v60, %v6171_v45  ;;  %v6172_v9 = vld [vmem:[#allocation19_spill] sm:$0xff]  ;;  %6173 = vst [vmem:[#allocation3_spill] sm:$0xff] %v5838_v23  ;;  %v5850_v45 = vadd.f32 %v5586_v60, %v5594_v61  ;;  %v5858_v13 = vadd.f32 %v5586_v60, %v5602_v12  ;;  %v2621_v61 = vmax.f32 %v5626_v21, 0.0 }
 0x295   :  { %v5834_v14 = vadd.f32 %v5586_v60, %v6172_v9  ;;  %6174 = vst [vmem:[#allocation4_spill] sm:$0xff] %v5842_v54  ;;  %6175 = vst [vmem:[#allocation5_spill] sm:$0xff] %v5846_v31  ;;  %v5854_v9 = vadd.f32 %v5586_v60, %v5598_v8  ;;  %v2623_v8 = vmax.f32 %v5634_v34, 0.0  ;;  %v2625_v60 = vmax.f32 %v5642_v57, 0.0 }
 0x296   :  { %6176 = vst [vmem:[#allocation7_spill] sm:$0xff] %v5850_v45  ;;  %6178 = vst [vmem:[#allocation8_spill] sm:$0xff] %v5858_v13  ;;  %v2622_v45 = vmax.f32 %v5630_v20, 0.0  ;;  %v2626_v12 = vmax.f32 %v5646_v41, 0.0  ;;  %v2627_v0 = vmax.f32 %v5650_v7, 0.0  ;;  %v2628_v54 = vmax.f32 %v5654_v58, 0.0 }
 0x297   :  { %6177 = vst [vmem:[#allocation6_spill] sm:$0xff] %v5854_v9  ;;  %v2624_v9 = vmax.f32 %v5638_v10, 0.0  ;;  %v2629_v46 = vmax.f32 %v5658_v42, 0.0  ;;  %v2630_v31 = vmax.f32 %v5662_v28, 0.0  ;;  %v2631_v21 = vmax.f32 %v5666_v38, 0.0 }
 0x298   :  { %v2632_v20 = vmax.f32 %v5670_v11, 0.0  ;;  %v2633_v34 = vmax.f32 %v5674_v43, 0.0  ;;  %v2634_v10 = vmax.f32 %v5678_v4, 0.0  ;;  %v2635_v57 = vmax.f32 %v5682_v36, 0.0  ;;  %v6179_v23 = vld [vmem:[#allocation26_spill] sm:$0xff]  ;;  %v6180_v19 = vld [vmem:[#allocation27_spill] sm:$0xff] }
 0x299   :  { %v2636_v41 = vmax.f32 %v5686_v49, 0.0  ;;  %v2637_v7 = vmax.f32 %v5690_v18, 0.0  ;;  %v2638_v58 = vmax.f32 %v5694_v3, 0.0  ;;  %v2639_v42 = vmax.f32 %v5698_v2, 0.0  ;;  %v6181_v44 = vld [vmem:[#allocation29_spill] sm:$0xff]  ;;  %v6182_v1 = vld [vmem:[#allocation28_spill] sm:$0xff] }
 0x29a   :  { %v2640_v28 = vmax.f32 %v5702_v48, 0.0  ;;  %v2641_v38 = vmax.f32 %v5706_v63, 0.0  ;;  %v2642_v11 = vmax.f32 %v5710_v62, 0.0  ;;  %v2643_v43 = vmax.f32 %v5714_v17, 0.0  ;;  %v6183_v35 = vld [vmem:[#allocation30_spill] sm:$0xff] }
 0x29b   :  { %v2644_v4 = vmax.f32 %v5718_v5, 0.0  ;;  %v2645_v36 = vmax.f32 %v5722_v53, 0.0  ;;  %v2646_v49 = vmax.f32 %v5726_v6, 0.0  ;;  %v2647_v18 = vmax.f32 %v5730_v39, 0.0  ;;  %v6184_v22 = vld [vmem:[#allocation2_spill] sm:$0xff]  ;;  %v6185_v13 = vld [vmem:[#allocation3_spill] sm:$0xff] }
 0x29c   :  { %v2648_v3 = vmax.f32 %v5734_v30, 0.0  ;;  %v2649_v2 = vmax.f32 %v5738_v29, 0.0  ;;  %v2650_v48 = vmax.f32 %v5742_v25, 0.0  ;;  %v2651_v63 = vmax.f32 %v5746_v15, 0.0 }
 0x29d   :  { %v2652_v62 = vmax.f32 %v5750_v56, 0.0  ;;  %v2653_v17 = vmax.f32 %v5754_v33, 0.0  ;;  %v2654_v5 = vmax.f32 %v5758_v37, 0.0  ;;  %v2655_v53 = vmax.f32 %v5762_v47, 0.0 }
 0x29e   :  { %v2656_v6 = vmax.f32 %v5766_v32, 0.0  ;;  %v2657_v39 = vmax.f32 %v5770_v52, 0.0  ;;  %v2658_v30 = vmax.f32 %v5774_v51, 0.0  ;;  %v2659_v29 = vmax.f32 %v5778_v27, 0.0 }
 0x29f   :  { %v2660_v25 = vmax.f32 %v5782_v26, 0.0  ;;  %v2661_v15 = vmax.f32 %v6179_v23, 0.0  ;;  %v2662_v56 = vmax.f32 %v5790_v50, 0.0  ;;  %v2663_v33 = vmax.f32 %v6180_v19, 0.0 }
 0x2a0   :  { %v2664_v37 = vmax.f32 %v6181_v44, 0.0  ;;  %v2665_v47 = vmax.f32 %v6182_v1, 0.0  ;;  %v2666_v32 = vmax.f32 %v6183_v35, 0.0  ;;  %v2667_v52 = vmax.f32 %v6184_v22, 0.0  ;;  %v6186_v1 = vld [vmem:[#allocation4_spill] sm:$0xff]  ;;  %v6187_v22 = vld [vmem:[#allocation5_spill] sm:$0xff] }
 0x2a1   :  { %v2668_v51 = vmax.f32 %v5814_v59, 0.0  ;;  %v2669_v27 = vmax.f32 %v5818_v16, 0.0  ;;  %v2670_v26 = vmax.f32 %v5822_v40, 0.0  ;;  %v2671_v23 = vmax.f32 %v5826_v55, 0.0  ;;  %v6188_v16 = vld [vmem:[#allocation7_spill] sm:$0xff]  ;;  %v6189_v55 = vld [vmem:[#allocation6_spill] sm:$0xff] }
 0x2a2   :  { %v2672_v50 = vmax.f32 %v5830_v24, 0.0  ;;  %v2673_v19 = vmax.f32 %v5834_v14, 0.0  ;;  %v2674_v44 = vmax.f32 %v6185_v13, 0.0  ;;  %v2675_v35 = vmax.f32 %v6186_v1, 0.0  ;;  %v6190_v14 = vld [vmem:[#allocation8_spill] sm:$0xff]  ;;  %v6191_v1 = vld [vmem:[#allocation22_spill] sm:$0xff] }
 0x2a3   :  { %v2676_v59 = vmax.f32 %v6187_v22, 0.0  ;;  %v2677_v40 = vmax.f32 %v6188_v16, 0.0  ;;  %v2678_v24 = vmax.f32 %v6189_v55, 0.0  ;;  %v2679_v13 = vmax.f32 %v6190_v14, 0.0  ;;  %v6193_v16 = vld [vmem:[#allocation21_spill] sm:$0xff] }
 0x2a4   :  { %v6192_v22 = vmax.f32 %v6191_v1, 0.0  ;;  %v6194_v55 = vmax.f32 %v6193_v16, 0.0  ;;  %v6195_v1 = vld [vmem:[#allocation24_spill] sm:$0xff] }
 0x2a5   :  { %v6196_v16 = vmax.f32 %v6195_v1, 0.0 }
 0x2a6   :  { %v3363_v14 = vpack.c.bf16 %v6194_v55, %v6192_v22  ;;  %v6197_v22 = vld [vmem:[#allocation23_spill] sm:$0xff] }
 0x2a7   :  { %v6198_v55 = vmax.f32 %v6197_v22, 0.0  ;;  %v6199_v22 = vld [vmem:[#allocation25_spill] sm:$0xff] }
 0x2a8   :  { %3364 = vst [vmem:[%s6034_s4] sm:$0xff] %v3363_v14  }
 0x2a9   :  { %v3368_v1 = vpack.c.bf16 %v6198_v55, %v6196_v16  ;;  %v6200_v16 = vmax.f32 %v6199_v22, 0.0  ;;  %v3378_v22 = vpack.c.bf16 %v2623_v8, %v2622_v45  ;;  %v3393_v8 = vpack.c.bf16 %v2629_v46, %v2628_v54 }
 0x2aa   :  { %v3398_v45 = vpack.c.bf16 %v2631_v21, %v2630_v31  ;;  %v3413_v54 = vpack.c.bf16 %v2637_v7, %v2636_v41  ;;  %v3418_v31 = vpack.c.bf16 %v2639_v42, %v2638_v58  ;;  %v3423_v46 = vpack.c.bf16 %v2641_v38, %v2640_v28 }
 0x2ab   :  { %v3373_v55 = vpack.c.bf16 %v2621_v61, %v6200_v16  ;;  %v3383_v16 = vpack.c.bf16 %v2625_v60, %v2624_v9  ;;  %v3388_v61 = vpack.c.bf16 %v2627_v0, %v2626_v12  ;;  %3520 = vst [vmem:[%s6034_s4 + $0x8] sm:$0xff] %v3368_v1   ;;  %3522 = vst [vmem:[%s6034_s4 + $0x18] sm:$0xff] %v3378_v22  }
 0x2ac   :  { %v3403_v9 = vpack.c.bf16 %v2633_v34, %v2632_v20  ;;  %v3408_v0 = vpack.c.bf16 %v2635_v57, %v2634_v10  ;;  %3525 = vst [vmem:[%s6034_s4 + $0x30] sm:$0xff] %v3393_v8   ;;  %3526 = vst [vmem:[%s6034_s4 + $0x38] sm:$0xff] %v3398_v45   ;;  %v3428_v60 = vpack.c.bf16 %v2643_v43, %v2642_v11 }
 0x2ad   :  { %3521 = vst [vmem:[%s6034_s4 + $0x10] sm:$0xff] %v3373_v55   ;;  %3523 = vst [vmem:[%s6034_s4 + $0x20] sm:$0xff] %v3383_v16   ;;  %v3433_v12 = vpack.c.bf16 %v2645_v36, %v2644_v4  ;;  %v3438_v21 = vpack.c.bf16 %v2647_v18, %v2646_v49  ;;  %v3443_v20 = vpack.c.bf16 %v2649_v2, %v2648_v3 }
 0x2ae   :  { %3524 = vst [vmem:[%s6034_s4 + $0x28] sm:$0xff] %v3388_v61   ;;  %3527 = vst [vmem:[%s6034_s4 + $0x40] sm:$0xff] %v3403_v9   ;;  %v3448_v34 = vpack.c.bf16 %v2651_v63, %v2650_v48  ;;  %v3453_v10 = vpack.c.bf16 %v2653_v17, %v2652_v62  ;;  %v3458_v57 = vpack.c.bf16 %v2655_v53, %v2654_v5 }
 0x2af   :  { %3528 = vst [vmem:[%s6034_s4 + $0x48] sm:$0xff] %v3408_v0   ;;  %3529 = vst [vmem:[%s6034_s4 + $0x50] sm:$0xff] %v3413_v54   ;;  %v3463_v41 = vpack.c.bf16 %v2657_v39, %v2656_v6  ;;  %v3468_v7 = vpack.c.bf16 %v2659_v29, %v2658_v30  ;;  %v3473_v58 = vpack.c.bf16 %v2661_v15, %v2660_v25 }
 0x2b0   :  { %3530 = vst [vmem:[%s6034_s4 + $0x58] sm:$0xff] %v3418_v31   ;;  %3531 = vst [vmem:[%s6034_s4 + $0x60] sm:$0xff] %v3423_v46   ;;  %v3478_v42 = vpack.c.bf16 %v2663_v33, %v2662_v56  ;;  %v3483_v28 = vpack.c.bf16 %v2665_v47, %v2664_v37  ;;  %v3488_v38 = vpack.c.bf16 %v2667_v52, %v2666_v32 }
 0x2b1   :  { %3532 = vst [vmem:[%s6034_s4 + $0x68] sm:$0xff] %v3428_v60   ;;  %3533 = vst [vmem:[%s6034_s4 + $0x70] sm:$0xff] %v3433_v12   ;;  %v3493_v11 = vpack.c.bf16 %v2669_v27, %v2668_v51  ;;  %v3498_v43 = vpack.c.bf16 %v2671_v23, %v2670_v26  ;;  %v3503_v4 = vpack.c.bf16 %v2673_v19, %v2672_v50 }
 0x2b2   :  { %3534 = vst [vmem:[%s6034_s4 + $0x78] sm:$0xff] %v3438_v21   ;;  %3535 = vst [vmem:[%s6034_s4 + $0x80] sm:$0xff] %v3443_v20   ;;  %v3508_v36 = vpack.c.bf16 %v2675_v35, %v2674_v44  ;;  %v3513_v49 = vpack.c.bf16 %v2677_v40, %v2676_v59  ;;  %v3518_v18 = vpack.c.bf16 %v2679_v13, %v2678_v24 }
 0x2b3   :  { %3536 = vst [vmem:[%s6034_s4 + $0x88] sm:$0xff] %v3448_v34   ;;  %3537 = vst [vmem:[%s6034_s4 + $0x90] sm:$0xff] %v3453_v10  }
 0x2b4   :  { %3538 = vst [vmem:[%s6034_s4 + $0x98] sm:$0xff] %v3458_v57   ;;  %3539 = vst [vmem:[%s6034_s4 + $0xa0] sm:$0xff] %v3463_v41  }
 0x2b5   :  { %3540 = vst [vmem:[%s6034_s4 + $0xa8] sm:$0xff] %v3468_v7   ;;  %3541 = vst [vmem:[%s6034_s4 + $0xb0] sm:$0xff] %v3473_v58  }
 0x2b6   :  { %3542 = vst [vmem:[%s6034_s4 + $0xb8] sm:$0xff] %v3478_v42   ;;  %3543 = vst [vmem:[%s6034_s4 + $0xc0] sm:$0xff] %v3483_v28  }
 0x2b7   :  { %3544 = vst [vmem:[%s6034_s4 + $0xc8] sm:$0xff] %v3488_v38   ;;  %3545 = vst [vmem:[%s6034_s4 + $0xd0] sm:$0xff] %v3493_v11  }
 0x2b8   :  { %3546 = vst [vmem:[%s6034_s4 + $0xd8] sm:$0xff] %v3498_v43   ;;  %3547 = vst [vmem:[%s6034_s4 + $0xe0] sm:$0xff] %v3503_v4  }
 0x2b9   :  { %3548 = vst [vmem:[%s6034_s4 + $0xe8] sm:$0xff] %v3508_v36   ;;  %3549 = vst [vmem:[%s6034_s4 + $0xf0] sm:$0xff] %v3513_v49  }
 0x2ba   :  { %3550 = vst [vmem:[%s6034_s4 + $0xf8] sm:$0xff] %v3518_v18  }

</bundles_post_ra>
